<compile_context>
chip_gen: v7x
topology: tpu7x:2x2x1
jax: 0.10.0
libtpu: 0.0.40
codegen_flags: <defaults>
</compile_context>

<pallas_src>
import functools
import math

import jax
import jax.numpy as jnp
from jax.experimental import pallas as pl
from jax.experimental.pallas import tpu as pltpu
import numpy as np


def cand_rgcn_kernel(src_ref, rid_ref, adst_ref, table_ref, wattn_ref, out_ref,
                     *, rel_offset):
    """One node tile: fused gather+projection via a two-hot MXU matmul, then reduce.

    src_ref/rid_ref : [TM, D] int32   source node / relation id per incoming edge
    adst_ref        : [TM, F] f32     precomputed h_dst @ Wpos_dst
    table_ref       : [ROWS, 2F] bf16 fused table:
                        rows [0, N)                  -> h @ [Wpos_src | Wnb_src]
                        rows [rel_offset, +R)        -> [0 | emb_rel @ Wnb_rel]
    wattn_ref       : [1, F]  f32     attn_fc weight
    out_ref         : [TM, F] f32
    """
    TM, D = src_ref.shape
    rows, two_f = table_ref.shape
    F = two_f // 2

    # ---- fused gather + source projection + relation message: ONE MXU matmul ----
    # Two-hot row r selects table[src[r]] + table[rel_offset + rid[r]]
    #   = [a_src | msg_src] + [0 | msg_rel]      (exact: 1.0 x bf16 rows, f32 acc).
    col = jax.lax.broadcasted_iota(jnp.int32, (1, rows), 1)            # [1, rows]
    src3 = src_ref[...][:, :, None]                                    # [TM, D, 1]
    rel3 = rid_ref[...][:, :, None] + rel_offset
    mask = (col[None] == src3) | (col[None] == rel3)                   # [TM, D, rows] bool
    two_hot = mask.astype(jnp.bfloat16).reshape(TM * D, rows)          # direct cast, no f32 pass

    proj = jnp.dot(two_hot, table_ref[...],
                   preferred_element_type=jnp.float32)                 # [TM*D, 2F]
    a_src = proj[:, :F].reshape(TM, D, F)
    msg = proj[:, F:].reshape(TM, D, F)

    # ---- edge attention (f32 VPU path; v5e has no bf16 VPU/EUP) ------------------
    a = a_src + adst_ref[...][:, None, :]
    a = jnp.where(a > 0, a, 0.01 * a)              # F.leaky_relu (default slope 0.01)
    e = jnp.sum(a * wattn_ref[...], axis=-1)       # attn_fc (out_feat == 1) -> [TM, D]

    # ---- reduce_func: softmax over the mailbox dim, weighted sum -----------------
    m = jnp.max(e, axis=-1, keepdims=True)
    p = jnp.exp(e - m)
    inv_l = pl.reciprocal(jnp.sum(p, axis=-1, keepdims=True), approx=True)  # EUP slot
    alpha = p * inv_l                                                       # [TM, D]
    out_ref[...] = jnp.sum(alpha[:, :, None] * msg, axis=1)                 # [TM, F]


def _round_up(x, m):
    return (x + m - 1) // m * m


@functools.partial(jax.jit, static_argnames=("tm",))
def cand_rgcn_forward(h, emb_rel, src_ids, rid, wpos, wattn, wnb, *, tm=128):
    """CandRGCNLayer.forward with default flags (no bias/activation/self-loop/skip/dropout).

    Tiling: tm node rows per grid step.
      * v7x    : tm <= 256 and keep n_blocks >= 2 so both TensorCores get work.
      * v5e/v6e: tm = 256-512 amortizes the ~0.35us per-step overhead for large N.
    """
    N, F = h.shape
    D = src_ids.shape[1]
    R = emb_rel.shape[0]
    f32 = jnp.float32

    n_blocks = pl.cdiv(N, tm)
    n_pad = n_blocks * tm

    # ---- wrapper-side precompute (well-shaped dense XLA matmuls, f32 acc) --------
    # Node rows of the fused table: h @ [Wpos_src | Wnb_src]  ->  [a_src | msg_src].
    w_src = jnp.concatenate([wpos[:F, :], wnb[:F, :]], axis=1).astype(f32)   # [F, 2F]
    node_rows = jnp.dot(h.astype(f32), w_src).astype(jnp.bfloat16)           # [N, 2F]
    # Relation rows: [0 | emb_rel @ Wnb_rel].
    rel_msg = jnp.dot(emb_rel.astype(f32), wnb[F:, :].astype(f32))           # [R, F]
    rel_rows = jnp.concatenate([jnp.zeros((R, F), f32), rel_msg],
                               axis=1).astype(jnp.bfloat16)                  # [R, 2F]

    rel_offset = _round_up(N, 8)                  # relation section starts here
    rows = _round_up(rel_offset + R, 128)         # lane/MXU friendly contraction dim
    table = jnp.zeros((rows, 2 * F), jnp.bfloat16)
    table = table.at[:N].set(node_rows).at[rel_offset:rel_offset + R].set(rel_rows)

    # Destination attention term (dense, one XLA matmul instead of a per-block MXU op).
    a_dst = jnp.dot(h.astype(f32), wpos[F:, :].astype(f32))                  # [N, F] f32
    wattn_f32 = wattn.astype(f32).reshape(1, F)

    # Pad the node dimension so no tail block is dropped (padded rows sliced off).
    src_pad = jnp.zeros((n_pad, D), jnp.int32).at[:N].set(src_ids.astype(jnp.int32))
    rid_pad = jnp.zeros((n_pad, D), jnp.int32).at[:N].set(rid.astype(jnp.int32))
    adst_pad = jnp.zeros((n_pad, F), f32).at[:N].set(a_dst)

    # Rough per-step VMEM footprint; raise the scoped limit only when needed (the
    # demo stays well under the 16/32 MiB defaults).
    est = (tm * D * rows * 2                # two-hot (bf16)
           + tm * D * 2 * F * 4             # projection (f32)
           + 3 * tm * D * F * 4             # a_src / msg / a (f32)
           + 2 * rows * 2 * F * 2           # fused table (double-buffered input)
           + 2 * 2 * tm * F * 4             # a_dst + out blocks (double-buffered)
           + 2 * 2 * tm * 128 * 4)          # src/rid blocks (lane-padded int32)
    vmem_limit = None if est <= 12 * 2 ** 20 else int(min(2 * est, 48 * 2 ** 20))

    kernel = functools.partial(cand_rgcn_kernel, rel_offset=rel_offset)
    out = pl.pallas_call(
        kernel,
        out_shape=jax.ShapeDtypeStruct((n_pad, F), f32),
        grid=(n_blocks,),
        in_specs=[
            pl.BlockSpec((tm, D), lambda i: (i, 0)),          # src ids tile
            pl.BlockSpec((tm, D), lambda i: (i, 0)),          # rel ids tile
            pl.BlockSpec((tm, F), lambda i: (i, 0)),          # a_dst tile
            # Grid-invariant operands (constant index_map -> DMA'd once by the pipeline).
            # TODO(synk): single-buffer these (pipeline_mode=pl.Buffered(1)) once that
            # path is verified; a pl.when(i==0) copy-to-scratch is not 2-TC/megacore safe.
            pl.BlockSpec((rows, 2 * F), lambda i: (0, 0)),    # fused table
            pl.BlockSpec((1, F), lambda i: (0, 0)),           # attn_fc weight
        ],
        out_specs=pl.BlockSpec((tm, F), lambda i: (i, 0)),    # lane-dense (F=128)
        compiler_params=pltpu.CompilerParams(
            dimension_semantics=("parallel",),                # v7x dual-TC sharding
            vmem_limit_bytes=vmem_limit),
    )(src_pad, rid_pad, adst_pad, table, wattn_f32)
    return out[:N]


def reference_forward(h, emb_rel, src_ids, rid, wpos, wattn, wnb):
    """Pure-JAX f32 reference mirroring the PyTorch forward (on the given values)."""
    h = h.astype(jnp.float32)
    emb_rel = emb_rel.astype(jnp.float32)
    wpos = wpos.astype(jnp.float32)
    wattn = wattn.astype(jnp.float32)
    wnb = wnb.astype(jnp.float32)

    h_src = h[src_ids]                                        # [N, D, F]
    rel = emb_rel[rid]                                        # [N, D, F]
    h_dst = jnp.broadcast_to(h[:, None, :], h_src.shape)      # [N, D, F]
    z2 = jnp.concatenate([h_src, h_dst], axis=-1)             # [N, D, 2F]
    a = z2 @ wpos                                             # pos_proj
    a = jnp.where(a > 0, a, 0.01 * a)                         # leaky_relu
    e = a @ wattn.T                                           # attn_fc -> [N, D, 1]
    msg = jnp.concatenate([h_src, rel], axis=-1) @ wnb        # weight_neighbor
    alpha = jax.nn.softmax(e, axis=1)                         # softmax over mailbox
    return jnp.sum(alpha * msg, axis=1)                       # [N, F]


def reference_forward_kernel_precision(h, emb_rel, src_ids, rid, wpos, wattn, wnb):
    """Same math, but with the wrapper's bf16-rounded fused precompute.

    Isolates the in-kernel error (gather, softmax, approx reciprocal, reduction)
    from the wrapper-side bf16 rounding of the fused table.
    """
    f32 = jnp.float32
    F = h.shape[1]
    w_src = jnp.concatenate([wpos[:F, :], wnb[:F, :]], axis=1).astype(f32)
    node_rows = jnp.dot(h.astype(f32), w_src).astype(jnp.bfloat16).astype(f32)      # [N, 2F]
    rel_msg = jnp.dot(emb_rel.astype(f32),
                      wnb[F:, :].astype(f32)).astype(jnp.bfloat16).astype(f32)      # [R, F]
    a_dst = jnp.dot(h.astype(f32), wpos[F:, :].astype(f32))                         # [N, F]

    a_src = node_rows[src_ids, :F]                            # [N, D, F]
    msg = node_rows[src_ids, F:] + rel_msg[rid]               # [N, D, F]
    a = a_src + a_dst[:, None, :]
    a = jnp.where(a > 0, a, 0.01 * a)
    e = jnp.sum(a * wattn.astype(f32), axis=-1)               # [N, D]
    alpha = jax.nn.softmax(e, axis=1)
    return jnp.sum(alpha[:, :, None] * msg, axis=1)           # [N, F]


def xavier_uniform(key, shape, gain):
    fan_in, fan_out = shape[0], shape[1]
    bound = gain * math.sqrt(6.0 / (fan_in + fan_out))
    return jax.random.uniform(key, shape, jnp.float32, minval=-bound, maxval=bound)


if __name__ == "__main__":
    # in_feat == out_feat == 128 (required by msg_func's .view; also lane-dense output
    # and K=128 MXU contractions).  N = 200 exercises the cdiv + padding tail; with
    # tm=128 that gives n_blocks=2 so both v7x TensorCores get work.  Fixed in-degree D=8.
    N, D, F, NUM_RELS, TM = 200, 8, 128, 16, 128
    gain = math.sqrt(2.0)  # calculate_gain('relu')

    key = jax.random.PRNGKey(0)
    k_h, k_rel, k_src, k_rid, k_wpos, k_wattn, k_wnb = jax.random.split(key, 7)

    # Features / parameters kept in bf16 (what feeds the MXU); references upcast the
    # same bf16 values to f32.
    h = jax.random.normal(k_h, (N, F), jnp.float32).astype(jnp.bfloat16)        # prev_h
    emb_rel = jax.random.normal(k_rel, (NUM_RELS, F), jnp.float32).astype(jnp.bfloat16)
    src_ids = jax.random.randint(k_src, (N, D), 0, N)                           # edges (src per dst)
    rid = jax.random.randint(k_rid, (N, D), 0, NUM_RELS)                        # edges.data['rid']

    wpos = xavier_uniform(k_wpos, (2 * F, F), gain).astype(jnp.bfloat16)        # pos_proj.weight.T
    wattn = xavier_uniform(k_wattn, (1, F), gain).astype(jnp.bfloat16)          # attn_fc.weight
    wnb = xavier_uniform(k_wnb, (2 * F, F), gain).astype(jnp.bfloat16)          # weight_neighbor

    out = cand_rgcn_forward(h, emb_rel, src_ids, rid, wpos, wattn, wnb, tm=TM)
    out = jax.block_until_ready(out)

    # 1) Tight check vs. a reference that shares the wrapper's bf16-rounded fused
    #    table: isolates the kernel's gather / softmax / approx-reciprocal error.
    ref_kp = reference_forward_kernel_precision(h, emb_rel, src_ids, rid, wpos, wattn, wnb)
    np.testing.assert_allclose(np.asarray(out), np.asarray(ref_kp), rtol=1e-2, atol=1e-2)

    # 2) End-to-end check vs. the f32 module-faithful reference.  Looser tolerance
    #    covers the bf16 rounding of the fused table (moved into the wrapper),
    #    softmax sensitivity to those roundings, and the approx EUP reciprocal.
    ref = reference_forward(h, emb_rel, src_ids, rid, wpos, wattn, wnb)
    np.testing.assert_allclose(np.asarray(out), np.asarray(ref), rtol=2e-2, atol=5e-2)

    print("KERNEL_OK")
</pallas_src>

<mosaic_0001>
module attributes {stable_mosaic.version = 11 : i64} {
  func.func @cand_rgcn_kernel(%arg0: i32, %arg1: memref<128x8xi32, #tpu.memory_space<vmem>>, %arg2: memref<128x8xi32, #tpu.memory_space<vmem>>, %arg3: memref<128x128xf32, #tpu.memory_space<vmem>>, %arg4: memref<256x256xbf16, #tpu.memory_space<vmem>>, %arg5: memref<1x128xf32, #tpu.memory_space<vmem>>, %arg6: memref<128x128xf32, #tpu.memory_space<vmem>>) attributes {dimension_semantics = [#tpu.dimension_semantics<parallel>], iteration_bounds = array<i64: 2>, scalar_prefetch = 0 : i64, scratch_operands = 0 : i64, tpu.core_type = #tpu.core_type<tc>, window_params = [{transform_indices = @transform_0, window_bounds = array<i64: 128, 8>}, {transform_indices = @transform_1, window_bounds = array<i64: 128, 8>}, {transform_indices = @transform_2, window_bounds = array<i64: 128, 128>}, {pipeline_mode = #tpu.pipeline_mode<synchronous>, transform_indices = @transform_3, window_bounds = array<i64: 256, 256>}, {pipeline_mode = #tpu.pipeline_mode<synchronous>, transform_indices = @transform_4, window_bounds = array<i64: 1, 128>}, {transform_indices = @transform_5, window_bounds = array<i64: 128, 128>}]} {
    %0 = tpu.iota {dimensions = array<i32: 1>} : vector<1x256xi32>
    %c0 = arith.constant 0 : index
    %c0_0 = arith.constant 0 : index
    %1 = vector.load %arg1[%c0, %c0_0] : memref<128x8xi32, #tpu.memory_space<vmem>>, vector<128x8xi32>
    %2 = vector.shape_cast %1 : vector<128x8xi32> to vector<128x8x1xi32>
    %c0_1 = arith.constant 0 : index
    %c0_2 = arith.constant 0 : index
    %3 = vector.load %arg2[%c0_1, %c0_2] : memref<128x8xi32, #tpu.memory_space<vmem>>, vector<128x8xi32>
    %4 = vector.shape_cast %3 : vector<128x8xi32> to vector<128x8x1xi32>
    %c200_i32 = arith.constant 200 : i32
    %5 = vector.broadcast %c200_i32 : i32 to vector<128x8x1xi32>
    %6 = arith.addi %4, %5 : vector<128x8x1xi32>
    %7 = vector.shape_cast %0 : vector<1x256xi32> to vector<1x1x256xi32>
    %8 = vector.broadcast %7 : vector<1x1x256xi32> to vector<128x8x256xi32>
    %9 = vector.broadcast %2 : vector<128x8x1xi32> to vector<128x8x256xi32>
    %10 = arith.cmpi eq, %8, %9 : vector<128x8x256xi32>
    %11 = vector.shape_cast %0 : vector<1x256xi32> to vector<1x1x256xi32>
    %12 = vector.broadcast %11 : vector<1x1x256xi32> to vector<128x8x256xi32>
    %13 = vector.broadcast %6 : vector<128x8x1xi32> to vector<128x8x256xi32>
    %14 = arith.cmpi eq, %12, %13 : vector<128x8x256xi32>
    %15 = arith.ori %10, %14 : vector<128x8x256xi1>
    %16 = arith.extui %15 : vector<128x8x256xi1> to vector<128x8x256xi32>
    %17 = arith.sitofp %16 : vector<128x8x256xi32> to vector<128x8x256xf32>
    %18 = arith.truncf %17 : vector<128x8x256xf32> to vector<128x8x256xbf16>
    %19 = vector.shape_cast %18 : vector<128x8x256xbf16> to vector<1024x256xbf16>
    %c0_3 = arith.constant 0 : index
    %c0_4 = arith.constant 0 : index
    %20 = vector.load %arg4[%c0_3, %c0_4] : memref<256x256xbf16, #tpu.memory_space<vmem>>, vector<256x256xbf16>
    %cst = arith.constant dense<0.000000e+00> : vector<1024x256xf32>
    %21 = tpu.matmul %19, %20, %cst {dimension_numbers = #tpu.dot_dimension_numbers<[1], [0], [0], [1], [0, 0, 1, 1], [], []>} : vector<1024x256xbf16>, vector<256x256xbf16>, vector<1024x256xf32> -> vector<1024x256xf32>
    %22 = vector.extract_strided_slice %21 {offsets = [0, 0], sizes = [1024, 128], strides = [1, 1]} : vector<1024x256xf32> to vector<1024x128xf32>
    %23 = vector.shape_cast %22 : vector<1024x128xf32> to vector<128x8x128xf32>
    %24 = vector.extract_strided_slice %21 {offsets = [0, 128], sizes = [1024, 128], strides = [1, 1]} : vector<1024x256xf32> to vector<1024x128xf32>
    %25 = vector.shape_cast %24 : vector<1024x128xf32> to vector<128x8x128xf32>
    %c0_5 = arith.constant 0 : index
    %c0_6 = arith.constant 0 : index
    %26 = vector.load %arg3[%c0_5, %c0_6] : memref<128x128xf32, #tpu.memory_space<vmem>>, vector<128x128xf32>
    %27 = vector.shape_cast %26 : vector<128x128xf32> to vector<128x1x128xf32>
    %28 = vector.broadcast %27 : vector<128x1x128xf32> to vector<128x8x128xf32>
    %29 = arith.addf %23, %28 : vector<128x8x128xf32>
    %cst_7 = arith.constant 0.000000e+00 : f32
    %30 = vector.broadcast %cst_7 : f32 to vector<128x8x128xf32>
    %31 = arith.cmpf ogt, %29, %30 : vector<128x8x128xf32>
    %cst_8 = arith.constant 0.00999999977 : f32
    %32 = vector.broadcast %cst_8 : f32 to vector<128x8x128xf32>
    %33 = arith.mulf %32, %29 : vector<128x8x128xf32>
    %34 = arith.select %31, %29, %33 : vector<128x8x128xi1>, vector<128x8x128xf32>
    %c0_9 = arith.constant 0 : index
    %c0_10 = arith.constant 0 : index
    %35 = vector.load %arg5[%c0_9, %c0_10] : memref<1x128xf32, #tpu.memory_space<vmem>>, vector<1x128xf32>
    %36 = vector.shape_cast %35 : vector<1x128xf32> to vector<1x1x128xf32>
    %37 = vector.broadcast %36 : vector<1x1x128xf32> to vector<128x8x128xf32>
    %38 = arith.mulf %34, %37 : vector<128x8x128xf32>
    %cst_11 = arith.constant dense<0.000000e+00> : vector<128x8xf32>
    %39 = vector.multi_reduction <add>, %38, %cst_11 [2] : vector<128x8x128xf32> to vector<128x8xf32>
    %cst_12 = arith.constant dense<0xFF800000> : vector<128xf32>
    %40 = vector.multi_reduction <maximumf>, %39, %cst_12 [1] : vector<128x8xf32> to vector<128xf32>
    %41 = vector.shape_cast %40 : vector<128xf32> to vector<128x1xf32>
    %42 = vector.broadcast %41 : vector<128x1xf32> to vector<128x8xf32>
    %43 = arith.subf %39, %42 : vector<128x8xf32>
    %44 = math.exp %43 : vector<128x8xf32>
    %cst_13 = arith.constant dense<0.000000e+00> : vector<128xf32>
    %45 = vector.multi_reduction <add>, %44, %cst_13 [1] : vector<128x8xf32> to vector<128xf32>
    %46 = vector.shape_cast %45 : vector<128xf32> to vector<128x1xf32>
    %47 = tpu.reciprocal %46 {approx = true} : vector<128x1xf32> -> vector<128x1xf32>
    %48 = vector.broadcast %47 : vector<128x1xf32> to vector<128x8xf32>
    %49 = arith.mulf %44, %48 : vector<128x8xf32>
    %50 = vector.shape_cast %49 : vector<128x8xf32> to vector<128x8x1xf32>
    %51 = vector.broadcast %50 : vector<128x8x1xf32> to vector<128x8x128xf32>
    %52 = arith.mulf %51, %25 : vector<128x8x128xf32>
    %cst_14 = arith.constant dense<0.000000e+00> : vector<128x128xf32>
    %53 = vector.multi_reduction <add>, %52, %cst_14 [1] : vector<128x8x128xf32> to vector<128x128xf32>
    %c0_15 = arith.constant 0 : index
    %c0_16 = arith.constant 0 : index
    %54 = vector.load %arg6[%c0_15, %c0_16] : memref<128x128xf32, #tpu.memory_space<vmem>>, vector<128x128xf32>
    tpu.vector_store %arg6[%c0_15, %c0_16], %53 {strides = array<i32>} : memref<128x128xf32, #tpu.memory_space<vmem>>, vector<128x128xf32>,
    return
  }
  func.func @transform_0(%arg0: i32) -> (i32, i32) {
    %c0_i32 = arith.constant 0 : i32
    %c0_i32_0 = arith.constant 0 : i32
    return %arg0, %c0_i32 : i32, i32
  }
  func.func @transform_1(%arg0: i32) -> (i32, i32) {
    %c0_i32 = arith.constant 0 : i32
    %c0_i32_0 = arith.constant 0 : i32
    return %arg0, %c0_i32 : i32, i32
  }
  func.func @transform_2(%arg0: i32) -> (i32, i32) {
    %c0_i32 = arith.constant 0 : i32
    %c0_i32_0 = arith.constant 0 : i32
    return %arg0, %c0_i32 : i32, i32
  }
  func.func @transform_3(%arg0: i32) -> (i32, i32) {
    %c0_i32 = arith.constant 0 : i32
    %c0_i32_0 = arith.constant 0 : i32
    %c0_i32_1 = arith.constant 0 : i32
    return %c0_i32, %c0_i32_0 : i32, i32
  }
  func.func @transform_4(%arg0: i32) -> (i32, i32) {
    %c0_i32 = arith.constant 0 : i32
    %c0_i32_0 = arith.constant 0 : i32
    %c0_i32_1 = arith.constant 0 : i32
    return %c0_i32, %c0_i32_0 : i32, i32
  }
  func.func @transform_5(%arg0: i32) -> (i32, i32) {
    %c0_i32 = arith.constant 0 : i32
    %c0_i32_0 = arith.constant 0 : i32
    return %arg0, %c0_i32 : i32, i32
  }
}

</mosaic_0001>

<bundles_post_ra>
// kernel: cand_rgcn_forward.1
= control target key start
LH: loop header
LB: loop body
LE: loop exit
PB: predicated region body
PF: predicated region fallthrough
CT: control target
= control target key end

     0   :  { %s14764_s18 = smov 0   ;;  %s22791_s0 = inlined_call_operand.vmem [shape: s32[256,8], index: 0, kind: input, shape index: {}]   ;;  %s22792_s1 = inlined_call_operand.vmem [shape: s32[256,8], index: 1, kind: input, shape index: {}]   ;;  %s22793_s2 = inlined_call_operand.vmem [shape: f32[256,128], index: 2, kind: input, shape index: {}]   ;;  %s22794_s3 = inlined_call_operand.vmem [shape: bf16[256,256], index: 3, kind: input, shape index: {}]   ;;  %s22795_s4 = inlined_call_operand.vmem [shape: f32[1,128], index: 4, kind: input, shape index: {}]   ;;  %s22796_s5 = inlined_call_operand.vmem [shape: f32[256,128], index: 5, kind: output, shape index: {}]  }
   0x1 LB: > { %s13507_s19 = sadd.s32 4294967295, %s14729_s18   ;;  %p13511_p0 = scmp.ge.s32.totalorder %s14729_s18, 1  ;;  %s14729_s18 = sphi %s14764_s18, %s15_s18  }
   0x2   : > { %p210_p1 = scmp.lt.s32.totalorder %s14729_s18, 3 }
   0x4   : > { %p211_p2 = pnand %p13511_p0, %p210_p1 }
   0x6   : > { %214 = sbr.rel (%p211_p2) target bundleno = 2176 (0x880), region = 40 }
   0xd   : > { %s13512_s20 = sshll.u32 %s13507_s19, 4  ;;  %v22797_v0 = vlaneseq }
   0xe   : > { %p249_p3 = scmp.lt.s32.totalorder %s13512_s20, 31 }
   0xf   : > { %v14773_v1 = vshrl.u32 %v22797_v0, 7 }
  0x10   : > { %s24597_s20 = smov (!%p249_p3, %s13512_s20), 31 }
  0x11   : > { %23159 = vst [vmem:[#allocation2_spill] sm:$0xff] %v14773_v1  ;;  %v14776_v2 = vsub.s32 0, %v14773_v1  ;;  %v14779_v3 = vsub.s32 2, %v14773_v1  ;;  %s14781_s21 = sshll.u32 %s24597_s20, 3  ;;  %v14790_v4 = vsub.s32 3, %v14773_v1  ;;  %v14793_v5 = vsub.s32 1, %v14773_v1 }
  0x12   : > { %s14787_s24 = scalar_lea.vmem %s22791_s0, %s14781_s21  ;;  %v14799_v9 = vsub.s32 5, %v14773_v1  ;;  %v14804_v12 = vsub.s32 4, %v14773_v1  ;;  %v14809_v15 = vsub.s32 7, %v14773_v1  ;;  %v14812_v16 = vsub.s32 6, %v14773_v1  ;;  %s15185_s23 = scalar_lea.vmem %s22792_s1, %s14781_s21 }
  0x13   : > { %23160 = vst [vmem:[#allocation3_spill] sm:$0xff] %v14776_v2  ;;  %23161 = vst [vmem:[#allocation4_spill] sm:$0xff] %v14779_v3  ;;  %v275_v6 = vld [vmem:[%s14787_s24] sm:$0xff]  ;;  %v276_v19 = vld [vmem:[%s14787_s24 + $0x8] sm:$0xff]  ;;  %s17089_s27 = scalar_lea.vmem %s22793_s2, %s14781_s21  ;;  %s22391_s12 = scalar_lea.vmem %s22796_s5, %s14781_s21 }
  0x14   : > { %23162 = vst [vmem:[#allocation5_spill] sm:$0xff] %v14790_v4  ;;  %23163 = vst [vmem:[#allocation6_spill] sm:$0xff] %v14793_v5  ;;  %v308_v7 = vrot.slane %v275_v6, %v14779_v3  ;;  %v294_v8 = vrot.slane %v275_v6, %v14776_v2  ;;  %v315_v10 = vrot.slane %v275_v6, %v14790_v4  ;;  %v277_v28 = vld [vmem:[%s14787_s24 + $0x10] sm:$0xff]  ;;  %v278_v37 = vld [vmem:[%s14787_s24 + $0x18] sm:$0xff] }
  0x15   : > { %23164 = vst [vmem:[#allocation7_spill] sm:$0xff] %v14799_v9  ;;  %v301_v11 = vrot.slane %v275_v6, %v14793_v5  ;;  %23165 = vst [vmem:[#allocation8_spill] sm:$0xff] %v14804_v12  ;;  %v329_v13 = vrot.slane %v275_v6, %v14799_v9  ;;  %v322_v14 = vrot.slane %v275_v6, %v14804_v12  ;;  %v279_v46 = vld [vmem:[%s14787_s24 + $0x20] sm:$0xff]  ;;  %v280_v55 = vld [vmem:[%s14787_s24 + $0x28] sm:$0xff] }
  0x16   : > { %310 = vbcast.lane.b32.xlu1 %v308_v7, 256  ;;  %296 = vbcast.lane.b32.xlu0 %v294_v8, 256  ;;  %23166 = vst [vmem:[#allocation9_spill] sm:$0xff] %v14809_v15  ;;  %23167 = vst [vmem:[#allocation10_spill] sm:$0xff] %v14812_v16  ;;  %v343_v17 = vrot.slane %v275_v6, %v14809_v15  ;;  %v336_v18 = vrot.slane %v275_v6, %v14812_v16  ;;  %v281_v6 = vld [vmem:[%s14787_s24 + $0x30] sm:$0xff] }
  0x17   : > { %v357_v20 = vrot.slane %v276_v19, %v14793_v5  ;;  %v350_v21 = vrot.slane %v276_v19, %v14776_v2  ;;  %v371_v22 = vrot.slane %v276_v19, %v14790_v4  ;;  %v364_v23 = vrot.slane %v276_v19, %v14779_v3 }
  0x18   : > { %v385_v24 = vrot.slane %v276_v19, %v14799_v9  ;;  %v378_v25 = vrot.slane %v276_v19, %v14804_v12  ;;  %v399_v26 = vrot.slane %v276_v19, %v14809_v15  ;;  %v392_v27 = vrot.slane %v276_v19, %v14812_v16  ;;  %v282_v19 = vld [vmem:[%s14787_s24 + $0x38] sm:$0xff] }
  0x19   : > { %v413_v29 = vrot.slane %v277_v28, %v14793_v5  ;;  %v406_v30 = vrot.slane %v277_v28, %v14776_v2  ;;  %v427_v31 = vrot.slane %v277_v28, %v14790_v4  ;;  %v420_v32 = vrot.slane %v277_v28, %v14779_v3 }
  0x1a   : > { %317 = vbcast.lane.b32.xlu1 %v315_v10, 256  ;;  %303 = vbcast.lane.b32.xlu0 %v301_v11, 256  ;;  %v441_v33 = vrot.slane %v277_v28, %v14799_v9  ;;  %v434_v34 = vrot.slane %v277_v28, %v14804_v12  ;;  %v455_v35 = vrot.slane %v277_v28, %v14809_v15 }
  0x1b   : > { %v448_v36 = vrot.slane %v277_v28, %v14812_v16  ;;  %v469_v38 = vrot.slane %v278_v37, %v14793_v5  ;;  %v462_v39 = vrot.slane %v278_v37, %v14776_v2  ;;  %v483_v40 = vrot.slane %v278_v37, %v14790_v4 }
  0x1c   : > { %v476_v41 = vrot.slane %v278_v37, %v14779_v3  ;;  %v497_v42 = vrot.slane %v278_v37, %v14799_v9  ;;  %v490_v43 = vrot.slane %v278_v37, %v14804_v12  ;;  %v511_v44 = vrot.slane %v278_v37, %v14809_v15 }
  0x1d   : > { %v504_v45 = vrot.slane %v278_v37, %v14812_v16  ;;  %v525_v47 = vrot.slane %v279_v46, %v14793_v5  ;;  %v518_v48 = vrot.slane %v279_v46, %v14776_v2  ;;  %v539_v49 = vrot.slane %v279_v46, %v14790_v4 }
  0x1e   : > { %331 = vbcast.lane.b32.xlu1 %v329_v13, 256  ;;  %324 = vbcast.lane.b32.xlu0 %v322_v14, 256  ;;  %v532_v50 = vrot.slane %v279_v46, %v14779_v3  ;;  %v553_v51 = vrot.slane %v279_v46, %v14799_v9  ;;  %v546_v52 = vrot.slane %v279_v46, %v14804_v12 }
  0x1f   : > { %v567_v53 = vrot.slane %v279_v46, %v14809_v15  ;;  %v560_v54 = vrot.slane %v279_v46, %v14812_v16  ;;  %v581_v56 = vrot.slane %v280_v55, %v14793_v5  ;;  %v574_v57 = vrot.slane %v280_v55, %v14776_v2 }
  0x20   : > { %v595_v58 = vrot.slane %v280_v55, %v14790_v4  ;;  %v588_v59 = vrot.slane %v280_v55, %v14779_v3  ;;  %v609_v60 = vrot.slane %v280_v55, %v14799_v9  ;;  %v602_v61 = vrot.slane %v280_v55, %v14804_v12 }
  0x21   : > { %v623_v62 = vrot.slane %v280_v55, %v14809_v15  ;;  %v616_v63 = vrot.slane %v280_v55, %v14812_v16  ;;  %v637_v7 = vrot.slane %v281_v6, %v14793_v5  ;;  %v630_v8 = vrot.slane %v281_v6, %v14776_v2 }
  0x22   : > { %345 = vbcast.lane.b32.xlu1 %v343_v17, 256  ;;  %338 = vbcast.lane.b32.xlu0 %v336_v18, 256  ;;  %v651_v10 = vrot.slane %v281_v6, %v14790_v4  ;;  %v644_v11 = vrot.slane %v281_v6, %v14779_v3  ;;  %v665_v13 = vrot.slane %v281_v6, %v14799_v9 }
  0x23   : > { %v658_v14 = vrot.slane %v281_v6, %v14804_v12  ;;  %v679_v17 = vrot.slane %v281_v6, %v14809_v15  ;;  %v672_v18 = vrot.slane %v281_v6, %v14812_v16 }
  0x26   : > { %359 = vbcast.lane.b32.xlu1 %v357_v20, 256  ;;  %352 = vbcast.lane.b32.xlu0 %v350_v21, 256  ;;  %v693_v20 = vrot.slane %v282_v19, %v14793_v5  ;;  %v686_v21 = vrot.slane %v282_v19, %v14776_v2 }
  0x2a   : > { %373 = vbcast.lane.b32.xlu1 %v371_v22, 256  ;;  %366 = vbcast.lane.b32.xlu0 %v364_v23, 256  ;;  %v707_v22 = vrot.slane %v282_v19, %v14790_v4  ;;  %v700_v23 = vrot.slane %v282_v19, %v14779_v3 }
  0x2e   : > { %387 = vbcast.lane.b32.xlu1 %v385_v24, 256  ;;  %380 = vbcast.lane.b32.xlu0 %v378_v25, 256 }
  0x32   : > { %401 = vbcast.lane.b32.xlu1 %v399_v26, 256  ;;  %394 = vbcast.lane.b32.xlu0 %v392_v27, 256  ;;  %v721_v26 = vrot.slane %v282_v19, %v14799_v9  ;;  %v714_v27 = vrot.slane %v282_v19, %v14804_v12 }
  0x36   : > { %415 = vbcast.lane.b32.xlu1 %v413_v29, 256  ;;  %408 = vbcast.lane.b32.xlu0 %v406_v30, 256  ;;  %v735_v30 = vrot.slane %v282_v19, %v14809_v15 }
  0x3a   : > { %429 = vbcast.lane.b32.xlu1 %v427_v31, 256  ;;  %422 = vbcast.lane.b32.xlu0 %v420_v32, 256  ;;  %v728_v31 = vrot.slane %v282_v19, %v14812_v16  ;;  %v283_v32 = vld [vmem:[%s14787_s24 + $0x40] sm:$0xff] }
  0x3e   : > { %443 = vbcast.lane.b32.xlu1 %v441_v33, 256  ;;  %436 = vbcast.lane.b32.xlu0 %v434_v34, 256 }
  0x42   : > { %457 = vbcast.lane.b32.xlu1 %v455_v35, 256  ;;  %450 = vbcast.lane.b32.xlu0 %v448_v36, 256  ;;  %v749_v35 = vrot.slane %v283_v32, %v14793_v5  ;;  %v742_v36 = vrot.slane %v283_v32, %v14776_v2 }
  0x46   : > { %471 = vbcast.lane.b32.xlu1 %v469_v38, 256  ;;  %464 = vbcast.lane.b32.xlu0 %v462_v39, 256  ;;  %v763_v39 = vrot.slane %v283_v32, %v14790_v4 }
  0x4a   : > { %485 = vbcast.lane.b32.xlu1 %v483_v40, 256  ;;  %478 = vbcast.lane.b32.xlu0 %v476_v41, 256  ;;  %v756_v40 = vrot.slane %v283_v32, %v14779_v3 }
  0x4e   : > { %499 = vbcast.lane.b32.xlu1 %v497_v42, 256  ;;  %492 = vbcast.lane.b32.xlu0 %v490_v43, 256  ;;  %v777_v43 = vrot.slane %v283_v32, %v14799_v9 }
  0x52   : > { %513 = vbcast.lane.b32.xlu1 %v511_v44, 256  ;;  %506 = vbcast.lane.b32.xlu0 %v504_v45, 256  ;;  %v770_v44 = vrot.slane %v283_v32, %v14804_v12 }
  0x56   : > { %527 = vbcast.lane.b32.xlu1 %v525_v47, 256  ;;  %520 = vbcast.lane.b32.xlu0 %v518_v48, 256  ;;  %v791_v47 = vrot.slane %v283_v32, %v14809_v15  ;;  %v784_v48 = vrot.slane %v283_v32, %v14812_v16 }
  0x5a   : > { %541 = vbcast.lane.b32.xlu1 %v539_v49, 256  ;;  %534 = vbcast.lane.b32.xlu0 %v532_v50, 256  ;;  %v284_v49 = vld [vmem:[%s14787_s24 + $0x48] sm:$0xff] }
  0x5b   : > { %v847_v6 = vrot.slane %v284_v49, %v14809_v15 }
  0x5e   : > { %555 = vbcast.lane.b32.xlu1 %v553_v51, 256  ;;  %548 = vbcast.lane.b32.xlu0 %v546_v52, 256  ;;  %v805_v52 = vrot.slane %v284_v49, %v14793_v5 }
  0x62   : > { %569 = vbcast.lane.b32.xlu1 %v567_v53, 256  ;;  %562 = vbcast.lane.b32.xlu0 %v560_v54, 256  ;;  %v798_v53 = vrot.slane %v284_v49, %v14776_v2 }
  0x66   : > { %583 = vbcast.lane.b32.xlu1 %v581_v56, 256  ;;  %576 = vbcast.lane.b32.xlu0 %v574_v57, 256  ;;  %v819_v56 = vrot.slane %v284_v49, %v14790_v4  ;;  %v812_v57 = vrot.slane %v284_v49, %v14779_v3 }
  0x6a   : > { %597 = vbcast.lane.b32.xlu1 %v595_v58, 256  ;;  %590 = vbcast.lane.b32.xlu0 %v588_v59, 256 }
  0x6e   : > { %611 = vbcast.lane.b32.xlu1 %v609_v60, 256  ;;  %604 = vbcast.lane.b32.xlu0 %v602_v61, 256  ;;  %v833_v60 = vrot.slane %v284_v49, %v14799_v9  ;;  %v826_v61 = vrot.slane %v284_v49, %v14804_v12 }
  0x72   : > { %625 = vbcast.lane.b32.xlu1 %v623_v62, 256  ;;  %618 = vbcast.lane.b32.xlu0 %v616_v63, 256 }
  0x76   : > { %639 = vbcast.lane.b32.xlu1 %v637_v7, 256  ;;  %632 = vbcast.lane.b32.xlu0 %v630_v8, 256  ;;  %v840_v7 = vrot.slane %v284_v49, %v14812_v16  ;;  %v285_v8 = vld [vmem:[%s14787_s24 + $0x50] sm:$0xff] }
  0x77   : > { %v875_v19 = vrot.slane %v285_v8, %v14790_v4  ;;  %v896_v32 = vrot.slane %v285_v8, %v14812_v16 }
  0x7a   : > { %653 = vbcast.lane.b32.xlu1 %v651_v10, 256  ;;  %646 = vbcast.lane.b32.xlu0 %v644_v11, 256 }
  0x7e   : > { %667 = vbcast.lane.b32.xlu1 %v665_v13, 256  ;;  %660 = vbcast.lane.b32.xlu0 %v658_v14, 256  ;;  %v861_v13 = vrot.slane %v285_v8, %v14793_v5  ;;  %v854_v14 = vrot.slane %v285_v8, %v14776_v2 }
  0x82   : > { %681 = vbcast.lane.b32.xlu1 %v679_v17, 256  ;;  %674 = vbcast.lane.b32.xlu0 %v672_v18, 256 }
  0x86   : > { %695 = vbcast.lane.b32.xlu1 %v693_v20, 256  ;;  %688 = vbcast.lane.b32.xlu0 %v686_v21, 256  ;;  %v868_v20 = vrot.slane %v285_v8, %v14779_v3 }
  0x88   : > { %v14875_v24 = vpop.permute.xlu1 %310  ;;  %v14877_v25 = vpop.permute.xlu0 %296 }
  0x8a   : > { %709 = vbcast.lane.b32.xlu1 %v707_v22, 256  ;;  %702 = vbcast.lane.b32.xlu0 %v700_v23, 256  ;;  %v889_v23 = vrot.slane %v285_v8, %v14799_v9 }
  0x8c   : > { %v14881_v28 = vpop.permute.xlu1 %317  ;;  %v14883_v29 = vpop.permute.xlu0 %303 }
  0x8e   : > { %723 = vbcast.lane.b32.xlu1 %v721_v26, 256  ;;  %716 = vbcast.lane.b32.xlu0 %v714_v27, 256  ;;  %v882_v26 = vrot.slane %v285_v8, %v14804_v12 }
  0x90   : > { %v14888_v33 = vpop.permute.xlu1 %331  ;;  %v14890_v34 = vpop.permute.xlu0 %324 }
  0x92   : > { %737 = vbcast.lane.b32.xlu1 %v735_v30, 256  ;;  %730 = vbcast.lane.b32.xlu0 %v728_v31, 256  ;;  %v903_v31 = vrot.slane %v285_v8, %v14809_v15 }
  0x94   : > { %v14894_v37 = vpop.permute.xlu1 %345  ;;  %v14896_v38 = vpop.permute.xlu0 %338 }
  0x96   : > { %751 = vbcast.lane.b32.xlu1 %v749_v35, 256  ;;  %744 = vbcast.lane.b32.xlu0 %v742_v36, 256  ;;  %v286_v35 = vld [vmem:[%s14787_s24 + $0x58] sm:$0xff] }
  0x97   : > { %v924_v49 = vrot.slane %v286_v35, %v14779_v3  ;;  %v952_v8 = vrot.slane %v286_v35, %v14812_v16 }
  0x98   : > { %v14900_v41 = vpop.permute.xlu1 %359  ;;  %v14902_v42 = vpop.permute.xlu0 %352 }
  0x9a   : > { %765 = vbcast.lane.b32.xlu1 %v763_v39, 256  ;;  %758 = vbcast.lane.b32.xlu0 %v756_v40, 256  ;;  %v917_v40 = vrot.slane %v286_v35, %v14793_v5 }
  0x9c   : > { %v14906_v45 = vpop.permute.xlu1 %373  ;;  %v14908_v46 = vpop.permute.xlu0 %366 }
  0x9e   : > { %779 = vbcast.lane.b32.xlu1 %v777_v43, 256  ;;  %772 = vbcast.lane.b32.xlu0 %v770_v44, 256  ;;  %v910_v43 = vrot.slane %v286_v35, %v14776_v2 }
  0xa0   : > { %v14913_v50 = vpop.permute.xlu1 %387  ;;  %v14915_v51 = vpop.permute.xlu0 %380 }
  0xa2   : > { %793 = vbcast.lane.b32.xlu1 %v791_v47, 256  ;;  %786 = vbcast.lane.b32.xlu0 %v784_v48, 256  ;;  %v931_v48 = vrot.slane %v286_v35, %v14790_v4 }
  0xa4   : > { %v14919_v54 = vpop.permute.xlu1 %401  ;;  %v14921_v55 = vpop.permute.xlu0 %394 }
  0xa6   : > { %807 = vbcast.lane.b32.xlu1 %v805_v52, 256  ;;  %800 = vbcast.lane.b32.xlu0 %v798_v53, 256 }
  0xa8   : > { %v14925_v58 = vpop.permute.xlu1 %415  ;;  %v14927_v59 = vpop.permute.xlu0 %408 }
  0xaa   : > { %821 = vbcast.lane.b32.xlu1 %v819_v56, 256  ;;  %814 = vbcast.lane.b32.xlu0 %v812_v57, 256  ;;  %v945_v56 = vrot.slane %v286_v35, %v14799_v9  ;;  %v938_v57 = vrot.slane %v286_v35, %v14804_v12 }
  0xac   : > { %v14931_v62 = vpop.permute.xlu1 %429  ;;  %v14933_v63 = vpop.permute.xlu0 %422 }
  0xae   : > { %835 = vbcast.lane.b32.xlu1 %v833_v60, 256  ;;  %828 = vbcast.lane.b32.xlu0 %v826_v61, 256 }
  0xb0   : > { %v14938_v10 = vpop.permute.xlu1 %443  ;;  %v14940_v11 = vpop.permute.xlu0 %436 }
  0xb2   : > { %849 = vbcast.lane.b32.xlu1 %v847_v6, 256  ;;  %842 = vbcast.lane.b32.xlu0 %v840_v7, 256  ;;  %v14368_v6 = vld [vmem:[%s22794_s3 + $0x4] ss:$8 sps:$4 sm:$0xff]   ;;  %v959_v7 = vrot.slane %v286_v35, %v14809_v15 }
  0xb3   : > { %4723 = vmatprep.subr.bf16.mxu0 %v14368_v6  ;;  %14323 = vmatprep.subr.bf16.mxu1 %v14368_v6 }
  0xb4   : > { %v14944_v17 = vpop.permute.xlu1 %457  ;;  %v14946_v18 = vpop.permute.xlu0 %450 }
  0xb6   : > { %863 = vbcast.lane.b32.xlu1 %v861_v13, 256  ;;  %856 = vbcast.lane.b32.xlu0 %v854_v14, 256  ;;  %v14370_v13 = vld [vmem:[%s22794_s3] ss:$8 sps:$4 sm:$0xff]  }
  0xb7   : > { %v287_v14 = vld [vmem:[%s14787_s24 + $0x60] sm:$0xff]  ;;  %4724 = vmatpush1.bf16.msra.mxu0 %v14370_v13  ;;  %14339 = vmatpush1.bf16.msra.mxu1 %v14370_v13 }
  0xb8   : > { %v14950_v21 = vpop.permute.xlu1 %471  ;;  %v14952_v22 = vpop.permute.xlu0 %464  ;;  %v994_v13 = vrot.slane %v287_v14, %v14804_v12 }
  0xba   : > { %877 = vbcast.lane.b32.xlu1 %v875_v19, 256  ;;  %870 = vbcast.lane.b32.xlu0 %v868_v20, 256 }
  0xbc   : > { %v14956_v27 = vpop.permute.xlu1 %485  ;;  %v14958_v30 = vpop.permute.xlu0 %478 }
  0xbe   : > { %891 = vbcast.lane.b32.xlu1 %v889_v23, 256  ;;  %884 = vbcast.lane.b32.xlu0 %v882_v26, 256  ;;  %v14371_v23 = vld [vmem:[%s22794_s3 + $0x14] ss:$8 sps:$4 sm:$0xff]   ;;  %v973_v26 = vrot.slane %v287_v14, %v14793_v5 }
  0xbf   : > { %4725 = vmatprep.subr.bf16.mxu0 %v14371_v23  ;;  %14324 = vmatprep.subr.bf16.mxu1 %v14371_v23  ;;  %v14379_v23 = vld [vmem:[%s22794_s3 + $0x30] ss:$8 sps:$4 sm:$0xff]  }
  0xc0   : > { %v14963_v36 = vpop.permute.xlu1 %499  ;;  %v14965_v39 = vpop.permute.xlu0 %492 }
  0xc2   : > { %905 = vbcast.lane.b32.xlu1 %v903_v31, 256  ;;  %898 = vbcast.lane.b32.xlu0 %v896_v32, 256  ;;  %v966_v31 = vrot.slane %v287_v14, %v14776_v2  ;;  %v14373_v32 = vld [vmem:[%s22794_s3 + $0x10] ss:$8 sps:$4 sm:$0xff]  }
  0xc3   : > { %4726 = vmatpush1.bf16.msra.mxu0 %v14373_v32  ;;  %14340 = vmatpush1.bf16.msra.mxu1 %v14373_v32  ;;  %v14380_v32 = vld [vmem:[%s22794_s3 + $0x44] ss:$8 sps:$4 sm:$0xff]  }
  0xc4   : > { %v14969_v44 = vpop.permute.xlu1 %513  ;;  %v14971_v47 = vpop.permute.xlu0 %506 }
  0xc6   : > { %919 = vbcast.lane.b32.xlu1 %v917_v40, 256  ;;  %912 = vbcast.lane.b32.xlu0 %v910_v43, 256  ;;  %v14374_v43 = vld [vmem:[%s22794_s3 + $0x24] ss:$8 sps:$4 sm:$0xff]  }
  0xc7   : > { %4727 = vmatprep.subr.bf16.mxu0 %v14374_v43  ;;  %14325 = vmatprep.subr.bf16.mxu1 %v14374_v43  ;;  %v1015_v43 = vrot.slane %v287_v14, %v14809_v15 }
  0xc8   : > { %v14975_v52 = vpop.permute.xlu1 %527  ;;  %v14977_v53 = vpop.permute.xlu0 %520 }
  0xca   : > { %933 = vbcast.lane.b32.xlu1 %v931_v48, 256  ;;  %926 = vbcast.lane.b32.xlu0 %v924_v49, 256  ;;  %v987_v48 = vrot.slane %v287_v14, %v14790_v4  ;;  %v980_v49 = vrot.slane %v287_v14, %v14779_v3 }
  0xcc   : > { %v14981_v60 = vpop.permute.xlu1 %541  ;;  %v14983_v61 = vpop.permute.xlu0 %534 }
  0xce   : > { %947 = vbcast.lane.b32.xlu1 %v945_v56, 256  ;;  %940 = vbcast.lane.b32.xlu0 %v938_v57, 256  ;;  %v14376_v56 = vld [vmem:[%s22794_s3 + $0x20] ss:$8 sps:$4 sm:$0xff]  }
  0xcf   : > { %4728 = vmatpush1.bf16.msra.mxu0 %v14376_v56  ;;  %14341 = vmatpush1.bf16.msra.mxu1 %v14376_v56  ;;  %v288_v56 = vld [vmem:[%s14787_s24 + $0x68] sm:$0xff] }
  0xd0   : > { %v14994_v19 = vpop.permute.xlu1 %555  ;;  %v14996_v20 = vpop.permute.xlu0 %548 }
  0xd2   : > { %961 = vbcast.lane.b32.xlu1 %v959_v7, 256  ;;  %954 = vbcast.lane.b32.xlu0 %v952_v8, 256  ;;  %v14377_v7 = vld [vmem:[%s22794_s3 + $0x34] ss:$8 sps:$4 sm:$0xff]   ;;  %v1001_v8 = vrot.slane %v287_v14, %v14799_v9 }
  0xd3   : > { %4729 = vmatprep.subr.bf16.mxu0 %v14377_v7  ;;  %14326 = vmatprep.subr.bf16.mxu1 %v14377_v7 }
  0xd4   : > { %v15006_v35 = vpop.permute.xlu1 %569  ;;  %v15008_v40 = vpop.permute.xlu0 %562  ;;  %4730 = vmatpush1.bf16.msra.mxu0 %v14379_v23  ;;  %14342 = vmatpush1.bf16.msra.mxu1 %v14379_v23 }
  0xd5   : > { %23168 = vst [vmem:[#allocation11_spill] sm:$0xff] %v15006_v35  ;;  %23169 = vst [vmem:[#allocation12_spill] sm:$0xff] %v15008_v40  ;;  %4731 = vmatprep.subr.bf16.mxu0 %v14380_v32  ;;  %14327 = vmatprep.subr.bf16.mxu1 %v14380_v32  ;;  %v14385_v32 = vld [vmem:[%s22794_s3 + $0x50] ss:$8 sps:$4 sm:$0xff]  }
  0xd6   : > { %975 = vbcast.lane.b32.xlu1 %v973_v26, 256  ;;  %968 = vbcast.lane.b32.xlu0 %v966_v31, 256 }
  0xd8   : > { %v15018_v57 = vpop.permute.xlu1 %583  ;;  %v15020_v6 = vpop.permute.xlu0 %576 }
  0xd9   : > { %23170 = vst [vmem:[#allocation13_spill] sm:$0xff] %v15018_v57  ;;  %23171 = vst [vmem:[#allocation14_spill] sm:$0xff] %v15020_v6 }
  0xda   : > { %989 = vbcast.lane.b32.xlu1 %v987_v48, 256  ;;  %982 = vbcast.lane.b32.xlu0 %v980_v49, 256  ;;  %v1008_v48 = vrot.slane %v287_v14, %v14812_v16  ;;  %v14382_v49 = vld [vmem:[%s22794_s3 + $0x40] ss:$8 sps:$4 sm:$0xff]   ;;  %v1029_v14 = vrot.slane %v288_v56, %v14793_v5 }
  0xdb   : > { %4732 = vmatpush1.bf16.msra.mxu0 %v14382_v49  ;;  %14343 = vmatpush1.bf16.msra.mxu1 %v14382_v49  ;;  %v1036_v49 = vrot.slane %v288_v56, %v14779_v3 }
  0xdc   : > { %v15030_v26 = vpop.permute.xlu1 %597  ;;  %v15032_v31 = vpop.permute.xlu0 %590 }
  0xdd   : > { %23172 = vst [vmem:[#allocation15_spill] sm:$0xff] %v15030_v26  ;;  %23173 = vst [vmem:[#allocation16_spill] sm:$0xff] %v15032_v31 }
  0xde   : > { %1003 = vbcast.lane.b32.xlu1 %v1001_v8, 256  ;;  %996 = vbcast.lane.b32.xlu0 %v994_v13, 256  ;;  %v14383_v8 = vld [vmem:[%s22794_s3 + $0x54] ss:$8 sps:$4 sm:$0xff]   ;;  %v1022_v13 = vrot.slane %v288_v56, %v14776_v2 }
  0xdf   : > { %4733 = vmatprep.subr.bf16.mxu0 %v14383_v8  ;;  %14328 = vmatprep.subr.bf16.mxu1 %v14383_v8  ;;  %v14388_v8 = vld [vmem:[%s22794_s3 + $0x60] ss:$8 sps:$4 sm:$0xff]  }
  0xe0   : > { %v15043_v7 = vpop.permute.xlu1 %611  ;;  %v15045_v23 = vpop.permute.xlu0 %604  ;;  %4734 = vmatpush1.bf16.msra.mxu0 %v14385_v32  ;;  %14344 = vmatpush1.bf16.msra.mxu1 %v14385_v32  ;;  %v1050_v32 = vrot.slane %v288_v56, %v14804_v12 }
  0xe1   : > { %23174 = vst [vmem:[#allocation17_spill] sm:$0xff] %v15043_v7  ;;  %23175 = vst [vmem:[#allocation18_spill] sm:$0xff] %v15045_v23  ;;  %v289_v7 = vld [vmem:[%s14787_s24 + $0x70] sm:$0xff] }
  0xe2   : > { %1017 = vbcast.lane.b32.xlu1 %v1015_v43, 256  ;;  %1010 = vbcast.lane.b32.xlu0 %v1008_v48, 256  ;;  %v14386_v43 = vld [vmem:[%s22794_s3 + $0x64] ss:$8 sps:$4 sm:$0xff]   ;;  %v1043_v48 = vrot.slane %v288_v56, %v14790_v4 }
  0xe3   : > { %4735 = vmatprep.subr.bf16.mxu0 %v14386_v43  ;;  %14329 = vmatprep.subr.bf16.mxu1 %v14386_v43  ;;  %v14391_v43 = vld [vmem:[%s22794_s3 + $0x70] ss:$8 sps:$4 sm:$0xff]  }
  0xe4   : > { %v15055_v0 = vpop.permute.xlu1 %625  ;;  %v15057_v1 = vpop.permute.xlu0 %618  ;;  %4736 = vmatpush1.bf16.msra.mxu0 %v14388_v8  ;;  %14345 = vmatpush1.bf16.msra.mxu1 %v14388_v8 }
  0xe5   : > { %23176 = vst [vmem:[#allocation19_spill] sm:$0xff] %v15055_v0  ;;  %23177 = vst [vmem:[#allocation20_spill] sm:$0xff] %v15057_v1 }
  0xe6   : > { %1031 = vbcast.lane.b32.xlu1 %v1029_v14, 256  ;;  %1024 = vbcast.lane.b32.xlu0 %v1022_v13, 256  ;;  %v14389_v14 = vld [vmem:[%s22794_s3 + $0x74] ss:$8 sps:$4 sm:$0xff]   ;;  %v1057_v13 = vrot.slane %v288_v56, %v14799_v9 }
  0xe7   : > { %4737 = vmatprep.subr.bf16.mxu0 %v14389_v14  ;;  %14330 = vmatprep.subr.bf16.mxu1 %v14389_v14  ;;  %v14394_v14 = vld [vmem:[%s22794_s3 + $0x80] ss:$8 sps:$4 sm:$0xff]  }
  0xe8   : > { %v15067_v0 = vpop.permute.xlu1 %639  ;;  %v15069_v1 = vpop.permute.xlu0 %632  ;;  %4738 = vmatpush1.bf16.msra.mxu0 %v14391_v43  ;;  %14346 = vmatpush1.bf16.msra.mxu1 %v14391_v43 }
  0xe9   : > { %23178 = vst [vmem:[#allocation21_spill] sm:$0xff] %v15067_v0  ;;  %23179 = vst [vmem:[#allocation22_spill] sm:$0xff] %v15069_v1  ;;  %v1064_v1 = vrot.slane %v288_v56, %v14812_v16 }
  0xea   : > { %1045 = vbcast.lane.b32.xlu1 %v1043_v48, 256  ;;  %1038 = vbcast.lane.b32.xlu0 %v1036_v49, 256  ;;  %v14392_v48 = vld [vmem:[%s22794_s3 + $0x84] ss:$8 sps:$4 sm:$0xff]   ;;  %v1071_v49 = vrot.slane %v288_v56, %v14809_v15  ;;  %v1085_v56 = vrot.slane %v289_v7, %v14793_v5 }
  0xeb   : > { %4739 = vmatprep.subr.bf16.mxu0 %v14392_v48  ;;  %14331 = vmatprep.subr.bf16.mxu1 %v14392_v48  ;;  %v14397_v48 = vld [vmem:[%s22794_s3 + $0x90] ss:$8 sps:$4 sm:$0xff]  }
  0xec   : > { %v15079_v0 = vpop.permute.xlu1 %653  ;;  %v15081_v8 = vpop.permute.xlu0 %646  ;;  %4740 = vmatpush1.bf16.msra.mxu0 %v14394_v14  ;;  %14347 = vmatpush1.bf16.msra.mxu1 %v14394_v14  ;;  %v1092_v14 = vrot.slane %v289_v7, %v14779_v3 }
  0xed   : > { %23180 = vst [vmem:[#allocation23_spill] sm:$0xff] %v15079_v0  ;;  %23181 = vst [vmem:[#allocation24_spill] sm:$0xff] %v15081_v8  ;;  %v290_v8 = vld [vmem:[%s14787_s24 + $0x78] sm:$0xff] }
  0xee   : > { %1059 = vbcast.lane.b32.xlu1 %v1057_v13, 256  ;;  %1052 = vbcast.lane.b32.xlu0 %v1050_v32, 256  ;;  %v14395_v13 = vld [vmem:[%s22794_s3 + $0x94] ss:$8 sps:$4 sm:$0xff]   ;;  %v1078_v32 = vrot.slane %v289_v7, %v14776_v2 }
  0xef   : > { %4741 = vmatprep.subr.bf16.mxu0 %v14395_v13  ;;  %14332 = vmatprep.subr.bf16.mxu1 %v14395_v13  ;;  %v14400_v13 = vld [vmem:[%s22794_s3 + $0xa0] ss:$8 sps:$4 sm:$0xff]  }
  0xf0   : > { %v15092_v0 = vpop.permute.xlu1 %667  ;;  %v15094_v43 = vpop.permute.xlu0 %660  ;;  %4742 = vmatpush1.bf16.msra.mxu0 %v14397_v48  ;;  %14348 = vmatpush1.bf16.msra.mxu1 %v14397_v48  ;;  %v1106_v48 = vrot.slane %v289_v7, %v14804_v12 }
  0xf1   : > { %23182 = vst [vmem:[#allocation25_spill] sm:$0xff] %v15092_v0  ;;  %23183 = vst [vmem:[#allocation26_spill] sm:$0xff] %v15094_v43 }
  0xf2   : > { %1073 = vbcast.lane.b32.xlu1 %v1071_v49, 256  ;;  %1066 = vbcast.lane.b32.xlu0 %v1064_v1, 256  ;;  %v14398_v1 = vld [vmem:[%s22794_s3 + $0xa4] ss:$8 sps:$4 sm:$0xff]   ;;  %v1099_v49 = vrot.slane %v289_v7, %v14790_v4 }
  0xf3   : > { %4743 = vmatprep.subr.bf16.mxu0 %v14398_v1  ;;  %14333 = vmatprep.subr.bf16.mxu1 %v14398_v1  ;;  %v14403_v1 = vld [vmem:[%s22794_s3 + $0xb0] ss:$8 sps:$4 sm:$0xff]  }
  0xf4   : > { %v15104_v0 = vpop.permute.xlu1 %681  ;;  %v15106_v43 = vpop.permute.xlu0 %674  ;;  %4744 = vmatpush1.bf16.msra.mxu0 %v14400_v13  ;;  %14349 = vmatpush1.bf16.msra.mxu1 %v14400_v13 }
  0xf5   : > { %23184 = vst [vmem:[#allocation27_spill] sm:$0xff] %v15104_v0  ;;  %23185 = vst [vmem:[#allocation28_spill] sm:$0xff] %v15106_v43 }
  0xf6   : > { %1087 = vbcast.lane.b32.xlu1 %v1085_v56, 256  ;;  %1080 = vbcast.lane.b32.xlu0 %v1078_v32, 256  ;;  %v14401_v56 = vld [vmem:[%s22794_s3 + $0xb4] ss:$8 sps:$4 sm:$0xff]   ;;  %v1113_v32 = vrot.slane %v289_v7, %v14799_v9 }
  0xf7   : > { %4745 = vmatprep.subr.bf16.mxu0 %v14401_v56  ;;  %14334 = vmatprep.subr.bf16.mxu1 %v14401_v56  ;;  %v14406_v56 = vld [vmem:[%s22794_s3 + $0xc0] ss:$8 sps:$4 sm:$0xff]  }
  0xf8   : > { %v15116_v0 = vpop.permute.xlu1 %695  ;;  %v15118_v43 = vpop.permute.xlu0 %688  ;;  %4746 = vmatpush1.bf16.msra.mxu0 %v14403_v1  ;;  %14350 = vmatpush1.bf16.msra.mxu1 %v14403_v1 }
  0xf9   : > { %23186 = vst [vmem:[#allocation29_spill] sm:$0xff] %v15116_v0  ;;  %23187 = vst [vmem:[#allocation30_spill] sm:$0xff] %v15118_v43  ;;  %v1120_v43 = vrot.slane %v289_v7, %v14812_v16 }
  0xfa   : > { %1101 = vbcast.lane.b32.xlu1 %v1099_v49, 256  ;;  %1094 = vbcast.lane.b32.xlu0 %v1092_v14, 256  ;;  %v14404_v49 = vld [vmem:[%s22794_s3 + $0xc4] ss:$8 sps:$4 sm:$0xff]   ;;  %v1127_v14 = vrot.slane %v289_v7, %v14809_v15  ;;  %v1141_v7 = vrot.slane %v290_v8, %v14793_v5 }
  0xfb   : > { %4747 = vmatprep.subr.bf16.mxu0 %v14404_v49  ;;  %14335 = vmatprep.subr.bf16.mxu1 %v14404_v49  ;;  %v14409_v49 = vld [vmem:[%s22794_s3 + $0xd0] ss:$8 sps:$4 sm:$0xff]  }
  0xfc   : > { %v15128_v0 = vpop.permute.xlu1 %709  ;;  %v15130_v13 = vpop.permute.xlu0 %702  ;;  %4748 = vmatpush1.bf16.msra.mxu0 %v14406_v56  ;;  %14351 = vmatpush1.bf16.msra.mxu1 %v14406_v56  ;;  %v1148_v56 = vrot.slane %v290_v8, %v14779_v3 }
  0xfd   : > { %23188 = vst [vmem:[#allocation31_spill] sm:$0xff] %v15128_v0  ;;  %23189 = vst [vmem:[#allocation32_spill] sm:$0xff] %v15130_v13 }
  0xfe   : > { %1115 = vbcast.lane.b32.xlu1 %v1113_v32, 256  ;;  %1108 = vbcast.lane.b32.xlu0 %v1106_v48, 256  ;;  %v14407_v32 = vld [vmem:[%s22794_s3 + $0xd4] ss:$8 sps:$4 sm:$0xff]   ;;  %v1134_v48 = vrot.slane %v290_v8, %v14776_v2 }
  0xff   : > { %4749 = vmatprep.subr.bf16.mxu0 %v14407_v32  ;;  %14336 = vmatprep.subr.bf16.mxu1 %v14407_v32  ;;  %v14412_v32 = vld [vmem:[%s22794_s3 + $0xe0] ss:$8 sps:$4 sm:$0xff]  }
 0x100   : > { %v15141_v13 = vpop.permute.xlu1 %723  ;;  %v15143_v1 = vpop.permute.xlu0 %716  ;;  %4750 = vmatpush1.bf16.msra.mxu0 %v14409_v49  ;;  %14352 = vmatpush1.bf16.msra.mxu1 %v14409_v49 }
 0x101   : > { %23190 = vst [vmem:[#allocation33_spill] sm:$0xff] %v15141_v13  ;;  %23191 = vst [vmem:[#allocation34_spill] sm:$0xff] %v15143_v1 }
 0x102   : > { %1129 = vbcast.lane.b32.xlu1 %v1127_v14, 256  ;;  %1122 = vbcast.lane.b32.xlu0 %v1120_v43, 256  ;;  %v14410_v43 = vld [vmem:[%s22794_s3 + $0xe4] ss:$8 sps:$4 sm:$0xff]   ;;  %v1155_v14 = vrot.slane %v290_v8, %v14790_v4 }
 0x103   : > { %4751 = vmatprep.subr.bf16.mxu0 %v14410_v43  ;;  %14337 = vmatprep.subr.bf16.mxu1 %v14410_v43  ;;  %v14415_v43 = vld [vmem:[%s22794_s3 + $0xf0] ss:$8 sps:$4 sm:$0xff]  }
 0x104   : > { %v15153_v13 = vpop.permute.xlu1 %737  ;;  %v15155_v1 = vpop.permute.xlu0 %730  ;;  %4752 = vmatpush1.bf16.msra.mxu0 %v14412_v32  ;;  %14353 = vmatpush1.bf16.msra.mxu1 %v14412_v32  ;;  %v1187_v32 = vld [vmem:[%s15185_s23] sm:$0xff] }
 0x105   : > { %23192 = vst [vmem:[#allocation35_spill] sm:$0xff] %v15153_v13  ;;  %23193 = vst [vmem:[#allocation36_spill] sm:$0xff] %v15155_v1  ;;  %v1162_v13 = vrot.slane %v290_v8, %v14804_v12  ;;  %v1213_v31 = vrot.slane %v1187_v32, %v14793_v5  ;;  %v1206_v6 = vrot.slane %v1187_v32, %v14776_v2 }
 0x106   : > { %1143 = vbcast.lane.b32.xlu1 %v1141_v7, 256  ;;  %1136 = vbcast.lane.b32.xlu0 %v1134_v48, 256  ;;  %v14413_v7 = vld [vmem:[%s22794_s3 + $0xf4] ss:$8 sps:$4 sm:$0xff]   ;;  %v1169_v48 = vrot.slane %v290_v8, %v14799_v9 }
 0x107   : > { %4753 = vmatprep.subr.bf16.mxu0 %v14413_v7  ;;  %14338 = vmatprep.subr.bf16.mxu1 %v14413_v7 }
 0x108   : > { %v15165_v1 = vpop.permute.xlu1 %751  ;;  %v15167_v49 = vpop.permute.xlu0 %744  ;;  %4754 = vmatpush1.bf16.msra.mxu0 %v14415_v43  ;;  %14354 = vmatpush1.bf16.msra.mxu1 %v14415_v43 }
 0x10a   : > { %1157 = vbcast.lane.b32.xlu1 %v1155_v14, 256  ;;  %1150 = vbcast.lane.b32.xlu0 %v1148_v56, 256  ;;  %v1183_v14 = vrot.slane %v290_v8, %v14809_v15  ;;  %v1176_v56 = vrot.slane %v290_v8, %v14812_v16  ;;  %v1227_v8 = vrot.slane %v1187_v32, %v14790_v4 }
 0x10c   : > { %v15177_v0 = vpop.permute.xlu1 %765  ;;  %v15179_v23 = vpop.permute.xlu0 %758 }
 0x10d   : > { %23194 = vst [vmem:[#allocation37_spill] sm:$0xff] %v15177_v0  ;;  %23195 = vst [vmem:[#allocation38_spill] sm:$0xff] %v15179_v23 }
 0x10e   : > { %1171 = vbcast.lane.b32.xlu1 %v1169_v48, 256  ;;  %1164 = vbcast.lane.b32.xlu0 %v1162_v13, 256  ;;  %v1220_v13 = vrot.slane %v1187_v32, %v14779_v3 }
 0x110   : > { %v15190_v7 = vpop.permute.xlu1 %779  ;;  %v15192_v26 = vpop.permute.xlu0 %772 }
 0x111   : > { %23196 = vst [vmem:[#allocation39_spill] sm:$0xff] %v15190_v7  ;;  %23197 = vst [vmem:[#allocation40_spill] sm:$0xff] %v15192_v26  ;;  %v1188_v26 = vld [vmem:[%s15185_s23 + $0x8] sm:$0xff] }
 0x112   : > { %1185 = vbcast.lane.b32.xlu1 %v1183_v14, 256  ;;  %1178 = vbcast.lane.b32.xlu0 %v1176_v56, 256  ;;  %v1241_v14 = vrot.slane %v1187_v32, %v14799_v9  ;;  %v1234_v56 = vrot.slane %v1187_v32, %v14804_v12 }
 0x114   : > { %v15196_v57 = vpop.permute.xlu1 %793  ;;  %v15198_v43 = vpop.permute.xlu0 %786 }
 0x115   : > { %23198 = vst [vmem:[#allocation41_spill] sm:$0xff] %v15196_v57  ;;  %23199 = vst [vmem:[#allocation42_spill] sm:$0xff] %v15198_v43 }
 0x116   : > { %1215 = vbcast.lane.b32.xlu1 %v1213_v31, 256  ;;  %1208 = vbcast.lane.b32.xlu0 %v1206_v6, 256  ;;  %v1255_v6 = vrot.slane %v1187_v32, %v14809_v15  ;;  %v1248_v31 = vrot.slane %v1187_v32, %v14812_v16  ;;  %v1283_v32 = vrot.slane %v1188_v26, %v14790_v4 }
 0x118   : > { %v15202_v48 = vpop.permute.xlu1 %807  ;;  %v15204_v7 = vpop.permute.xlu0 %800 }
 0x119   : > { %23200 = vst [vmem:[#allocation43_spill] sm:$0xff] %v15202_v48  ;;  %23201 = vst [vmem:[#allocation44_spill] sm:$0xff] %v15204_v7 }
 0x11a   : > { %1229 = vbcast.lane.b32.xlu1 %v1227_v8, 256  ;;  %1222 = vbcast.lane.b32.xlu0 %v1220_v13, 256  ;;  %v1269_v8 = vrot.slane %v1188_v26, %v14793_v5  ;;  %v1262_v13 = vrot.slane %v1188_v26, %v14776_v2 }
 0x11c   : > { %v15208_v57 = vpop.permute.xlu1 %821  ;;  %v15210_v43 = vpop.permute.xlu0 %814 }
 0x11d   : > { %23202 = vst [vmem:[#allocation45_spill] sm:$0xff] %v15208_v57  ;;  %23203 = vst [vmem:[#allocation46_spill] sm:$0xff] %v15210_v43 }
 0x11e   : > { %1243 = vbcast.lane.b32.xlu1 %v1241_v14, 256  ;;  %1236 = vbcast.lane.b32.xlu0 %v1234_v56, 256  ;;  %v1276_v14 = vrot.slane %v1188_v26, %v14779_v3 }
 0x120   : > { %v15215_v48 = vpop.permute.xlu1 %835  ;;  %v15217_v7 = vpop.permute.xlu0 %828 }
 0x121   : > { %23204 = vst [vmem:[#allocation47_spill] sm:$0xff] %v15215_v48  ;;  %23205 = vst [vmem:[#allocation48_spill] sm:$0xff] %v15217_v7  ;;  %v1189_v7 = vld [vmem:[%s15185_s23 + $0x10] sm:$0xff] }
 0x122   : > { %1257 = vbcast.lane.b32.xlu1 %v1255_v6, 256  ;;  %1250 = vbcast.lane.b32.xlu0 %v1248_v31, 256  ;;  %v1297_v6 = vrot.slane %v1188_v26, %v14799_v9  ;;  %v1290_v31 = vrot.slane %v1188_v26, %v14804_v12 }
 0x124   : > { %v15221_v57 = vpop.permute.xlu1 %849  ;;  %v15223_v43 = vpop.permute.xlu0 %842 }
 0x125   : > { %23206 = vst [vmem:[#allocation49_spill] sm:$0xff] %v15221_v57  ;;  %23207 = vst [vmem:[#allocation50_spill] sm:$0xff] %v15223_v43 }
 0x126   : > { %1271 = vbcast.lane.b32.xlu1 %v1269_v8, 256  ;;  %1264 = vbcast.lane.b32.xlu0 %v1262_v13, 256  ;;  %v1311_v8 = vrot.slane %v1188_v26, %v14809_v15  ;;  %v1304_v13 = vrot.slane %v1188_v26, %v14812_v16  ;;  %v1339_v26 = vrot.slane %v1189_v7, %v14790_v4 }
 0x128   : > { %v15227_v56 = vpop.permute.xlu1 %863  ;;  %v15229_v48 = vpop.permute.xlu0 %856 }
 0x129   : > { %23208 = vst [vmem:[#allocation51_spill] sm:$0xff] %v15227_v56  ;;  %23209 = vst [vmem:[#allocation52_spill] sm:$0xff] %v15229_v48 }
 0x12a   : > { %1285 = vbcast.lane.b32.xlu1 %v1283_v32, 256  ;;  %1278 = vbcast.lane.b32.xlu0 %v1276_v14, 256  ;;  %v1325_v32 = vrot.slane %v1189_v7, %v14793_v5  ;;  %v1318_v14 = vrot.slane %v1189_v7, %v14776_v2 }
 0x12c   : > { %v15233_v57 = vpop.permute.xlu1 %877  ;;  %v15235_v43 = vpop.permute.xlu0 %870 }
 0x12d   : > { %23210 = vst [vmem:[#allocation53_spill] sm:$0xff] %v15233_v57  ;;  %23211 = vst [vmem:[#allocation54_spill] sm:$0xff] %v15235_v43 }
 0x12e   : > { %1299 = vbcast.lane.b32.xlu1 %v1297_v6, 256  ;;  %1292 = vbcast.lane.b32.xlu0 %v1290_v31, 256  ;;  %v1332_v6 = vrot.slane %v1189_v7, %v14779_v3 }
 0x130   : > { %v15240_v56 = vpop.permute.xlu1 %891  ;;  %v15242_v48 = vpop.permute.xlu0 %884 }
 0x131   : > { %23212 = vst [vmem:[#allocation55_spill] sm:$0xff] %v15240_v56  ;;  %23213 = vst [vmem:[#allocation56_spill] sm:$0xff] %v15242_v48  ;;  %v1190_v48 = vld [vmem:[%s15185_s23 + $0x18] sm:$0xff] }
 0x132   : > { %1313 = vbcast.lane.b32.xlu1 %v1311_v8, 256  ;;  %1306 = vbcast.lane.b32.xlu0 %v1304_v13, 256  ;;  %v1353_v8 = vrot.slane %v1189_v7, %v14799_v9  ;;  %v1346_v13 = vrot.slane %v1189_v7, %v14804_v12 }
 0x134   : > { %v15246_v57 = vpop.permute.xlu1 %905  ;;  %v15248_v43 = vpop.permute.xlu0 %898 }
 0x135   : > { %23214 = vst [vmem:[#allocation57_spill] sm:$0xff] %v15246_v57  ;;  %23215 = vst [vmem:[#allocation58_spill] sm:$0xff] %v15248_v43 }
 0x136   : > { %1327 = vbcast.lane.b32.xlu1 %v1325_v32, 256  ;;  %1320 = vbcast.lane.b32.xlu0 %v1318_v14, 256  ;;  %v1367_v32 = vrot.slane %v1189_v7, %v14809_v15  ;;  %v1360_v14 = vrot.slane %v1189_v7, %v14812_v16  ;;  %v1395_v7 = vrot.slane %v1190_v48, %v14790_v4 }
 0x138   : > { %v15252_v31 = vpop.permute.xlu1 %919  ;;  %v15254_v56 = vpop.permute.xlu0 %912 }
 0x139   : > { %23216 = vst [vmem:[#allocation59_spill] sm:$0xff] %v15252_v31  ;;  %23217 = vst [vmem:[#allocation60_spill] sm:$0xff] %v15254_v56 }
 0x13a   : > { %1341 = vbcast.lane.b32.xlu1 %v1339_v26, 256  ;;  %1334 = vbcast.lane.b32.xlu0 %v1332_v6, 256  ;;  %v1381_v26 = vrot.slane %v1190_v48, %v14793_v5  ;;  %v1374_v6 = vrot.slane %v1190_v48, %v14776_v2 }
 0x13c   : > { %v15258_v57 = vpop.permute.xlu1 %933  ;;  %v15260_v43 = vpop.permute.xlu0 %926 }
 0x13d   : > { %23218 = vst [vmem:[#allocation61_spill] sm:$0xff] %v15258_v57  ;;  %23219 = vst [vmem:[#allocation62_spill] sm:$0xff] %v15260_v43 }
 0x13e   : > { %1355 = vbcast.lane.b32.xlu1 %v1353_v8, 256  ;;  %1348 = vbcast.lane.b32.xlu0 %v1346_v13, 256  ;;  %v1388_v8 = vrot.slane %v1190_v48, %v14779_v3 }
 0x140   : > { %v15265_v31 = vpop.permute.xlu1 %947  ;;  %v15267_v56 = vpop.permute.xlu0 %940 }
 0x141   : > { %23220 = vst [vmem:[#allocation63_spill] sm:$0xff] %v15265_v31  ;;  %23221 = vst [vmem:[#allocation64_spill] sm:$0xff] %v15267_v56  ;;  %v1191_v31 = vld [vmem:[%s15185_s23 + $0x20] sm:$0xff] }
 0x142   : > { %1369 = vbcast.lane.b32.xlu1 %v1367_v32, 256  ;;  %1362 = vbcast.lane.b32.xlu0 %v1360_v14, 256  ;;  %v1409_v32 = vrot.slane %v1190_v48, %v14799_v9  ;;  %v1402_v14 = vrot.slane %v1190_v48, %v14804_v12 }
 0x144   : > { %v15271_v57 = vpop.permute.xlu1 %961  ;;  %v15273_v43 = vpop.permute.xlu0 %954 }
 0x145   : > { %23222 = vst [vmem:[#allocation65_spill] sm:$0xff] %v15271_v57  ;;  %23223 = vst [vmem:[#allocation66_spill] sm:$0xff] %v15273_v43 }
 0x146   : > { %1383 = vbcast.lane.b32.xlu1 %v1381_v26, 256  ;;  %1376 = vbcast.lane.b32.xlu0 %v1374_v6, 256  ;;  %v1423_v26 = vrot.slane %v1190_v48, %v14809_v15  ;;  %v1416_v6 = vrot.slane %v1190_v48, %v14812_v16  ;;  %v1451_v48 = vrot.slane %v1191_v31, %v14790_v4 }
 0x148   : > { %v15277_v13 = vpop.permute.xlu1 %975  ;;  %v15279_v56 = vpop.permute.xlu0 %968 }
 0x149   : > { %23224 = vst [vmem:[#allocation67_spill] sm:$0xff] %v15277_v13  ;;  %23225 = vst [vmem:[#allocation68_spill] sm:$0xff] %v15279_v56 }
 0x14a   : > { %1397 = vbcast.lane.b32.xlu1 %v1395_v7, 256  ;;  %1390 = vbcast.lane.b32.xlu0 %v1388_v8, 256  ;;  %v1437_v7 = vrot.slane %v1191_v31, %v14793_v5  ;;  %v1430_v8 = vrot.slane %v1191_v31, %v14776_v2 }
 0x14c   : > { %v15283_v57 = vpop.permute.xlu1 %989  ;;  %v15285_v43 = vpop.permute.xlu0 %982 }
 0x14d   : > { %23226 = vst [vmem:[#allocation69_spill] sm:$0xff] %v15283_v57  ;;  %23227 = vst [vmem:[#allocation70_spill] sm:$0xff] %v15285_v43 }
 0x14e   : > { %1411 = vbcast.lane.b32.xlu1 %v1409_v32, 256  ;;  %1404 = vbcast.lane.b32.xlu0 %v1402_v14, 256  ;;  %v1444_v32 = vrot.slane %v1191_v31, %v14779_v3 }
 0x150   : > { %v15290_v13 = vpop.permute.xlu1 %1003  ;;  %v15292_v56 = vpop.permute.xlu0 %996 }
 0x151   : > { %23228 = vst [vmem:[#allocation71_spill] sm:$0xff] %v15290_v13  ;;  %23229 = vst [vmem:[#allocation72_spill] sm:$0xff] %v15292_v56  ;;  %v1192_v13 = vld [vmem:[%s15185_s23 + $0x28] sm:$0xff] }
 0x152   : > { %1425 = vbcast.lane.b32.xlu1 %v1423_v26, 256  ;;  %1418 = vbcast.lane.b32.xlu0 %v1416_v6, 256  ;;  %v1465_v26 = vrot.slane %v1191_v31, %v14799_v9  ;;  %v1458_v6 = vrot.slane %v1191_v31, %v14804_v12 }
 0x154   : > { %v15296_v57 = vpop.permute.xlu1 %1017  ;;  %v15298_v43 = vpop.permute.xlu0 %1010 }
 0x155   : > { %23230 = vst [vmem:[#allocation73_spill] sm:$0xff] %v15296_v57  ;;  %23231 = vst [vmem:[#allocation74_spill] sm:$0xff] %v15298_v43 }
 0x156   : > { %1439 = vbcast.lane.b32.xlu1 %v1437_v7, 256  ;;  %1432 = vbcast.lane.b32.xlu0 %v1430_v8, 256  ;;  %v1479_v7 = vrot.slane %v1191_v31, %v14809_v15  ;;  %v1472_v8 = vrot.slane %v1191_v31, %v14812_v16  ;;  %v1507_v31 = vrot.slane %v1192_v13, %v14790_v4 }
 0x158   : > { %v15302_v14 = vpop.permute.xlu1 %1031  ;;  %v15304_v56 = vpop.permute.xlu0 %1024 }
 0x159   : > { %23232 = vst [vmem:[#allocation75_spill] sm:$0xff] %v15302_v14  ;;  %23233 = vst [vmem:[#allocation76_spill] sm:$0xff] %v15304_v56 }
 0x15a   : > { %1453 = vbcast.lane.b32.xlu1 %v1451_v48, 256  ;;  %1446 = vbcast.lane.b32.xlu0 %v1444_v32, 256  ;;  %v1493_v48 = vrot.slane %v1192_v13, %v14793_v5  ;;  %v1486_v32 = vrot.slane %v1192_v13, %v14776_v2 }
 0x15c   : > { %v15308_v57 = vpop.permute.xlu1 %1045  ;;  %v15310_v43 = vpop.permute.xlu0 %1038 }
 0x15d   : > { %23234 = vst [vmem:[#allocation77_spill] sm:$0xff] %v15308_v57  ;;  %23235 = vst [vmem:[#allocation78_spill] sm:$0xff] %v15310_v43 }
 0x15e   : > { %1467 = vbcast.lane.b32.xlu1 %v1465_v26, 256  ;;  %1460 = vbcast.lane.b32.xlu0 %v1458_v6, 256  ;;  %v1500_v26 = vrot.slane %v1192_v13, %v14779_v3 }
 0x160   : > { %v15315_v14 = vpop.permute.xlu1 %1059  ;;  %v15317_v56 = vpop.permute.xlu0 %1052 }
 0x161   : > { %23236 = vst [vmem:[#allocation79_spill] sm:$0xff] %v15315_v14  ;;  %23237 = vst [vmem:[#allocation80_spill] sm:$0xff] %v15317_v56  ;;  %v1193_v14 = vld [vmem:[%s15185_s23 + $0x30] sm:$0xff] }
 0x162   : > { %1481 = vbcast.lane.b32.xlu1 %v1479_v7, 256  ;;  %1474 = vbcast.lane.b32.xlu0 %v1472_v8, 256  ;;  %v1521_v7 = vrot.slane %v1192_v13, %v14799_v9  ;;  %v1514_v8 = vrot.slane %v1192_v13, %v14804_v12 }
 0x164   : > { %v15321_v57 = vpop.permute.xlu1 %1073  ;;  %v15323_v43 = vpop.permute.xlu0 %1066 }
 0x165   : > { %23238 = vst [vmem:[#allocation81_spill] sm:$0xff] %v15321_v57  ;;  %23239 = vst [vmem:[#allocation82_spill] sm:$0xff] %v15323_v43 }
 0x166   : > { %1495 = vbcast.lane.b32.xlu1 %v1493_v48, 256  ;;  %1488 = vbcast.lane.b32.xlu0 %v1486_v32, 256  ;;  %v1535_v48 = vrot.slane %v1192_v13, %v14809_v15  ;;  %v1528_v32 = vrot.slane %v1192_v13, %v14812_v16  ;;  %v1563_v13 = vrot.slane %v1193_v14, %v14790_v4 }
 0x168   : > { %v15327_v6 = vpop.permute.xlu1 %1087  ;;  %v15329_v56 = vpop.permute.xlu0 %1080 }
 0x169   : > { %23240 = vst [vmem:[#allocation83_spill] sm:$0xff] %v15327_v6  ;;  %23241 = vst [vmem:[#allocation84_spill] sm:$0xff] %v15329_v56 }
 0x16a   : > { %1509 = vbcast.lane.b32.xlu1 %v1507_v31, 256  ;;  %1502 = vbcast.lane.b32.xlu0 %v1500_v26, 256  ;;  %v1549_v31 = vrot.slane %v1193_v14, %v14793_v5  ;;  %v1542_v26 = vrot.slane %v1193_v14, %v14776_v2 }
 0x16c   : > { %v15333_v57 = vpop.permute.xlu1 %1101  ;;  %v15335_v43 = vpop.permute.xlu0 %1094 }
 0x16d   : > { %23242 = vst [vmem:[#allocation85_spill] sm:$0xff] %v15333_v57  ;;  %23243 = vst [vmem:[#allocation86_spill] sm:$0xff] %v15335_v43 }
 0x16e   : > { %1523 = vbcast.lane.b32.xlu1 %v1521_v7, 256  ;;  %1516 = vbcast.lane.b32.xlu0 %v1514_v8, 256  ;;  %v1556_v7 = vrot.slane %v1193_v14, %v14779_v3 }
 0x170   : > { %v15340_v6 = vpop.permute.xlu1 %1115  ;;  %v15342_v56 = vpop.permute.xlu0 %1108 }
 0x171   : > { %23244 = vst [vmem:[#allocation87_spill] sm:$0xff] %v15340_v6  ;;  %23245 = vst [vmem:[#allocation88_spill] sm:$0xff] %v15342_v56  ;;  %v1194_v56 = vld [vmem:[%s15185_s23 + $0x38] sm:$0xff] }
 0x172   : > { %1537 = vbcast.lane.b32.xlu1 %v1535_v48, 256  ;;  %1530 = vbcast.lane.b32.xlu0 %v1528_v32, 256  ;;  %v1577_v48 = vrot.slane %v1193_v14, %v14799_v9  ;;  %v1570_v32 = vrot.slane %v1193_v14, %v14804_v12 }
 0x174   : > { %v15346_v57 = vpop.permute.xlu1 %1129  ;;  %v15348_v43 = vpop.permute.xlu0 %1122 }
 0x175   : > { %23246 = vst [vmem:[#allocation89_spill] sm:$0xff] %v15346_v57  ;;  %23247 = vst [vmem:[#allocation90_spill] sm:$0xff] %v15348_v43 }
 0x176   : > { %1551 = vbcast.lane.b32.xlu1 %v1549_v31, 256  ;;  %1544 = vbcast.lane.b32.xlu0 %v1542_v26, 256  ;;  %v1591_v31 = vrot.slane %v1193_v14, %v14809_v15  ;;  %v1584_v26 = vrot.slane %v1193_v14, %v14812_v16  ;;  %v1619_v14 = vrot.slane %v1194_v56, %v14790_v4 }
 0x178   : > { %v15352_v8 = vpop.permute.xlu1 %1143  ;;  %v15354_v6 = vpop.permute.xlu0 %1136 }
 0x179   : > { %23248 = vst [vmem:[#allocation91_spill] sm:$0xff] %v15352_v8  ;;  %23249 = vst [vmem:[#allocation92_spill] sm:$0xff] %v15354_v6 }
 0x17a   : > { %1565 = vbcast.lane.b32.xlu1 %v1563_v13, 256  ;;  %1558 = vbcast.lane.b32.xlu0 %v1556_v7, 256  ;;  %v1605_v13 = vrot.slane %v1194_v56, %v14793_v5  ;;  %v1598_v7 = vrot.slane %v1194_v56, %v14776_v2 }
 0x17c   : > { %v15358_v57 = vpop.permute.xlu1 %1157  ;;  %v15360_v43 = vpop.permute.xlu0 %1150 }
 0x17d   : > { %23250 = vst [vmem:[#allocation93_spill] sm:$0xff] %v15358_v57  ;;  %23251 = vst [vmem:[#allocation94_spill] sm:$0xff] %v15360_v43  ;;  %v23254_v57 = vlaneseq }
 0x17e   : > { %1579 = vbcast.lane.b32.xlu1 %v1577_v48, 256  ;;  %1572 = vbcast.lane.b32.xlu0 %v1570_v32, 256 }
 0x17f   : > { %v15372_v0 = vand.u32 127, %v23254_v57  ;;  %v1633_v57 = vrot.slane %v1194_v56, %v14799_v9 }
 0x180   : > { %v15365_v8 = vpop.permute.xlu1 %1171  ;;  %v15367_v6 = vpop.permute.xlu0 %1164 }
 0x181   : > { %23252 = vst [vmem:[#allocation95_spill] sm:$0xff] %v15365_v8  ;;  %23253 = vst [vmem:[#allocation96_spill] sm:$0xff] %v15367_v6  ;;  %v1612_v8 = vrot.slane %v1194_v56, %v14779_v3  ;;  %vm2227_vm8 = vcmp.eq.s32.totalorder %v15372_v0, %v14877_v25  ;;  %vm2229_vm10 = vcmp.eq.s32.totalorder %v15372_v0, %v14883_v29 }
 0x182   : > { %1593 = vbcast.lane.b32.xlu1 %v1591_v31, 256  ;;  %1586 = vbcast.lane.b32.xlu0 %v1584_v26, 256  ;;  %v15381_v31 = vadd.s32 128, %v15372_v0 }
 0x184   : > { %v15374_v48 = vpop.permute.xlu1 %1185  ;;  %v15376_v32 = vpop.permute.xlu0 %1178  ;;  %vm2228_vm0 = vcmp.eq.s32.totalorder %v15381_v31, %v14877_v25  ;;  %vm2230_vm4 = vcmp.eq.s32.totalorder %v15381_v31, %v14883_v29  ;;  %vm2232_vm15 = vcmp.eq.s32.totalorder %v15381_v31, %v14875_v24 }
 0x185   : > { %23255 = vst [vmem:[#allocation97_spill] sm:$0xff] %v15374_v48  ;;  %23256 = vst [vmem:[#allocation98_spill] sm:$0xff] %v15376_v32  ;;  %v1626_v48 = vrot.slane %v1194_v56, %v14804_v12 }
 0x186   : > { %1607 = vbcast.lane.b32.xlu1 %v1605_v13, 256  ;;  %1600 = vbcast.lane.b32.xlu0 %v1598_v7, 256 }
 0x188   : > { %v1216_v26 = vpop.permute.xlu1 %1215  ;;  %v1209_v6 = vpop.permute.xlu0 %1208 }
 0x189   : > { %v2100_v43 = vadd.s32 200, %v1216_v26  ;;  %v2099_v23 = vadd.s32 200, %v1209_v6  ;;  %v22885_v26 = vmov 1.0|1.0  }
 0x18a   : > { %1621 = vbcast.lane.b32.xlu1 %v1619_v14, 256  ;;  %1614 = vbcast.lane.b32.xlu0 %v1612_v8, 256  ;;  %v1647_v14 = vrot.slane %v1194_v56, %v14809_v15 }
 0x18b   : > { %vm2484_vm1 = vcmp.eq.s32.totalorder %v15381_v31, %v2099_v23  ;;  %vm2486_vm2 = vcmp.eq.s32.totalorder %v15381_v31, %v2100_v43  ;;  %vm2483_vm3 = vcmp.eq.s32.totalorder %v15372_v0, %v2099_v23  ;;  %vm2485_vm6 = vcmp.eq.s32.totalorder %v15372_v0, %v2100_v43 }
 0x18c   : > { %v1230_v13 = vpop.permute.xlu1 %1229  ;;  %v1223_v7 = vpop.permute.xlu0 %1222  ;;  %vm2740_vm5 = vmor %vm2228_vm0, %vm2484_vm1  ;;  %vm2234_vm1 = vcmp.eq.s32.totalorder %v15381_v31, %v14881_v28 }
 0x18d   : > { %v2102_v6 = vadd.s32 200, %v1230_v13  ;;  %v2101_v8 = vadd.s32 200, %v1223_v7  ;;  %vm2742_vm7 = vmor %vm2230_vm4, %vm2486_vm2  ;;  %v1640_v13 = vrot.slane %v1194_v56, %v14812_v16  ;;  %v15404_v7 = vld [vmem:[%s15185_s23 + $0x40] sm:$0xff] }
 0x18e   : > { %1635 = vbcast.lane.b32.xlu1 %v1633_v57, 256  ;;  %1628 = vbcast.lane.b32.xlu0 %v1626_v48, 256  ;;  %vm14067_vm9 = vmpackc.low %vm2742_vm7, %vm2740_vm5  ;;  %v1661_v43 = vrot.slane %v15404_v7, %v14793_v5  ;;  %v1654_v56 = vrot.slane %v15404_v7, %v14776_v2 }
 0x18f   : > { %vm2488_vm11 = vcmp.eq.s32.totalorder %v15381_v31, %v2101_v8  ;;  %14068 = vmatprep.mubr.msk.bf16.mxu0 %vm14067_vm9, %v22885_v26  ;;  %vm2739_vm12 = vmor %vm2227_vm8, %vm2483_vm3  ;;  %vm2490_vm13 = vcmp.eq.s32.totalorder %v15381_v31, %v2102_v6  ;;  %vm2487_vm2 = vcmp.eq.s32.totalorder %v15372_v0, %v2101_v8  ;;  %vm2489_vm4 = vcmp.eq.s32.totalorder %v15372_v0, %v2102_v6 }
 0x190   : > { %vm2741_vm14 = vmor %vm2229_vm10, %vm2485_vm6  ;;  %v1244_v25 = vpop.permute.xlu1 %1243  ;;  %v1237_v48 = vpop.permute.xlu0 %1236  ;;  %vm2231_vm6 = vcmp.eq.s32.totalorder %v15372_v0, %v14875_v24  ;;  %vm2233_vm8 = vcmp.eq.s32.totalorder %v15372_v0, %v14881_v28  ;;  %v1675_v28 = vrot.slane %v15404_v7, %v14790_v4  ;;  %v1682_v6 = vrot.slane %v15404_v7, %v14804_v12 }
 0x191   : > { %vm14069_vm0 = vmpackc.low %vm2741_vm14, %vm2739_vm12  ;;  %v2103_v29 = vadd.s32 200, %v1237_v48  ;;  %v2104_v23 = vadd.s32 200, %v1244_v25 }
 0x192   : > { %14070 = vmatmul.mubr.msk.bf16.vlgmr.msra.gmra.mrb[0].mxu0 %vm14069_vm0, %v22885_v26  ;;  %1649 = vbcast.lane.b32.xlu1 %v1647_v14, 256  ;;  %vm2744_vm3 = vmor %vm2232_vm15, %vm2488_vm11  ;;  %vm2238_vm15 = vcmp.eq.s32.totalorder %v15381_v31, %v14888_v33 }
 0x193   : > { %1642 = vbcast.lane.b32.xlu0 %v1640_v13, 256  ;;  %vm2746_vm5 = vmor %vm2234_vm1, %vm2490_vm13  ;;  %vm2492_vm9 = vcmp.eq.s32.totalorder %v15381_v31, %v2103_v29  ;;  %vm2494_vm11 = vcmp.eq.s32.totalorder %v15381_v31, %v2104_v23  ;;  %vm2236_vm13 = vcmp.eq.s32.totalorder %v15381_v31, %v14890_v34  ;;  %vm2491_vm1 = vcmp.eq.s32.totalorder %v15372_v0, %v2103_v29 }
 0x194   : > { %vm14071_vm7 = vmpackc.low %vm2746_vm5, %vm2744_vm3  ;;  %v1258_v57 = vpop.permute.xlu1 %1257  ;;  %v1251_v14 = vpop.permute.xlu0 %1250  ;;  %vm2493_vm3 = vcmp.eq.s32.totalorder %v15372_v0, %v2104_v23  ;;  %vm2235_vm5 = vcmp.eq.s32.totalorder %v15372_v0, %v14890_v34  ;;  %v1703_v29 = vrot.slane %v15404_v7, %v14809_v15  ;;  %v15496_v23 = vld [vmem:[%s15185_s23 + $0x48] sm:$0xff] }
 0x195   : > { %14072 = vmatprep.mubr.msk.bf16.mxu0 %vm14071_vm7, %v22885_v26  ;;  %vm15432_vm10 = vmor %vm2231_vm6, %vm2487_vm2  ;;  %v2105_v13 = vadd.s32 200, %v1251_v14  ;;  %v2106_v8 = vadd.s32 200, %v1258_v57  ;;  %vm2237_vm7 = vcmp.eq.s32.totalorder %v15372_v0, %v14888_v33  ;;  %v1710_v34 = vrot.slane %v15496_v23, %v14776_v2 }
 0x196   : > { %1663 = vbcast.lane.b32.xlu1 %v1661_v43, 256  ;;  %vm15437_vm12 = vmor %vm2233_vm8, %vm2489_vm4  ;;  %v1668_v43 = vrot.slane %v15404_v7, %v14779_v3 }
 0x197   : > { %1656 = vbcast.lane.b32.xlu0 %v1654_v56, 256  ;;  %vm14073_vm14 = vmpackc.low %vm15437_vm12, %vm15432_vm10  ;;  %v1689_v56 = vrot.slane %v15404_v7, %v14799_v9  ;;  %vm2496_vm6 = vcmp.eq.s32.totalorder %v15381_v31, %v2105_v13  ;;  %vm2498_vm8 = vcmp.eq.s32.totalorder %v15381_v31, %v2106_v8  ;;  %vm2240_vm10 = vcmp.eq.s32.totalorder %v15381_v31, %v14896_v38 }
 0x198   : > { %v1272_v25 = vpop.permute.xlu1 %1271  ;;  %vm2748_vm0 = vmor %vm2236_vm13, %vm2492_vm9  ;;  %v1265_v48 = vpop.permute.xlu0 %1264  ;;  %vm2242_vm12 = vcmp.eq.s32.totalorder %v15381_v31, %v14894_v37 }
 0x199   : > { %vm2750_vm2 = vmor %vm2238_vm15, %vm2494_vm11  ;;  %vm2495_vm15 = vcmp.eq.s32.totalorder %v15372_v0, %v2105_v13  ;;  %v1731_v13 = vrot.slane %v15496_v23, %v14790_v4 }
 0x19a   : > { %14074 = vmatmul.mubr.msk.bf16.gmra.mrb[4].mxu0 %vm14073_vm14, %v22885_v26  ;;  %vm14075_vm4 = vmpackc.low %vm2750_vm2, %vm2748_vm0  ;;  %1677 = vbcast.lane.b32.xlu1 %v1675_v28, 256  ;;  %v2107_v28 = vadd.s32 200, %v1265_v48  ;;  %v23269_v48 = vmov 1.0|1.0  }
 0x19b   : > { %14076 = vmatprep.mubr.msk.bf16.mxu0 %vm14075_vm4, %v22885_v26  ;;  %1670 = vbcast.lane.b32.xlu0 %v1668_v43, 256  ;;  %vm15471_vm9 = vmor %vm2235_vm5, %vm2491_vm1  ;;  %v2108_v26 = vadd.s32 200, %v1272_v25  ;;  %vm2497_vm1 = vcmp.eq.s32.totalorder %v15372_v0, %v2106_v8  ;;  %vm2241_vm5 = vcmp.eq.s32.totalorder %v15372_v0, %v14894_v37 }
 0x19c   : > { %v1286_v57 = vpop.permute.xlu1 %1285  ;;  %v1279_v14 = vpop.permute.xlu0 %1278  ;;  %vm15479_vm11 = vmor %vm2237_vm7, %vm2493_vm3  ;;  %vm2239_vm3 = vcmp.eq.s32.totalorder %v15372_v0, %v14896_v38  ;;  %vm2500_vm4 = vcmp.eq.s32.totalorder %v15381_v31, %v2107_v28  ;;  %v1738_v38 = vrot.slane %v15496_v23, %v14804_v12 }
 0x19d   : > { %vm15485_vm13 = vmor %vm2240_vm10, %vm2496_vm6  ;;  %vm2502_vm6 = vcmp.eq.s32.totalorder %v15381_v31, %v2108_v26  ;;  %vm2246_vm10 = vcmp.eq.s32.totalorder %v15381_v31, %v14900_v41  ;;  %v2109_v24 = vadd.s32 200, %v1279_v14  ;;  %v2110_v8 = vadd.s32 200, %v1286_v57 }
 0x19e   : > { %1691 = vbcast.lane.b32.xlu1 %v1689_v56, 256  ;;  %vm15491_vm14 = vmor %vm2242_vm12, %vm2498_vm8  ;;  %v1696_v56 = vrot.slane %v15404_v7, %v14812_v16  ;;  %v1717_v7 = vrot.slane %v15496_v23, %v14793_v5  ;;  %vm2244_vm8 = vcmp.eq.s32.totalorder %v15381_v31, %v14902_v42  ;;  %v1745_v57 = vrot.slane %v15496_v23, %v14799_v9 }
 0x19f   : > { %1684 = vbcast.lane.b32.xlu0 %v1682_v6, 256  ;;  %vm14077_vm0 = vmpackc.low %vm15479_vm11, %vm15471_vm9 }
 0x1a0   : > { %v1300_v32 = vpop.permute.xlu1 %1299  ;;  %v1293_v40 = vpop.permute.xlu0 %1292  ;;  %vm14079_vm2 = vmpackc.low %vm15491_vm14, %vm15485_vm13  ;;  %vm2499_vm13 = vcmp.eq.s32.totalorder %v15372_v0, %v2107_v28  ;;  %v1759_v28 = vrot.slane %v15496_v23, %v14809_v15 }
 0x1a1   : > { %vm15528_vm7 = vmor %vm2239_vm3, %vm2495_vm15  ;;  %vm2501_vm15 = vcmp.eq.s32.totalorder %v15372_v0, %v2108_v26  ;;  %vm2245_vm3 = vcmp.eq.s32.totalorder %v15372_v0, %v14900_v41  ;;  %v2111_v33 = vadd.s32 200, %v1293_v40  ;;  %v15611_v26 = vld [vmem:[%s15185_s23 + $0x50] sm:$0xff] }
 0x1a2   : > { %14078 = vmatmul.mubr.msk.bf16.gmra.mrb[8].mxu0 %vm14077_vm0, %v23269_v48  ;;  %1705 = vbcast.lane.b32.xlu1 %v1703_v29, 256  ;;  %vm15536_vm9 = vmor %vm2241_vm5, %vm2497_vm1  ;;  %vm2243_vm1 = vcmp.eq.s32.totalorder %v15372_v0, %v14902_v42  ;;  %v2112_v29 = vadd.s32 200, %v1300_v32  ;;  %v1773_v40 = vrot.slane %v15611_v26, %v14793_v5 }
 0x1a3   : > { %14080 = vmatprep.mubr.msk.bf16.mxu0 %vm14079_vm2, %v23269_v48  ;;  %1698 = vbcast.lane.b32.xlu0 %v1696_v56, 256  ;;  %vm15542_vm11 = vmor %vm2244_vm8, %vm2500_vm4  ;;  %vm2504_vm2 = vcmp.eq.s32.totalorder %v15381_v31, %v2109_v24  ;;  %vm2506_vm4 = vcmp.eq.s32.totalorder %v15381_v31, %v2110_v8  ;;  %vm2250_vm8 = vcmp.eq.s32.totalorder %v15381_v31, %v14906_v45 }
 0x1a4   : > { %v15520_v25 = vpop.permute.xlu1 %1313  ;;  %v15522_v6 = vpop.permute.xlu0 %1306  ;;  %vm15548_vm12 = vmor %vm2246_vm10, %vm2502_vm6  ;;  %vm2248_vm6 = vcmp.eq.s32.totalorder %v15381_v31, %v14908_v46 }
 0x1a5   : > { %vm14081_vm14 = vmpackc.low %vm15536_vm9, %vm15528_vm7  ;;  %v2113_v41 = vadd.s32 200, %v15522_v6 }
 0x1a6   : > { %1719 = vbcast.lane.b32.xlu1 %v1717_v7, 256  ;;  %v1724_v7 = vrot.slane %v15496_v23, %v14779_v3  ;;  %vm14083_vm0 = vmpackc.low %vm15548_vm12, %vm15542_vm11  ;;  %vm2503_vm11 = vcmp.eq.s32.totalorder %v15372_v0, %v2109_v24  ;;  %v1787_v24 = vrot.slane %v15611_v26, %v14790_v4 }
 0x1a7   : > { %1712 = vbcast.lane.b32.xlu0 %v1710_v34, 256  ;;  %vm15586_vm5 = vmor %vm2243_vm1, %vm2499_vm13  ;;  %vm2505_vm13 = vcmp.eq.s32.totalorder %v15372_v0, %v2110_v8  ;;  %vm2249_vm1 = vcmp.eq.s32.totalorder %v15372_v0, %v14906_v45  ;;  %v2114_v8 = vadd.s32 200, %v15520_v25  ;;  %v1801_v25 = vrot.slane %v15611_v26, %v14799_v9 }
 0x1a8   : > { %v15552_v43 = vpop.permute.xlu1 %1327  ;;  %v15554_v56 = vpop.permute.xlu0 %1320  ;;  %vm15594_vm7 = vmor %vm2245_vm3, %vm2501_vm15  ;;  %vm2247_vm15 = vcmp.eq.s32.totalorder %v15372_v0, %v14908_v46 }
 0x1a9   : > { %vm15600_vm9 = vmor %vm2248_vm6, %vm2504_vm2  ;;  %vm2510_vm2 = vcmp.eq.s32.totalorder %v15381_v31, %v2112_v29  ;;  %vm2254_vm6 = vcmp.eq.s32.totalorder %v15381_v31, %v14913_v50  ;;  %v2115_v45 = vadd.s32 200, %v15554_v56 }
 0x1aa   : > { %14082 = vmatmul.mubr.msk.bf16.gmra.mrb[12].mxu0 %vm14081_vm14, %v23269_v48  ;;  %1733 = vbcast.lane.b32.xlu1 %v1731_v13, 256  ;;  %vm15606_vm10 = vmor %vm2250_vm8, %vm2506_vm4  ;;  %vm2252_vm4 = vcmp.eq.s32.totalorder %v15381_v31, %v14915_v51 }
 0x1ab   : > { %14084 = vmatprep.mubr.msk.bf16.mxu0 %vm14083_vm0, %v23269_v48  ;;  %1726 = vbcast.lane.b32.xlu0 %v1724_v7, 256  ;;  %vm14085_vm12 = vmpackc.low %vm15594_vm7, %vm15586_vm5  ;;  %vm2508_vm0 = vcmp.eq.s32.totalorder %v15381_v31, %v2111_v33 }
 0x1ac   : > { %v15578_v14 = vpop.permute.xlu1 %1341  ;;  %v15580_v34 = vpop.permute.xlu0 %1334  ;;  %vm14087_vm14 = vmpackc.low %vm15606_vm10, %vm15600_vm9  ;;  %vm2507_vm9 = vcmp.eq.s32.totalorder %v15372_v0, %v2111_v33  ;;  %v1815_v33 = vrot.slane %v15611_v26, %v14809_v15 }
 0x1ad   : > { %vm15647_vm3 = vmor %vm2247_vm15, %vm2503_vm11  ;;  %vm2509_vm11 = vcmp.eq.s32.totalorder %v15372_v0, %v2112_v29  ;;  %vm2253_vm15 = vcmp.eq.s32.totalorder %v15372_v0, %v14913_v50  ;;  %v15733_v29 = vld [vmem:[%s15185_s23 + $0x58] sm:$0xff]  ;;  %v2117_v50 = vadd.s32 200, %v15580_v34 }
 0x1ae   : > { %1747 = vbcast.lane.b32.xlu1 %v1745_v57, 256  ;;  %v1752_v57 = vrot.slane %v15496_v23, %v14812_v16  ;;  %vm15655_vm5 = vmor %vm2249_vm1, %vm2505_vm13  ;;  %vm2251_vm13 = vcmp.eq.s32.totalorder %v15372_v0, %v14915_v51 }
 0x1af   : > { %1740 = vbcast.lane.b32.xlu0 %v1738_v38, 256  ;;  %v1766_v38 = vrot.slane %v15611_v26, %v14776_v2  ;;  %vm15661_vm7 = vmor %vm2252_vm4, %vm2508_vm0  ;;  %vm2514_vm0 = vcmp.eq.s32.totalorder %v15381_v31, %v2114_v8  ;;  %vm2258_vm4 = vcmp.eq.s32.totalorder %v15381_v31, %v14919_v54 }
 0x1b0   : > { %v15613_v7 = vpop.permute.xlu1 %1355  ;;  %v15615_v35 = vpop.permute.xlu0 %1348  ;;  %vm15668_vm8 = vmor %vm2254_vm6, %vm2510_vm2  ;;  %vm2256_vm2 = vcmp.eq.s32.totalorder %v15381_v31, %v14921_v55 }
 0x1b1   : > { %vm14089_vm10 = vmpackc.low %vm15655_vm5, %vm15647_vm3 }
 0x1b2   : > { %14086 = vmatmul.mubr.msk.bf16.gmra.mrb[16].mxu0 %vm14085_vm12, %v23269_v48  ;;  %1761 = vbcast.lane.b32.xlu1 %v1759_v28, 256  ;;  %vm14091_vm12 = vmpackc.low %vm15668_vm8, %vm15661_vm7  ;;  %vm2511_vm7 = vcmp.eq.s32.totalorder %v15372_v0, %v2113_v41 }
 0x1b3   : > { %14088 = vmatprep.mubr.msk.bf16.mxu0 %vm14087_vm14, %v23269_v48  ;;  %1754 = vbcast.lane.b32.xlu0 %v1752_v57, 256  ;;  %v1780_v57 = vrot.slane %v15611_v26, %v14779_v3  ;;  %vm2512_vm14 = vcmp.eq.s32.totalorder %v15381_v31, %v2113_v41  ;;  %vm15707_vm1 = vmor %vm2251_vm13, %vm2507_vm9  ;;  %vm2513_vm9 = vcmp.eq.s32.totalorder %v15372_v0, %v2114_v8  ;;  %v2118_v8 = vadd.s32 200, %v15578_v14 }
 0x1b4   : > { %v15639_v32 = vpop.permute.xlu1 %1369  ;;  %v15641_v23 = vpop.permute.xlu0 %1362  ;;  %vm15715_vm3 = vmor %vm2253_vm15, %vm2509_vm11  ;;  %vm2255_vm11 = vcmp.eq.s32.totalorder %v15372_v0, %v14921_v55  ;;  %vm2257_vm13 = vcmp.eq.s32.totalorder %v15372_v0, %v14919_v54  ;;  %v1843_v41 = vrot.slane %v15733_v29, %v14790_v4  ;;  %v1857_v14 = vrot.slane %v15733_v29, %v14799_v9 }
 0x1b5   : > { %vm15721_vm5 = vmor %vm2256_vm2, %vm2512_vm14  ;;  %vm2262_vm2 = vcmp.eq.s32.totalorder %v15381_v31, %v14925_v58  ;;  %v2119_v54 = vadd.s32 200, %v15615_v35 }
 0x1b6   : > { %1775 = vbcast.lane.b32.xlu1 %v1773_v40, 256  ;;  %vm15728_vm6 = vmor %vm2258_vm4, %vm2514_vm0  ;;  %vm2260_vm0 = vcmp.eq.s32.totalorder %v15381_v31, %v14927_v59 }
 0x1b7   : > { %1768 = vbcast.lane.b32.xlu0 %v1766_v38, 256  ;;  %v1794_v38 = vrot.slane %v15611_v26, %v14804_v12  ;;  %vm14093_vm8 = vmpackc.low %vm15715_vm3, %vm15707_vm1 }
 0x1b8   : > { %v15673_v28 = vpop.permute.xlu1 %1383  ;;  %v15675_v13 = vpop.permute.xlu0 %1376  ;;  %vm15770_vm15 = vmor %vm2255_vm11, %vm2511_vm7  ;;  %vm2261_vm11 = vcmp.eq.s32.totalorder %v15372_v0, %v14925_v58  ;;  %v2121_v58 = vadd.s32 200, %v15641_v23 }
 0x1b9   : > { %vm15778_vm1 = vmor %vm2257_vm13, %vm2513_vm9  ;;  %vm2259_vm9 = vcmp.eq.s32.totalorder %v15372_v0, %v14927_v59 }
 0x1ba   : > { %14090 = vmatmul.mubr.msk.bf16.gmra.mrb[20].mxu0 %vm14089_vm10, %v23269_v48  ;;  %1789 = vbcast.lane.b32.xlu1 %v1787_v24, 256  ;;  %v2116_v24 = vadd.s32 200, %v15552_v43  ;;  %vm14095_vm10 = vmpackc.low %vm15728_vm6, %vm15721_vm5  ;;  %v1829_v43 = vrot.slane %v15733_v29, %v14793_v5  ;;  %vm2515_vm5 = vcmp.eq.s32.totalorder %v15372_v0, %v2115_v45 }
 0x1bb   : > { %14092 = vmatprep.mubr.msk.bf16.mxu0 %vm14091_vm12, %v23269_v48  ;;  %1782 = vbcast.lane.b32.xlu0 %v1780_v57, 256  ;;  %vm2516_vm12 = vcmp.eq.s32.totalorder %v15381_v31, %v2115_v45  ;;  %vm14097_vm6 = vmpackc.low %vm15778_vm1, %vm15770_vm15  ;;  %v1871_v45 = vrot.slane %v15733_v29, %v14809_v15 }
 0x1bc   : > { %v15699_v6 = vpop.permute.xlu1 %1397  ;;  %v15701_v40 = vpop.permute.xlu0 %1390  ;;  %vm2518_vm14 = vcmp.eq.s32.totalorder %v15381_v31, %v2116_v24  ;;  %vm15784_vm3 = vmor %vm2260_vm0, %vm2516_vm12  ;;  %vm2517_vm7 = vcmp.eq.s32.totalorder %v15372_v0, %v2116_v24  ;;  %vm2522_vm12 = vcmp.eq.s32.totalorder %v15381_v31, %v2118_v8  ;;  %vm2266_vm0 = vcmp.eq.s32.totalorder %v15381_v31, %v14931_v62  ;;  %v15856_v24 = vld [vmem:[%s15185_s23 + $0x60] sm:$0xff] }
 0x1bd   : > { %vm15791_vm4 = vmor %vm2262_vm2, %vm2518_vm14  ;;  %vm2264_vm14 = vcmp.eq.s32.totalorder %v15381_v31, %v14933_v63  ;;  %v1885_v35 = vrot.slane %v15856_v24, %v14793_v5 }
 0x1be   : > { %1803 = vbcast.lane.b32.xlu1 %v1801_v25, 256  ;;  %v1808_v25 = vrot.slane %v15611_v26, %v14812_v16  ;;  %vm15830_vm13 = vmor %vm2259_vm9, %vm2515_vm5  ;;  %vm2521_vm5 = vcmp.eq.s32.totalorder %v15372_v0, %v2118_v8  ;;  %vm2265_vm9 = vcmp.eq.s32.totalorder %v15372_v0, %v14931_v62  ;;  %v2122_v8 = vadd.s32 200, %v15639_v32 }
 0x1bf   : > { %1796 = vbcast.lane.b32.xlu0 %v1794_v38, 256  ;;  %v1822_v38 = vrot.slane %v15733_v29, %v14776_v2  ;;  %vm15838_vm15 = vmor %vm2261_vm11, %vm2517_vm7  ;;  %vm2263_vm7 = vcmp.eq.s32.totalorder %v15372_v0, %v14933_v63  ;;  %v1913_v32 = vrot.slane %v15856_v24, %v14799_v9  ;;  %v2123_v62 = vadd.s32 200, %v15675_v13 }
 0x1c0   : > { %v15736_v37 = vpop.permute.xlu1 %1411  ;;  %v15738_v57 = vpop.permute.xlu0 %1404  ;;  %vm15851_vm2 = vmor %vm2266_vm0, %vm2522_vm12  ;;  %vm2268_vm12 = vcmp.eq.s32.totalorder %v15381_v31, %v14940_v11  ;;  %v2126_v63 = vadd.s32 200, %v15699_v6 }
 0x1c2   : > { %14094 = vmatmul.mubr.msk.bf16.gmra.mrb[24].mxu0 %vm14093_vm8, %v23269_v48  ;;  %1817 = vbcast.lane.b32.xlu1 %v1815_v33, 256  ;;  %vm14099_vm8 = vmpackc.low %vm15791_vm4, %vm15784_vm3  ;;  %vm2519_vm3 = vcmp.eq.s32.totalorder %v15372_v0, %v2117_v50 }
 0x1c3   : > { %14096 = vmatprep.mubr.msk.bf16.mxu0 %vm14095_vm10, %v23269_v48  ;;  %1810 = vbcast.lane.b32.xlu0 %v1808_v25, 256  ;;  %v1836_v25 = vrot.slane %v15733_v29, %v14779_v3  ;;  %vm2520_vm10 = vcmp.eq.s32.totalorder %v15381_v31, %v2117_v50  ;;  %vm14101_vm4 = vmpackc.low %vm15838_vm15, %vm15830_vm13  ;;  %v1899_v50 = vrot.slane %v15856_v24, %v14790_v4 }
 0x1c4   : > { %v15762_v56 = vpop.permute.xlu1 %1425  ;;  %v15764_v26 = vpop.permute.xlu0 %1418  ;;  %vm15844_vm1 = vmor %vm2264_vm14, %vm2520_vm10  ;;  %vm2270_vm14 = vcmp.eq.s32.totalorder %v15381_v31, %v14938_v10 }
 0x1c5   : > { %vm15893_vm11 = vmor %vm2263_vm7, %vm2519_vm3  ;;  %vm2269_vm7 = vcmp.eq.s32.totalorder %v15372_v0, %v14938_v10 }
 0x1c6   : > { %1831 = vbcast.lane.b32.xlu1 %v1829_v43, 256  ;;  %vm15901_vm13 = vmor %vm2265_vm9, %vm2521_vm5  ;;  %vm2267_vm5 = vcmp.eq.s32.totalorder %v15372_v0, %v14940_v11  ;;  %v2125_v11 = vadd.s32 200, %v15701_v40 }
 0x1c7   : > { %1824 = vbcast.lane.b32.xlu0 %v1822_v38, 256  ;;  %v1850_v38 = vrot.slane %v15733_v29, %v14804_v12 }
 0x1c8   : > { %v15796_v33 = vpop.permute.xlu1 %1439  ;;  %v15798_v42 = vpop.permute.xlu0 %1432 }
 0x1ca   : > { %14098 = vmatmul.mubr.msk.bf16.gmra.mrb[28].mxu0 %vm14097_vm6, %v23269_v48  ;;  %1845 = vbcast.lane.b32.xlu1 %v1843_v41, 256  ;;  %v2120_v41 = vadd.s32 200, %v15613_v7  ;;  %vm14103_vm6 = vmpackc.low %vm15851_vm2, %vm15844_vm1  ;;  %vm2523_vm1 = vcmp.eq.s32.totalorder %v15372_v0, %v2119_v54 }
 0x1cb   : > { %14100 = vmatprep.mubr.msk.bf16.mxu0 %vm14099_vm8, %v23269_v48  ;;  %1838 = vbcast.lane.b32.xlu0 %v1836_v25, 256  ;;  %vm2524_vm8 = vcmp.eq.s32.totalorder %v15381_v31, %v2119_v54  ;;  %vm14105_vm2 = vmpackc.low %vm15901_vm13, %vm15893_vm11  ;;  %v1927_v54 = vrot.slane %v15856_v24, %v14809_v15 }
 0x1cc   : > { %v15822_v34 = vpop.permute.xlu1 %1453  ;;  %v15824_v43 = vpop.permute.xlu0 %1446  ;;  %vm2526_vm10 = vcmp.eq.s32.totalorder %v15381_v31, %v2120_v41  ;;  %vm15907_vm15 = vmor %vm2268_vm12, %vm2524_vm8  ;;  %vm2525_vm3 = vcmp.eq.s32.totalorder %v15372_v0, %v2120_v41  ;;  %vm2530_vm8 = vcmp.eq.s32.totalorder %v15381_v31, %v2122_v8  ;;  %vm2274_vm12 = vcmp.eq.s32.totalorder %v15381_v31, %v14944_v17  ;;  %v15979_v41 = vld [vmem:[%s15185_s23 + $0x68] sm:$0xff] }
 0x1cd   : > { %vm15914_vm0 = vmor %vm2270_vm14, %vm2526_vm10  ;;  %vm2272_vm10 = vcmp.eq.s32.totalorder %v15381_v31, %v14946_v18  ;;  %v1955_v10 = vrot.slane %v15979_v41, %v14790_v4  ;;  %v1948_v59 = vrot.slane %v15979_v41, %v14779_v3  ;;  %v1969_v6 = vrot.slane %v15979_v41, %v14799_v9 }
 0x1ce   : > { %1859 = vbcast.lane.b32.xlu1 %v1857_v14, 256  ;;  %v1864_v14 = vrot.slane %v15733_v29, %v14812_v16  ;;  %vm15953_vm9 = vmor %vm2267_vm5, %vm2523_vm1  ;;  %vm2529_vm1 = vcmp.eq.s32.totalorder %v15372_v0, %v2122_v8  ;;  %vm2273_vm5 = vcmp.eq.s32.totalorder %v15372_v0, %v14944_v17  ;;  %v2128_v17 = vadd.s32 200, %v15736_v37 }
 0x1cf   : > { %1852 = vbcast.lane.b32.xlu0 %v1850_v38, 256  ;;  %v1878_v38 = vrot.slane %v15856_v24, %v14776_v2  ;;  %vm15961_vm11 = vmor %vm2269_vm7, %vm2525_vm3  ;;  %vm2271_vm3 = vcmp.eq.s32.totalorder %v15372_v0, %v14946_v18  ;;  %v1976_v8 = vrot.slane %v15979_v41, %v14812_v16 }
 0x1d0   : > { %v15859_v46 = vpop.permute.xlu1 %1467  ;;  %v15861_v25 = vpop.permute.xlu0 %1460  ;;  %vm15974_vm14 = vmor %vm2274_vm12, %vm2530_vm8  ;;  %vm2276_vm8 = vcmp.eq.s32.totalorder %v15381_v31, %v14952_v22 }
 0x1d1   : > { %v16317_v18 = vadd.s32 200, %v15859_v46 }
 0x1d2   : > { %14102 = vmatmul.mubr.msk.bf16.gmra.mrb[32].mxu0 %vm14101_vm4, %v23269_v48  ;;  %1873 = vbcast.lane.b32.xlu1 %v1871_v45, 256  ;;  %vm14107_vm4 = vmpackc.low %vm15914_vm0, %vm15907_vm15  ;;  %vm2527_vm15 = vcmp.eq.s32.totalorder %v15372_v0, %v2121_v58 }
 0x1d3   : > { %14104 = vmatprep.mubr.msk.bf16.mxu0 %vm14103_vm6, %v23269_v48  ;;  %1866 = vbcast.lane.b32.xlu0 %v1864_v14, 256  ;;  %v1892_v14 = vrot.slane %v15856_v24, %v14779_v3  ;;  %vm2528_vm6 = vcmp.eq.s32.totalorder %v15381_v31, %v2121_v58  ;;  %vm14109_vm0 = vmpackc.low %vm15961_vm11, %vm15953_vm9  ;;  %v1983_v58 = vrot.slane %v15979_v41, %v14809_v15 }
 0x1d4   : > { %v15885_v7 = vpop.permute.xlu1 %1481  ;;  %v15887_v29 = vpop.permute.xlu0 %1474  ;;  %vm15967_vm13 = vmor %vm2272_vm10, %vm2528_vm6  ;;  %vm2278_vm10 = vcmp.eq.s32.totalorder %v15381_v31, %v14950_v21 }
 0x1d5   : > { %vm16016_vm7 = vmor %vm2271_vm3, %vm2527_vm15  ;;  %vm2277_vm3 = vcmp.eq.s32.totalorder %v15372_v0, %v14950_v21  ;;  %v1962_v21 = vrot.slane %v15979_v41, %v14804_v12 }
 0x1d6   : > { %1887 = vbcast.lane.b32.xlu1 %v1885_v35, 256  ;;  %vm16024_vm9 = vmor %vm2273_vm5, %vm2529_vm1  ;;  %vm2536_vm1 = vcmp.eq.s32.totalorder %v15381_v31, %v2125_v11 }
 0x1d7   : > { %1880 = vbcast.lane.b32.xlu0 %v1878_v38, 256  ;;  %v1906_v38 = vrot.slane %v15856_v24, %v14804_v12  ;;  %vm14113_vm15 = vmpackc.low %vm16024_vm9, %vm16016_vm7 }
 0x1d8   : > { %v15919_v45 = vpop.permute.xlu1 %1495  ;;  %v15921_v51 = vpop.permute.xlu0 %1488 }
 0x1da   : > { %14106 = vmatmul.mubr.msk.bf16.gmra.mrb[36].mxu0 %vm14105_vm2, %v23269_v48  ;;  %1901 = vbcast.lane.b32.xlu1 %v1899_v50, 256  ;;  %v2124_v50 = vadd.s32 200, %v15673_v28  ;;  %vm14111_vm2 = vmpackc.low %vm15974_vm14, %vm15967_vm13  ;;  %v1941_v28 = vrot.slane %v15979_v41, %v14793_v5  ;;  %vm2531_vm13 = vcmp.eq.s32.totalorder %v15372_v0, %v2123_v62 }
 0x1db   : > { %14108 = vmatprep.mubr.msk.bf16.mxu0 %vm14107_vm4, %v23269_v48  ;;  %1894 = vbcast.lane.b32.xlu0 %v1892_v14, 256  ;;  %vm2532_vm4 = vcmp.eq.s32.totalorder %v15381_v31, %v2123_v62 }
 0x1dc   : > { %v15945_v23 = vpop.permute.xlu1 %1509  ;;  %v15947_v35 = vpop.permute.xlu0 %1502  ;;  %vm2534_vm6 = vcmp.eq.s32.totalorder %v15381_v31, %v2124_v50  ;;  %vm16031_vm11 = vmor %vm2276_vm8, %vm2532_vm4  ;;  %vm2533_vm14 = vcmp.eq.s32.totalorder %v15372_v0, %v2124_v50  ;;  %vm2538_vm4 = vcmp.eq.s32.totalorder %v15381_v31, %v2126_v63  ;;  %vm2282_vm8 = vcmp.eq.s32.totalorder %v15381_v31, %v14956_v27 }
 0x1dd   : > { %vm16038_vm12 = vmor %vm2278_vm10, %vm2534_vm6  ;;  %vm2280_vm6 = vcmp.eq.s32.totalorder %v15381_v31, %v14958_v30  ;;  %v2132_v50 = vadd.s32 200, %v15796_v33  ;;  %v16366_v33 = vadd.s32 200, %v15885_v7 }
 0x1de   : > { %1915 = vbcast.lane.b32.xlu1 %v1913_v32, 256  ;;  %v1920_v32 = vrot.slane %v15856_v24, %v14812_v16  ;;  %vm16084_vm7 = vmor %vm2277_vm3, %vm2533_vm14  ;;  %vm2279_vm14 = vcmp.eq.s32.totalorder %v15372_v0, %v14958_v30 }
 0x1df   : > { %1908 = vbcast.lane.b32.xlu0 %v1906_v38, 256  ;;  %v1934_v38 = vrot.slane %v15979_v41, %v14776_v2  ;;  %vm16093_vm9 = vmor %vm2280_vm6, %vm2536_vm1  ;;  %vm2281_vm1 = vcmp.eq.s32.totalorder %v15372_v0, %v14956_v27 }
 0x1e0   : > { %v15982_v55 = vpop.permute.xlu1 %1523  ;;  %v15984_v14 = vpop.permute.xlu0 %1516  ;;  %vm16098_vm10 = vmor %vm2282_vm8, %vm2538_vm4  ;;  %vm2284_vm4 = vcmp.eq.s32.totalorder %v15381_v31, %v14965_v39  ;;  %vm2541_vm8 = vcmp.eq.s32.totalorder %v15372_v0, %v2128_v17 }
 0x1e2   : > { %14110 = vmatmul.mubr.msk.bf16.gmra.mrb[40].mxu0 %vm14109_vm0, %v23269_v48  ;;  %1929 = vbcast.lane.b32.xlu1 %v1927_v54, 256  ;;  %vm2275_vm0 = vcmp.eq.s32.totalorder %v15372_v0, %v14952_v22 }
 0x1e3   : > { %14112 = vmatprep.mubr.msk.bf16.mxu0 %vm14111_vm2, %v23269_v48  ;;  %1922 = vbcast.lane.b32.xlu0 %v1920_v32, 256  ;;  %vm14115_vm2 = vmpackc.low %vm16038_vm12, %vm16031_vm11  ;;  %vm2535_vm11 = vcmp.eq.s32.totalorder %v15372_v0, %v2125_v11  ;;  %vm2537_vm12 = vcmp.eq.s32.totalorder %v15372_v0, %v2126_v63  ;;  %v2129_v11 = vadd.s32 200, %v15764_v26  ;;  %v2134_v26 = vadd.s32 200, %v15822_v34 }
 0x1e4   : > { %v16008_v13 = vpop.permute.xlu1 %1537  ;;  %v16010_v24 = vpop.permute.xlu0 %1530  ;;  %vm16070_vm5 = vmor %vm2275_vm0, %vm2531_vm13 }
 0x1e5   : > { %vm14117_vm13 = vmpackc.low %vm16084_vm7, %vm16070_vm5  ;;  %vm2286_vm7 = vcmp.eq.s32.totalorder %v15381_v31, %v14963_v36 }
 0x1e6   : > { %1943 = vbcast.lane.b32.xlu1 %v1941_v28, 256  ;;  %vm14119_vm0 = vmpackc.low %vm16098_vm10, %vm16093_vm9  ;;  %vm2283_vm10 = vcmp.eq.s32.totalorder %v15372_v0, %v14965_v39  ;;  %v23374_v39 = vmov 0 }
 0x1e7   : > { %1936 = vbcast.lane.b32.xlu0 %v1934_v38, 256  ;;  %v2127_v38 = vadd.s32 200, %v15738_v57  ;;  %vm16134_vm3 = vmor %vm2279_vm14, %vm2535_vm11 }
 0x1e8   : > { %v16043_v54 = vpop.permute.xlu1 %1551  ;;  %v16045_v40 = vpop.permute.xlu0 %1544  ;;  %vm16144_vm6 = vmor %vm2281_vm1, %vm2537_vm12  ;;  %vm2285_vm12 = vcmp.eq.s32.totalorder %v15372_v0, %v14963_v36 }
 0x1e9   : > { %vm2539_vm5 = vcmp.eq.s32.totalorder %v15372_v0, %v2127_v38  ;;  %vm16183_vm14 = vmor %vm2285_vm12, %vm2541_vm8  ;;  %vm2289_vm12 = vcmp.eq.s32.totalorder %v15372_v0, %v14969_v44 }
 0x1ea   : > { %14114 = vmatmul.mubr.msk.bf16.gmra.mrb[44].mxu0 %vm14113_vm15, %v23269_v48  ;;  %1957 = vbcast.lane.b32.xlu1 %v1955_v10, 256  ;;  %v16106_v10 = vld [vmem:[%s15185_s23 + $0x70] sm:$0xff]  ;;  %vm2540_vm15 = vcmp.eq.s32.totalorder %v15381_v31, %v2127_v38 }
 0x1eb   : > { %14116 = vmatprep.mubr.msk.bf16.mxu0 %vm14115_vm2, %v23269_v48  ;;  %1950 = vbcast.lane.b32.xlu0 %v1948_v59, 256  ;;  %vm2542_vm2 = vcmp.eq.s32.totalorder %v15381_v31, %v2128_v17  ;;  %v1997_v41 = vrot.slane %v16106_v10, %v14793_v5  ;;  %v1990_v22 = vrot.slane %v16106_v10, %v14776_v2  ;;  %vm16160_vm9 = vmor %vm2284_vm4, %vm2540_vm15 }
 0x1ec   : > { %v16076_v32 = vpop.permute.xlu1 %1565  ;;  %v16078_v28 = vpop.permute.xlu0 %1558  ;;  %vm16169_vm11 = vmor %vm2286_vm7, %vm2542_vm2  ;;  %v2011_v62 = vrot.slane %v16106_v10, %v14790_v4  ;;  %vm2544_vm15 = vcmp.eq.s32.totalorder %v15381_v31, %v2129_v11  ;;  %v2004_v17 = vrot.slane %v16106_v10, %v14779_v3  ;;  %vm2288_vm4 = vcmp.eq.s32.totalorder %v15381_v31, %v14971_v47 }
 0x1ed   : > { %vm14123_vm2 = vmpackc.low %vm16169_vm11, %vm16160_vm9  ;;  %vm2287_vm9 = vcmp.eq.s32.totalorder %v15372_v0, %v14971_v47  ;;  %v2039_v27 = vrot.slane %v16106_v10, %v14809_v15 }
 0x1ee   : > { %1971 = vbcast.lane.b32.xlu1 %v1969_v6, 256  ;;  %vm16221_vm8 = vmor %vm2288_vm4, %vm2544_vm15  ;;  %vm2550_vm15 = vcmp.eq.s32.totalorder %v15381_v31, %v2132_v50  ;;  %vm2294_vm4 = vcmp.eq.s32.totalorder %v15381_v31, %v14975_v52 }
 0x1ef   : > { %1964 = vbcast.lane.b32.xlu0 %v1962_v21, 256  ;;  %v2130_v21 = vadd.s32 200, %v15762_v56  ;;  %v2131_v56 = vadd.s32 200, %v15798_v42  ;;  %v2025_v42 = vrot.slane %v16106_v10, %v14799_v9 }
 0x1f0   : > { %v16113_v37 = vpop.permute.xlu1 %1579  ;;  %v16115_v57 = vpop.permute.xlu0 %1572 }
 0x1f1   : > { %vm2546_vm1 = vcmp.eq.s32.totalorder %v15381_v31, %v2130_v21  ;;  %vm2545_vm7 = vcmp.eq.s32.totalorder %v15372_v0, %v2130_v21 }
 0x1f2   : > { %14118 = vmatmul.mubr.msk.bf16.gmra.mrb[48].mxu0 %vm14117_vm13, %v23269_v48  ;;  %1985 = vbcast.lane.b32.xlu1 %v1983_v58, 256  ;;  %vm16179_vm13 = vmor %vm2283_vm10, %vm2539_vm5  ;;  %vm2548_vm10 = vcmp.eq.s32.totalorder %v15381_v31, %v2131_v56 }
 0x1f3   : > { %14120 = vmatprep.mubr.msk.bf16.mxu0 %vm14119_vm0, %v23269_v48  ;;  %1978 = vbcast.lane.b32.xlu0 %v1976_v8, 256  ;;  %vm14121_vm0 = vmpackc.low %vm16144_vm6, %vm16134_vm3  ;;  %vm2543_vm3 = vcmp.eq.s32.totalorder %v15372_v0, %v2129_v11  ;;  %vm2290_vm6 = vcmp.eq.s32.totalorder %v15381_v31, %v14969_v44  ;;  %v2133_v44 = vadd.s32 200, %v15824_v43  ;;  %v16263_v11 = vld [vmem:[%s15185_s23 + $0x78] sm:$0xff] }
 0x1f4   : > { %v16152_v59 = vpop.permute.xlu1 %1593  ;;  %v16154_v6 = vpop.permute.xlu0 %1586  ;;  %vm14125_vm5 = vmpackc.low %vm16183_vm14, %vm16179_vm13  ;;  %v2053_v34 = vrot.slane %v16263_v11, %v14793_v5  ;;  %vm2293_vm14 = vcmp.eq.s32.totalorder %v15372_v0, %v14975_v52  ;;  %vm2298_vm13 = vcmp.eq.s32.totalorder %v15381_v31, %v14981_v60  ;;  %v2060_v30 = vrot.slane %v16263_v11, %v14779_v3 }
 0x1f5   : > { %vm16236_vm11 = vmor %vm2290_vm6, %vm2546_vm1  ;;  %v2074_v47 = vrot.slane %v16263_v11, %v14804_v12 }
 0x1f6   : > { %1999 = vbcast.lane.b32.xlu1 %v1997_v41, 256  ;;  %v2018_v41 = vrot.slane %v16106_v10, %v14804_v12  ;;  %vm16255_vm1 = vmor %vm2289_vm12, %vm2545_vm7  ;;  %vm2547_vm7 = vcmp.eq.s32.totalorder %v15372_v0, %v2131_v56  ;;  %v2067_v56 = vrot.slane %v16263_v11, %v14790_v4  ;;  %vm23384_vm12 = vcmp.eq.s32.totalorder %v15372_v0, %v2134_v26 }
 0x1f7   : > { %1992 = vbcast.lane.b32.xlu0 %v1990_v22, 256  ;;  %vm16280_vm6 = vmor %vm2294_vm4, %vm2550_vm15  ;;  %vm2551_vm4 = vcmp.eq.s32.totalorder %v15372_v0, %v2133_v44  ;;  %v23393_v22 = vmov 0 }
 0x1f8   : > { %v16193_v36 = vpop.permute.xlu1 %1607  ;;  %v16195_v38 = vpop.permute.xlu0 %1600 }
 0x1fa   : > { %14122 = vmatmul.mubr.msk.bf16.gmra.mrb[52].mxu0 %vm14121_vm0, %v23269_v48  ;;  %2013 = vbcast.lane.b32.xlu1 %v2011_v62, 256  ;;  %vm16245_vm0 = vmor %vm2287_vm9, %vm2543_vm3 }
 0x1fb   : > { %14124 = vmatprep.mubr.msk.bf16.mxu0 %vm14123_vm2, %v23269_v48  ;;  %2006 = vbcast.lane.b32.xlu0 %v2004_v17, 256  ;;  %vm2292_vm2 = vcmp.eq.s32.totalorder %v15381_v31, %v14977_v53  ;;  %v2032_v17 = vrot.slane %v16106_v10, %v14812_v16  ;;  %vm14127_vm9 = vmpackc.low %vm16236_vm11, %vm16221_vm8  ;;  %vm2291_vm8 = vcmp.eq.s32.totalorder %v15372_v0, %v14977_v53  ;;  %v16306_v10 = vadd.s32 200, %v15861_v25 }
 0x1fc   : > { %v16228_v58 = vpop.permute.xlu1 %1621  ;;  %v16230_v8 = vpop.permute.xlu0 %1614  ;;  %vm16267_vm3 = vmor %vm2292_vm2, %vm2548_vm10  ;;  %vm2549_vm10 = vcmp.eq.s32.totalorder %v15372_v0, %v2132_v50  ;;  %vm2552_vm11 = vcmp.eq.s32.totalorder %v15381_v31, %v2133_v44  ;;  %v2046_v25 = vrot.slane %v16263_v11, %v14776_v2  ;;  %vm2296_vm2 = vcmp.eq.s32.totalorder %v15381_v31, %v14983_v61 }
 0x1fd   : > { %vm16325_vm15 = vmor %vm2291_vm8, %vm2547_vm7  ;;  %v23380_v50 = vmov 0  ;;  %v16683_v44 = vadd.s32 200, %v15945_v23  ;;  %v23469_v23 = vld [vmem:[#allocation42_spill] sm:$0xff] }
 0x1fe   : > { %2027 = vbcast.lane.b32.xlu1 %v2025_v42, 256  ;;  %v23375_v39 = vsel %vm16325_vm15, 4294967295, %v23374_v39  ;;  %vm16347_vm8 = vmor %vm2296_vm2, %vm2552_vm11  ;;  %v23378_v42 = vmov 0  ;;  %vm2300_vm2 = vcmp.eq.s32.totalorder %v15381_v31, %v14996_v20  ;;  %vm23395_vm11 = vcmp.eq.s32.totalorder %v15381_v31, %v15165_v1 }
 0x1ff   : > { %2020 = vbcast.lane.b32.xlu0 %v2018_v41, 256  ;;  %v23379_v42 = vsel %vm16347_vm8, 4294967295, %v23378_v42  ;;  %v16369_v41 = vadd.s32 200, %v15887_v29  ;;  %vm2357_vm15 = vcmp.eq.s32.totalorder %v15372_v0, %v15165_v1  ;;  %v23414_v1 = vmov 0 }
 0x200   : > { %v16272_v21 = vpop.permute.xlu1 %1635  ;;  %v16274_v62 = vpop.permute.xlu0 %1628 }
 0x202   : > { %14126 = vmatmul.mubr.msk.bf16.gmra.mrb[56].mxu0 %vm14125_vm5, %v23269_v48  ;;  %2041 = vbcast.lane.b32.xlu1 %v2039_v27, 256  ;;  %vm2554_vm5 = vcmp.eq.s32.totalorder %v15381_v31, %v2134_v26  ;;  %v23382_v27 = vmov 0  ;;  %v23417_v26 = vld [vmem:[#allocation38_spill] sm:$0xff] }
 0x203   : > { %14128 = vmatprep.mubr.msk.bf16.mxu0 %vm14127_vm9, %v23269_v48  ;;  %2034 = vbcast.lane.b32.xlu0 %v2032_v17, 256  ;;  %vm16336_vm9 = vmor %vm2293_vm14, %vm2549_vm10  ;;  %vm2297_vm10 = vcmp.eq.s32.totalorder %v15372_v0, %v14981_v60  ;;  %vm2295_vm14 = vcmp.eq.s32.totalorder %v15372_v0, %v14983_v61  ;;  %v23389_v60 = vmov 0 }
 0x204   : > { %v16319_v53 = vpop.permute.xlu1 %1649  ;;  %vm16359_vm7 = vmor %vm2298_vm13, %vm2554_vm5  ;;  %vm2302_vm5 = vcmp.eq.s32.totalorder %v15381_v31, %v14994_v19 }
 0x205   : > { %v16332_v52 = vpop.permute.xlu0 %1642  ;;  %v23381_v50 = vsel %vm16359_vm7, 4294967295, %v23380_v50  ;;  %vm16375_vm13 = vmor %vm2295_vm14, %vm2551_vm4 }
 0x206   : > { %2055 = vbcast.lane.b32.xlu1 %v2053_v34, 256  ;;  %v23383_v27 = vsel %vm16375_vm13, 4294967295, %v23382_v27  ;;  %vm16392_vm4 = vmor %vm2297_vm10, %vm23384_vm12  ;;  %v2081_v34 = vrot.slane %v16263_v11, %v14799_v9 }
 0x207   : > { %2048 = vbcast.lane.b32.xlu0 %v2046_v25, 256  ;;  %vm23387_vm14 = vmpackc.low %vm16255_vm1, %vm16245_vm0  ;;  %vm23388_vm0 = vcmp.eq.s32.totalorder %v15381_v31, %v16306_v10  ;;  %v23399_v25 = vld [vmem:[#allocation11_spill] sm:$0xff] }
 0x208   : > { %v1664_v61 = vpop.permute.xlu1 %1663  ;;  %vm16415_vm1 = vmor %vm2300_vm2, %vm23388_vm0  ;;  %vm23392_vm0 = vcmp.eq.s32.totalorder %v15381_v31, %v16317_v18  ;;  %vm2306_vm7 = vcmp.eq.s32.totalorder %v15381_v31, %v23399_v25 }
 0x209   : > { %v2164_v7 = vadd.s32 200, %v1664_v61  ;;  %v1657_v29 = vpop.permute.xlu0 %1656  ;;  %v23390_v60 = vsel %vm16415_vm1, 4294967295, %v23389_v60  ;;  %vm23391_vm12 = vmpackc.low %vm16280_vm6, %vm16267_vm3  ;;  %vm23398_vm3 = vcmp.eq.s32.totalorder %v15381_v31, %v15167_v49  ;;  %v23502_v61 = vmov 0 }
 0x20a   : > { %14130 = vmatmul.mubr.msk.bf16.gmra.mrb[60].mxu0 %vm23387_vm14, %v23269_v48  ;;  %v2163_v17 = vadd.s32 200, %v1657_v29  ;;  %2069 = vbcast.lane.b32.xlu1 %v2067_v56, 256  ;;  %vm16438_vm10 = vmor %vm2302_vm5, %vm23392_vm0  ;;  %vm2301_vm5 = vcmp.eq.s32.totalorder %v15372_v0, %v14994_v19  ;;  %vm2299_vm0 = vcmp.eq.s32.totalorder %v15372_v0, %v14996_v20  ;;  %v23400_v56 = vld [vmem:[#allocation12_spill] sm:$0xff]  ;;  %vm23401_vm14 = vcmp.eq.s32.totalorder %v15372_v0, %v16306_v10 }
 0x20b   : > { %14132 = vmatprep.mubr.msk.bf16.mxu0 %vm23391_vm12, %v23269_v48  ;;  %vm2614_vm2 = vcmp.eq.s32.totalorder %v15381_v31, %v2164_v7  ;;  %v23394_v22 = vsel %vm16438_vm10, 4294967295, %v23393_v22  ;;  %2062 = vbcast.lane.b32.xlu0 %v2060_v30, 256  ;;  %vm16474_vm1 = vmor %vm2299_vm0, %vm23401_vm14  ;;  %v23402_v20 = vmov 0  ;;  %v2095_v30 = vrot.slane %v16263_v11, %v14809_v15  ;;  %v23443_v10 = vld [vmem:[#allocation40_spill] sm:$0xff] }
 0x20c   : > { %v1678_v63 = vpop.permute.xlu1 %1677  ;;  %vm2612_vm12 = vcmp.eq.s32.totalorder %v15381_v31, %v2163_v17  ;;  %vm16451_vm8 = vmor %vm23395_vm11, %vm2614_vm2  ;;  %vm2304_vm11 = vcmp.eq.s32.totalorder %v15381_v31, %v23400_v56  ;;  %vm2355_vm2 = vcmp.eq.s32.totalorder %v15372_v0, %v15167_v49  ;;  %v23403_v20 = vsel %vm16474_vm1, 4294967295, %v23402_v20 }
 0x20d   : > { %v2166_v43 = vadd.s32 200, %v1678_v63  ;;  %vm2868_vm6 = vmor %vm23398_vm3, %vm2612_vm12  ;;  %v1671_v19 = vpop.permute.xlu0 %1670  ;;  %vm23404_vm3 = vcmp.eq.s32.totalorder %v15372_v0, %v16317_v18  ;;  %vm23410_vm14 = vcmp.eq.s32.totalorder %v15381_v31, %v16369_v41  ;;  %v23411_v18 = vmov 0 }
 0x20e   : > { %2083 = vbcast.lane.b32.xlu1 %v2081_v34, 256  ;;  %vm14195_vm10 = vmpackc.low %vm16451_vm8, %vm2868_vm6  ;;  %v2165_v49 = vadd.s32 200, %v1671_v19  ;;  %vm23407_vm8 = vcmp.eq.s32.totalorder %v15372_v0, %v2163_v17  ;;  %vm23413_vm0 = vcmp.eq.s32.totalorder %v15381_v31, %v16366_v33  ;;  %v16511_v29 = vadd.s32 200, %v15919_v45  ;;  %v23418_v45 = vld [vmem:[#allocation37_spill] sm:$0xff] }
 0x20f   : > { %vm16481_vm12 = vmor %vm2301_vm5, %vm23404_vm3  ;;  %14196 = vmatprep.mubr.msk.bf16.mxu1 %vm14195_vm10, %v23269_v48  ;;  %v16514_v17 = vadd.s32 200, %v15921_v51  ;;  %2076 = vbcast.lane.b32.xlu0 %v2074_v47, 256  ;;  %v2088_v63 = vrot.slane %v16263_v11, %v14812_v16  ;;  %v23433_v47 = vld [vmem:[#allocation14_spill] sm:$0xff]  ;;  %v23438_v19 = vmov 0 }
 0x210   : > { %vm16490_vm6 = vmor %vm2355_vm2, %vm23407_vm8  ;;  %v1692_v34 = vpop.permute.xlu1 %1691  ;;  %vm2616_vm8 = vcmp.eq.s32.totalorder %v15381_v31, %v2165_v49  ;;  %vm23419_vm2 = vnez %v23375_v39 }
 0x211   : > { %vm16499_vm5 = vmor %vm2304_vm11, %vm23410_vm14  ;;  %vm23416_vm11 = vcmp.eq.s32.totalorder %v15372_v0, %v2164_v7  ;;  %v2168_v51 = vadd.s32 200, %v1692_v34  ;;  %v1685_v11 = vpop.permute.xlu0 %1684  ;;  %v23473_v7 = vmov 0 }
 0x212   : > { %v23412_v18 = vsel %vm16499_vm5, 4294967295, %v23411_v18  ;;  %vm16506_vm10 = vmor %vm2306_vm7, %vm23413_vm0  ;;  %vm2360_vm7 = vcmp.eq.s32.totalorder %v15381_v31, %v23417_v26  ;;  %v2167_v39 = vadd.s32 200, %v1685_v11  ;;  %2097 = vbcast.lane.b32.xlu1 %v2095_v30, 256  ;;  %vm2359_vm5 = vcmp.eq.s32.totalorder %v15372_v0, %v23417_v26  ;;  %v23450_v30 = vld [vmem:[#allocation39_spill] sm:$0xff]  ;;  %v23547_v11 = vld [vmem:[#allocation17_spill] sm:$0xff] }
 0x213   : > { %v23415_v1 = vsel %vm16506_vm10, 4294967295, %v23414_v1  ;;  %vm2869_vm3 = vmor %vm2357_vm15, %vm23416_vm11  ;;  %vm2362_vm15 = vcmp.eq.s32.totalorder %v15381_v31, %v23418_v45  ;;  %2090 = vbcast.lane.b32.xlu0 %v2088_v63, 256  ;;  %v16638_v26 = vadd.s32 200, %v15947_v35 }
 0x214   : > { %vm14197_vm14 = vmpackc.low %vm2869_vm3, %vm16490_vm6  ;;  %v1706_v46 = vpop.permute.xlu1 %1705 }
 0x215   : > { %vm23420_vm10 = vmpackc.low %vm16336_vm9, %vm23419_vm2  ;;  %14198 = vmatmul.mubr.msk.bf16.vlgmr.msra.gmra.mrb[0].mxu1 %vm14197_vm14, %v23269_v48  ;;  %vm23425_vm2 = vnez %v23381_v50  ;;  %vm23428_vm14 = vcmp.eq.s32.totalorder %v15381_v31, %v2166_v43  ;;  %v23432_v50 = vld [vmem:[#allocation13_spill] sm:$0xff]  ;;  %v2170_v34 = vadd.s32 200, %v1706_v46  ;;  %v23478_v46 = vld [vmem:[#allocation16_spill] sm:$0xff] }
 0x216   : > { %14134 = vmatmul.mubr.msk.bf16.gmra.mrb[64].mxu0 %vm23420_vm10, %v23269_v48  ;;  %vm16540_vm6 = vmor %vm2360_vm7, %vm2616_vm8  ;;  %vm23426_vm7 = vnez %v23379_v42  ;;  %vm2366_vm10 = vcmp.eq.s32.totalorder %v15381_v31, %v23450_v30 }
 0x217   : > { %vm23427_vm8 = vmpackc.low %vm23425_vm2, %vm23426_vm7  ;;  %vm2305_vm2 = vcmp.eq.s32.totalorder %v15372_v0, %v23399_v25  ;;  %vm2303_vm7 = vcmp.eq.s32.totalorder %v15372_v0, %v23400_v56  ;;  %v1699_v25 = vpop.permute.xlu0 %1698 }
 0x218   : > { %14136 = vmatprep.mubr.msk.bf16.mxu0 %vm23427_vm8, %v23269_v48  ;;  %vm2874_vm11 = vmor %vm2362_vm15, %vm23428_vm14  ;;  %vm2361_vm15 = vcmp.eq.s32.totalorder %v15372_v0, %v23418_v45  ;;  %vm23429_vm14 = vcmp.eq.s32.totalorder %v15372_v0, %v2165_v49  ;;  %vm23434_vm8 = vcmp.eq.s32.totalorder %v15372_v0, %v2166_v43  ;;  %v23441_v49 = vmov 0  ;;  %v1720_v45 = vpop.permute.xlu1 %1719 }
 0x219   : > { %vm14199_vm3 = vmpackc.low %vm2874_vm11, %vm16540_vm6  ;;  %vm2310_vm11 = vcmp.eq.s32.totalorder %v15381_v31, %v23432_v50  ;;  %vm2308_vm6 = vcmp.eq.s32.totalorder %v15381_v31, %v23433_v47  ;;  %v2169_v43 = vadd.s32 200, %v1699_v25  ;;  %v2172_v42 = vadd.s32 200, %v1720_v45 }
 0x21a   : > { %14200 = vmatprep.mubr.msk.bf16.mxu1 %vm14199_vm3, %v23269_v48  ;;  %vm16579_vm9 = vmor %vm2359_vm5, %vm23429_vm14  ;;  %vm23437_vm5 = vcmp.eq.s32.totalorder %v15372_v0, %v16369_v41  ;;  %vm23440_vm14 = vcmp.eq.s32.totalorder %v15372_v0, %v16366_v33  ;;  %v23445_v41 = vmov 0  ;;  %v23448_v33 = vmov 0 }
 0x21b   : > { %vm16590_vm0 = vmor %vm2361_vm15, %vm23434_vm8  ;;  %vm2364_vm15 = vcmp.eq.s32.totalorder %v15381_v31, %v23443_v10  ;;  %vm2624_vm1 = vcmp.eq.s32.totalorder %v15381_v31, %v2169_v43  ;;  %v1713_v35 = vpop.permute.xlu0 %1712 }
 0x21c   : > { %vm16597_vm3 = vmor %vm2303_vm7, %vm23437_vm5  ;;  %vm23444_vm7 = vcmp.eq.s32.totalorder %v15381_v31, %v16514_v17 }
 0x21d   : > { %v23439_v19 = vsel %vm16597_vm3, 4294967295, %v23438_v19  ;;  %vm16604_vm13 = vmor %vm2305_vm2, %vm23440_vm14  ;;  %vm23447_vm2 = vcmp.eq.s32.totalorder %v15381_v31, %v16511_v29 }
 0x21e   : > { %v23442_v49 = vsel %vm16604_vm13, 4294967295, %v23441_v49  ;;  %vm14201_vm8 = vmpackc.low %vm16590_vm0, %vm16579_vm9  ;;  %vm23451_vm0 = vcmp.eq.s32.totalorder %v15381_v31, %v2167_v39  ;;  %vm23465_vm13 = vcmp.eq.s32.totalorder %v15372_v0, %v2168_v51 }
 0x21f   : > { %vm16617_vm5 = vmor %vm2308_vm6, %vm23444_vm7  ;;  %vm23454_vm6 = vcmp.eq.s32.totalorder %v15381_v31, %v2168_v51  ;;  %14202 = vmatmul.mubr.msk.bf16.gmra.mrb[4].mxu1 %vm14201_vm8, %v23269_v48  ;;  %vm23460_vm8 = vnez %v23390_v60  ;;  %v2171_v51 = vadd.s32 200, %v1713_v35  ;;  %v1727_v25 = vpop.permute.xlu0 %1726  ;;  %v23519_v35 = vld [vmem:[#allocation46_spill] sm:$0xff]  ;;  %v2150_v60 = vadd.s32 200, %v16076_v32 }
 0x220   : > { %v23446_v41 = vsel %vm16617_vm5, 4294967295, %v23445_v41  ;;  %vm16624_vm14 = vmor %vm2310_vm11, %vm23447_vm2  ;;  %vm2563_vm5 = vcmp.eq.s32.totalorder %v15372_v0, %v16514_v17  ;;  %v17126_v17 = vadd.s32 200, %v16115_v57 }
 0x221   : > { %v23449_v33 = vsel %vm16624_vm14, 4294967295, %v23448_v33  ;;  %vm16633_vm9 = vmor %vm2364_vm15, %vm23451_vm0  ;;  %vm2363_vm15 = vcmp.eq.s32.totalorder %v15372_v0, %v23443_v10  ;;  %vm23455_vm0 = vnez %v23383_v27  ;;  %v23504_v10 = vld [vmem:[#allocation44_spill] sm:$0xff]  ;;  %v23571_v27 = vld [vmem:[#allocation51_spill] sm:$0xff] }
 0x222   : > { %vm2878_vm7 = vmor %vm2366_vm10, %vm23454_vm6 }
 0x223   : > { %vm23456_vm11 = vmpackc.low %vm16392_vm4, %vm23455_vm0  ;;  %vm23459_vm4 = vnez %v23394_v22  ;;  %v23470_v22 = vld [vmem:[#allocation41_spill] sm:$0xff]  ;;  %vm23479_vm0 = vcmp.eq.s32.totalorder %v15381_v31, %v2170_v34 }
 0x224   : > { %14138 = vmatmul.mubr.msk.bf16.gmra.mrb[68].mxu0 %vm23456_vm11, %v23269_v48  ;;  %vm14203_vm10 = vmpackc.low %vm2878_vm7, %vm16633_vm9  ;;  %vm23462_vm9 = vcmp.eq.s32.totalorder %v15372_v0, %v2167_v39  ;;  %v23476_v39 = vmov 0 }
 0x225   : > { %vm23461_vm11 = vmpackc.low %vm23459_vm4, %vm23460_vm8  ;;  %14204 = vmatprep.mubr.msk.bf16.mxu1 %vm14203_vm10, %v23269_v48  ;;  %vm23466_vm4 = vcmp.eq.s32.totalorder %v15372_v0, %v23450_v30  ;;  %vm2307_vm10 = vcmp.eq.s32.totalorder %v15372_v0, %v23433_v47  ;;  %v23489_v47 = vld [vmem:[#allocation15_spill] sm:$0xff] }
 0x226   : > { %14140 = vmatprep.mubr.msk.bf16.mxu0 %vm23461_vm11, %v23269_v48  ;;  %vm16678_vm7 = vmor %vm2363_vm15, %vm23462_vm9  ;;  %vm2309_vm15 = vcmp.eq.s32.totalorder %v15372_v0, %v23432_v50  ;;  %vm2368_vm11 = vcmp.eq.s32.totalorder %v15381_v31, %v23469_v23 }
 0x227   : > { %vm16691_vm8 = vmor %vm23466_vm4, %vm23465_vm13  ;;  %vm2370_vm4 = vcmp.eq.s32.totalorder %v15381_v31, %v23470_v22  ;;  %vm23475_vm13 = vcmp.eq.s32.totalorder %v15372_v0, %v16511_v29  ;;  %v23483_v29 = vmov 0 }
 0x228   : > { %vm16712_vm14 = vmor %vm2368_vm11, %vm2624_vm1  ;;  %vm2312_vm1 = vcmp.eq.s32.totalorder %v15381_v31, %v23478_v46 }
 0x229   : > { %vm16719_vm9 = vmor %vm2307_vm10, %vm2563_vm5  ;;  %vm2367_vm5 = vcmp.eq.s32.totalorder %v15372_v0, %v23469_v23 }
 0x22a   : > { %v23474_v7 = vsel %vm16719_vm9, 4294967295, %v23473_v7  ;;  %vm16726_vm6 = vmor %vm2309_vm15, %vm23475_vm13  ;;  %vm23482_vm13 = vcmp.eq.s32.totalorder %v15381_v31, %v16638_v26 }
 0x22b   : > { %v23477_v39 = vsel %vm16726_vm6, 4294967295, %v23476_v39  ;;  %vm16735_vm2 = vmor %vm2370_vm4, %vm23479_vm0  ;;  %vm2369_vm0 = vcmp.eq.s32.totalorder %v15372_v0, %v23470_v22  ;;  %vm23485_vm4 = vnez %v23442_v49  ;;  %vm23486_vm6 = vcmp.eq.s32.totalorder %v15372_v0, %v2169_v43  ;;  %v17104_v22 = vld [vmem:[%s17089_s27] sm:$0xff] }
 0x22c   : > { %vm14207_vm10 = vmpackc.low %vm16735_vm2, %vm16712_vm14  ;;  %vm2314_vm14 = vcmp.eq.s32.totalorder %v15381_v31, %v23489_v47  ;;  %v2147_v43 = vadd.s32 200, %v16045_v40 }
 0x22d   : > { %vm16750_vm11 = vmor %vm2312_vm1, %vm23482_vm13  ;;  %vm23490_vm1 = vnez %v23403_v20  ;;  %v1734_v20 = vpop.permute.xlu1 %1733 }
 0x22e   : > { %v23484_v29 = vsel %vm16750_vm11, 4294967295, %v23483_v29  ;;  %vm16762_vm9 = vmor %vm2367_vm5, %vm23486_vm6  ;;  %vm23493_vm5 = vcmp.eq.s32.totalorder %v15372_v0, %v2170_v34  ;;  %v2174_v30 = vadd.s32 200, %v1734_v20  ;;  %v23509_v34 = vmov 0 }
 0x22f   : > { %vm23491_vm13 = vmpackc.low %vm16481_vm12, %vm23490_vm1  ;;  %vm2630_vm12 = vcmp.eq.s32.totalorder %v15381_v31, %v2172_v42  ;;  %vm23498_vm1 = vnez %v23415_v1  ;;  %v2173_v1 = vadd.s32 200, %v1727_v25  ;;  %vm23513_vm11 = vnez %v23474_v7 }
 0x230   : > { %14142 = vmatmul.mubr.msk.bf16.gmra.mrb[72].mxu0 %vm23491_vm13, %v23269_v48  ;;  %vm23492_vm6 = vmpackc.low %vm16691_vm8, %vm16678_vm7  ;;  %vm23499_vm7 = vnez %v23412_v18  ;;  %v23505_v18 = vld [vmem:[#allocation43_spill] sm:$0xff] }
 0x231   : > { %14206 = vmatmul.mubr.msk.bf16.gmra.mrb[8].mxu1 %vm23492_vm6, %v23269_v48  ;;  %vm16783_vm15 = vmor %vm2369_vm0, %vm23493_vm5  ;;  %vm23501_vm0 = vcmp.eq.s32.totalorder %v15381_v31, %v16683_v44  ;;  %vm2372_vm6 = vcmp.eq.s32.totalorder %v15381_v31, %v23504_v10  ;;  %vm2627_vm5 = vcmp.eq.s32.totalorder %v15372_v0, %v2171_v51  ;;  %v1748_v45 = vpop.permute.xlu1 %1747 }
 0x232   : > { %vm23500_vm8 = vmpackc.low %vm23498_vm1, %vm23499_vm7  ;;  %14208 = vmatprep.mubr.msk.bf16.mxu1 %vm14207_vm10, %v23269_v48  ;;  %vm2374_vm10 = vcmp.eq.s32.totalorder %v15381_v31, %v23505_v18  ;;  %vm2629_vm7 = vcmp.eq.s32.totalorder %v15372_v0, %v2172_v42  ;;  %vm2373_vm1 = vcmp.eq.s32.totalorder %v15372_v0, %v23505_v18  ;;  %v23553_v42 = vld [vmem:[#allocation47_spill] sm:$0xff]  ;;  %v23566_v18 = vld [vmem:[#allocation50_spill] sm:$0xff] }
 0x233   : > { %14144 = vmatprep.mubr.msk.bf16.mxu0 %vm23500_vm8, %v23269_v48  ;;  %vm16802_vm13 = vmor %vm2314_vm14, %vm23501_vm0  ;;  %vm23506_vm14 = vcmp.eq.s32.totalorder %v15381_v31, %v2171_v51  ;;  %vm2371_vm0 = vcmp.eq.s32.totalorder %v15372_v0, %v23504_v10  ;;  %v23543_v51 = vld [vmem:[#allocation18_spill] sm:$0xff]  ;;  %v23565_v10 = vld [vmem:[#allocation19_spill] sm:$0xff] }
 0x234   : > { %v23503_v61 = vsel %vm16802_vm13, 4294967295, %v23502_v61  ;;  %vm16818_vm8 = vmor %vm2372_vm6, %vm23506_vm14  ;;  %vm2632_vm6 = vcmp.eq.s32.totalorder %v15381_v31, %v2173_v1 }
 0x235   : > { %vm2886_vm3 = vmor %vm2374_vm10, %vm2630_vm12  ;;  %vm23514_vm12 = vnez %v23477_v39  ;;  %vm2569_vm10 = vcmp.eq.s32.totalorder %v15372_v0, %v16683_v44  ;;  %v2144_v44 = vadd.s32 200, %v15982_v55  ;;  %v1762_v25 = vpop.permute.xlu1 %1761  ;;  %v23575_v39 = vld [vmem:[#allocation54_spill] sm:$0xff] }
 0x236   : > { %vm16826_vm13 = vmor %vm2371_vm0, %vm2627_vm5  ;;  %vm23515_vm5 = vnez %v23439_v19  ;;  %vm2376_vm0 = vcmp.eq.s32.totalorder %v15381_v31, %v23519_v35  ;;  %v23525_v19 = vld [vmem:[#allocation45_spill] sm:$0xff]  ;;  %v2178_v20 = vadd.s32 200, %v1762_v25 }
 0x237   : > { %v23510_v34 = vsel %vm16826_vm13, 4294967295, %v23509_v34  ;;  %vm16830_vm2 = vmor %vm2373_vm1, %vm2629_vm7  ;;  %vm2574_vm13 = vcmp.eq.s32.totalorder %v15381_v31, %v2144_v44 }
 0x238   : > { %vm14211_vm14 = vmpackc.low %vm2886_vm3, %vm16818_vm8  ;;  %vm2378_vm8 = vcmp.eq.s32.totalorder %v15381_v31, %v23525_v19 }
 0x239   : > { %vm23516_vm1 = vmpackc.low %vm23485_vm4, %vm23515_vm5  ;;  %vm23520_vm4 = vnez %v23449_v33  ;;  %vm23521_vm5 = vnez %v23446_v41  ;;  %v2143_v41 = vadd.s32 200, %v15984_v14  ;;  %v1741_v33 = vpop.permute.xlu0 %1740  ;;  %v23532_v14 = vmov 0  ;;  %v1776_v63 = vpop.permute.xlu1 %1775 }
 0x23a   : > { %14146 = vmatmul.mubr.msk.bf16.gmra.mrb[76].mxu0 %vm23516_vm1, %v23269_v48  ;;  %vm23517_vm7 = vmmov %vm16762_vm9  ;;  %v2175_v55 = vadd.s32 200, %v1741_v33  ;;  %v23570_v33 = vld [vmem:[#allocation52_spill] sm:$0xff] }
 0x23b   : > { %vm23518_vm3 = vmpackc.low %vm16783_vm15, %vm23517_vm7  ;;  %vm2375_vm15 = vcmp.eq.s32.totalorder %v15372_v0, %v23519_v35  ;;  %v23568_v35 = vld [vmem:[#allocation22_spill] sm:$0xff] }
 0x23c   : > { %14210 = vmatmul.mubr.msk.bf16.gmra.mrb[12].mxu1 %vm23518_vm3, %v23269_v48  ;;  %vm23522_vm1 = vmpackc.low %vm23520_vm4, %vm23521_vm5  ;;  %vm2311_vm4 = vcmp.eq.s32.totalorder %v15372_v0, %v23478_v46  ;;  %v23552_v46 = vld [vmem:[#allocation48_spill] sm:$0xff] }
 0x23d   : > { %14148 = vmatprep.mubr.msk.bf16.mxu0 %vm23522_vm1, %v23269_v48  ;;  %14212 = vmatprep.mubr.msk.bf16.mxu1 %vm14211_vm14, %v23269_v48  ;;  %vm16877_vm9 = vmor %vm2376_vm0, %vm2632_vm6  ;;  %vm23528_vm14 = vcmp.eq.s32.totalorder %v15381_v31, %v2174_v30  ;;  %vm2313_vm1 = vcmp.eq.s32.totalorder %v15372_v0, %v23489_v47  ;;  %vm2631_vm6 = vcmp.eq.s32.totalorder %v15372_v0, %v2173_v1  ;;  %v1755_v50 = vpop.permute.xlu0 %1754  ;;  %v2146_v47 = vadd.s32 200, %v16008_v13  ;;  %v23567_v1 = vld [vmem:[#allocation49_spill] sm:$0xff] }
 0x23e   : > { %vm16886_vm5 = vmor %vm2378_vm8, %vm23528_vm14  ;;  %vm23531_vm0 = vcmp.eq.s32.totalorder %v15372_v0, %v16638_v26  ;;  %vm2633_vm8 = vcmp.eq.s32.totalorder %v15372_v0, %v2174_v30  ;;  %v2176_v26 = vadd.s32 200, %v1748_v45  ;;  %v2177_v56 = vadd.s32 200, %v1755_v50 }
 0x23f   : > { %vm16897_vm3 = vmor %vm2311_vm4, %vm23531_vm0  ;;  %vm2377_vm4 = vcmp.eq.s32.totalorder %v15372_v0, %v23525_v19  ;;  %vm2572_vm0 = vcmp.eq.s32.totalorder %v15381_v31, %v2143_v41  ;;  %v14732_v19 = vmov 1966171168   ;;  %v2149_v45 = vadd.s32 200, %v16078_v28  ;;  %v23572_v28 = vld [vmem:[#allocation2_spill] sm:$0xff] }
 0x240   : > { %v23533_v14 = vsel %vm16897_vm3, 4294967295, %v23532_v14  ;;  %vm16902_vm14 = vmor %vm2313_vm1, %vm2569_vm10  ;;  %vm23544_vm10 = vnez %v23503_v61  ;;  %v23564_v61 = vld [vmem:[#allocation20_spill] sm:$0xff]  ;;  %v5430_v49 = vunpack.c.l.s4 %v14732_v19  ;;  %v17131_v50 = vadd.s32 200, %v16113_v37 }
 0x241   : > { %vm14215_vm7 = vmpackc.low %vm16886_vm5, %vm16877_vm9  ;;  %vm23539_vm5 = vnez %v23510_v34  ;;  %v1769_v30 = vpop.permute.xlu0 %1768  ;;  %v2148_v34 = vadd.s32 200, %v16043_v54  ;;  %v2180_v54 = vadd.s32 200, %v1776_v63  ;;  %v23581_v63 = vld [vmem:[#allocation55_spill] sm:$0xff] }
 0x242   : > { %vm16919_vm1 = vmor %vm2375_vm15, %vm2631_vm6  ;;  %vm2316_vm6 = vcmp.eq.s32.totalorder %v15381_v31, %v23543_v51  ;;  %v2179_v40 = vadd.s32 200, %v1769_v30 }
 0x243   : > { %vm23538_vm9 = vmpackc.low %vm23514_vm12, %vm23513_vm11  ;;  %vm23545_vm11 = vnez %v23484_v29  ;;  %v2145_v29 = vadd.s32 200, %v16010_v24 }
 0x244   : > { %14150 = vmatmul.mubr.msk.bf16.gmra.mrb[80].mxu0 %vm23538_vm9, %v23269_v48  ;;  %vm23540_vm3 = vmpackc.low %vm16830_vm2, %vm23539_vm5  ;;  %vm2638_vm9 = vcmp.eq.s32.totalorder %v15381_v31, %v2176_v26  ;;  %vm2317_vm2 = vcmp.eq.s32.totalorder %v15372_v0, %v23547_v11 }
 0x245   : > { %14214 = vmatmul.mubr.msk.bf16.gmra.mrb[16].mxu1 %vm23540_vm3, %v23269_v48  ;;  %vm16936_vm15 = vmor %vm2377_vm4, %vm2633_vm8  ;;  %vm2318_vm3 = vcmp.eq.s32.totalorder %v15381_v31, %v23547_v11  ;;  %vm2636_vm8 = vcmp.eq.s32.totalorder %v15381_v31, %v2175_v55  ;;  %v23574_v11 = vld [vmem:[#allocation23_spill] sm:$0xff] }
 0x246   : > { %vm23546_vm12 = vmpackc.low %vm23544_vm10, %vm23545_vm11  ;;  %14216 = vmatprep.mubr.msk.bf16.mxu1 %vm14215_vm7, %v23269_v48  ;;  %vm2380_vm7 = vcmp.eq.s32.totalorder %v15381_v31, %v23552_v46 }
 0x247   : > { %14152 = vmatprep.mubr.msk.bf16.mxu0 %vm23546_vm12, %v23269_v48  ;;  %vm16956_vm4 = vmor %vm2316_vm6, %vm2572_vm0  ;;  %vm2382_vm0 = vcmp.eq.s32.totalorder %v15381_v31, %v23553_v42  ;;  %vm2571_vm6 = vcmp.eq.s32.totalorder %v15372_v0, %v2143_v41  ;;  %v23569_v41 = vld [vmem:[#allocation21_spill] sm:$0xff] }
 0x248   : > { %vm16961_vm10 = vmor %vm2318_vm3, %vm2574_vm13  ;;  %vm2573_vm13 = vcmp.eq.s32.totalorder %v15372_v0, %v2144_v44  ;;  %vm2315_vm3 = vcmp.eq.s32.totalorder %v15372_v0, %v23543_v51  ;;  %v5431_v44 = vunpack.c.0.s8 %v5430_v49  ;;  %v23573_v51 = vld [vmem:[#allocation24_spill] sm:$0xff] }
 0x249   : > { %vm16974_vm11 = vmor %vm2380_vm7, %vm2636_vm8  ;;  %vm2635_vm8 = vcmp.eq.s32.totalorder %v15372_v0, %v2175_v55  ;;  %v1790_v55 = vpop.permute.xlu1 %1789 }
 0x24a   : > { %vm2894_vm12 = vmor %vm2382_vm0, %vm2638_vm9  ;;  %vm23556_vm9 = vnez %v23533_v14  ;;  %v1783_v14 = vpop.permute.xlu0 %1782  ;;  %v2182_v23 = vadd.s32 200, %v1790_v55 }
 0x24b   : > { %vm14219_vm5 = vmpackc.low %vm2894_vm12, %vm16974_vm11  ;;  %vm2637_vm12 = vcmp.eq.s32.totalorder %v15372_v0, %v2176_v26  ;;  %v17093_v26 = vsub.s32 %v5431_v44, %v23572_v28  ;;  %v2181_v32 = vadd.s32 200, %v1783_v14  ;;  %v17211_v14 = vadd.s32 200, %v16154_v6 }
 0x24c   : > { %vm23557_vm7 = vmpackc.low %vm16902_vm14, %vm23556_vm9 }
 0x24d   : > { %14154 = vmatmul.mubr.msk.bf16.gmra.mrb[84].mxu0 %vm23557_vm7, %v23269_v48  ;;  %vm23558_vm0 = vmpackc.low %vm16936_vm15, %vm16919_vm1  ;;  %vm2379_vm1 = vcmp.eq.s32.totalorder %v15372_v0, %v23552_v46  ;;  %vm2322_vm7 = vcmp.eq.s32.totalorder %v15381_v31, %v23565_v10  ;;  %v5435_v7 = vrot.slane %v17104_v22, %v17093_v26  ;;  %v23576_v46 = vld [vmem:[#allocation53_spill] sm:$0xff] }
 0x24e   : > { %14218 = vmatmul.mubr.msk.bf16.gmra.mrb[20].mxu1 %vm23558_vm0, %v23269_v48  ;;  %vm17000_vm11 = vmor %vm2315_vm3, %vm2571_vm6  ;;  %vm2640_vm0 = vcmp.eq.s32.totalorder %v15381_v31, %v2177_v56 }
 0x24f   : > { %vm23561_vm14 = vmpackc.low %vm16961_vm10, %vm16956_vm4  ;;  %14220 = vmatprep.mubr.msk.bf16.mxu1 %vm14219_vm5, %v23269_v48  ;;  %vm2381_vm4 = vcmp.eq.s32.totalorder %v15372_v0, %v23553_v42  ;;  %vm2576_vm10 = vcmp.eq.s32.totalorder %v15381_v31, %v2145_v29  ;;  %vm2578_vm5 = vcmp.eq.s32.totalorder %v15381_v31, %v2146_v47  ;;  %v5443_v42 = vcombine.high %v5435_v7, %v5435_v7 }
 0x250   : > { %14156 = vmatprep.mubr.msk.bf16.mxu0 %vm23561_vm14, %v23269_v48  ;;  %vm17014_vm9 = vmor %vm2317_vm2, %vm2573_vm13  ;;  %vm2320_vm13 = vcmp.eq.s32.totalorder %v15381_v31, %v23564_v61  ;;  %vm2642_vm14 = vcmp.eq.s32.totalorder %v15381_v31, %v2178_v20  ;;  %v5451_v25 = vrot.slane %v5435_v7, %v17093_v26 }
 0x251   : > { %vm14157_vm15 = vmpackc.low %vm17014_vm9, %vm17000_vm11  ;;  %v5465_v57 = vrot.slane %v5443_v42, %v17093_v26 }
 0x252   : > { %vm2891_vm2 = vmor %vm2379_vm1, %vm2635_vm8  ;;  %vm2384_vm1 = vcmp.eq.s32.totalorder %v15381_v31, %v23566_v18  ;;  %v6215_v13 = vrot.slane %v5451_v25, %v14776_v2 }
 0x253   : > { %vm2893_vm6 = vmor %vm2381_vm4, %vm2637_vm12  ;;  %vm2386_vm12 = vcmp.eq.s32.totalorder %v15381_v31, %v23567_v1  ;;  %vm2575_vm4 = vcmp.eq.s32.totalorder %v15372_v0, %v2145_v29  ;;  %v1797_v29 = vpop.permute.xlu0 %1796  ;;  %v5475_v44 = vcombine.high %v5465_v57, %v5465_v57 }
 0x254   : > { %vm14221_vm3 = vmpackc.low %vm2893_vm6, %vm2891_vm2  ;;  %v17143_v37 = vadd.s32 200, %v1797_v29 }
 0x255   : > { %vm2832_vm11 = vmor %vm2320_vm13, %vm2576_vm10  ;;  %14158 = vmatmul.mubr.msk.bf16.gmra.mrb[88].mxu0 %vm14157_vm15, %v23269_v48  ;;  %vm2577_vm10 = vcmp.eq.s32.totalorder %v15372_v0, %v2146_v47  ;;  %vm2321_vm13 = vcmp.eq.s32.totalorder %v15372_v0, %v23565_v10  ;;  %v1804_v47 = vpop.permute.xlu1 %1803  ;;  %v6219_v10 = vrot.slane %v5465_v57, %v14776_v2  ;;  %v23593_v57 = vld [vmem:[#allocation28_spill] sm:$0xff] }
 0x256   : > { %vm2834_vm9 = vmor %vm2322_vm7, %vm2578_vm5  ;;  %14222 = vmatmul.mubr.msk.bf16.gmra.mrb[24].mxu1 %vm14221_vm3, %v23269_v48  ;;  %vm2319_vm5 = vcmp.eq.s32.totalorder %v15372_v0, %v23564_v61  ;;  %vm2639_vm3 = vcmp.eq.s32.totalorder %v15372_v0, %v2177_v56  ;;  %v17150_v24 = vadd.s32 200, %v1804_v47  ;;  %v23577_v56 = vld [vmem:[#allocation26_spill] sm:$0xff]  ;;  %v23578_v61 = vld [vmem:[#allocation25_spill] sm:$0xff] }
 0x257   : > { %vm14159_vm8 = vmpackc.low %vm2834_vm9, %vm2832_vm11 }
 0x258   : > { %14160 = vmatprep.mubr.msk.bf16.mxu0 %vm14159_vm8, %v23269_v48  ;;  %vm2896_vm2 = vmor %vm2384_vm1, %vm2640_vm0  ;;  %vm2641_vm0 = vcmp.eq.s32.totalorder %v15372_v0, %v2178_v20  ;;  %vm2385_vm1 = vcmp.eq.s32.totalorder %v15372_v0, %v23567_v1  ;;  %vm2580_vm8 = vcmp.eq.s32.totalorder %v15381_v31, %v2147_v43  ;;  %v5428_v20 = vcombine.high %v17104_v22, %v17104_v22 }
 0x259   : > { %vm2898_vm6 = vmor %vm2386_vm12, %vm2642_vm14  ;;  %vm2383_vm14 = vcmp.eq.s32.totalorder %v15372_v0, %v23566_v18  ;;  %v5473_v1 = vcombine.high %v5451_v25, %v5451_v25 }
 0x25a   : > { %vm14223_vm15 = vmpackc.low %vm2898_vm6, %vm2896_vm2  ;;  %vm2582_vm2 = vcmp.eq.s32.totalorder %v15381_v31, %v2148_v34 }
 0x25b   : > { %14224 = vmatprep.mubr.msk.bf16.mxu1 %vm14223_vm15, %v23269_v48  ;;  %vm2831_vm7 = vmor %vm2319_vm5, %vm2575_vm4  ;;  %vm2326_vm5 = vcmp.eq.s32.totalorder %v15381_v31, %v23569_v41  ;;  %vm2644_vm15 = vcmp.eq.s32.totalorder %v15381_v31, %v2179_v40  ;;  %v6223_v55 = vrot.slane %v5473_v1, %v14776_v2 }
 0x25c   : > { %vm2833_vm11 = vmor %vm2321_vm13, %vm2577_vm10  ;;  %vm2324_vm10 = vcmp.eq.s32.totalorder %v15381_v31, %v23568_v35 }
 0x25d   : > { %vm14161_vm9 = vmpackc.low %vm2833_vm11, %vm2831_vm7 }
 0x25e   : > { %vm2895_vm12 = vmor %vm2383_vm14, %vm2639_vm3  ;;  %14162 = vmatmul.mubr.msk.bf16.gmra.mrb[92].mxu0 %vm14161_vm9, %v23269_v48  ;;  %vm2646_vm3 = vcmp.eq.s32.totalorder %v15381_v31, %v2180_v54  ;;  %vm2390_vm14 = vcmp.eq.s32.totalorder %v15381_v31, %v23571_v27  ;;  %vm2579_vm9 = vcmp.eq.s32.totalorder %v15372_v0, %v2147_v43  ;;  %v23579_v43 = vld [vmem:[#allocation56_spill] sm:$0xff] }
 0x25f   : > { %vm2897_vm4 = vmor %vm2385_vm1, %vm2641_vm0  ;;  %vm2388_vm0 = vcmp.eq.s32.totalorder %v15381_v31, %v23570_v33 }
 0x260   : > { %vm14225_vm6 = vmpackc.low %vm2897_vm4, %vm2895_vm12  ;;  %vm2581_vm12 = vcmp.eq.s32.totalorder %v15372_v0, %v2148_v34 }
 0x261   : > { %14226 = vmatmul.mubr.msk.bf16.gmra.mrb[28].mxu1 %vm14225_vm6, %v23269_v48  ;;  %vm2836_vm13 = vmor %vm2324_vm10, %vm2580_vm8  ;;  %vm2325_vm10 = vcmp.eq.s32.totalorder %v15372_v0, %v23569_v41  ;;  %vm2643_vm6 = vcmp.eq.s32.totalorder %v15372_v0, %v2179_v40 }
 0x262   : > { %vm2838_vm7 = vmor %vm2326_vm5, %vm2582_vm2  ;;  %vm2323_vm2 = vcmp.eq.s32.totalorder %v15372_v0, %v23568_v35  ;;  %v5442_v35 = vrot.slane %v5428_v20, %v17093_v26 }
 0x263   : > { %vm14163_vm11 = vmpackc.low %vm2838_vm7, %vm2836_vm13 }
 0x264   : > { %14164 = vmatprep.mubr.msk.bf16.mxu0 %vm14163_vm11, %v23269_v48  ;;  %vm2900_vm1 = vmor %vm2388_vm0, %vm2644_vm15  ;;  %vm2645_vm15 = vcmp.eq.s32.totalorder %v15372_v0, %v2180_v54  ;;  %vm2389_vm0 = vcmp.eq.s32.totalorder %v15372_v0, %v23571_v27  ;;  %vm2584_vm11 = vcmp.eq.s32.totalorder %v15381_v31, %v2149_v45  ;;  %v17203_v27 = vld [vmem:[%s22795_s4] ss:$0 sm:$0xff]  ;;  %v17268_v25 = vrot.slane %v5442_v35, %v17093_v26 }
 0x265   : > { %vm2902_vm8 = vmor %vm2390_vm14, %vm2646_vm3  ;;  %vm2387_vm3 = vcmp.eq.s32.totalorder %v15372_v0, %v23570_v33  ;;  %v4757_v18 = vpop.f32.mrb[0].mxu0 }
 0x266   : > { %vm14227_vm4 = vmpackc.low %vm2902_vm8, %vm2900_vm1  ;;  %v6852_v30 = vadd.f32 %v6215_v13, %v4757_v18  ;;  %v17174_v34 = vpop.f32.mrb[1].mxu0  ;;  %v23597_v18 = vld [vmem:[#allocation58_spill] sm:$0xff] }
 0x267   : > { %14228 = vmatprep.mubr.msk.bf16.mxu1 %vm14227_vm4, %v23269_v48  ;;  %vm2835_vm5 = vmor %vm2323_vm2, %vm2579_vm9  ;;  %vm2586_vm9 = vcmp.eq.s32.totalorder %v15381_v31, %v2150_v60  ;;  %vm2330_vm2 = vcmp.eq.s32.totalorder %v15381_v31, %v23574_v11  ;;  %vm2648_vm4 = vcmp.eq.s32.totalorder %v15381_v31, %v2181_v32  ;;  %23580 = vst [vmem:[#allocation11_spill] sm:$0xff] %v17174_v34  ;;  %v4761_v54 = vpop.f32.mrb[2].mxu0 }
 0x268   : > { %vm2837_vm13 = vmor %vm2325_vm10, %vm2581_vm12  ;;  %vm2328_vm12 = vcmp.eq.s32.totalorder %v15381_v31, %v23573_v51  ;;  %v7108_v49 = vmul.f32 0.01, %v6852_v30  ;;  %v6853_v41 = vadd.f32 %v6219_v10, %v4761_v54  ;;  %v17198_v33 = vpop.f32.mrb[3].mxu0 }
 0x269   : > { %vm14165_vm7 = vmpackc.low %vm2837_vm13, %vm2835_vm5  ;;  %23586 = vst [vmem:[#allocation12_spill] sm:$0xff] %v17198_v33  ;;  %v5405_v33 = vld [vmem:[%s17089_s27 + $0x48] sm:$0xff] }
 0x26a   : > { %14166 = vmatmul.mubr.msk.bf16.gmra.mrb[96].mxu0 %vm14165_vm7, %v23269_v48  ;;  %vm2899_vm14 = vmor %vm2387_vm3, %vm2643_vm6  ;;  %vm2650_vm6 = vcmp.eq.s32.totalorder %v15381_v31, %v2182_v23  ;;  %vm2394_vm3 = vcmp.eq.s32.totalorder %v15381_v31, %v23576_v46  ;;  %vm2583_vm7 = vcmp.eq.s32.totalorder %v15372_v0, %v2149_v45  ;;  %v17208_v45 = vadd.s32 200, %v16152_v59 }
 0x26b   : > { %vm2901_vm1 = vmor %vm2389_vm0, %vm2645_vm15  ;;  %vm2392_vm15 = vcmp.eq.s32.totalorder %v15381_v31, %v23575_v39  ;;  %v7109_v6 = vmul.f32 0.01, %v6853_v41  ;;  %v5474_v59 = vcombine.high %v17268_v25, %v17268_v25 }
 0x26c   : > { %vm14229_vm8 = vmpackc.low %vm2901_vm1, %vm2899_vm14  ;;  %vm2327_vm1 = vcmp.eq.s32.totalorder %v15372_v0, %v23573_v51  ;;  %v5444_v51 = vcombine.high %v5442_v35, %v5442_v35 }
 0x26d   : > { %14230 = vmatmul.mubr.msk.bf16.gmra.mrb[32].mxu1 %vm14229_vm8, %v23269_v48  ;;  %vm2840_vm10 = vmor %vm2328_vm12, %vm2584_vm11  ;;  %vm2585_vm11 = vcmp.eq.s32.totalorder %v15372_v0, %v2150_v60  ;;  %vm2329_vm12 = vcmp.eq.s32.totalorder %v15372_v0, %v23574_v11  ;;  %vm2647_vm8 = vcmp.eq.s32.totalorder %v15372_v0, %v2181_v32  ;;  %v1811_v60 = vpop.permute.xlu0 %1810  ;;  %v1818_v32 = vpop.permute.xlu1 %1817 }
 0x26e   : > { %vm2842_vm5 = vmor %vm2330_vm2, %vm2586_vm9  ;;  %v17240_v11 = vadd.s32 200, %v1811_v60 }
 0x26f   : > { %vm14167_vm13 = vmpackc.low %vm2842_vm5, %vm2840_vm10 }
 0x270   : > { %14168 = vmatprep.mubr.msk.bf16.mxu0 %vm14167_vm13, %v23269_v48  ;;  %vm2904_vm0 = vmor %vm2392_vm15, %vm2648_vm4  ;;  %vm2649_vm4 = vcmp.eq.s32.totalorder %v15372_v0, %v2182_v23  ;;  %vm2393_vm15 = vcmp.eq.s32.totalorder %v15372_v0, %v23576_v46  ;;  %vm2588_vm13 = vcmp.eq.s32.totalorder %v15381_v31, %v17126_v17  ;;  %v17249_v46 = vadd.s32 200, %v1818_v32 }
 0x271   : > { %vm2906_vm14 = vmor %vm2394_vm3, %vm2650_vm6  ;;  %vm2391_vm6 = vcmp.eq.s32.totalorder %v15372_v0, %v23575_v39  ;;  %v6227_v39 = vrot.slane %v5475_v44, %v14776_v2  ;;  %v1825_v44 = vpop.permute.xlu0 %1824 }
 0x272   : > { %vm14231_vm9 = vmpackc.low %vm2906_vm14, %vm2904_vm0 }
 0x273   : > { %14232 = vmatprep.mubr.msk.bf16.mxu1 %vm14231_vm9, %v23269_v48  ;;  %vm2839_vm2 = vmor %vm2327_vm1, %vm2583_vm7  ;;  %vm2590_vm7 = vcmp.eq.s32.totalorder %v15381_v31, %v17131_v50  ;;  %vm2334_vm1 = vcmp.eq.s32.totalorder %v15381_v31, %v23578_v61  ;;  %vm2652_vm9 = vcmp.eq.s32.totalorder %v15381_v31, %v17143_v37 }
 0x274   : > { %vm2841_vm10 = vmor %vm2329_vm12, %vm2585_vm11  ;;  %vm2332_vm11 = vcmp.eq.s32.totalorder %v15381_v31, %v23577_v56 }
 0x275   : > { %vm14169_vm5 = vmpackc.low %vm2841_vm10, %vm2839_vm2  ;;  %vm2396_vm10 = vcmp.eq.s32.totalorder %v15381_v31, %v23579_v43 }
 0x276   : > { %14170 = vmatmul.mubr.msk.bf16.gmra.mrb[100].mxu0 %vm14169_vm5, %v23269_v48  ;;  %vm2903_vm3 = vmor %vm2391_vm6, %vm2647_vm8  ;;  %vm2654_vm8 = vcmp.eq.s32.totalorder %v15381_v31, %v17150_v24  ;;  %vm2398_vm5 = vcmp.eq.s32.totalorder %v15381_v31, %v23581_v63 }
 0x277   : > { %vm2905_vm0 = vmor %vm2393_vm15, %vm2649_vm4  ;;  %vm2333_vm4 = vcmp.eq.s32.totalorder %v15372_v0, %v23578_v61  ;;  %vm2589_vm15 = vcmp.eq.s32.totalorder %v15372_v0, %v17131_v50 }
 0x278   : > { %vm14233_vm14 = vmpackc.low %vm2905_vm0, %vm2903_vm3  ;;  %vm6980_vm0 = vcmp.gt.f32.partialorder %v6852_v30, 0.0 }
 0x279   : > { %14234 = vmatmul.mubr.msk.bf16.gmra.mrb[36].mxu1 %vm14233_vm14, %v23269_v48  ;;  %vm2844_vm12 = vmor %vm2332_vm11, %vm2588_vm13  ;;  %vm2587_vm13 = vcmp.eq.s32.totalorder %v15372_v0, %v17126_v17  ;;  %vm2331_vm11 = vcmp.eq.s32.totalorder %v15372_v0, %v23577_v56  ;;  %v7236_v23 = vsel %vm6980_vm0, %v6852_v30, %v7108_v49  ;;  %v4767_v17 = vpop.f32.mrb[4].mxu0  ;;  %vm2336_vm0 = vcmp.eq.s32.totalorder %v15381_v31, %v23593_v57 }
 0x27a   : > { %vm2846_vm2 = vmor %vm2334_vm1, %vm2590_vm7  ;;  %vm2651_vm1 = vcmp.eq.s32.totalorder %v15372_v0, %v17143_v37  ;;  %v7371_v22 = vmul.f32 %v17203_v27, %v7236_v23  ;;  %v6854_v50 = vadd.f32 %v6223_v55, %v4767_v17  ;;  %v17265_v47 = vpop.f32.mrb[5].mxu0  ;;  %v23592_v37 = vld [vmem:[#allocation27_spill] sm:$0xff]  ;;  %v17327_v49 = vadd.s32 200, %v16193_v36  ;;  %v1832_v55 = vpop.permute.xlu1 %1831 }
 0x27b   : > { %vm14171_vm6 = vmpackc.low %vm2846_vm2, %vm2844_vm12  ;;  %vm6981_vm12 = vcmp.gt.f32.partialorder %v6853_v41, 0.0  ;;  %23591 = vst [vmem:[#allocation38_spill] sm:$0xff] %v17265_v47  ;;  %v4771_v13 = vpop.f32.mrb[6].mxu0  ;;  %v1839_v36 = vpop.permute.xlu0 %1838 }
 0x27c   : > { %14172 = vmatprep.mubr.msk.bf16.mxu0 %vm14171_vm6, %v23269_v48  ;;  %vm17186_vm3 = vmor %vm2396_vm10, %vm2652_vm9  ;;  %vm2395_vm10 = vcmp.eq.s32.totalorder %v15372_v0, %v23579_v43  ;;  %v7237_v7 = vsel %vm6981_vm12, %v6853_v41, %v7109_v6  ;;  %7499 = vadd.xlane.f32.xlu0 %v7371_v22  ;;  %v7110_v20 = vmul.f32 0.01, %v6854_v50  ;;  %v6855_v61 = vadd.f32 %v6227_v39, %v4771_v13  ;;  %v17289_v10 = vpop.f32.mrb[7].mxu0  ;;  %v17351_v6 = vld [vmem:[%s17089_s27 + $0x8] sm:$0xff] }
 0x27d   : > { %vm17194_vm7 = vmor %vm2398_vm5, %vm2654_vm8  ;;  %vm2653_vm8 = vcmp.eq.s32.totalorder %v15372_v0, %v17150_v24  ;;  %vm2397_vm5 = vcmp.eq.s32.totalorder %v15372_v0, %v23581_v63  ;;  %v7372_v29 = vmul.f32 %v17203_v27, %v7237_v7  ;;  %v17277_v24 = vrot.slane %v5444_v51, %v17093_v26  ;;  %23596 = vst [vmem:[#allocation37_spill] sm:$0xff] %v17289_v10  ;;  %v23598_v63 = vld [vmem:[#allocation57_spill] sm:$0xff]  ;;  %v4777_v60 = vpop.f32.mrb[8].mxu0 }
 0x27e   : > { %vm14235_vm14 = vmpackc.low %vm17194_vm7, %vm17186_vm3  ;;  %vm2338_vm7 = vcmp.eq.s32.totalorder %v15381_v31, %v23592_v37  ;;  %vm2400_vm12 = vcmp.eq.s32.totalorder %v15381_v31, %v23597_v18  ;;  %v7111_v1 = vmul.f32 0.01, %v6855_v61  ;;  %v6231_v43 = vrot.slane %v17268_v25, %v14776_v2  ;;  %v17346_v32 = vpop.f32.mrb[9].mxu0  ;;  %v23605_v25 = vld [vmem:[#allocation30_spill] sm:$0xff] }
 0x27f   : > { %14236 = vmatprep.mubr.msk.bf16.mxu1 %vm14235_vm14, %v23269_v48  ;;  %vm17224_vm9 = vmor %vm2331_vm11, %vm2587_vm13  ;;  %vm2594_vm13 = vcmp.eq.s32.totalorder %v15381_v31, %v17208_v45  ;;  %7501 = vadd.xlane.f32.xlu1 %v7372_v29  ;;  %vm2656_vm14 = vcmp.eq.s32.totalorder %v15381_v31, %v17240_v11  ;;  %v6235_v35 = vrot.slane %v17277_v24, %v14776_v2  ;;  %v17330_v41 = vadd.s32 200, %v16195_v38 }
 0x280   : > { %vm2845_vm2 = vmor %vm2333_vm4, %vm2589_vm15  ;;  %vm2592_vm4 = vcmp.eq.s32.totalorder %v15381_v31, %v17211_v14  ;;  %v6856_v38 = vadd.f32 %v6231_v43, %v4777_v60  ;;  %23603 = vst [vmem:[#allocation13_spill] sm:$0xff] %v17346_v32  ;;  %v5476_v22 = vcombine.high %v17277_v24, %v17277_v24  ;;  %v17366_v51 = vadd.s32 200, %v1825_v44 }
 0x281   : > { %vm14173_vm6 = vmpackc.low %vm2845_vm2, %vm17224_vm9  ;;  %vm6982_vm9 = vcmp.gt.f32.partialorder %v6854_v50, 0.0  ;;  %v5484_v17 = vrot.slane %v17351_v6, %v17093_v26  ;;  %v17449_v60 = vadd.s32 200, %v16228_v58 }
 0x282   : > { %14174 = vmatmul.mubr.msk.bf16.gmra.mrb[104].mxu0 %vm14173_vm6, %v23269_v48  ;;  %vm17255_vm15 = vmor %vm2395_vm10, %vm2651_vm1  ;;  %vm6983_vm6 = vcmp.gt.f32.partialorder %v6855_v61, 0.0  ;;  %v7238_v30 = vsel %vm6982_vm9, %v6854_v50, %v7110_v20  ;;  %v7112_v7 = vmul.f32 0.01, %v6856_v38  ;;  %v6243_v13 = vrot.slane %v5476_v22, %v14776_v2 }
 0x283   : > { %vm2909_vm3 = vmor %vm2397_vm5, %vm2653_vm8  ;;  %vm2658_vm8 = vcmp.eq.s32.totalorder %v15381_v31, %v17249_v46  ;;  %vm2402_vm5 = vcmp.eq.s32.totalorder %v15381_v31, %v23598_v63  ;;  %v7373_v54 = vmul.f32 %v17203_v27, %v7238_v30  ;;  %v7239_v19 = vsel %vm6983_vm6, %v6855_v61, %v7111_v1  ;;  %v23609_v1 = vld [vmem:[#allocation60_spill] sm:$0xff] }
 0x284   : > { %vm14237_vm11 = vmpackc.low %vm2909_vm3, %vm17255_vm15  ;;  %v7374_v23 = vmul.f32 %v17203_v27, %v7239_v19  ;;  %vm6984_vm6 = vcmp.gt.f32.partialorder %v6856_v38, 0.0  ;;  %v17417_v61 = vrot.slane %v5484_v17, %v17093_v26  ;;  %v5477_v22 = vcombine.high %v17351_v6, %v17351_v6 }
 0x285   : > { %14238 = vmatmul.mubr.msk.bf16.gmra.mrb[40].mxu1 %vm14237_vm11, %v23269_v48  ;;  %vm17285_vm1 = vmor %vm2336_vm0, %vm2592_vm4  ;;  %vm2591_vm4 = vcmp.eq.s32.totalorder %v15372_v0, %v17211_v14  ;;  %vm2335_vm0 = vcmp.eq.s32.totalorder %v15372_v0, %v23593_v57  ;;  %7503 = vadd.xlane.f32.xlu0 %v7373_v54  ;;  %v4781_v14 = vpop.f32.mrb[10].mxu0  ;;  %v7240_v50 = vsel %vm6984_vm6, %v6856_v38, %v7112_v7  ;;  %v23606_v57 = vld [vmem:[#allocation29_spill] sm:$0xff]  ;;  %v17488_v7 = vadd.s32 200, %v1839_v36 }
 0x286   : > { %vm2850_vm2 = vmor %vm2338_vm7, %vm2594_vm13  ;;  %vm2593_vm13 = vcmp.eq.s32.totalorder %v15372_v0, %v17208_v45  ;;  %vm2337_vm7 = vcmp.eq.s32.totalorder %v15372_v0, %v23592_v37  ;;  %v6857_v39 = vadd.f32 %v6235_v35, %v4781_v14  ;;  %v17370_v42 = vpop.f32.mrb[11].mxu0  ;;  %v17376_v45 = vadd.s32 200, %v1832_v55  ;;  %v1846_v14 = vpop.permute.xlu1 %1845 }
 0x287   : > { %vm14175_vm10 = vmpackc.low %vm2850_vm2, %vm17285_vm1  ;;  %vm2655_vm1 = vcmp.eq.s32.totalorder %v15372_v0, %v17240_v11  ;;  %23604 = vst [vmem:[#allocation14_spill] sm:$0xff] %v17370_v42  ;;  %v6239_v11 = vrot.slane %v5474_v59, %v14776_v2  ;;  %v7375_v37 = vmul.f32 %v17203_v27, %v7240_v50  ;;  %v4787_v56 = vpop.f32.mrb[12].mxu0  ;;  %vm2339_vm6 = vcmp.eq.s32.totalorder %v15372_v0, %v23605_v25 }
 0x288   : > { %14176 = vmatprep.mubr.msk.bf16.mxu0 %vm14175_vm10, %v23269_v48  ;;  %vm17313_vm15 = vmor %vm2400_vm12, %vm2656_vm14  ;;  %vm2401_vm14 = vcmp.eq.s32.totalorder %v15372_v0, %v23598_v63  ;;  %vm2399_vm12 = vcmp.eq.s32.totalorder %v15372_v0, %v23597_v18  ;;  %v7113_v29 = vmul.f32 0.01, %v6857_v39  ;;  %v5492_v18 = vcombine.high %v5484_v17, %v5484_v17  ;;  %v17425_v30 = vpop.f32.mrb[13].mxu0  ;;  %v23611_v63 = vld [vmem:[#allocation59_spill] sm:$0xff] }
 0x289   : > { %vm2914_vm3 = vmor %vm2402_vm5, %vm2658_vm8  ;;  %vm2657_vm8 = vcmp.eq.s32.totalorder %v15372_v0, %v17249_v46  ;;  %vm2598_vm5 = vcmp.eq.s32.totalorder %v15381_v31, %v17327_v49  ;;  %7505 = vadd.xlane.f32.xlu0 %v7374_v23  ;;  %7507 = vadd.xlane.f32.xlu1 %v7375_v37  ;;  %v6858_v43 = vadd.f32 %v6239_v11, %v4787_v56  ;;  %v4791_v54 = vpop.f32.mrb[14].mxu0  ;;  %v17452_v55 = vadd.s32 200, %v16230_v8  ;;  %v23620_v37 = vld [vmem:[#allocation31_spill] sm:$0xff] }
 0x28a   : > { %vm14239_vm11 = vmpackc.low %vm2914_vm3, %vm17313_vm15  ;;  %vm6985_vm3 = vcmp.gt.f32.partialorder %v6857_v39, 0.0  ;;  %23610 = vst [vmem:[#allocation40_spill] sm:$0xff] %v17425_v30  ;;  %v6859_v19 = vadd.f32 %v6243_v13, %v4791_v54  ;;  %v17446_v44 = vpop.f32.mrb[15].mxu0  ;;  %v6247_v38 = vrot.slane %v17417_v61, %v14776_v2  ;;  %v5514_v59 = vrot.slane %v5492_v18, %v17093_v26  ;;  %v23624_v18 = vld [vmem:[#allocation62_spill] sm:$0xff] }
 0x28b   : > { %14240 = vmatprep.mubr.msk.bf16.mxu1 %vm14239_vm11, %v23269_v48  ;;  %vm17342_vm9 = vmor %vm2335_vm0, %vm2591_vm4  ;;  %vm2596_vm4 = vcmp.eq.s32.totalorder %v15381_v31, %v17330_v41  ;;  %vm2342_vm11 = vcmp.eq.s32.totalorder %v15381_v31, %v23606_v57  ;;  %v7241_v24 = vsel %vm6985_vm3, %v6857_v39, %v7113_v29  ;;  %v7114_v35 = vmul.f32 0.01, %v6858_v43  ;;  %23614 = vst [vmem:[#allocation39_spill] sm:$0xff] %v17446_v44  ;;  %v4797_v17 = vpop.f32.mrb[16].mxu0 }
 0x28c   : > { %vm2849_vm2 = vmor %vm2337_vm7, %vm2593_vm13  ;;  %vm2340_vm7 = vcmp.eq.s32.totalorder %v15381_v31, %v23605_v25  ;;  %v7376_v20 = vmul.f32 %v17203_v27, %v7241_v24  ;;  %v7115_v8 = vmul.f32 0.01, %v6859_v19  ;;  %v17494_v39 = vadd.s32 200, %v1846_v14  ;;  %v17511_v25 = vpop.f32.mrb[17].mxu0 }
 0x28d   : > { %vm14177_vm10 = vmpackc.low %vm2849_vm2, %vm17342_vm9  ;;  %vm2662_vm9 = vcmp.eq.s32.totalorder %v15381_v31, %v17376_v45  ;;  %vm2404_vm2 = vcmp.eq.s32.totalorder %v15381_v31, %v23609_v1  ;;  %v6251_v29 = vrot.slane %v5514_v59, %v14776_v2  ;;  %v6860_v11 = vadd.f32 %v6247_v38, %v4797_v17  ;;  %23619 = vst [vmem:[#allocation42_spill] sm:$0xff] %v17511_v25  ;;  %v4801_v46 = vpop.f32.mrb[18].mxu0 }
 0x28e   : > { %14178 = vmatmul.mubr.msk.bf16.gmra.mrb[108].mxu0 %vm14177_vm10, %v23269_v48  ;;  %vm2911_vm15 = vmor %vm2399_vm12, %vm2655_vm1  ;;  %vm2660_vm1 = vcmp.eq.s32.totalorder %v15381_v31, %v17366_v51  ;;  %7509 = vadd.xlane.f32.xlu0 %v7376_v20  ;;  %v17528_v24 = vpop.f32.mrb[19].mxu0  ;;  %v5524_v56 = vcombine.high %v5514_v59, %v5514_v59  ;;  %v23623_v20 = vld [vmem:[#allocation61_spill] sm:$0xff]  ;;  %v17568_v36 = vadd.s32 200, %v16272_v21  ;;  %v17571_v38 = vadd.s32 200, %v16274_v62  ;;  %v1853_v59 = vpop.permute.xlu0 %1852 }
 0x28f   : > { %vm2913_vm13 = vmor %vm2401_vm14, %vm2657_vm8  ;;  %vm2341_vm8 = vcmp.eq.s32.totalorder %v15372_v0, %v23606_v57  ;;  %v23621_v57 = vld [vmem:[#allocation32_spill] sm:$0xff]  ;;  %v7116_v13 = vmul.f32 0.01, %v6860_v11  ;;  %23622 = vst [vmem:[#allocation41_spill] sm:$0xff] %v17528_v24  ;;  %v4807_v14 = vpop.f32.mrb[20].mxu0  ;;  %v17604_v6 = vadd.s32 200, %v1853_v59 }
 0x290   : > { %vm14241_vm0 = vmpackc.low %vm2913_vm13, %vm2911_vm15  ;;  %vm2597_vm13 = vcmp.eq.s32.totalorder %v15372_v0, %v17327_v49 }
 0x291   : > { %14242 = vmatmul.mubr.msk.bf16.gmra.mrb[44].mxu1 %vm14241_vm0, %v23269_v48  ;;  %vm17405_vm14 = vmor %vm2340_vm7, %vm2596_vm4  ;;  %vm2595_vm4 = vcmp.eq.s32.totalorder %v15372_v0, %v17330_v41  ;;  %vm6986_vm7 = vcmp.gt.f32.partialorder %v6858_v43, 0.0 }
 0x292   : > { %vm2854_vm12 = vmor %vm2342_vm11, %vm2598_vm5  ;;  %vm2406_vm5 = vcmp.eq.s32.totalorder %v15381_v31, %v23611_v63  ;;  %vm2659_vm11 = vcmp.eq.s32.totalorder %v15372_v0, %v17366_v51  ;;  %v7242_v23 = vsel %vm6986_vm7, %v6858_v43, %v7114_v35  ;;  %v5522_v51 = vcombine.high %v17417_v61, %v17417_v61  ;;  %v1867_v59 = vpop.permute.xlu0 %1866 }
 0x293   : > { %vm14179_vm10 = vmpackc.low %vm2854_vm12, %vm17405_vm14  ;;  %vm6987_vm14 = vcmp.gt.f32.partialorder %v6859_v19, 0.0  ;;  %v7377_v41 = vmul.f32 %v17203_v27, %v7242_v23  ;;  %v6861_v61 = vadd.f32 %v6251_v29, %v4801_v46  ;;  %v17585_v23 = vpop.f32.mrb[21].mxu0  ;;  %v23632_v46 = vld [vmem:[#allocation33_spill] sm:$0xff] }
 0x294   : > { %14180 = vmatprep.mubr.msk.bf16.mxu0 %vm14179_vm10, %v23269_v48  ;;  %vm17437_vm15 = vmor %vm2404_vm2, %vm2660_vm1  ;;  %vm2405_vm2 = vcmp.eq.s32.totalorder %v15372_v0, %v23611_v63  ;;  %vm2403_vm10 = vcmp.eq.s32.totalorder %v15372_v0, %v23609_v1  ;;  %v7243_v49 = vsel %vm6987_vm14, %v6859_v19, %v7115_v8  ;;  %vm2410_vm14 = vcmp.eq.s32.totalorder %v15381_v31, %v23623_v20  ;;  %v1860_v8 = vpop.permute.xlu1 %1859 }
 0x295   : > { %vm2918_vm3 = vmor %vm2406_vm5, %vm2662_vm9  ;;  %vm2661_vm9 = vcmp.eq.s32.totalorder %v15372_v0, %v17376_v45  ;;  %7511 = vadd.xlane.f32.xlu1 %v7377_v41  ;;  %v7378_v50 = vmul.f32 %v17203_v27, %v7243_v49  ;;  %v5491_v45 = vrot.slane %v5477_v22, %v17093_v26  ;;  %v6255_v43 = vrot.slane %v5522_v51, %v14776_v2 }
 0x296   : > { %vm14243_vm0 = vmpackc.low %vm2918_vm3, %vm17437_vm15  ;;  %vm2344_vm3 = vcmp.eq.s32.totalorder %v15381_v31, %v23621_v57  ;;  %v7117_v40 = vmul.f32 0.01, %v6861_v61  ;;  %v6259_v19 = vrot.slane %v5524_v56, %v14776_v2  ;;  %23629 = vst [vmem:[#allocation16_spill] sm:$0xff] %v17585_v23 }
 0x297   : > { %14244 = vmatprep.mubr.msk.bf16.mxu1 %vm14243_vm0, %v23269_v48  ;;  %vm17468_vm1 = vmor %vm2339_vm6, %vm2595_vm4  ;;  %vm2602_vm4 = vcmp.eq.s32.totalorder %v15381_v31, %v17449_v60  ;;  %7513 = vadd.xlane.f32.xlu0 %v7378_v50  ;;  %vm2664_vm0 = vcmp.eq.s32.totalorder %v15381_v31, %v17488_v7  ;;  %v5493_v35 = vcombine.high %v5491_v45, %v5491_v45 }
 0x298   : > { %vm2853_vm12 = vmor %vm2341_vm8, %vm2597_vm13  ;;  %vm2600_vm8 = vcmp.eq.s32.totalorder %v15381_v31, %v17452_v55  ;;  %vm2346_vm13 = vcmp.eq.s32.totalorder %v15381_v31, %v23620_v37  ;;  %v6862_v62 = vadd.f32 %v6255_v43, %v4807_v14  ;;  %v17589_v22 = vrot.slane %v5491_v45, %v17093_v26  ;;  %v23636_v43 = vld [vmem:[#allocation64_spill] sm:$0xff] }
 0x299   : > { %vm14181_vm6 = vmpackc.low %vm2853_vm12, %vm17468_vm1  ;;  %vm6988_vm1 = vcmp.gt.f32.partialorder %v6860_v11, 0.0  ;;  %v17602_v49 = vrot.slane %v5493_v35, %v17093_v26 }
 0x29a   : > { %14182 = vmatmul.mubr.msk.bf16.gmra.mrb[112].mxu0 %vm14181_vm6, %v23269_v48  ;;  %vm17500_vm5 = vmor %vm2403_vm10, %vm2659_vm11  ;;  %vm2599_vm10 = vcmp.eq.s32.totalorder %v15372_v0, %v17452_v55  ;;  %v7244_v1 = vsel %vm6988_vm1, %v6860_v11, %v7116_v13  ;;  %vm2407_vm1 = vcmp.eq.s32.totalorder %v15372_v0, %v23624_v18  ;;  %v4811_v55 = vpop.f32.mrb[22].mxu0  ;;  %v7118_v17 = vmul.f32 0.01, %v6862_v62 }
 0x29b   : > { %vm2917_vm15 = vmor %vm2405_vm2, %vm2661_vm9  ;;  %vm2666_vm9 = vcmp.eq.s32.totalorder %v15381_v31, %v17494_v39  ;;  %vm2408_vm2 = vcmp.eq.s32.totalorder %v15381_v31, %v23624_v18  ;;  %v7379_v54 = vmul.f32 %v17203_v27, %v7244_v1  ;;  %v6863_v29 = vadd.f32 %v6259_v19, %v4811_v55  ;;  %v17608_v50 = vpop.f32.mrb[23].mxu0  ;;  %v17656_v18 = vld [vmem:[%s17089_s27 + $0x10] sm:$0xff]  ;;  %v23635_v1 = vld [vmem:[#allocation63_spill] sm:$0xff]  ;;  %v1874_v55 = vpop.permute.xlu1 %1873 }
 0x29c   : > { %vm14245_vm7 = vmpackc.low %vm2917_vm15, %vm17500_vm5  ;;  %vm6989_vm5 = vcmp.gt.f32.partialorder %v6861_v61, 0.0  ;;  %vm2601_vm15 = vcmp.eq.s32.totalorder %v15372_v0, %v17449_v60  ;;  %23630 = vst [vmem:[#allocation15_spill] sm:$0xff] %v17608_v50  ;;  %v17616_v60 = vadd.s32 200, %v1860_v8  ;;  %v6267_v45 = vrot.slane %v17602_v49, %v14776_v2  ;;  %v4817_v56 = vpop.f32.mrb[24].mxu0 }
 0x29d   : > { %14246 = vmatmul.mubr.msk.bf16.gmra.mrb[48].mxu1 %vm14245_vm7, %v23269_v48  ;;  %vm2856_vm11 = vmor %vm2344_vm3, %vm2600_vm8  ;;  %vm2343_vm3 = vcmp.eq.s32.totalorder %v15372_v0, %v23621_v57  ;;  %7515 = vadd.xlane.f32.xlu1 %v7379_v54  ;;  %v7245_v58 = vsel %vm6989_vm5, %v6861_v61, %v7117_v40  ;;  %v7119_v11 = vmul.f32 0.01, %v6863_v29  ;;  %v23631_v57 = vld [vmem:[#allocation34_spill] sm:$0xff]  ;;  %v5523_v61 = vcombine.high %v17589_v22, %v17589_v22  ;;  %v17666_v40 = vpop.f32.mrb[25].mxu0 }
 0x29e   : > { %vm2858_vm12 = vmor %vm2346_vm13, %vm2602_vm4  ;;  %vm2345_vm4 = vcmp.eq.s32.totalorder %v15372_v0, %v23620_v37  ;;  %v7380_v41 = vmul.f32 %v17203_v27, %v7245_v58  ;;  %v6263_v37 = vrot.slane %v17589_v22, %v14776_v2  ;;  %23637 = vst [vmem:[#allocation44_spill] sm:$0xff] %v17666_v40  ;;  %v4821_v35 = vpop.f32.mrb[26].mxu0  ;;  %v5525_v19 = vcombine.high %v17602_v49, %v17602_v49 }
 0x29f   : > { %vm14183_vm6 = vmpackc.low %vm2858_vm12, %vm2856_vm11  ;;  %v6865_v58 = vadd.f32 %v6267_v45, %v4821_v35  ;;  %v17685_v8 = vpop.f32.mrb[27].mxu0  ;;  %v5533_v21 = vrot.slane %v17656_v18, %v17093_v26  ;;  %v6271_v22 = vrot.slane %v5523_v61, %v14776_v2  ;;  %v23646_v45 = vld [vmem:[#allocation35_spill] sm:$0xff]  ;;  %v1888_v54 = vpop.permute.xlu1 %1887 }
 0x2a0   : > { %14184 = vmatprep.mubr.msk.bf16.mxu0 %vm14183_vm6, %v23269_v48  ;;  %vm17549_vm8 = vmor %vm2408_vm2, %vm2664_vm0  ;;  %vm2663_vm0 = vcmp.eq.s32.totalorder %v15372_v0, %v17488_v7  ;;  %vm6990_vm2 = vcmp.gt.f32.partialorder %v6862_v62, 0.0  ;;  %7517 = vadd.xlane.f32.xlu0 %v7380_v41  ;;  %vm2606_vm6 = vcmp.eq.s32.totalorder %v15381_v31, %v17568_v36  ;;  %v6864_v63 = vadd.f32 %v6263_v37, %v4817_v56  ;;  %v1881_v35 = vpop.permute.xlu0 %1880 }
 0x2a1   : > { %vm2922_vm13 = vmor %vm2410_vm14, %vm2666_vm9  ;;  %vm2665_vm14 = vcmp.eq.s32.totalorder %v15372_v0, %v17494_v39  ;;  %v7246_v51 = vsel %vm6990_vm2, %v6862_v62, %v7118_v17  ;;  %vm2412_vm2 = vcmp.eq.s32.totalorder %v15381_v31, %v23636_v43  ;;  %23640 = vst [vmem:[#allocation43_spill] sm:$0xff] %v17685_v8  ;;  %v17692_v62 = vadd.s32 200, %v16319_v53 }
 0x2a2   : > { %vm14247_vm7 = vmpackc.low %vm2922_vm13, %vm17549_vm8  ;;  %vm2604_vm8 = vcmp.eq.s32.totalorder %v15381_v31, %v17571_v38  ;;  %vm2348_vm13 = vcmp.eq.s32.totalorder %v15381_v31, %v23631_v57  ;;  %v7381_v7 = vmul.f32 %v17203_v27, %v7246_v51  ;;  %v7120_v14 = vmul.f32 0.01, %v6864_v63 }
 0x2a3   : > { %14248 = vmatprep.mubr.msk.bf16.mxu1 %vm14247_vm7, %v23269_v48  ;;  %vm17581_vm11 = vmor %vm2343_vm3, %vm2599_vm10  ;;  %vm2409_vm10 = vcmp.eq.s32.totalorder %v15372_v0, %v23623_v20  ;;  %vm2350_vm7 = vcmp.eq.s32.totalorder %v15381_v31, %v23632_v46  ;;  %v17695_v41 = vadd.s32 200, %v16332_v52  ;;  %v7121_v52 = vmul.f32 0.01, %v6865_v58 }
 0x2a4   : > { %vm2857_vm9 = vmor %vm2345_vm4, %vm2601_vm15  ;;  %vm6991_vm15 = vcmp.gt.f32.partialorder %v6863_v29, 0.0  ;;  %7519 = vadd.xlane.f32.xlu1 %v7381_v7  ;;  %v17713_v17 = vadd.s32 200, %v1867_v59  ;;  %v5541_v51 = vcombine.high %v5533_v21, %v5533_v21 }
 0x2a5   : > { %vm14185_vm12 = vmpackc.low %vm2857_vm9, %vm17581_vm11  ;;  %v7247_v13 = vsel %vm6991_vm15, %v6863_v29, %v7119_v11  ;;  %vm2349_vm9 = vcmp.eq.s32.totalorder %v15372_v0, %v23632_v46  ;;  %vm6992_vm15 = vcmp.gt.f32.partialorder %v6864_v63, 0.0  ;;  %v6275_v29 = vrot.slane %v5525_v19, %v14776_v2 }
 0x2a6   : > { %14186 = vmatmul.mubr.msk.bf16.gmra.mrb[116].mxu0 %vm14185_vm12, %v23269_v48  ;;  %vm2919_vm5 = vmor %vm2407_vm1, %vm2663_vm0  ;;  %vm2668_vm0 = vcmp.eq.s32.totalorder %v15381_v31, %v17604_v6  ;;  %vm2670_vm1 = vcmp.eq.s32.totalorder %v15381_v31, %v17616_v60  ;;  %v7382_v20 = vmul.f32 %v17203_v27, %v7247_v13  ;;  %vm2414_vm12 = vcmp.eq.s32.totalorder %v15381_v31, %v23635_v1  ;;  %v23647_v13 = vld [vmem:[#allocation36_spill] sm:$0xff] }
 0x2a7   : > { %vm2921_vm4 = vmor %vm2409_vm10, %vm2665_vm14  ;;  %v7248_v49 = vsel %vm6992_vm15, %v6864_v63, %v7120_v14  ;;  %vm2352_vm15 = vcmp.eq.s32.totalorder %v15381_v31, %v23647_v13  ;;  %v23651_v63 = vld [vmem:[#allocation66_spill] sm:$0xff] }
 0x2a8   : > { %vm14249_vm3 = vmpackc.low %vm2921_vm4, %vm2919_vm5  ;;  %7521 = vadd.xlane.f32.xlu0 %v7382_v20 }
 0x2a9   : > { %14250 = vmatmul.mubr.msk.bf16.gmra.mrb[52].mxu1 %vm14249_vm3, %v23269_v48  ;;  %vm17641_vm11 = vmor %vm2348_vm13, %vm2604_vm8  ;;  %vm2603_vm8 = vcmp.eq.s32.totalorder %v15372_v0, %v17571_v38  ;;  %vm2347_vm13 = vcmp.eq.s32.totalorder %v15372_v0, %v23631_v57  ;;  %v7383_v38 = vmul.f32 %v17203_v27, %v7248_v49  ;;  %v4827_v57 = vpop.f32.mrb[28].mxu0  ;;  %v17811_v49 = vadd.s32 200, %v1888_v54 }
 0x2aa   : > { %vm2862_vm14 = vmor %vm2350_vm7, %vm2606_vm6  ;;  %vm2605_vm6 = vcmp.eq.s32.totalorder %v15372_v0, %v17568_v36  ;;  %vm2667_vm7 = vcmp.eq.s32.totalorder %v15372_v0, %v17604_v6  ;;  %v17731_v36 = vadd.s32 200, %v1874_v55  ;;  %v6866_v46 = vadd.f32 %v6271_v22, %v4827_v57  ;;  %v17747_v39 = vpop.f32.mrb[29].mxu0 }
 0x2ab   : > { %vm14187_vm10 = vmpackc.low %vm2862_vm14, %vm17641_vm11  ;;  %vm6993_vm11 = vcmp.gt.f32.partialorder %v6865_v58, 0.0  ;;  %7523 = vadd.xlane.f32.xlu1 %v7383_v38  ;;  %23645 = vst [vmem:[#allocation46_spill] sm:$0xff] %v17747_v39  ;;  %v17750_v6 = vrot.slane %v5533_v21, %v17093_v26  ;;  %v17813_v38 = vadd.s32 200, %v1881_v35  ;;  %v23662_v35 = vld [vmem:[#allocation68_spill] sm:$0xff] }
 0x2ac   : > { %14188 = vmatprep.mubr.msk.bf16.mxu0 %vm14187_vm10, %v23269_v48  ;;  %vm17676_vm5 = vmor %vm2412_vm2, %vm2668_vm0  ;;  %v7249_v11 = vsel %vm6993_vm11, %v6865_v58, %v7121_v52  ;;  %vm2413_vm10 = vcmp.eq.s32.totalorder %v15372_v0, %v23635_v1  ;;  %v7122_v20 = vmul.f32 0.01, %v6866_v46  ;;  %vm2416_vm11 = vcmp.eq.s32.totalorder %v15381_v31, %v23651_v63  ;;  %v23652_v58 = vld [vmem:[#allocation65_spill] sm:$0xff] }
 0x2ad   : > { %vm2926_vm4 = vmor %vm2414_vm12, %vm2670_vm1  ;;  %vm2669_vm1 = vcmp.eq.s32.totalorder %v15372_v0, %v17616_v60  ;;  %vm2411_vm12 = vcmp.eq.s32.totalorder %v15372_v0, %v23636_v43  ;;  %v7384_v7 = vmul.f32 %v17203_v27, %v7249_v11  ;;  %v4831_v60 = vpop.f32.mrb[30].mxu0  ;;  %v17771_v43 = vrot.slane %v5541_v51, %v17093_v26 }
 0x2ae   : > { %vm14251_vm3 = vmpackc.low %vm2926_vm4, %vm17676_vm5  ;;  %vm2354_vm4 = vcmp.eq.s32.totalorder %v15381_v31, %v23646_v45  ;;  %v6867_v61 = vadd.f32 %v6275_v29, %v4831_v60  ;;  %v17768_v1 = vpop.f32.mrb[31].mxu0  ;;  %v6279_v14 = vrot.slane %v17750_v6, %v14776_v2  ;;  %v5526_v52 = vcombine.high %v17656_v18, %v17656_v18  ;;  %v23679_v18 = vld [vmem:[#allocation72_spill] sm:$0xff] }
 0x2af   : > { %14252 = vmatprep.mubr.msk.bf16.mxu1 %vm14251_vm3, %v23269_v48  ;;  %vm17706_vm0 = vmor %vm2347_vm13, %vm2603_vm8  ;;  %vm2608_vm8 = vcmp.eq.s32.totalorder %v15381_v31, %v17695_v41  ;;  %vm2672_vm13 = vcmp.eq.s32.totalorder %v15381_v31, %v17713_v17  ;;  %7525 = vadd.xlane.f32.xlu0 %v7384_v7  ;;  %23650 = vst [vmem:[#allocation45_spill] sm:$0xff] %v17768_v1  ;;  %v4837_v29 = vpop.f32.mrb[32].mxu0  ;;  %v1902_v7 = vpop.permute.xlu1 %1901 }
 0x2b0   : > { %vm2861_vm14 = vmor %vm2349_vm9, %vm2605_vm6  ;;  %vm2610_vm6 = vcmp.eq.s32.totalorder %v15381_v31, %v17692_v62  ;;  %v7123_v19 = vmul.f32 0.01, %v6867_v61  ;;  %v6283_v55 = vrot.slane %v17771_v43, %v14776_v2  ;;  %v6868_v51 = vadd.f32 %v6279_v14, %v4837_v29  ;;  %v17830_v37 = vpop.f32.mrb[33].mxu0 }
 0x2b1   : > { %vm14189_vm2 = vmpackc.low %vm2861_vm14, %vm17706_vm0  ;;  %vm6994_vm0 = vcmp.gt.f32.partialorder %v6866_v46, 0.0  ;;  %23657 = vst [vmem:[#allocation18_spill] sm:$0xff] %v17830_v37  ;;  %v5571_v57 = vcombine.high %v17750_v6, %v17750_v6  ;;  %v1895_v6 = vpop.permute.xlu0 %1894 }
 0x2b2   : > { %14190 = vmatmul.mubr.msk.bf16.gmra.mrb[120].mxu0 %vm14189_vm2, %v23269_v48  ;;  %vm17737_vm9 = vmor %vm2411_vm12, %vm2667_vm7  ;;  %vm6995_vm2 = vcmp.gt.f32.partialorder %v6867_v61, 0.0  ;;  %v7250_v59 = vsel %vm6994_vm0, %v6866_v46, %v7122_v20  ;;  %vm2415_vm0 = vcmp.eq.s32.totalorder %v15372_v0, %v23651_v63  ;;  %v4841_v46 = vpop.f32.mrb[34].mxu0  ;;  %v23661_v20 = vld [vmem:[#allocation67_spill] sm:$0xff] }
 0x2b3   : > { %vm2925_vm5 = vmor %vm2413_vm10, %vm2669_vm1  ;;  %vm2674_vm1 = vcmp.eq.s32.totalorder %v15381_v31, %v17731_v36  ;;  %vm2418_vm10 = vcmp.eq.s32.totalorder %v15381_v31, %v23652_v58  ;;  %v7385_v22 = vmul.f32 %v17203_v27, %v7250_v59  ;;  %v7251_v53 = vsel %vm6995_vm2, %v6867_v61, %v7123_v19  ;;  %v17851_v56 = vpop.f32.mrb[35].mxu0  ;;  %v1916_v21 = vpop.permute.xlu1 %1915 }
 0x2b4   : > { %vm14253_vm3 = vmpackc.low %vm2925_vm5, %vm17737_vm9  ;;  %v7386_v11 = vmul.f32 %v17203_v27, %v7251_v53  ;;  %v6869_v60 = vadd.f32 %v6283_v55, %v4841_v46  ;;  %23660 = vst [vmem:[#allocation17_spill] sm:$0xff] %v17851_v56  ;;  %vm2417_vm2 = vcmp.eq.s32.totalorder %v15372_v0, %v23652_v58  ;;  %v6287_v54 = vrot.slane %v5571_v57, %v14776_v2 }
 0x2b5   : > { %14254 = vmatmul.mubr.msk.bf16.gmra.mrb[56].mxu1 %vm14253_vm3, %v23269_v48  ;;  %vm17764_vm7 = vmor %vm2352_vm15, %vm2608_vm8  ;;  %vm2607_vm8 = vcmp.eq.s32.totalorder %v15372_v0, %v17695_v41  ;;  %7527 = vadd.xlane.f32.xlu1 %v7385_v22  ;;  %vm2671_vm3 = vcmp.eq.s32.totalorder %v15372_v0, %v17713_v17  ;;  %v17875_v19 = vadd.s32 200, %v1902_v7  ;;  %v17877_v59 = vadd.s32 200, %v1895_v6  ;;  %v4847_v22 = vpop.f32.mrb[36].mxu0  ;;  %v1909_v53 = vpop.permute.xlu0 %1908  ;;  %v23672_v6 = vld [vmem:[#allocation70_spill] sm:$0xff] }
 0x2b6   : > { %vm2866_vm14 = vmor %vm2354_vm4, %vm2610_vm6  ;;  %vm2609_vm6 = vcmp.eq.s32.totalorder %v15372_v0, %v17692_v62  ;;  %vm2351_vm4 = vcmp.eq.s32.totalorder %v15372_v0, %v23647_v13  ;;  %7529 = vadd.xlane.f32.xlu0 %v7386_v11  ;;  %v7124_v13 = vmul.f32 0.01, %v6868_v51  ;;  %v5540_v62 = vrot.slane %v5526_v52, %v17093_v26  ;;  %v17904_v29 = vpop.f32.mrb[37].mxu0 }
 0x2b7   : > { %vm14191_vm12 = vmpackc.low %vm2866_vm14, %vm17764_vm7  ;;  %v7125_v61 = vmul.f32 0.01, %v6869_v60  ;;  %v6870_v52 = vadd.f32 %v6287_v54, %v4847_v22  ;;  %23665 = vst [vmem:[#allocation48_spill] sm:$0xff] %v17904_v29 }
 0x2b8   : > { %14192 = vmatprep.mubr.msk.bf16.mxu0 %vm14191_vm12, %v23269_v48  ;;  %vm17795_vm9 = vmor %vm2416_vm11, %vm2672_vm13  ;;  %vm2353_vm13 = vcmp.eq.s32.totalorder %v15372_v0, %v23646_v45  ;;  %vm2673_vm11 = vcmp.eq.s32.totalorder %v15372_v0, %v17731_v36  ;;  %v5573_v45 = vcombine.high %v17771_v43, %v17771_v43  ;;  %vm6996_vm12 = vcmp.gt.f32.partialorder %v6868_v51, 0.0 }
 0x2b9   : > { %vm2930_vm5 = vmor %vm2418_vm10, %vm2674_vm1  ;;  %vm2422_vm10 = vcmp.eq.s32.totalorder %v15381_v31, %v23661_v20  ;;  %v7252_v43 = vsel %vm6996_vm12, %v6868_v51, %v7124_v13  ;;  %v5542_v58 = vcombine.high %v5540_v62, %v5540_v62  ;;  %v17907_v11 = vrot.slane %v5540_v62, %v17093_v26  ;;  %v4851_v51 = vpop.f32.mrb[38].mxu0 }
 0x2ba   : > { %vm14255_vm15 = vmpackc.low %vm2930_vm5, %vm17795_vm9  ;;  %vm2676_vm9 = vcmp.eq.s32.totalorder %v15381_v31, %v17813_v38  ;;  %v7387_v17 = vmul.f32 %v17203_v27, %v7252_v43  ;;  %v6291_v63 = vrot.slane %v5573_v45, %v14776_v2  ;;  %vm2421_vm12 = vcmp.eq.s32.totalorder %v15372_v0, %v23661_v20  ;;  %v17930_v46 = vpop.f32.mrb[39].mxu0  ;;  %v23671_v45 = vld [vmem:[#allocation69_spill] sm:$0xff] }
 0x2bb   : > { %14256 = vmatprep.mubr.msk.bf16.mxu1 %vm14255_vm15, %v23269_v48  ;;  %vm17826_vm7 = vmor %vm2351_vm4, %vm2607_vm8  ;;  %vm2678_vm8 = vcmp.eq.s32.totalorder %v15381_v31, %v17811_v49  ;;  %vm6997_vm4 = vcmp.gt.f32.partialorder %v6869_v60, 0.0  ;;  %vm2420_vm15 = vcmp.eq.s32.totalorder %v15381_v31, %v23662_v35  ;;  %v7126_v7 = vmul.f32 0.01, %v6870_v52  ;;  %23670 = vst [vmem:[#allocation47_spill] sm:$0xff] %v17930_v46  ;;  %v4857_v36 = vpop.f32.mrb[40].mxu0 }
 0x2bc   : > { %vm17841_vm1 = vmor %vm2353_vm13, %vm2609_vm6  ;;  %v7253_v14 = vsel %vm6997_vm4, %v6869_v60, %v7125_v61  ;;  %7531 = vadd.xlane.f32.xlu1 %v7387_v17  ;;  %v6871_v41 = vadd.f32 %v6291_v63, %v4851_v51  ;;  %vm2424_vm4 = vcmp.eq.s32.totalorder %v15381_v31, %v23672_v6  ;;  %v17937_v13 = vadd.s32 200, %v1916_v21  ;;  %v1930_v17 = vpop.permute.xlu1 %1929 }
 0x2bd   : > { %vm14193_vm14 = vmpackc.low %vm17841_vm1, %vm17826_vm7  ;;  %v7388_v55 = vmul.f32 %v17203_v27, %v7253_v14  ;;  %vm2419_vm1 = vcmp.eq.s32.totalorder %v15372_v0, %v23662_v35  ;;  %v6295_v61 = vrot.slane %v17907_v11, %v14776_v2  ;;  %v17973_v14 = vld [vmem:[%s17089_s27 + $0x18] sm:$0xff] }
 0x2be   : > { %14194 = vmatmul.mubr.msk.bf16.gmra.mrb[124].mxu0 %vm14193_vm14, %v23269_v48  ;;  %vm2927_vm6 = vmor %vm2415_vm0, %vm2671_vm3  ;;  %vm2675_vm3 = vcmp.eq.s32.totalorder %v15372_v0, %v17813_v38  ;;  %vm2677_vm0 = vcmp.eq.s32.totalorder %v15372_v0, %v17811_v49  ;;  %v5570_v38 = vrot.slane %v5542_v58, %v17093_v26  ;;  %v17939_v49 = vadd.s32 200, %v1909_v53  ;;  %v1923_v58 = vpop.permute.xlu0 %1922 }
 0x2bf   : > { %vm2929_vm5 = vmor %vm2417_vm2, %vm2673_vm11  ;;  %vm2682_vm2 = vcmp.eq.s32.totalorder %v15381_v31, %v17875_v19  ;;  %7533 = vadd.xlane.f32.xlu0 %v7388_v55  ;;  %v7127_v62 = vmul.f32 0.01, %v6871_v41  ;;  %v6872_v22 = vadd.f32 %v6295_v61, %v4857_v36  ;;  %v17986_v55 = vpop.f32.mrb[41].mxu0  ;;  %v5572_v53 = vcombine.high %v17907_v11, %v17907_v11 }
 0x2c0   : > { %vm14257_vm13 = vmpackc.low %vm2929_vm5, %vm2927_vm6  ;;  %vm6998_vm6 = vcmp.gt.f32.partialorder %v6870_v52, 0.0  ;;  %vm2426_vm5 = vcmp.eq.s32.totalorder %v15381_v31, %v23671_v45  ;;  %v6299_v54 = vrot.slane %v5570_v38, %v14776_v2  ;;  %23677 = vst [vmem:[#allocation20_spill] sm:$0xff] %v17986_v55  ;;  %v4861_v51 = vpop.f32.mrb[42].mxu0  ;;  %v5574_v57 = vcombine.high %v5570_v38, %v5570_v38  ;;  %v1944_v36 = vpop.permute.xlu1 %1943 }
 0x2c1   : > { %14258 = vmatmul.mubr.msk.bf16.gmra.mrb[60].mxu1 %vm14257_vm13, %v23269_v48  ;;  %vm17886_vm7 = vmor %vm2420_vm15, %vm2676_vm9  ;;  %v7254_v20 = vsel %vm6998_vm6, %v6870_v52, %v7126_v7  ;;  %v23678_v52 = vld [vmem:[#allocation71_spill] sm:$0xff]  ;;  %vm2428_vm6 = vcmp.eq.s32.totalorder %v15381_v31, %v23679_v18  ;;  %v7128_v7 = vmul.f32 0.01, %v6872_v22  ;;  %v18014_v60 = vadd.s32 200, %v1923_v58 }
 0x2c2   : > { %vm2934_vm11 = vmor %vm2422_vm10, %vm2678_vm8  ;;  %vm2680_vm10 = vcmp.eq.s32.totalorder %v15381_v31, %v17877_v59  ;;  %v7389_v43 = vmul.f32 %v17203_v27, %v7254_v20  ;;  %v6303_v61 = vrot.slane %v5572_v53, %v14776_v2  ;;  %v1937_v21 = vpop.permute.xlu0 %1936 }
 0x2c3   : > { %vm14259_vm14 = vmpackc.low %vm2934_vm11, %vm17886_vm7  ;;  %vm2679_vm7 = vcmp.eq.s32.totalorder %v15372_v0, %v17877_v59  ;;  %vm2681_vm11 = vcmp.eq.s32.totalorder %v15372_v0, %v17875_v19  ;;  %v5582_v19 = vrot.slane %v17973_v14, %v17093_v26  ;;  %v18082_v38 = vadd.s32 200, %v1937_v21 }
 0x2c4   : > { %14260 = vmatprep.mubr.msk.bf16.mxu1 %vm14259_vm14, %v23269_v48  ;;  %vm17919_vm8 = vmor %vm2419_vm1, %vm2675_vm3  ;;  %vm6999_vm3 = vcmp.gt.f32.partialorder %v6871_v41, 0.0  ;;  %vm2423_vm14 = vcmp.eq.s32.totalorder %v15372_v0, %v23672_v6  ;;  %7535 = vadd.xlane.f32.xlu1 %v7389_v43  ;;  %v18012_v6 = vadd.s32 200, %v1930_v17 }
 0x2c5   : > { %vm17926_vm9 = vmor %vm2421_vm12, %vm2677_vm0  ;;  %v7255_v35 = vsel %vm6999_vm3, %v6871_v41, %v7127_v62  ;;  %vm2684_vm12 = vcmp.eq.s32.totalorder %v15381_v31, %v17939_v49  ;;  %v6873_v41 = vadd.f32 %v6299_v54, %v4861_v51  ;;  %v6307_v54 = vrot.slane %v5574_v57, %v14776_v2  ;;  %v23702_v57 = vld [vmem:[#allocation75_spill] sm:$0xff] }
 0x2c6   : > { %vm14261_vm15 = vmpackc.low %vm17926_vm9, %vm17919_vm8  ;;  %v7390_v63 = vmul.f32 %v17203_v27, %v7255_v35  ;;  %vm2430_vm9 = vcmp.eq.s32.totalorder %v15381_v31, %v23678_v52  ;;  %v5590_v17 = vcombine.high %v5582_v19, %v5582_v19  ;;  %v5598_v59 = vrot.slane %v5582_v19, %v17093_v26 }
 0x2c7   : > { %vm17948_vm13 = vmor %vm2424_vm4, %vm2680_vm10  ;;  %vm2686_vm10 = vcmp.eq.s32.totalorder %v15381_v31, %v17937_v13  ;;  %vm7001_vm3 = vcmp.gt.f32.partialorder %v6873_v41, 0.0  ;;  %v7129_v62 = vmul.f32 0.01, %v6873_v41  ;;  %v18080_v19 = vadd.s32 200, %v1944_v36 }
 0x2c8   : > { %vm2938_vm0 = vmor %vm2426_vm5, %vm2682_vm2  ;;  %vm2425_vm2 = vcmp.eq.s32.totalorder %v15372_v0, %v23671_v45  ;;  %7537 = vadd.xlane.f32.xlu0 %v7390_v63  ;;  %v18008_v45 = vpop.f32.mrb[43].mxu0 }
 0x2c9   : > { %14262 = vmatmul.mubr.msk.bf16.gmra.mrb[64].mxu1 %vm14261_vm15, %v23269_v48  ;;  %vm14263_vm1 = vmpackc.low %vm2938_vm0, %vm17948_vm13  ;;  %vm7000_vm15 = vcmp.gt.f32.partialorder %v6872_v22, 0.0  ;;  %23684 = vst [vmem:[#allocation19_spill] sm:$0xff] %v18008_v45  ;;  %v7257_v35 = vsel %vm7001_vm3, %v6873_v41, %v7129_v62  ;;  %v4867_v63 = vpop.f32.mrb[44].mxu0 }
 0x2ca   : > { %14264 = vmatprep.mubr.msk.bf16.mxu1 %vm14263_vm1, %v23269_v48  ;;  %vm17982_vm8 = vmor %vm2423_vm14, %vm2679_vm7  ;;  %v7256_v20 = vsel %vm7000_vm15, %v6872_v22, %v7128_v7  ;;  %vm2683_vm7 = vcmp.eq.s32.totalorder %v15372_v0, %v17939_v49  ;;  %vm2427_vm14 = vcmp.eq.s32.totalorder %v15372_v0, %v23679_v18  ;;  %v7392_v58 = vmul.f32 %v17203_v27, %v7257_v35  ;;  %v18056_v18 = vpop.f32.mrb[45].mxu0 }
 0x2cb   : > { %vm17997_vm5 = vmor %vm2425_vm2, %vm2681_vm11  ;;  %v7391_v43 = vmul.f32 %v17203_v27, %v7256_v20  ;;  %vm2685_vm11 = vcmp.eq.s32.totalorder %v15372_v0, %v17937_v13  ;;  %vm2429_vm2 = vcmp.eq.s32.totalorder %v15372_v0, %v23678_v52  ;;  %v6874_v53 = vadd.f32 %v6303_v61, %v4867_v63  ;;  %23689 = vst [vmem:[#allocation50_spill] sm:$0xff] %v18056_v18  ;;  %v23690_v27 = vld [vmem:[#allocation73_spill] sm:$0xff]  ;;  %v23691_v52 = vld [vmem:[#allocation74_spill] sm:$0xff]  ;;  %v4871_v51 = vpop.f32.mrb[46].mxu0 }
 0x2cc   : > { %vm18004_vm4 = vmor %vm2428_vm6, %vm2684_vm12  ;;  %vm2688_vm12 = vcmp.eq.s32.totalorder %v15381_v31, %v18014_v60  ;;  %vm2432_vm6 = vcmp.eq.s32.totalorder %v15381_v31, %v23691_v52  ;;  %7541 = vadd.xlane.f32.xlu0 %v7392_v58  ;;  %v6875_v7 = vadd.f32 %v6307_v54, %v4871_v51  ;;  %v18077_v41 = vpop.f32.mrb[47].mxu0  ;;  %v5612_v13 = vrot.slane %v5590_v17, %v17093_v26  ;;  %v18101_v54 = vld [vmem:[%s22795_s4] ss:$0 sm:$0xff]  ;;  %v1958_v58 = vpop.permute.xlu1 %1957 }
 0x2cd   : > { %vm18019_vm13 = vmor %vm2430_vm9, %vm2686_vm10  ;;  %7539 = vadd.xlane.f32.xlu1 %v7391_v43  ;;  %vm2690_vm10 = vcmp.eq.s32.totalorder %v15381_v31, %v18012_v6  ;;  %vm2434_vm9 = vcmp.eq.s32.totalorder %v15381_v31, %v23690_v27  ;;  %vm7002_vm15 = vcmp.gt.f32.partialorder %v6874_v53, 0.0  ;;  %v7130_v11 = vmul.f32 0.01, %v6874_v53  ;;  %23696 = vst [vmem:[#allocation49_spill] sm:$0xff] %v18077_v41  ;;  %v4877_v21 = vpop.f32.mrb[48].mxu0 }
 0x2ce   : > { %vm14265_vm0 = vmpackc.low %vm17997_vm5, %vm17982_vm8  ;;  %vm7003_vm3 = vcmp.gt.f32.partialorder %v6875_v7, 0.0  ;;  %v7131_v20 = vmul.f32 0.01, %v6875_v7  ;;  %v6311_v43 = vrot.slane %v5598_v59, %v14776_v2  ;;  %v6315_v17 = vrot.slane %v5612_v13, %v14776_v2  ;;  %v18131_v49 = vpop.f32.mrb[49].mxu0 }
 0x2cf   : > { %vm14267_vm1 = vmpackc.low %vm18019_vm13, %vm18004_vm4  ;;  %v7258_v61 = vsel %vm7002_vm15, %v6874_v53, %v7130_v11  ;;  %v5575_v63 = vcombine.high %v17973_v14, %v17973_v14  ;;  %v1951_v14 = vpop.permute.xlu0 %1950  ;;  %23701 = vst [vmem:[#allocation22_spill] sm:$0xff] %v18131_v49  ;;  %v5620_v51 = vcombine.high %v5598_v59, %v5598_v59  ;;  %v23703_v11 = vld [vmem:[#allocation76_spill] sm:$0xff] }
 0x2d0   : > { %vm18052_vm8 = vmor %vm2427_vm14, %vm2683_vm7  ;;  %vm2687_vm7 = vcmp.eq.s32.totalorder %v15372_v0, %v18014_v60  ;;  %v7393_v35 = vmul.f32 %v18101_v54, %v7258_v61  ;;  %v7259_v36 = vsel %vm7003_vm3, %v6875_v7, %v7131_v20  ;;  %vm2431_vm14 = vcmp.eq.s32.totalorder %v15372_v0, %v23691_v52  ;;  %v4881_v60 = vpop.f32.mrb[50].mxu0  ;;  %v1972_v53 = vpop.permute.xlu1 %1971 }
 0x2d1   : > { %14266 = vmatmul.mubr.msk.bf16.gmra.mrb[68].mxu1 %vm14265_vm0, %v23269_v48  ;;  %vm18066_vm5 = vmor %vm2429_vm2, %vm2685_vm11  ;;  %vm2689_vm11 = vcmp.eq.s32.totalorder %v15372_v0, %v18012_v6  ;;  %v7394_v22 = vmul.f32 %v18101_v54, %v7259_v36  ;;  %vm2433_vm2 = vcmp.eq.s32.totalorder %v15372_v0, %v23690_v27  ;;  %v6876_v52 = vadd.f32 %v6311_v43, %v4877_v21  ;;  %v18151_v61 = vpop.f32.mrb[51].mxu0 }
 0x2d2   : > { %14268 = vmatprep.mubr.msk.bf16.mxu1 %vm14267_vm1, %v23269_v48  ;;  %vm18073_vm4 = vmor %vm2432_vm6, %vm2688_vm12  ;;  %vm2692_vm12 = vcmp.eq.s32.totalorder %v15381_v31, %v18082_v38  ;;  %7543 = vadd.xlane.f32.xlu1 %v7393_v35  ;;  %vm2436_vm6 = vcmp.eq.s32.totalorder %v15381_v31, %v23703_v11  ;;  %v5622_v7 = vcombine.high %v5612_v13, %v5612_v13  ;;  %v18154_v43 = vadd.s32 200, %v1958_v58 }
 0x2d3   : > { %vm18087_vm13 = vmor %vm2434_vm9, %vm2690_vm10  ;;  %vm2694_vm10 = vcmp.eq.s32.totalorder %v15381_v31, %v18080_v19  ;;  %vm2438_vm9 = vcmp.eq.s32.totalorder %v15381_v31, %v23702_v57  ;;  %7545 = vadd.xlane.f32.xlu0 %v7394_v22  ;;  %vm7004_vm15 = vcmp.gt.f32.partialorder %v6876_v52, 0.0  ;;  %v7132_v62 = vmul.f32 0.01, %v6876_v52  ;;  %23708 = vst [vmem:[#allocation21_spill] sm:$0xff] %v18151_v61  ;;  %v1965_v27 = vpop.permute.xlu0 %1964 }
 0x2d4   : > { %vm14269_vm0 = vmpackc.low %vm18066_vm5, %vm18052_vm8  ;;  %v6877_v20 = vadd.f32 %v6315_v17, %v4881_v60  ;;  %v5589_v6 = vrot.slane %v5575_v63, %v17093_v26  ;;  %v18156_v35 = vadd.s32 200, %v1951_v14  ;;  %v6319_v17 = vrot.slane %v5620_v51, %v14776_v2 }
 0x2d5   : > { %vm14271_vm1 = vmpackc.low %vm18087_vm13, %vm18073_vm4  ;;  %v7260_v21 = vsel %vm7004_vm15, %v6876_v52, %v7132_v62  ;;  %v6323_v58 = vrot.slane %v5622_v7, %v14776_v2  ;;  %v4887_v52 = vpop.f32.mrb[52].mxu0  ;;  %v23714_v62 = vld [vmem:[#allocation77_spill] sm:$0xff] }
 0x2d6   : > { %vm18127_vm8 = vmor %vm2431_vm14, %vm2687_vm7  ;;  %vm7005_vm3 = vcmp.gt.f32.partialorder %v6877_v20, 0.0  ;;  %v7133_v36 = vmul.f32 0.01, %v6877_v20  ;;  %vm2691_vm7 = vcmp.eq.s32.totalorder %v15372_v0, %v18082_v38  ;;  %v7395_v63 = vmul.f32 %v18101_v54, %v7260_v21  ;;  %v18198_v7 = vpop.f32.mrb[53].mxu0 }
 0x2d7   : > { %vm18140_vm5 = vmor %vm2433_vm2, %vm2689_vm11  ;;  %vm2693_vm11 = vcmp.eq.s32.totalorder %v15372_v0, %v18080_v19  ;;  %v5591_v14 = vcombine.high %v5589_v6, %v5589_v6  ;;  %vm2435_vm14 = vcmp.eq.s32.totalorder %v15372_v0, %v23703_v11  ;;  %vm2437_vm2 = vcmp.eq.s32.totalorder %v15372_v0, %v23702_v57  ;;  %23713 = vst [vmem:[#allocation52_spill] sm:$0xff] %v18198_v7  ;;  %v23715_v57 = vld [vmem:[#allocation78_spill] sm:$0xff]  ;;  %v1986_v11 = vpop.permute.xlu1 %1985 }
 0x2d8   : > { %vm18147_vm4 = vmor %vm2436_vm6, %vm2692_vm12  ;;  %v7261_v22 = vsel %vm7005_vm3, %v6877_v20, %v7133_v36  ;;  %vm2696_vm12 = vcmp.eq.s32.totalorder %v15381_v31, %v18156_v35  ;;  %7547 = vadd.xlane.f32.xlu1 %v7395_v63  ;;  %v6878_v60 = vadd.f32 %v6319_v17, %v4887_v52  ;;  %v5605_v59 = vrot.slane %v5589_v6, %v17093_v26  ;;  %v4891_v20 = vpop.f32.mrb[54].mxu0 }
 0x2d9   : > { %14270 = vmatmul.mubr.msk.bf16.gmra.mrb[72].mxu1 %vm14269_vm0, %v23269_v48  ;;  %vm18161_vm13 = vmor %vm2438_vm9, %vm2694_vm10  ;;  %v7396_v51 = vmul.f32 %v18101_v54, %v7261_v22  ;;  %vm2698_vm10 = vcmp.eq.s32.totalorder %v15381_v31, %v18154_v43  ;;  %vm2442_vm9 = vcmp.eq.s32.totalorder %v15381_v31, %v23714_v62  ;;  %vm2440_vm6 = vcmp.eq.s32.totalorder %v15381_v31, %v23715_v57  ;;  %v18219_v21 = vpop.f32.mrb[55].mxu0  ;;  %v18269_v22 = vld [vmem:[%s17089_s27 + $0x20] sm:$0xff] }
 0x2da   : > { %14272 = vmatprep.mubr.msk.bf16.mxu1 %vm14271_vm1, %v23269_v48  ;;  %vm14273_vm0 = vmpackc.low %vm18140_vm5, %vm18127_vm8  ;;  %vm7006_vm15 = vcmp.gt.f32.partialorder %v6878_v60, 0.0  ;;  %v7134_v13 = vmul.f32 0.01, %v6878_v60  ;;  %v6879_v36 = vadd.f32 %v6323_v58, %v4891_v20  ;;  %23720 = vst [vmem:[#allocation51_spill] sm:$0xff] %v18219_v21  ;;  %v5619_v19 = vrot.slane %v5591_v14, %v17093_v26  ;;  %v1979_v20 = vpop.permute.xlu0 %1978 }
 0x2db   : > { %vm14275_vm1 = vmpackc.low %vm18161_vm13, %vm18147_vm4  ;;  %7549 = vadd.xlane.f32.xlu0 %v7396_v51  ;;  %v18222_v17 = vadd.s32 200, %v1972_v53  ;;  %v18224_v63 = vadd.s32 200, %v1965_v27  ;;  %v6327_v58 = vrot.slane %v5605_v59, %v14776_v2  ;;  %v5631_v7 = vrot.slane %v18269_v22, %v17093_v26 }
 0x2dc   : > { %vm18194_vm8 = vmor %vm2435_vm14, %vm2691_vm7  ;;  %vm7007_vm3 = vcmp.gt.f32.partialorder %v6879_v36, 0.0  ;;  %v7135_v52 = vmul.f32 0.01, %v6879_v36  ;;  %v7262_v51 = vsel %vm7006_vm15, %v6878_v60, %v7134_v13  ;;  %vm2695_vm7 = vcmp.eq.s32.totalorder %v15372_v0, %v18156_v35  ;;  %v4897_v60 = vpop.f32.mrb[56].mxu0 }
 0x2dd   : > { %vm18208_vm5 = vmor %vm2437_vm2, %vm2693_vm11  ;;  %v7397_v14 = vmul.f32 %v18101_v54, %v7262_v51  ;;  %vm2697_vm11 = vcmp.eq.s32.totalorder %v15372_v0, %v18154_v43  ;;  %v6331_v53 = vrot.slane %v5619_v19, %v14776_v2  ;;  %vm2439_vm14 = vcmp.eq.s32.totalorder %v15372_v0, %v23715_v57  ;;  %v18266_v13 = vpop.f32.mrb[57].mxu0 }
 0x2de   : > { %vm18215_vm4 = vmor %vm2440_vm6, %vm2696_vm12  ;;  %v7263_v27 = vsel %vm7007_vm3, %v6879_v36, %v7135_v52  ;;  %vm2700_vm12 = vcmp.eq.s32.totalorder %v15381_v31, %v18224_v63  ;;  %vm2441_vm2 = vcmp.eq.s32.totalorder %v15372_v0, %v23714_v62  ;;  %v6880_v6 = vadd.f32 %v6327_v58, %v4897_v60  ;;  %23725 = vst [vmem:[#allocation2_spill] sm:$0xff] %v18266_v13  ;;  %v23726_v52 = vld [vmem:[#allocation79_spill] sm:$0xff]  ;;  %v23727_v62 = vld [vmem:[#allocation80_spill] sm:$0xff]  ;;  %v4901_v51 = vpop.f32.mrb[58].mxu0  ;;  %v1993_v57 = vpop.permute.xlu0 %1992 }
 0x2df   : > { %vm18229_vm13 = vmor %vm2442_vm9, %vm2698_vm10  ;;  %7551 = vadd.xlane.f32.xlu1 %v7397_v14  ;;  %v7398_v38 = vmul.f32 %v18101_v54, %v7263_v27  ;;  %vm2702_vm10 = vcmp.eq.s32.totalorder %v15381_v31, %v18222_v17  ;;  %v5621_v36 = vcombine.high %v5605_v59, %v5605_v59  ;;  %vm2446_vm9 = vcmp.eq.s32.totalorder %v15381_v31, %v23726_v52  ;;  %v18289_v27 = vpop.f32.mrb[59].mxu0  ;;  %v2000_v59 = vpop.permute.xlu1 %1999 }
 0x2e0   : > { %vm2444_vm6 = vcmp.eq.s32.totalorder %v15381_v31, %v23727_v62  ;;  %vm7008_vm15 = vcmp.gt.f32.partialorder %v6880_v6, 0.0  ;;  %v7136_v58 = vmul.f32 0.01, %v6880_v6  ;;  %v6881_v14 = vadd.f32 %v6331_v53, %v4901_v51  ;;  %23732 = vst [vmem:[#allocation24_spill] sm:$0xff] %v18289_v27 }
 0x2e1   : > { %14274 = vmatmul.mubr.msk.bf16.gmra.mrb[76].mxu1 %vm14273_vm0, %v23269_v48  ;;  %vm14277_vm0 = vmpackc.low %vm18208_vm5, %vm18194_vm8  ;;  %7553 = vadd.xlane.f32.xlu0 %v7398_v38  ;;  %v5623_v60 = vcombine.high %v5619_v19, %v5619_v19  ;;  %v18291_v43 = vadd.s32 200, %v1986_v11  ;;  %v18293_v13 = vadd.s32 200, %v1979_v20  ;;  %v6335_v51 = vrot.slane %v5621_v36, %v14776_v2  ;;  %v23739_v38 = vld [vmem:[#allocation82_spill] sm:$0xff] }
 0x2e2   : > { %14276 = vmatprep.mubr.msk.bf16.mxu1 %vm14275_vm1, %v23269_v48  ;;  %vm14279_vm1 = vmpackc.low %vm18229_vm13, %vm18215_vm4  ;;  %vm7009_vm3 = vcmp.gt.f32.partialorder %v6881_v14, 0.0  ;;  %v7137_v49 = vmul.f32 0.01, %v6881_v14  ;;  %v7264_v53 = vsel %vm7008_vm15, %v6880_v6, %v7136_v58  ;;  %v4907_v6 = vpop.f32.mrb[60].mxu0  ;;  %v5639_v35 = vcombine.high %v5631_v7, %v5631_v7 }
 0x2e3   : > { %vm18262_vm8 = vmor %vm2439_vm14, %vm2695_vm7  ;;  %vm2699_vm7 = vcmp.eq.s32.totalorder %v15372_v0, %v18224_v63  ;;  %v7399_v19 = vmul.f32 %v18101_v54, %v7264_v53  ;;  %v6339_v11 = vrot.slane %v5623_v60, %v14776_v2  ;;  %v6882_v58 = vadd.f32 %v6335_v51, %v4907_v6 }
 0x2e4   : > { %vm18278_vm5 = vmor %vm2441_vm2, %vm2697_vm11  ;;  %vm2443_vm11 = vcmp.eq.s32.totalorder %v15372_v0, %v23727_v62  ;;  %v7265_v20 = vsel %vm7009_vm3, %v6881_v14, %v7137_v49  ;;  %vm2445_vm2 = vcmp.eq.s32.totalorder %v15372_v0, %v23726_v52  ;;  %v18340_v14 = vpop.f32.mrb[61].mxu0  ;;  %v18343_v60 = vrot.slane %v5631_v7, %v17093_v26  ;;  %v23738_v52 = vld [vmem:[#allocation81_spill] sm:$0xff] }
 0x2e5   : > { %vm18285_vm4 = vmor %vm2444_vm6, %vm2700_vm12  ;;  %vm2704_vm12 = vcmp.eq.s32.totalorder %v15381_v31, %v18293_v13  ;;  %7555 = vadd.xlane.f32.xlu1 %v7399_v19  ;;  %v7400_v36 = vmul.f32 %v18101_v54, %v7265_v20  ;;  %23737 = vst [vmem:[#allocation23_spill] sm:$0xff] %v18340_v14  ;;  %vm2448_vm6 = vcmp.eq.s32.totalorder %v15381_v31, %v23739_v38  ;;  %v4911_v62 = vpop.f32.mrb[62].mxu0  ;;  %v18356_v53 = vadd.s32 200, %v1993_v57 }
 0x2e6   : > { %vm18298_vm13 = vmor %vm2446_vm9, %vm2702_vm10  ;;  %vm2706_vm10 = vcmp.eq.s32.totalorder %v15381_v31, %v18291_v43  ;;  %vm2450_vm9 = vcmp.eq.s32.totalorder %v15381_v31, %v23738_v52  ;;  %vm7010_vm15 = vcmp.gt.f32.partialorder %v6882_v58, 0.0  ;;  %v7138_v51 = vmul.f32 0.01, %v6882_v58  ;;  %v18365_v20 = vpop.f32.mrb[63].mxu0 }
 0x2e7   : > { %vm14283_vm14 = vmpackc.low %vm18298_vm13, %vm18285_vm4  ;;  %7557 = vadd.xlane.f32.xlu0 %v7400_v36  ;;  %v6883_v19 = vadd.f32 %v6339_v11, %v4911_v62  ;;  %23744 = vst [vmem:[#allocation54_spill] sm:$0xff] %v18365_v20  ;;  %v18377_v6 = vrot.slane %v5639_v35, %v17093_v26  ;;  %v6343_v11 = vrot.slane %v18343_v60, %v14776_v2  ;;  %v2014_v35 = vpop.permute.xlu1 %2013 }
 0x2e8   : > { %vm18361_vm4 = vmor %vm2448_vm6, %vm2704_vm12  ;;  %v7266_v14 = vsel %vm7010_vm15, %v6882_v58, %v7138_v51  ;;  %v2007_v58 = vpop.permute.xlu0 %2006  ;;  %v18400_v63 = vpop.f32.mrb[0].mxu1  ;;  %v5624_v18 = vcombine.high %v18269_v22, %v18269_v22  ;;  %v18463_v55 = vadd.s32 200, %v2014_v35 }
 0x2e9   : > { %14278 = vmatmul.mubr.msk.bf16.gmra.mrb[80].mxu1 %vm14277_vm0, %v23269_v48  ;;  %vm14281_vm0 = vmpackc.low %vm18278_vm5, %vm18262_vm8  ;;  %vm7011_vm3 = vcmp.gt.f32.partialorder %v6883_v19, 0.0  ;;  %v7139_v36 = vmul.f32 0.01, %v6883_v19  ;;  %v6347_v62 = vrot.slane %v18377_v6, %v14776_v2  ;;  %v18423_v22 = vpop.f32.mrb[1].mxu1  ;;  %v5671_v20 = vcombine.high %v18377_v6, %v18377_v6 }
 0x2ea   : > { %14280 = vmatprep.mubr.msk.bf16.mxu1 %vm14279_vm1, %v23269_v48  ;;  %vm2701_vm1 = vcmp.eq.s32.totalorder %v15372_v0, %v18222_v17  ;;  %vm18336_vm8 = vmor %vm2443_vm11, %vm2699_vm7  ;;  %v18367_v17 = vadd.s32 200, %v2000_v59  ;;  %vm2703_vm7 = vcmp.eq.s32.totalorder %v15372_v0, %v18293_v13  ;;  %v7401_v59 = vmul.f32 %v18101_v54, %v7266_v14  ;;  %v4917_v14 = vpop.f32.mrb[64].mxu0  ;;  %23750 = vst [vmem:[#allocation26_spill] sm:$0xff] %v18423_v22 }
 0x2eb   : > { %vm18352_vm5 = vmor %vm2445_vm2, %vm2701_vm1  ;;  %vm2447_vm11 = vcmp.eq.s32.totalorder %v15372_v0, %v23739_v38  ;;  %vm2705_vm1 = vcmp.eq.s32.totalorder %v15372_v0, %v18291_v43  ;;  %v7267_v49 = vsel %vm7011_vm3, %v6883_v19, %v7139_v36  ;;  %vm2449_vm2 = vcmp.eq.s32.totalorder %v15372_v0, %v23738_v52  ;;  %v18421_v57 = vpop.f32.mrb[65].mxu0  ;;  %v23751_v36 = vld [vmem:[#allocation84_spill] sm:$0xff] }
 0x2ec   : > { %vm18372_vm13 = vmor %vm2450_vm9, %vm2706_vm10  ;;  %7559 = vadd.xlane.f32.xlu1 %v7401_v59  ;;  %v7402_v51 = vmul.f32 %v18101_v54, %v7267_v49  ;;  %vm2710_vm10 = vcmp.eq.s32.totalorder %v15381_v31, %v18367_v17  ;;  %v6884_v19 = vadd.f32 %v6343_v11, %v4917_v14  ;;  %23749 = vst [vmem:[#allocation53_spill] sm:$0xff] %v18421_v57  ;;  %v4921_v38 = vpop.f32.mrb[66].mxu0  ;;  %v18436_v11 = vpop.f32.mrb[2].mxu1  ;;  %v23754_v59 = vld [vmem:[#allocation83_spill] sm:$0xff]  ;;  %v18447_v49 = vadd.s32 200, %v2007_v58 }
 0x2ed   : > { %vm14287_vm12 = vmpackc.low %vm18372_vm13, %vm18361_vm4  ;;  %v5669_v52 = vcombine.high %v18343_v60, %v18343_v60  ;;  %vm2452_vm9 = vcmp.eq.s32.totalorder %v15381_v31, %v23751_v36  ;;  %v18456_v22 = vpop.f32.mrb[67].mxu0  ;;  %v18458_v57 = vpop.f32.mrb[3].mxu1  ;;  %v5638_v27 = vrot.slane %v5624_v18, %v17093_v26  ;;  %vm2707_vm3 = vcmp.eq.s32.totalorder %v15372_v0, %v18356_v53 }
 0x2ee   : > { %vm18432_vm6 = vmor %vm2449_vm2, %vm2705_vm1  ;;  %7561 = vadd.xlane.f32.xlu0 %v7402_v51  ;;  %vm7012_vm15 = vcmp.gt.f32.partialorder %v6884_v19, 0.0  ;;  %v7140_v43 = vmul.f32 0.01, %v6884_v19  ;;  %v6885_v51 = vadd.f32 %v6347_v62, %v4921_v38  ;;  %23759 = vst [vmem:[#allocation25_spill] sm:$0xff] %v18456_v22  ;;  %vm2451_vm1 = vcmp.eq.s32.totalorder %v15372_v0, %v23751_v36  ;;  %v2028_v18 = vpop.permute.xlu1 %2027  ;;  %v2021_v6 = vpop.permute.xlu0 %2020 }
 0x2ef   : > { %23760 = vst [vmem:[#allocation56_spill] sm:$0xff] %v18458_v57  ;;  %v6351_v29 = vrot.slane %v5669_v52, %v14776_v2  ;;  %vm2712_vm2 = vcmp.eq.s32.totalorder %v15381_v31, %v18447_v49  ;;  %v6355_v52 = vrot.slane %v5671_v20, %v14776_v2  ;;  %v5640_v38 = vcombine.high %v5638_v27, %v5638_v27 }
 0x2f0   : > { %v7268_v58 = vsel %vm7012_vm15, %v6884_v19, %v7140_v43  ;;  %v7141_v62 = vmul.f32 0.01, %v6885_v51  ;;  %v18549_v22 = vadd.s32 200, %v2028_v18 }
 0x2f1   : > { %14282 = vmatmul.mubr.msk.bf16.gmra.mrb[84].mxu1 %vm14281_vm0, %v23269_v48  ;;  %vm14285_vm0 = vmpackc.low %vm18352_vm5, %vm18336_vm8  ;;  %vm2454_vm5 = vcmp.eq.s32.totalorder %v15381_v31, %v23754_v59  ;;  %v7403_v35 = vmul.f32 %v18101_v54, %v7268_v58  ;;  %v18508_v58 = vrot.slane %v5638_v27, %v17093_v26 }
 0x2f2   : > { %14284 = vmatprep.mubr.msk.bf16.mxu1 %vm14283_vm14, %v23269_v48  ;;  %vm2708_vm14 = vcmp.eq.s32.totalorder %v15381_v31, %v18356_v53  ;;  %vm18417_vm8 = vmor %vm2447_vm11, %vm2703_vm7  ;;  %vm2453_vm11 = vcmp.eq.s32.totalorder %v15372_v0, %v23754_v59  ;;  %v18487_v19 = vpop.f32.mrb[4].mxu1  ;;  %v18533_v59 = vadd.s32 200, %v2021_v6  ;;  %v2042_v18 = vpop.permute.xlu1 %2041 }
 0x2f3   : > { %vm18443_vm4 = vmor %vm2452_vm9, %vm2708_vm14  ;;  %vm2709_vm14 = vcmp.eq.s32.totalorder %v15372_v0, %v18367_v17  ;;  %7563 = vadd.xlane.f32.xlu1 %v7403_v35  ;;  %v18504_v20 = vpop.f32.mrb[5].mxu1  ;;  %v23768_v35 = vld [vmem:[#allocation85_spill] sm:$0xff]  ;;  %v6359_v6 = vrot.slane %v18508_v58, %v14776_v2 }
 0x2f4   : > { %vm18452_vm13 = vmor %vm2454_vm5, %vm2710_vm10  ;;  %vm2714_vm10 = vcmp.eq.s32.totalorder %v15381_v31, %v18463_v55  ;;  %23764 = vst [vmem:[#allocation27_spill] sm:$0xff] %v18504_v20  ;;  %v18522_v36 = vpop.f32.mrb[6].mxu1  ;;  %vm2458_vm5 = vcmp.eq.s32.totalorder %v15381_v31, %v23768_v35 }
 0x2f5   : > { %vm14289_vm7 = vmpackc.low %vm18432_vm6, %vm18417_vm8  ;;  %v18544_v57 = vpop.f32.mrb[7].mxu1 }
 0x2f6   : > { %vm18498_vm8 = vmor %vm2451_vm1, %vm2707_vm3  ;;  %23774 = vst [vmem:[#allocation58_spill] sm:$0xff] %v18544_v57  ;;  %vm2711_vm3 = vcmp.eq.s32.totalorder %v15372_v0, %v18447_v49  ;;  %vm2713_vm1 = vcmp.eq.s32.totalorder %v15372_v0, %v18463_v55 }
 0x2f7   : > { %v4927_v7 = vpop.f32.mrb[68].mxu0  ;;  %vm18518_vm6 = vmor %vm2453_vm11, %vm2709_vm14  ;;  %vm2457_vm11 = vcmp.eq.s32.totalorder %v15372_v0, %v23768_v35 }
 0x2f8   : > { %v6886_v43 = vadd.f32 %v6351_v29, %v4927_v7  ;;  %v18502_v14 = vpop.f32.mrb[69].mxu0 }
 0x2f9   : > { %14286 = vmatmul.mubr.msk.bf16.gmra.mrb[88].mxu1 %vm14285_vm0, %v23269_v48  ;;  %vm7013_vm0 = vcmp.gt.f32.partialorder %v6885_v51, 0.0  ;;  %23763 = vst [vmem:[#allocation55_spill] sm:$0xff] %v18502_v14  ;;  %v4931_v53 = vpop.f32.mrb[70].mxu0  ;;  %v18547_v14 = vrot.slane %v5640_v38, %v17093_v26  ;;  %v2035_v38 = vpop.permute.xlu0 %2034 }
 0x2fa   : > { %14288 = vmatprep.mubr.msk.bf16.mxu1 %vm14287_vm12, %v23269_v48  ;;  %vm14291_vm12 = vmpackc.low %vm18452_vm13, %vm18443_vm4  ;;  %v7269_v13 = vsel %vm7013_vm0, %v6885_v51, %v7141_v62  ;;  %v23765_v62 = vld [vmem:[#allocation86_spill] sm:$0xff]  ;;  %vm7014_vm15 = vcmp.gt.f32.partialorder %v6886_v43, 0.0  ;;  %v7142_v17 = vmul.f32 0.01, %v6886_v43  ;;  %v18542_v20 = vpop.f32.mrb[71].mxu0  ;;  %v18620_v35 = vadd.s32 200, %v2035_v38 }
 0x2fb   : > { %v7404_v51 = vmul.f32 %v18101_v54, %v7269_v13  ;;  %vm2456_vm9 = vcmp.eq.s32.totalorder %v15381_v31, %v23765_v62  ;;  %vm18538_vm13 = vmor %vm2458_vm5, %vm2714_vm10  ;;  %v6887_v13 = vadd.f32 %v6355_v52, %v4931_v53  ;;  %23773 = vst [vmem:[#allocation28_spill] sm:$0xff] %v18542_v20  ;;  %v6363_v53 = vrot.slane %v18547_v14, %v14776_v2  ;;  %v23779_v20 = vld [vmem:[#allocation88_spill] sm:$0xff] }
 0x2fc   : > { %vm18529_vm4 = vmor %vm2456_vm9, %vm2712_vm2  ;;  %vm2716_vm2 = vcmp.eq.s32.totalorder %v15381_v31, %v18533_v59  ;;  %vm2718_vm10 = vcmp.eq.s32.totalorder %v15381_v31, %v18549_v22  ;;  %vm2460_vm9 = vcmp.eq.s32.totalorder %v15381_v31, %v23779_v20  ;;  %v5672_v37 = vcombine.high %v18547_v14, %v18547_v14  ;;  %v2056_v14 = vpop.permute.xlu1 %2055 }
 0x2fd   : > { %7565 = vadd.xlane.f32.xlu0 %v7404_v51  ;;  %v7270_v51 = vsel %vm7014_vm15, %v6886_v43, %v7142_v17  ;;  %vm7015_vm0 = vcmp.gt.f32.partialorder %v6887_v13, 0.0  ;;  %v7143_v52 = vmul.f32 0.01, %v6887_v13  ;;  %vm14295_vm14 = vmpackc.low %vm18538_vm13, %vm18529_vm4  ;;  %v18637_v38 = vadd.s32 200, %v2042_v18  ;;  %v2049_v18 = vpop.permute.xlu0 %2048 }
 0x2fe   : > { %v7405_v60 = vmul.f32 %v18101_v54, %v7270_v51  ;;  %vm18616_vm4 = vmor %vm2460_vm9, %vm2716_vm2  ;;  %vm2720_vm2 = vcmp.eq.s32.totalorder %v15381_v31, %v18620_v35  ;;  %v6371_v49 = vrot.slane %v5672_v37, %v14776_v2  ;;  %v18723_v41 = vadd.s32 200, %v2056_v14 }
 0x2ff   : > { %v7271_v27 = vsel %vm7015_vm0, %v6887_v13, %v7143_v52  ;;  %v5670_v13 = vcombine.high %v18508_v58, %v18508_v58  ;;  %v18595_v52 = vld [vmem:[%s17089_s27 + $0x28] sm:$0xff] }
 0x300   : > { %7567 = vadd.xlane.f32.xlu1 %v7405_v60  ;;  %v7406_v57 = vmul.f32 %v18101_v54, %v7271_v27  ;;  %v2070_v14 = vpop.permute.xlu1 %2069 }
 0x301   : > { %14290 = vmatmul.mubr.msk.bf16.gmra.mrb[92].mxu1 %vm14289_vm7, %v23269_v48  ;;  %vm14293_vm7 = vmpackc.low %vm18518_vm6, %vm18498_vm8  ;;  %v6367_v39 = vrot.slane %v5670_v13, %v14776_v2 }
 0x302   : > { %14292 = vmatprep.mubr.msk.bf16.mxu1 %vm14291_vm12, %v23269_v48  ;;  %vm2455_vm12 = vcmp.eq.s32.totalorder %v15372_v0, %v23765_v62  ;;  %vm18605_vm6 = vmor %vm2457_vm11, %vm2713_vm1  ;;  %7569 = vadd.xlane.f32.xlu0 %v7406_v57  ;;  %v5680_v57 = vrot.slane %v18595_v52, %v17093_v26  ;;  %vm2459_vm1 = vcmp.eq.s32.totalorder %v15372_v0, %v23779_v20 }
 0x303   : > { %v4937_v43 = vpop.f32.mrb[72].mxu0  ;;  %vm18583_vm8 = vmor %vm2455_vm12, %vm2711_vm3  ;;  %vm2715_vm3 = vcmp.eq.s32.totalorder %v15372_v0, %v18533_v59 }
 0x304   : > { %v18574_v29 = vpop.f32.mrb[8].mxu1  ;;  %v6888_v17 = vadd.f32 %v6359_v6, %v4937_v43  ;;  %v18587_v7 = vpop.f32.mrb[73].mxu0  ;;  %v23782_v43 = vld [vmem:[#allocation87_spill] sm:$0xff] }
 0x305   : > { %23777 = vst [vmem:[#allocation57_spill] sm:$0xff] %v18587_v7  ;;  %v18589_v51 = vpop.f32.mrb[9].mxu1  ;;  %v4941_v6 = vpop.f32.mrb[74].mxu0  ;;  %vm2462_vm5 = vcmp.eq.s32.totalorder %v15381_v31, %v23782_v43  ;;  %vm2461_vm11 = vcmp.eq.s32.totalorder %v15372_v0, %v23782_v43  ;;  %v18707_v43 = vadd.s32 200, %v2049_v18 }
 0x306   : > { %23778 = vst [vmem:[#allocation30_spill] sm:$0xff] %v18589_v51  ;;  %v18609_v60 = vpop.f32.mrb[10].mxu1  ;;  %vm7016_vm15 = vcmp.gt.f32.partialorder %v6888_v17, 0.0  ;;  %v7144_v55 = vmul.f32 0.01, %v6888_v17  ;;  %vm18625_vm13 = vmor %vm2462_vm5, %vm2718_vm10  ;;  %v6889_v51 = vadd.f32 %v6363_v53, %v4941_v6  ;;  %v18629_v7 = vpop.f32.mrb[75].mxu0  ;;  %vm2722_vm10 = vcmp.eq.s32.totalorder %v15381_v31, %v18637_v38 }
 0x307   : > { %23787 = vst [vmem:[#allocation29_spill] sm:$0xff] %v18629_v7  ;;  %v18631_v21 = vpop.f32.mrb[11].mxu1  ;;  %vm14299_vm12 = vmpackc.low %vm18625_vm13, %vm18616_vm4 }
 0x308   : > { %23788 = vst [vmem:[#allocation60_spill] sm:$0xff] %v18631_v21  ;;  %v7272_v61 = vsel %vm7016_vm15, %v6888_v17, %v7144_v55  ;;  %vm7017_vm0 = vcmp.gt.f32.partialorder %v6889_v51, 0.0  ;;  %v7145_v53 = vmul.f32 0.01, %v6889_v51  ;;  %v5688_v55 = vcombine.high %v5680_v57, %v5680_v57  ;;  %v23793_v21 = vld [vmem:[#allocation90_spill] sm:$0xff] }
 0x309   : > { %14294 = vmatmul.mubr.msk.bf16.gmra.mrb[96].mxu1 %vm14293_vm7, %v23269_v48  ;;  %vm14297_vm7 = vmpackc.low %vm18605_vm6, %vm18583_vm8  ;;  %v7407_v62 = vmul.f32 %v18101_v54, %v7272_v61  ;;  %vm2464_vm9 = vcmp.eq.s32.totalorder %v15381_v31, %v23793_v21 }
 0x30a   : > { %14296 = vmatprep.mubr.msk.bf16.mxu1 %vm14295_vm14, %v23269_v48  ;;  %vm2717_vm14 = vcmp.eq.s32.totalorder %v15372_v0, %v18549_v22  ;;  %v7273_v6 = vsel %vm7017_vm0, %v6889_v51, %v7145_v53  ;;  %vm18672_vm8 = vmor %vm2459_vm1, %vm2715_vm3  ;;  %v18682_v53 = vrot.slane %v5680_v57, %v17093_v26  ;;  %v18721_v7 = vrot.slane %v5688_v55, %v17093_v26  ;;  %v2063_v55 = vpop.permute.xlu0 %2062 }
 0x30b   : > { %7571 = vadd.xlane.f32.xlu1 %v7407_v62  ;;  %v7408_v51 = vmul.f32 %v18101_v54, %v7273_v6  ;;  %vm18692_vm6 = vmor %vm2461_vm11, %vm2717_vm14  ;;  %v23796_v62 = vld [vmem:[#allocation89_spill] sm:$0xff]  ;;  %vm2719_vm3 = vcmp.eq.s32.totalorder %v15372_v0, %v18620_v35  ;;  %vm2463_vm1 = vcmp.eq.s32.totalorder %v15372_v0, %v23793_v21  ;;  %vm2721_vm14 = vcmp.eq.s32.totalorder %v15372_v0, %v18637_v38 }
 0x30c   : > { %vm2466_vm5 = vcmp.eq.s32.totalorder %v15381_v31, %v23796_v62  ;;  %vm18703_vm4 = vmor %vm2464_vm9, %vm2720_vm2  ;;  %v6375_v18 = vrot.slane %v18682_v53, %v14776_v2  ;;  %vm2465_vm11 = vcmp.eq.s32.totalorder %v15372_v0, %v23796_v62  ;;  %vm2724_vm2 = vcmp.eq.s32.totalorder %v15381_v31, %v18707_v43 }
 0x30d   : > { %v4947_v17 = vpop.f32.mrb[76].mxu0  ;;  %7573 = vadd.xlane.f32.xlu0 %v7408_v51  ;;  %vm18712_vm13 = vmor %vm2466_vm5, %vm2722_vm10  ;;  %v5673_v57 = vcombine.high %v18595_v52, %v18595_v52  ;;  %vm2726_vm10 = vcmp.eq.s32.totalorder %v15381_v31, %v18723_v41 }
 0x30e   : > { %v6890_v58 = vadd.f32 %v6367_v39, %v4947_v17  ;;  %v18676_v27 = vpop.f32.mrb[77].mxu0 }
 0x30f   : > { %v18661_v13 = vpop.f32.mrb[12].mxu1  ;;  %23791 = vst [vmem:[#allocation59_spill] sm:$0xff] %v18676_v27  ;;  %v4951_v20 = vpop.f32.mrb[78].mxu0  ;;  %v5687_v45 = vrot.slane %v5673_v57, %v17093_v26 }
 0x310   : > { %v18678_v37 = vpop.f32.mrb[13].mxu1  ;;  %vm7018_vm15 = vcmp.gt.f32.partialorder %v6890_v58, 0.0  ;;  %v7146_v22 = vmul.f32 0.01, %v6890_v58  ;;  %v6891_v6 = vadd.f32 %v6371_v49, %v4951_v20  ;;  %v6379_v20 = vrot.slane %v18721_v7, %v14776_v2 }
 0x311   : > { %14298 = vmatmul.mubr.msk.bf16.gmra.mrb[100].mxu1 %vm14297_vm7, %v23269_v48  ;;  %23792 = vst [vmem:[#allocation31_spill] sm:$0xff] %v18678_v37  ;;  %v18696_v59 = vpop.f32.mrb[14].mxu1  ;;  %v18716_v37 = vpop.f32.mrb[79].mxu0  ;;  %vm14301_vm7 = vmpackc.low %vm18692_vm6, %vm18672_vm8 }
 0x312   : > { %14300 = vmatprep.mubr.msk.bf16.mxu1 %vm14299_vm12, %v23269_v48  ;;  %23801 = vst [vmem:[#allocation32_spill] sm:$0xff] %v18716_v37  ;;  %v18718_v27 = vpop.f32.mrb[15].mxu1  ;;  %v7274_v51 = vsel %vm7018_vm15, %v6890_v58, %v7146_v22  ;;  %vm7019_vm0 = vcmp.gt.f32.partialorder %v6891_v6, 0.0  ;;  %v7147_v49 = vmul.f32 0.01, %v6891_v6  ;;  %vm14303_vm12 = vmpackc.low %vm18712_vm13, %vm18703_vm4  ;;  %v23807_v37 = vld [vmem:[#allocation92_spill] sm:$0xff] }
 0x313   : > { %23802 = vst [vmem:[#allocation61_spill] sm:$0xff] %v18718_v27  ;;  %v7409_v61 = vmul.f32 %v18101_v54, %v7274_v51  ;;  %vm18762_vm8 = vmor %vm2463_vm1, %vm2719_vm3  ;;  %vm2468_vm9 = vcmp.eq.s32.totalorder %v15381_v31, %v23807_v37  ;;  %vm2723_vm3 = vcmp.eq.s32.totalorder %v15372_v0, %v18707_v43  ;;  %vm2467_vm1 = vcmp.eq.s32.totalorder %v15372_v0, %v23807_v37 }
 0x314   : > { %v7275_v22 = vsel %vm7019_vm0, %v6891_v6, %v7147_v49  ;;  %v5718_v49 = vcombine.high %v18682_v53, %v18682_v53  ;;  %vm18781_vm6 = vmor %vm2465_vm11, %vm2721_vm14  ;;  %vm2725_vm14 = vcmp.eq.s32.totalorder %v15372_v0, %v18723_v41 }
 0x315   : > { %7575 = vadd.xlane.f32.xlu1 %v7409_v61  ;;  %v7410_v52 = vmul.f32 %v18101_v54, %v7275_v22  ;;  %vm18790_vm4 = vmor %vm2468_vm9, %vm2724_vm2  ;;  %v18794_v61 = vadd.s32 200, %v2063_v55 }
 0x316   : > { %v6383_v23 = vrot.slane %v5718_v49, %v14776_v2 }
 0x317   : > { %v4957_v58 = vpop.f32.mrb[80].mxu0  ;;  %7577 = vadd.xlane.f32.xlu0 %v7410_v52  ;;  %v18810_v52 = vadd.s32 200, %v2070_v14  ;;  %v2077_v14 = vpop.permute.xlu0 %2076  ;;  %vm2728_vm2 = vcmp.eq.s32.totalorder %v15381_v31, %v18794_v61 }
 0x318   : > { %v18748_v39 = vpop.f32.mrb[16].mxu1  ;;  %v6892_v51 = vadd.f32 %v6375_v18, %v4957_v58  ;;  %v18766_v27 = vpop.f32.mrb[81].mxu0  ;;  %v23810_v18 = vld [vmem:[#allocation91_spill] sm:$0xff] }
 0x319   : > { %14302 = vmatmul.mubr.msk.bf16.gmra.mrb[104].mxu1 %vm14301_vm7, %v23269_v48  ;;  %23805 = vst [vmem:[#allocation62_spill] sm:$0xff] %v18766_v27  ;;  %v18768_v6 = vpop.f32.mrb[17].mxu1  ;;  %v4961_v35 = vpop.f32.mrb[82].mxu0  ;;  %vm2470_vm5 = vcmp.eq.s32.totalorder %v15381_v31, %v23810_v18  ;;  %v5720_v27 = vcombine.high %v18721_v7, %v18721_v7  ;;  %vm14305_vm7 = vmpackc.low %vm18781_vm6, %vm18762_vm8  ;;  %vm2469_vm11 = vcmp.eq.s32.totalorder %v15372_v0, %v23810_v18  ;;  %v18882_v18 = vadd.s32 200, %v2077_v14 }
 0x31a   : > { %14304 = vmatprep.mubr.msk.bf16.mxu1 %vm14303_vm12, %v23269_v48  ;;  %23806 = vst [vmem:[#allocation34_spill] sm:$0xff] %v18768_v6  ;;  %vm7020_vm15 = vcmp.gt.f32.partialorder %v6892_v51, 0.0  ;;  %v7148_v38 = vmul.f32 0.01, %v6892_v51  ;;  %vm18799_vm13 = vmor %vm2470_vm5, %vm2726_vm10  ;;  %v6893_v58 = vadd.f32 %v6379_v20, %v4961_v35  ;;  %v18803_v22 = vpop.f32.mrb[18].mxu1  ;;  %v18805_v6 = vpop.f32.mrb[83].mxu0  ;;  %v5689_v35 = vcombine.high %v5687_v45, %v5687_v45 }
 0x31b   : > { %23815 = vst [vmem:[#allocation33_spill] sm:$0xff] %v18805_v6  ;;  %v18812_v55 = vpop.f32.mrb[19].mxu1  ;;  %v2084_v7 = vpop.permute.xlu1 %2083  ;;  %vm14307_vm12 = vmpackc.low %vm18799_vm13, %vm18790_vm4  ;;  %v6387_v49 = vrot.slane %v5720_v27, %v14776_v2  ;;  %vm2730_vm10 = vcmp.eq.s32.totalorder %v15381_v31, %v18810_v52 }
 0x31c   : > { %23816 = vst [vmem:[#allocation63_spill] sm:$0xff] %v18812_v55  ;;  %v7276_v40 = vsel %vm7020_vm15, %v6892_v51, %v7148_v38  ;;  %vm7021_vm0 = vcmp.gt.f32.partialorder %v6893_v58, 0.0  ;;  %v7149_v20 = vmul.f32 0.01, %v6893_v58  ;;  %vm18847_vm8 = vmor %vm2467_vm1, %vm2723_vm3  ;;  %v18898_v6 = vadd.s32 200, %v2084_v7 }
 0x31d   : > { %v7411_v57 = vmul.f32 %v18101_v54, %v7276_v40  ;;  %vm18867_vm6 = vmor %vm2469_vm11, %vm2725_vm14  ;;  %vm2727_vm3 = vcmp.eq.s32.totalorder %v15372_v0, %v18794_v61  ;;  %vm2729_vm1 = vcmp.eq.s32.totalorder %v15372_v0, %v18810_v52 }
 0x31e   : > { %v7277_v21 = vsel %vm7021_vm0, %v6893_v58, %v7149_v20  ;;  %v18857_v58 = vrot.slane %v5687_v45, %v17093_v26  ;;  %v23821_v20 = vld [vmem:[#allocation94_spill] sm:$0xff] }
 0x31f   : > { %7579 = vadd.xlane.f32.xlu1 %v7411_v57  ;;  %v7412_v62 = vmul.f32 %v18101_v54, %v7277_v21  ;;  %vm2472_vm9 = vcmp.eq.s32.totalorder %v15381_v31, %v23821_v20  ;;  %v23824_v57 = vld [vmem:[#allocation93_spill] sm:$0xff]  ;;  %v2098_v7 = vpop.permute.xlu1 %2097 }
 0x320   : > { %v4967_v17 = vpop.f32.mrb[84].mxu0  ;;  %vm2474_vm5 = vcmp.eq.s32.totalorder %v15381_v31, %v23824_v57  ;;  %vm18878_vm4 = vmor %vm2472_vm9, %vm2728_vm2  ;;  %v6391_v14 = vrot.slane %v18857_v58, %v14776_v2  ;;  %vm2473_vm11 = vcmp.eq.s32.totalorder %v15372_v0, %v23824_v57  ;;  %vm2732_vm2 = vcmp.eq.s32.totalorder %v15381_v31, %v18882_v18  ;;  %v18967_v57 = vld [vmem:[%s17089_s27 + $0x30] sm:$0xff] }
 0x321   : > { %14306 = vmatmul.mubr.msk.bf16.gmra.mrb[108].mxu1 %vm14305_vm7, %v23269_v48  ;;  %v18836_v51 = vpop.f32.mrb[20].mxu1  ;;  %v6894_v53 = vadd.f32 %v6383_v23, %v4967_v17  ;;  %v18851_v38 = vpop.f32.mrb[85].mxu0  ;;  %7581 = vadd.xlane.f32.xlu0 %v7412_v62  ;;  %vm18887_vm13 = vmor %vm2474_vm5, %vm2730_vm10  ;;  %vm2734_vm10 = vcmp.eq.s32.totalorder %v15381_v31, %v18898_v6 }
 0x322   : > { %14308 = vmatprep.mubr.msk.bf16.mxu1 %vm14307_vm12, %v23269_v48  ;;  %23819 = vst [vmem:[#allocation64_spill] sm:$0xff] %v18851_v38  ;;  %v18853_v27 = vpop.f32.mrb[21].mxu1  ;;  %v4971_v37 = vpop.f32.mrb[86].mxu0  ;;  %v18896_v38 = vrot.slane %v5689_v35, %v17093_v26  ;;  %vm14309_vm7 = vmpackc.low %vm18867_vm6, %vm18847_vm8  ;;  %vm2471_vm12 = vcmp.eq.s32.totalorder %v15372_v0, %v23821_v20 }
 0x323   : > { %23820 = vst [vmem:[#allocation35_spill] sm:$0xff] %v18853_v27  ;;  %v18871_v43 = vpop.f32.mrb[22].mxu1  ;;  %vm7022_vm15 = vcmp.gt.f32.partialorder %v6894_v53, 0.0  ;;  %v7150_v41 = vmul.f32 0.01, %v6894_v53  ;;  %v6895_v21 = vadd.f32 %v6387_v49, %v4971_v37  ;;  %v18891_v27 = vpop.f32.mrb[87].mxu0  ;;  %vm14311_vm14 = vmpackc.low %vm18887_vm13, %vm18878_vm4 }
 0x324   : > { %23829 = vst [vmem:[#allocation36_spill] sm:$0xff] %v18891_v27  ;;  %v18893_v55 = vpop.f32.mrb[23].mxu1  ;;  %v2091_v35 = vpop.permute.xlu0 %2090  ;;  %v6395_v37 = vrot.slane %v18896_v38, %v14776_v2  ;;  %vm18932_vm8 = vmor %vm2471_vm12, %vm2727_vm3  ;;  %v5721_v46 = vcombine.high %v18896_v38, %v18896_v38  ;;  %vm2731_vm3 = vcmp.eq.s32.totalorder %v15372_v0, %v18882_v18 }
 0x325   : > { %23830 = vst [vmem:[#allocation66_spill] sm:$0xff] %v18893_v55  ;;  %v7278_v62 = vsel %vm7022_vm15, %v6894_v53, %v7150_v41  ;;  %vm7023_vm0 = vcmp.gt.f32.partialorder %v6895_v21, 0.0  ;;  %v7151_v49 = vmul.f32 0.01, %v6895_v21  ;;  %vm18951_vm6 = vmor %vm2473_vm11, %vm2729_vm1  ;;  %vm2733_vm11 = vcmp.eq.s32.totalorder %v15372_v0, %v18898_v6 }
 0x326   : > { %v7413_v40 = vmul.f32 %v18101_v54, %v7278_v62  ;;  %v6403_v20 = vrot.slane %v5721_v46, %v14776_v2  ;;  %v23848_v46 = vld [vmem:[#allocation98_spill] sm:$0xff] }
 0x327   : > { %v7279_v45 = vsel %vm7023_vm0, %v6895_v21, %v7151_v49  ;;  %v5719_v21 = vcombine.high %v18857_v58, %v18857_v58  ;;  %v23835_v49 = vld [vmem:[#allocation96_spill] sm:$0xff]  ;;  %v23851_v58 = vld [vmem:[#allocation97_spill] sm:$0xff] }
 0x328   : > { %v4977_v53 = vpop.f32.mrb[88].mxu0  ;;  %7583 = vadd.xlane.f32.xlu1 %v7413_v40  ;;  %v7414_v55 = vmul.f32 %v18101_v54, %v7279_v45  ;;  %vm2476_vm9 = vcmp.eq.s32.totalorder %v15381_v31, %v23835_v49  ;;  %v18969_v45 = vadd.s32 200, %v2091_v35 }
 0x329   : > { %14310 = vmatmul.mubr.msk.bf16.gmra.mrb[112].mxu1 %vm14309_vm7, %v23269_v48  ;;  %v18923_v23 = vpop.f32.mrb[24].mxu1  ;;  %v6896_v41 = vadd.f32 %v6391_v14, %v4977_v53  ;;  %v18936_v17 = vpop.f32.mrb[89].mxu0  ;;  %v23838_v53 = vld [vmem:[#allocation95_spill] sm:$0xff]  ;;  %vm18962_vm4 = vmor %vm2476_vm9, %vm2732_vm2  ;;  %v6399_v35 = vrot.slane %v5719_v21, %v14776_v2  ;;  %vm2480_vm9 = vcmp.eq.s32.totalorder %v15381_v31, %v23848_v46 }
 0x32a   : > { %14312 = vmatprep.mubr.msk.bf16.mxu1 %vm14311_vm14, %v23269_v48  ;;  %23833 = vst [vmem:[#allocation65_spill] sm:$0xff] %v18936_v17  ;;  %v18938_v62 = vpop.f32.mrb[25].mxu1  ;;  %v4981_v14 = vpop.f32.mrb[90].mxu0  ;;  %vm2478_vm5 = vcmp.eq.s32.totalorder %v15381_v31, %v23838_v53  ;;  %7585 = vadd.xlane.f32.xlu0 %v7414_v55  ;;  %v2226_v55 = vadd.s32 200, %v2098_v7  ;;  %vm14313_vm7 = vmpackc.low %vm18951_vm6, %vm18932_vm8  ;;  %vm2475_vm14 = vcmp.eq.s32.totalorder %v15372_v0, %v23835_v49 }
 0x32b   : > { %23834 = vst [vmem:[#allocation67_spill] sm:$0xff] %v18938_v62  ;;  %v18955_v40 = vpop.f32.mrb[26].mxu1  ;;  %vm7024_vm15 = vcmp.gt.f32.partialorder %v6896_v41, 0.0  ;;  %v7152_v52 = vmul.f32 0.01, %v6896_v41  ;;  %vm18974_vm13 = vmor %vm2478_vm5, %vm2734_vm10  ;;  %v6897_v17 = vadd.f32 %v6395_v37, %v4981_v14  ;;  %v18978_v27 = vpop.f32.mrb[91].mxu0  ;;  %v5729_v14 = vrot.slane %v18967_v57, %v17093_v26 }
 0x32c   : > { %23843 = vst [vmem:[#allocation68_spill] sm:$0xff] %v18978_v27  ;;  %v18980_v25 = vpop.f32.mrb[27].mxu1  ;;  %vm14315_vm1 = vmpackc.low %vm18974_vm13, %vm18962_vm4  ;;  %vm2736_vm12 = vcmp.eq.s32.totalorder %v15381_v31, %v18969_v45  ;;  %vm2477_vm2 = vcmp.eq.s32.totalorder %v15372_v0, %v23838_v53  ;;  %vm2738_vm10 = vcmp.eq.s32.totalorder %v15381_v31, %v2226_v55  ;;  %vm2482_vm5 = vcmp.eq.s32.totalorder %v15381_v31, %v23851_v58  ;;  %v19062_v31 = vld [vmem:[%s22795_s4] ss:$0 sm:$0xff] }
 0x32d   : > { %23844 = vst [vmem:[#allocation69_spill] sm:$0xff] %v18980_v25  ;;  %v7280_v56 = vsel %vm7024_vm15, %v6896_v41, %v7152_v52  ;;  %vm7025_vm0 = vcmp.gt.f32.partialorder %v6897_v17, 0.0  ;;  %v7153_v37 = vmul.f32 0.01, %v6897_v17  ;;  %vm19013_vm8 = vmor %vm2475_vm14, %vm2731_vm3  ;;  %v5737_v53 = vcombine.high %v5729_v14, %v5729_v14 }
 0x32e   : > { %v7415_v38 = vmul.f32 %v18101_v54, %v7280_v56  ;;  %vm19025_vm6 = vmor %vm2477_vm2, %vm2733_vm11  ;;  %vm2479_vm14 = vcmp.eq.s32.totalorder %v15372_v0, %v23848_v46 }
 0x32f   : > { %v7281_v41 = vsel %vm7025_vm0, %v6897_v17, %v7153_v37  ;;  %vm19036_vm4 = vmor %vm2480_vm9, %vm2736_vm12  ;;  %vm2735_vm0 = vcmp.eq.s32.totalorder %v15372_v0, %v18969_v45  ;;  %vm2481_vm12 = vcmp.eq.s32.totalorder %v15372_v0, %v23851_v58 }
 0x330   : > { %7587 = vadd.xlane.f32.xlu1 %v7415_v38  ;;  %v7416_v49 = vmul.f32 %v18101_v54, %v7281_v41  ;;  %vm19046_vm13 = vmor %vm2482_vm5, %vm2738_vm10  ;;  %v5745_v41 = vrot.slane %v5729_v14, %v17093_v26 }
 0x331   : > { %14314 = vmatmul.mubr.msk.bf16.gmra.mrb[116].mxu1 %vm14313_vm7, %v23269_v48  ;;  %v4987_v7 = vpop.f32.mrb[92].mxu0  ;;  %vm14317_vm3 = vmpackc.low %vm19025_vm6, %vm19013_vm8 }
 0x332   : > { %14316 = vmatprep.mubr.msk.bf16.mxu1 %vm14315_vm1, %v23269_v48  ;;  %v6898_v62 = vadd.f32 %v6399_v35, %v4987_v7  ;;  %v19017_v21 = vpop.f32.mrb[93].mxu0  ;;  %7589 = vadd.xlane.f32.xlu0 %v7416_v49  ;;  %vm14319_vm11 = vmpackc.low %vm19046_vm13, %vm19036_vm4  ;;  %vm2737_vm1 = vcmp.eq.s32.totalorder %v15372_v0, %v2226_v55  ;;  %v6407_v14 = vrot.slane %v5745_v41, %v14776_v2 }
 0x333   : > { %23847 = vst [vmem:[#allocation70_spill] sm:$0xff] %v19017_v21  ;;  %v4991_v61 = vpop.f32.mrb[94].mxu0  ;;  %vm2991_vm2 = vmor %vm2479_vm14, %vm2735_vm0 }
 0x334   : > { %v19029_v18 = vpop.f32.mrb[28].mxu1  ;;  %vm7026_vm15 = vcmp.gt.f32.partialorder %v6898_v62, 0.0  ;;  %v7154_v6 = vmul.f32 0.01, %v6898_v62  ;;  %v19042_v35 = vpop.f32.mrb[95].mxu0  ;;  %v6899_v38 = vadd.f32 %v6403_v20, %v4991_v61  ;;  %v5759_v61 = vrot.slane %v5737_v53, %v17093_v26  ;;  %vm2993_vm10 = vmor %vm2481_vm12, %vm2737_vm1 }
 0x335   : > { %v19040_v52 = vpop.f32.mrb[29].mxu1  ;;  %23855 = vst [vmem:[#allocation72_spill] sm:$0xff] %v19042_v35  ;;  %vm14321_vm8 = vmpackc.low %vm2993_vm10, %vm2991_vm2 }
 0x336   : > { %23854 = vst [vmem:[#allocation71_spill] sm:$0xff] %v19040_v52  ;;  %v19050_v7 = vpop.f32.mrb[30].mxu1  ;;  %v7282_v21 = vsel %vm7026_vm15, %v6898_v62, %v7154_v6  ;;  %vm7027_vm7 = vcmp.gt.f32.partialorder %v6899_v38, 0.0  ;;  %v7155_v49 = vmul.f32 0.01, %v6899_v38  ;;  %v6411_v62 = vrot.slane %v5759_v61, %v14776_v2 }
 0x337   : > { %v19053_v25 = vpop.f32.mrb[31].mxu1  ;;  %v7417_v20 = vmul.f32 %v19062_v31, %v7282_v21 }
 0x338   : > { %23858 = vst [vmem:[#allocation73_spill] sm:$0xff] %v19053_v25  ;;  %v7283_v56 = vsel %vm7027_vm7, %v6899_v38, %v7155_v49 }
 0x339   : > { %14318 = vmatmul.mubr.msk.bf16.gmra.mrb[120].mxu1 %vm14317_vm3, %v23269_v48  ;;  %7591 = vadd.xlane.f32.xlu1 %v7417_v20  ;;  %v7418_v45 = vmul.f32 %v19062_v31, %v7283_v56  ;;  %v5767_v20 = vcombine.high %v5745_v41, %v5745_v41 }
 0x33a   : > { %14320 = vmatprep.mubr.msk.bf16.mxu1 %vm14319_vm11, %v23269_v48 }
 0x33b   : > { %7593 = vadd.xlane.f32.xlu0 %v7418_v45 }
 0x33d   : > { %v4997_v21 = vpop.f32.mrb[96].mxu0 }
 0x33e   : > { %v6900_v55 = vadd.f32 %v6407_v14, %v4997_v21  ;;  %v19082_v17 = vpop.f32.mrb[97].mxu0  ;;  %v5769_v21 = vcombine.high %v5759_v61, %v5759_v61 }
 0x33f   : > { %23859 = vst [vmem:[#allocation74_spill] sm:$0xff] %v19082_v17  ;;  %v5001_v53 = vpop.f32.mrb[98].mxu0 }
 0x340   : > { %vm7028_vm9 = vcmp.gt.f32.partialorder %v6900_v55, 0.0  ;;  %v7156_v54 = vmul.f32 0.01, %v6900_v55  ;;  %v19084_v6 = vpop.f32.mrb[32].mxu1  ;;  %v6901_v46 = vadd.f32 %v6411_v62, %v5001_v53  ;;  %v19086_v37 = vpop.f32.mrb[99].mxu0  ;;  %v5722_v62 = vcombine.high %v18967_v57, %v18967_v57 }
 0x341   : > { %23860 = vst [vmem:[#allocation75_spill] sm:$0xff] %v19086_v37  ;;  %14322 = vmatmul.mubr.msk.bf16.gmra.mrb[124].mxu1 %vm14321_vm8, %v23269_v48  ;;  %v19089_v58 = vpop.f32.mrb[33].mxu1  ;;  %v6415_v48 = vrot.slane %v5767_v20, %v14776_v2 }
 0x342   : > { %23861 = vst [vmem:[#allocation76_spill] sm:$0xff] %v19089_v58  ;;  %vm7029_vm6 = vcmp.gt.f32.partialorder %v6901_v46, 0.0  ;;  %v7157_v38 = vmul.f32 0.01, %v6901_v46  ;;  %v19091_v49 = vpop.f32.mrb[34].mxu1  ;;  %v7284_v56 = vsel %vm7028_vm9, %v6900_v55, %v7156_v54  ;;  %v6419_v58 = vrot.slane %v5769_v21, %v14776_v2 }
 0x343   : > { %v19093_v14 = vpop.f32.mrb[35].mxu1  ;;  %v7419_v45 = vmul.f32 %v19062_v31, %v7284_v56  ;;  %v5736_v41 = vrot.slane %v5722_v62, %v17093_v26 }
 0x344   : > { %23862 = vst [vmem:[#allocation77_spill] sm:$0xff] %v19093_v14  ;;  %v7285_v52 = vsel %vm7029_vm6, %v6901_v46, %v7157_v38 }
 0x345   : > { %v7420_v53 = vmul.f32 %v19062_v31, %v7285_v52  ;;  %7595 = vadd.xlane.f32.xlu1 %v7419_v45  ;;  %v5738_v52 = vcombine.high %v5736_v41, %v5736_v41 }
 0x347   : > { %7597 = vadd.xlane.f32.xlu0 %v7420_v53 }
 0x349   : > { %v5007_v25 = vpop.f32.mrb[100].mxu0 }
 0x34a   : > { %v6902_v14 = vadd.f32 %v6415_v48, %v5007_v25  ;;  %v19102_v55 = vpop.f32.mrb[101].mxu0  ;;  %v5752_v25 = vrot.slane %v5736_v41, %v17093_v26  ;;  %v5766_v48 = vrot.slane %v5738_v52, %v17093_v26 }
 0x34b   : > { %23863 = vst [vmem:[#allocation78_spill] sm:$0xff] %v19102_v55  ;;  %v5011_v54 = vpop.f32.mrb[102].mxu0 }
 0x34c   : > { %vm7030_vm5 = vcmp.gt.f32.partialorder %v6902_v14, 0.0  ;;  %v7158_v61 = vmul.f32 0.01, %v6902_v14  ;;  %v19104_v46 = vpop.f32.mrb[36].mxu1  ;;  %v6903_v57 = vadd.f32 %v6419_v58, %v5011_v54  ;;  %v19106_v38 = vpop.f32.mrb[103].mxu0  ;;  %v6423_v54 = vrot.slane %v5752_v25, %v14776_v2 }
 0x34d   : > { %23864 = vst [vmem:[#allocation79_spill] sm:$0xff] %v19106_v38  ;;  %v19108_v56 = vpop.f32.mrb[37].mxu1 }
 0x34e   : > { %23865 = vst [vmem:[#allocation80_spill] sm:$0xff] %v19108_v56  ;;  %vm7031_vm4 = vcmp.gt.f32.partialorder %v6903_v57, 0.0  ;;  %v7159_v20 = vmul.f32 0.01, %v6903_v57  ;;  %v19110_v45 = vpop.f32.mrb[38].mxu1  ;;  %v7286_v21 = vsel %vm7030_vm5, %v6902_v14, %v7158_v61  ;;  %v6427_v56 = vrot.slane %v5766_v48, %v14776_v2 }
 0x34f   : > { %v19113_v62 = vpop.f32.mrb[39].mxu1  ;;  %v7421_v53 = vmul.f32 %v19062_v31, %v7286_v21 }
 0x350   : > { %23866 = vst [vmem:[#allocation81_spill] sm:$0xff] %v19113_v62  ;;  %v7287_v55 = vsel %vm7031_vm4, %v6903_v57, %v7159_v20  ;;  %v5768_v62 = vcombine.high %v5752_v25, %v5752_v25 }
 0x351   : > { %7599 = vadd.xlane.f32.xlu1 %v7421_v53  ;;  %v7422_v58 = vmul.f32 %v19062_v31, %v7287_v55 }
 0x353   : > { %7601 = vadd.xlane.f32.xlu0 %v7422_v58 }
 0x355   : > { %v5017_v17 = vpop.f32.mrb[104].mxu0 }
 0x356   : > { %v6904_v38 = vadd.f32 %v6423_v54, %v5017_v17  ;;  %v19120_v14 = vpop.f32.mrb[105].mxu0 }
 0x357   : > { %23867 = vst [vmem:[#allocation82_spill] sm:$0xff] %v19120_v14  ;;  %v5021_v41 = vpop.f32.mrb[106].mxu0  ;;  %v5770_v14 = vcombine.high %v5766_v48, %v5766_v48 }
 0x358   : > { %vm7032_vm15 = vcmp.gt.f32.partialorder %v6904_v38, 0.0  ;;  %v7160_v61 = vmul.f32 0.01, %v6904_v38  ;;  %v19122_v21 = vpop.f32.mrb[40].mxu1  ;;  %v6905_v52 = vadd.f32 %v6427_v56, %v5021_v41  ;;  %v19124_v57 = vpop.f32.mrb[107].mxu0  ;;  %v5403_v56 = vld [vmem:[%s17089_s27 + $0x38] sm:$0xff]  ;;  %v6431_v41 = vrot.slane %v5768_v62, %v14776_v2 }
 0x359   : > { %23868 = vst [vmem:[#allocation84_spill] sm:$0xff] %v19124_v57  ;;  %v19126_v20 = vpop.f32.mrb[41].mxu1  ;;  %v5778_v57 = vrot.slane %v5403_v56, %v17093_v26  ;;  %v5771_v32 = vcombine.high %v5403_v56, %v5403_v56 }
 0x35a   : > { %23869 = vst [vmem:[#allocation83_spill] sm:$0xff] %v19126_v20  ;;  %vm7033_vm13 = vcmp.gt.f32.partialorder %v6905_v52, 0.0  ;;  %v7161_v55 = vmul.f32 0.01, %v6905_v52  ;;  %v19128_v53 = vpop.f32.mrb[42].mxu1  ;;  %v7288_v58 = vsel %vm7032_vm15, %v6904_v38, %v7160_v61  ;;  %v6435_v20 = vrot.slane %v5770_v14, %v14776_v2 }
 0x35b   : > { %v19130_v17 = vpop.f32.mrb[43].mxu1  ;;  %v7423_v54 = vmul.f32 %v19062_v31, %v7288_v58 }
 0x35c   : > { %23870 = vst [vmem:[#allocation86_spill] sm:$0xff] %v19130_v17  ;;  %v7289_v37 = vsel %vm7033_vm13, %v6905_v52, %v7161_v55 }
 0x35d   : > { %7603 = vadd.xlane.f32.xlu1 %v7423_v54  ;;  %v7424_v35 = vmul.f32 %v19062_v31, %v7289_v37  ;;  %v5786_v37 = vcombine.high %v5778_v57, %v5778_v57 }
 0x35f   : > { %7605 = vadd.xlane.f32.xlu0 %v7424_v35 }
 0x361   : > { %v5027_v27 = vpop.f32.mrb[108].mxu0 }
 0x362   : > { %v6906_v38 = vadd.f32 %v6431_v41, %v5027_v27  ;;  %v19138_v25 = vpop.f32.mrb[109].mxu0  ;;  %v5794_v27 = vrot.slane %v5778_v57, %v17093_v26 }
 0x363   : > { %23871 = vst [vmem:[#allocation85_spill] sm:$0xff] %v19138_v25  ;;  %v5031_v61 = vpop.f32.mrb[110].mxu0  ;;  %v5808_v25 = vrot.slane %v5786_v37, %v17093_v26 }
 0x364   : > { %vm7034_vm3 = vcmp.gt.f32.partialorder %v6906_v38, 0.0  ;;  %v7162_v58 = vmul.f32 0.01, %v6906_v38  ;;  %v19140_v48 = vpop.f32.mrb[44].mxu1  ;;  %v6907_v52 = vadd.f32 %v6435_v20, %v5031_v61  ;;  %v19142_v55 = vpop.f32.mrb[111].mxu0  ;;  %v6439_v61 = vrot.slane %v5794_v27, %v14776_v2 }
 0x365   : > { %23872 = vst [vmem:[#allocation88_spill] sm:$0xff] %v19142_v55  ;;  %v19144_v54 = vpop.f32.mrb[45].mxu1 }
 0x366   : > { %23873 = vst [vmem:[#allocation87_spill] sm:$0xff] %v19144_v54  ;;  %vm7035_vm7 = vcmp.gt.f32.partialorder %v6907_v52, 0.0  ;;  %v7163_v35 = vmul.f32 0.01, %v6907_v52  ;;  %v19146_v62 = vpop.f32.mrb[46].mxu1  ;;  %v7290_v14 = vsel %vm7034_vm3, %v6906_v38, %v7162_v58  ;;  %v6443_v54 = vrot.slane %v5808_v25, %v14776_v2 }
 0x367   : > { %v19149_v41 = vpop.f32.mrb[47].mxu1  ;;  %v7425_v17 = vmul.f32 %v19062_v31, %v7290_v14 }
 0x368   : > { %23874 = vst [vmem:[#allocation90_spill] sm:$0xff] %v19149_v41  ;;  %v7291_v1 = vsel %vm7035_vm7, %v6907_v52, %v7163_v35 }
 0x369   : > { %7607 = vadd.xlane.f32.xlu1 %v7425_v17  ;;  %v7426_v20 = vmul.f32 %v19062_v31, %v7291_v1 }
 0x36b   : > { %7609 = vadd.xlane.f32.xlu0 %v7426_v20  ;;  %v5816_v20 = vcombine.high %v5794_v27, %v5794_v27 }
 0x36d   : > { %v5037_v55 = vpop.f32.mrb[112].mxu0 }
 0x36e   : > { %v6908_v30 = vadd.f32 %v6439_v61, %v5037_v55  ;;  %v19156_v38 = vpop.f32.mrb[113].mxu0  ;;  %v5818_v61 = vcombine.high %v5808_v25, %v5808_v25 }
 0x36f   : > { %23875 = vst [vmem:[#allocation89_spill] sm:$0xff] %v19156_v38  ;;  %v5041_v57 = vpop.f32.mrb[114].mxu0 }
 0x370   : > { %vm7036_vm0 = vcmp.gt.f32.partialorder %v6908_v30, 0.0  ;;  %v7164_v58 = vmul.f32 0.01, %v6908_v30  ;;  %v19158_v41 = vpop.f32.mrb[48].mxu1  ;;  %v6909_v14 = vadd.f32 %v6443_v54, %v5041_v57  ;;  %v19160_v37 = vpop.f32.mrb[115].mxu0  ;;  %v6447_v57 = vrot.slane %v5816_v20, %v14776_v2  ;;  %v5404_v20 = vld [vmem:[%s17089_s27 + $0x40] sm:$0xff] }
 0x371   : > { %23876 = vst [vmem:[#allocation92_spill] sm:$0xff] %v19160_v37  ;;  %v19162_v17 = vpop.f32.mrb[49].mxu1  ;;  %v5785_v37 = vrot.slane %v5771_v32, %v17093_v26 }
 0x372   : > { %23877 = vst [vmem:[#allocation91_spill] sm:$0xff] %v19162_v17  ;;  %vm7037_vm11 = vcmp.gt.f32.partialorder %v6909_v14, 0.0  ;;  %v7165_v1 = vmul.f32 0.01, %v6909_v14  ;;  %v19164_v52 = vpop.f32.mrb[50].mxu1  ;;  %v7292_v35 = vsel %vm7036_vm0, %v6908_v30, %v7164_v58  ;;  %v6451_v17 = vrot.slane %v5818_v61, %v14776_v2 }
 0x373   : > { %v19166_v8 = vpop.f32.mrb[51].mxu1  ;;  %v7427_v55 = vmul.f32 %v19062_v31, %v7292_v35 }
 0x374   : > { %23878 = vst [vmem:[#allocation94_spill] sm:$0xff] %v19166_v8  ;;  %v7293_v38 = vsel %vm7037_vm11, %v6909_v14, %v7165_v1 }
 0x375   : > { %7611 = vadd.xlane.f32.xlu1 %v7427_v55  ;;  %v7428_v54 = vmul.f32 %v19062_v31, %v7293_v38  ;;  %v5787_v38 = vcombine.high %v5785_v37, %v5785_v37 }
 0x377   : > { %7613 = vadd.xlane.f32.xlu0 %v7428_v54  ;;  %v5801_v54 = vrot.slane %v5785_v37, %v17093_v26 }
 0x379   : > { %v5047_v30 = vpop.f32.mrb[116].mxu0  ;;  %v6455_v50 = vrot.slane %v5801_v54, %v14776_v2  ;;  %v5817_v47 = vcombine.high %v5801_v54, %v5801_v54 }
 0x37a   : > { %v6910_v27 = vadd.f32 %v6447_v57, %v5047_v30  ;;  %v19173_v58 = vpop.f32.mrb[117].mxu0 }
 0x37b   : > { %23879 = vst [vmem:[#allocation93_spill] sm:$0xff] %v19173_v58  ;;  %v5051_v8 = vpop.f32.mrb[118].mxu0  ;;  %v5820_v58 = vcombine.high %v5404_v20, %v5404_v20 }
 0x37c   : > { %vm7038_vm1 = vcmp.gt.f32.partialorder %v6910_v27, 0.0  ;;  %v7166_v25 = vmul.f32 0.01, %v6910_v27  ;;  %v19175_v14 = vpop.f32.mrb[52].mxu1  ;;  %v6911_v56 = vadd.f32 %v6451_v17, %v5051_v8  ;;  %v19177_v1 = vpop.f32.mrb[119].mxu0  ;;  %v5815_v8 = vrot.slane %v5787_v38, %v17093_v26 }
 0x37d   : > { %23880 = vst [vmem:[#allocation96_spill] sm:$0xff] %v19177_v1  ;;  %v19179_v35 = vpop.f32.mrb[53].mxu1  ;;  %v5827_v1 = vrot.slane %v5404_v20, %v17093_v26 }
 0x37e   : > { %23881 = vst [vmem:[#allocation95_spill] sm:$0xff] %v19179_v35  ;;  %vm7039_vm14 = vcmp.gt.f32.partialorder %v6911_v56, 0.0  ;;  %v7167_v55 = vmul.f32 0.01, %v6911_v56  ;;  %v19182_v32 = vpop.f32.mrb[54].mxu1  ;;  %v7294_v61 = vsel %vm7038_vm1, %v6910_v27, %v7166_v25  ;;  %v5834_v27 = vrot.slane %v5820_v58, %v17093_v26 }
 0x37f   : > { %v19185_v57 = vpop.f32.mrb[55].mxu1  ;;  %v7429_v30 = vmul.f32 %v19062_v31, %v7294_v61  ;;  %v6459_v37 = vrot.slane %v5815_v8, %v14776_v2  ;;  %v5843_v25 = vrot.slane %v5827_v1, %v17093_v26  ;;  %v5835_v61 = vcombine.high %v5827_v1, %v5827_v1 }
 0x380   : > { %23882 = vst [vmem:[#allocation98_spill] sm:$0xff] %v19185_v57  ;;  %v7295_v17 = vsel %vm7039_vm14, %v6911_v56, %v7167_v55  ;;  %v5876_v57 = vrot.slane %v5405_v33, %v17093_v26  ;;  %v19210_v15 = vrot.slane %v5834_v27, %v17093_v26  ;;  %vm8395_vm14 = vcmask 1041409  }
 0x381   : > { %7615 = vadd.xlane.f32.xlu1 %v7429_v30  ;;  %v7430_v35 = vmul.f32 %v19062_v31, %v7295_v17  ;;  %v5836_v30 = vcombine.high %v5834_v27, %v5834_v27  ;;  %v6471_v58 = vrot.slane %v5843_v25, %v14776_v2  ;;  %v5857_v42 = vrot.slane %v5835_v61, %v17093_v26 }
 0x382   : > { %v5884_v1 = vcombine.high %v5876_v57, %v5876_v57  ;;  %v5865_v34 = vcombine.high %v5843_v25, %v5843_v25  ;;  %v5866_v54 = vcombine.high %v19210_v15, %v19210_v15  ;;  %v19222_v25 = vrot.slane %v5876_v57, %v17093_v26 }
 0x383   : > { %7617 = vadd.xlane.f32.xlu0 %v7430_v35  ;;  %v5867_v5 = vcombine.high %v5857_v42, %v5857_v42  ;;  %v19216_v61 = vrot.slane %v5836_v30, %v17093_v26  ;;  %v6475_v9 = vrot.slane %v5857_v42, %v14776_v2  ;;  %v19233_v42 = vsub.s32 %v15372_v0, %v23572_v28 }
 0x384   : > { %v6479_v57 = vrot.slane %v5865_v34, %v14776_v2 }
 0x385   : > { %v5057_v38 = vpop.f32.mrb[120].mxu0  ;;  %v5868_v27 = vcombine.high %v19216_v61, %v19216_v61  ;;  %23887 = vst [vmem:[#allocation102_spill] sm:$0xff] %v19233_v42  ;;  %v6483_v30 = vrot.slane %v5867_v5, %v14776_v2  ;;  %v6917_v0 = vadd.f32 %v6475_v9, %v18436_v11  ;;  %v6491_v28 = vrot.slane %v19216_v61, %v14776_v2 }
 0x386   : > { %v6912_v56 = vadd.f32 %v6455_v50, %v5057_v38  ;;  %v19197_v55 = vpop.f32.mrb[121].mxu0 }
 0x387   : > { %23883 = vst [vmem:[#allocation97_spill] sm:$0xff] %v19197_v55  ;;  %v5061_v20 = vpop.f32.mrb[122].mxu0  ;;  %v6499_v34 = vrot.slane %v5868_v27, %v14776_v2  ;;  %vm7045_vm6 = vcmp.gt.f32.partialorder %v6917_v0, 0.0  ;;  %v6921_v3 = vadd.f32 %v6491_v28, %v18609_v60 }
 0x388   : > { %vm7040_vm12 = vcmp.gt.f32.partialorder %v6912_v56, 0.0  ;;  %v7168_v17 = vmul.f32 0.01, %v6912_v56  ;;  %v19199_v24 = vpop.f32.mrb[56].mxu1  ;;  %v6913_v35 = vadd.f32 %v6459_v37, %v5061_v20  ;;  %v19201_v44 = vpop.f32.mrb[123].mxu0  ;;  %v5869_v37 = vcombine.high %v5405_v33, %v5405_v33 }
 0x389   : > { %23884 = vst [vmem:[#allocation99_spill] sm:$0xff] %v19201_v44  ;;  %v19205_v10 = vpop.f32.mrb[57].mxu1  ;;  %vm7049_vm13 = vcmp.gt.f32.partialorder %v6921_v3, 0.0 }
 0x38a   : > { %23885 = vst [vmem:[#allocation100_spill] sm:$0xff] %v19205_v10  ;;  %vm7041_vm2 = vcmp.gt.f32.partialorder %v6913_v35, 0.0  ;;  %v7169_v50 = vmul.f32 0.01, %v6913_v35  ;;  %v19207_v38 = vpop.f32.mrb[58].mxu1  ;;  %v7296_v55 = vsel %vm7040_vm12, %v6912_v56, %v7168_v17  ;;  %v5819_v10 = vcombine.high %v5815_v8, %v5815_v8 }
 0x38b   : > { %v19212_v20 = vpop.f32.mrb[59].mxu1  ;;  %v7431_v44 = vmul.f32 %v19062_v31, %v7296_v55  ;;  %v19228_v56 = vrot.slane %v5884_v1, %v17093_v26  ;;  %v6463_v8 = vrot.slane %v5817_v47, %v14776_v2  ;;  %v6916_v55 = vadd.f32 %v6471_v58, %v18400_v63 }
 0x38c   : > { %23886 = vst [vmem:[#allocation101_spill] sm:$0xff] %v19212_v20  ;;  %v7297_v16 = vsel %vm7041_vm2, %v6913_v35, %v7169_v50  ;;  %v6487_v47 = vrot.slane %v19210_v15, %v14776_v2  ;;  %v6467_v17 = vrot.slane %v5819_v10, %v14776_v2  ;;  %v6495_v63 = vrot.slane %v5866_v54, %v14776_v2  ;;  %v5406_v10 = vld [vmem:[%s17089_s27 + $0x50] sm:$0xff] }
 0x38d   : > { %7619 = vadd.xlane.f32.xlu1 %v7431_v44  ;;  %v7432_v33 = vmul.f32 %v19062_v31, %v7297_v16  ;;  %v5914_v44 = vcombine.high %v19222_v25, %v19222_v25  ;;  %v5883_v16 = vrot.slane %v5869_v37, %v17093_v26  ;;  %v5916_v35 = vcombine.high %v19228_v56, %v19228_v56 }
 0x38e   : > { %v7172_v11 = vmul.f32 0.01, %v6916_v55  ;;  %vm7044_vm8 = vcmp.gt.f32.partialorder %v6916_v55, 0.0 }
 0x38f   : > { %7621 = vadd.xlane.f32.xlu0 %v7432_v33  ;;  %v19259_v50 = vrot.slane %v5914_v44, %v14776_v2  ;;  %v19262_v37 = vrot.slane %v5883_v16, %v17093_v26  ;;  %v5885_v61 = vcombine.high %v5883_v16, %v5883_v16  ;;  %v6918_v33 = vadd.f32 %v6479_v57, %v18487_v19 }
 0x390   : > { %v5925_v44 = vrot.slane %v5406_v10, %v17093_v26  ;;  %v6919_v16 = vadd.f32 %v6483_v30, %v18522_v36  ;;  %v7300_v30 = vsel %vm7044_vm8, %v6916_v55, %v7172_v11  ;;  %vm8397_vm8 = vcmask 1042434  }
 0x391   : > { %v5067_v58 = vpop.f32.mrb[124].mxu0  ;;  %v7174_v4 = vmul.f32 0.01, %v6918_v33  ;;  %vm7046_vm5 = vcmp.gt.f32.partialorder %v6918_v33, 0.0 }
 0x392   : > { %v6914_v1 = vadd.f32 %v6463_v8, %v5067_v58  ;;  %v19256_v9 = vpop.f32.mrb[125].mxu0  ;;  %v7173_v8 = vmul.f32 0.01, %v6917_v0  ;;  %v19270_v58 = vrot.slane %v5916_v35, %v14776_v2  ;;  %vm7047_vm4 = vcmp.gt.f32.partialorder %v6919_v16, 0.0 }
 0x393   : > { %23888 = vst [vmem:[#allocation103_spill] sm:$0xff] %v19256_v9  ;;  %v5071_v54 = vpop.f32.mrb[126].mxu0  ;;  %v5933_v55 = vcombine.high %v5925_v44, %v5925_v44  ;;  %v7302_v28 = vsel %vm7046_vm5, %v6918_v33, %v7174_v4 }
 0x394   : > { %vm7042_vm10 = vcmp.gt.f32.partialorder %v6914_v1, 0.0  ;;  %v7170_v27 = vmul.f32 0.01, %v6914_v1  ;;  %v19265_v5 = vpop.f32.mrb[60].mxu1  ;;  %v6915_v15 = vadd.f32 %v6467_v17, %v5071_v54  ;;  %v19267_v20 = vpop.f32.mrb[127].mxu0  ;;  %v19281_v54 = vrot.slane %v5885_v61, %v17093_v26 }
 0x395   : > { %23889 = vst [vmem:[#allocation104_spill] sm:$0xff] %v19267_v20  ;;  %v19273_v9 = vpop.f32.mrb[61].mxu1  ;;  %v7175_v61 = vmul.f32 0.01, %v6919_v16  ;;  %v19319_v33 = vrot.slane %v5933_v55, %v17093_v26 }
 0x396   : > { %23890 = vst [vmem:[#allocation105_spill] sm:$0xff] %v19273_v9  ;;  %vm7043_vm9 = vcmp.gt.f32.partialorder %v6915_v15, 0.0  ;;  %v7171_v19 = vmul.f32 0.01, %v6915_v15  ;;  %v19276_v57 = vpop.f32.mrb[62].mxu1  ;;  %v7298_v12 = vsel %vm7042_vm10, %v6914_v1, %v7170_v27  ;;  %v6920_v9 = vadd.f32 %v6487_v47, %v18574_v29 }
 0x397   : > { %v19283_v35 = vpop.f32.mrb[63].mxu1  ;;  %v7433_v20 = vmul.f32 %v19062_v31, %v7298_v12  ;;  %v5915_v1 = vcombine.high %v19262_v37, %v19262_v37  ;;  %v5918_v27 = vcombine.high %v5406_v10, %v5406_v10  ;;  %v7301_v12 = vsel %vm7045_vm6, %v6917_v0, %v7173_v8 }
 0x398   : > { %23891 = vst [vmem:[#allocation106_spill] sm:$0xff] %v19283_v35  ;;  %v7299_v36 = vsel %vm7043_vm9, %v6915_v15, %v7171_v19  ;;  %v19293_v35 = vrot.slane %v5925_v44, %v17093_v26  ;;  %v7435_v47 = vmul.f32 %v19062_v31, %v7300_v30  ;;  %v7176_v15 = vmul.f32 0.01, %v6920_v9 }
 0x399   : > { %7623 = vadd.xlane.f32.xlu1 %v7433_v20  ;;  %v7434_v17 = vmul.f32 %v19062_v31, %v7299_v36  ;;  %v6922_v20 = vadd.f32 %v6495_v63, %v18661_v13  ;;  %v5917_v10 = vcombine.high %v19281_v54, %v19281_v54  ;;  %vm7048_vm15 = vcmp.gt.f32.partialorder %v6920_v9, 0.0 }
 0x39a   : > { %v19306_v0 = vrot.slane %v5915_v1, %v14776_v2  ;;  %v5932_v11 = vrot.slane %v5918_v27, %v17093_v26  ;;  %v7436_v44 = vmul.f32 %v19062_v31, %v7301_v12  ;;  %v7177_v13 = vmul.f32 0.01, %v6921_v3 }
 0x39b   : > { %7625 = vadd.xlane.f32.xlu0 %v7434_v17  ;;  %v6923_v63 = vadd.f32 %v6499_v34, %v18696_v59  ;;  %v7303_v4 = vsel %vm7047_vm4, %v6919_v16, %v7175_v61  ;;  %v5963_v36 = vcombine.high %v19293_v35, %v19293_v35  ;;  %v7437_v1 = vmul.f32 %v19062_v31, %v7302_v28  ;;  %v5407_v61 = vld [vmem:[%s17089_s27 + $0x58] sm:$0xff] }
 0x39c   : > { %v19302_v60 = vpop.f32.mrb[64].mxu1  ;;  %v7178_v59 = vmul.f32 0.01, %v6922_v20  ;;  %v23894_v34 = vrot.slane %v19222_v25, %v14776_v2  ;;  %v19331_v16 = vrot.slane %v5917_v10, %v14776_v2  ;;  %v7304_v12 = vsel %vm7048_vm15, %v6920_v9, %v7176_v15  ;;  %v19346_v9 = vpop.xlane.xlu0 %7499 }
 0x39d   : > { %v19309_v8 = vpop.f32.mrb[65].mxu1  ;;  %7627 = vadd.xlane.f32.xlu1 %v7435_v47  ;;  %vm7050_vm3 = vcmp.gt.f32.partialorder %v6922_v20, 0.0  ;;  %v5965_v55 = vcombine.high %v19319_v33, %v19319_v33  ;;  %v19338_v47 = vrot.slane %v5932_v11, %v17093_v26  ;;  %v7438_v28 = vmul.f32 %v19062_v31, %v7303_v4  ;;  %23896 = vst [vmem:[#allocation109_spill] sm:$0xff] %v19346_v9 }
 0x39e   : > { %23892 = vst [vmem:[#allocation107_spill] sm:$0xff] %v19309_v8  ;;  %v19315_v17 = vpop.f32.mrb[66].mxu1  ;;  %v6924_v27 = vadd.f32 %v23894_v34, %v18748_v39  ;;  %v23895_v39 = vrot.slane %v19228_v56, %v14776_v2  ;;  %v5934_v10 = vcombine.high %v5932_v11, %v5932_v11  ;;  %v7305_v34 = vsel %vm7049_vm13, %v6921_v3, %v7177_v13 }
 0x39f   : > { %v19323_v30 = vpop.f32.mrb[67].mxu1  ;;  %7629 = vadd.xlane.f32.xlu0 %v7436_v44  ;;  %v7179_v44 = vmul.f32 0.01, %v6923_v63  ;;  %vm7051_vm7 = vcmp.gt.f32.partialorder %v6923_v63, 0.0  ;;  %v19349_v15 = vrot.slane %v5963_v36, %v14776_v2  ;;  %v5974_v19 = vrot.slane %v5407_v61, %v17093_v26 }
 0x3a0   : > { %23893 = vst [vmem:[#allocation108_spill] sm:$0xff] %v19323_v30  ;;  %v6925_v25 = vadd.f32 %v23895_v39, %v18803_v22  ;;  %v7439_v4 = vmul.f32 %v19062_v31, %v7304_v12  ;;  %v6926_v29 = vadd.f32 %v19259_v50, %v18836_v51  ;;  %v7306_v3 = vsel %vm7050_vm3, %v6922_v20, %v7178_v59 }
 0x3a1   : > { %7631 = vadd.xlane.f32.xlu1 %v7437_v1  ;;  %v7180_v1 = vmul.f32 0.01, %v6924_v27  ;;  %vm7052_vm0 = vcmp.gt.f32.partialorder %v6924_v27, 0.0  ;;  %v19361_v11 = vrot.slane %v5965_v55, %v14776_v2  ;;  %v7440_v12 = vmul.f32 %v19062_v31, %v7305_v34  ;;  %v19376_v55 = vpop.xlane.xlu0 %7503 }
 0x3a2   : > { %v7181_v51 = vmul.f32 0.01, %v6925_v25  ;;  %v6927_v50 = vadd.f32 %v19270_v58, %v18871_v43  ;;  %v7307_v59 = vsel %vm7051_vm7, %v6923_v63, %v7179_v44  ;;  %23898 = vst [vmem:[#allocation111_spill] sm:$0xff] %v19376_v55  ;;  %vm7053_vm11 = vcmp.gt.f32.partialorder %v6925_v25, 0.0 }
 0x3a3   : > { %7633 = vadd.xlane.f32.xlu0 %v7438_v28  ;;  %v19371_v28 = vrot.slane %v5934_v10, %v17093_v26  ;;  %v5982_v39 = vcombine.high %v5974_v19, %v5974_v19  ;;  %v5967_v13 = vcombine.high %v5407_v61, %v5407_v61  ;;  %v7441_v34 = vmul.f32 %v19062_v31, %v7306_v3 }
 0x3a4   : > { %v19357_v56 = vpop.f32.mrb[68].mxu1  ;;  %v23900_v43 = vrot.slane %v19262_v37, %v14776_v2  ;;  %v5964_v10 = vcombine.high %v19338_v47, %v19338_v47  ;;  %v7308_v63 = vsel %vm7052_vm0, %v6924_v27, %v7180_v1  ;;  %vm7054_vm1 = vcmp.gt.f32.partialorder %v6926_v29, 0.0 }
 0x3a5   : > { %v19365_v36 = vpop.f32.mrb[69].mxu1  ;;  %7635 = vadd.xlane.f32.xlu1 %v7439_v4  ;;  %v7182_v4 = vmul.f32 0.01, %v6926_v29  ;;  %v5966_v61 = vcombine.high %v19371_v28, %v19371_v28  ;;  %v19391_v44 = vrot.slane %v5974_v19, %v17093_v26  ;;  %v7442_v3 = vmul.f32 %v19062_v31, %v7307_v59 }
 0x3a6   : > { %23897 = vst [vmem:[#allocation110_spill] sm:$0xff] %v19365_v36  ;;  %v19373_v20 = vpop.f32.mrb[70].mxu1  ;;  %v6928_v58 = vadd.f32 %v23900_v43, %v18923_v23  ;;  %v7183_v37 = vmul.f32 0.01, %v6927_v50  ;;  %v23902_v23 = vrot.slane %v19281_v54, %v14776_v2  ;;  %v7309_v1 = vsel %vm7053_vm11, %v6925_v25, %v7181_v51  ;;  %v19416_v51 = vpop.xlane.xlu0 %7505 }
 0x3a7   : > { %v19378_v22 = vpop.f32.mrb[71].mxu1  ;;  %7637 = vadd.xlane.f32.xlu0 %v7440_v12  ;;  %v19394_v12 = vpop.xlane.xlu1 %7501  ;;  %vm7055_vm12 = vcmp.gt.f32.partialorder %v6927_v50, 0.0  ;;  %v19404_v19 = vrot.slane %v5982_v39, %v17093_v26  ;;  %v5981_v59 = vrot.slane %v5967_v13, %v17093_v26  ;;  %v6930_v8 = vadd.f32 %v19306_v0, %v19029_v18  ;;  %23903 = vst [vmem:[#allocation114_spill] sm:$0xff] %v19416_v51 }
 0x3a8   : > { %23899 = vst [vmem:[#allocation112_spill] sm:$0xff] %v19378_v22  ;;  %23901 = vst [vmem:[#allocation113_spill] sm:$0xff] %v19394_v12  ;;  %v6929_v43 = vadd.f32 %v23902_v23, %v18955_v40  ;;  %v7184_v36 = vmul.f32 0.01, %v6928_v58  ;;  %v19411_v40 = vrot.slane %v5964_v10, %v14776_v2  ;;  %v7310_v25 = vsel %vm7054_vm1, %v6926_v29, %v7182_v4 }
 0x3a9   : > { %7639 = vadd.xlane.f32.xlu1 %v7441_v34  ;;  %v7443_v34 = vmul.f32 %v19062_v31, %v7308_v63  ;;  %vm7056_vm2 = vcmp.gt.f32.partialorder %v6928_v58, 0.0  ;;  %v19419_v39 = vrot.slane %v5966_v61, %v14776_v2  ;;  %v7444_v18 = vmul.f32 %v19062_v31, %v7309_v1 }
 0x3aa   : > { %v7185_v10 = vmul.f32 0.01, %v6929_v43  ;;  %v6931_v29 = vadd.f32 %v19331_v16, %v19050_v7  ;;  %v6012_v4 = vcombine.high %v19391_v44, %v19391_v44  ;;  %v7311_v61 = vsel %vm7055_vm12, %v6927_v50, %v7183_v37 }
 0x3ab   : > { %7641 = vadd.xlane.f32.xlu0 %v7442_v3  ;;  %v19426_v0 = vpop.xlane.xlu1 %7507  ;;  %vm7057_vm10 = vcmp.gt.f32.partialorder %v6929_v43, 0.0  ;;  %v7445_v1 = vmul.f32 %v19062_v31, %v7310_v25  ;;  %v7186_v27 = vmul.f32 0.01, %v6930_v8  ;;  %v23907_v7 = vrot.slane %v19293_v35, %v14776_v2 }
 0x3ac   : > { %v19413_v54 = vpop.f32.mrb[72].mxu1  ;;  %23905 = vst [vmem:[#allocation116_spill] sm:$0xff] %v19426_v0  ;;  %v6014_v50 = vcombine.high %v19404_v19, %v19404_v19  ;;  %v7312_v37 = vsel %vm7056_vm2, %v6928_v58, %v7184_v36  ;;  %v7890_v23 = vrot.slane %v19394_v12, %v19233_v42  ;;  %vm7058_vm9 = vcmp.gt.f32.partialorder %v6930_v8, 0.0 }
 0x3ad   : > { %v19423_v63 = vpop.f32.mrb[73].mxu1  ;;  %7643 = vadd.xlane.f32.xlu1 %v7443_v34  ;;  %v5983_v34 = vcombine.high %v5981_v59, %v5981_v59  ;;  %v6932_v16 = vadd.f32 %v23907_v7, %v19084_v6  ;;  %v19452_v25 = vrot.slane %v5981_v59, %v17093_v26  ;;  %vm8399_vm6 = vcmask 1043459  }
 0x3ae   : > { %23904 = vst [vmem:[#allocation115_spill] sm:$0xff] %v19423_v63  ;;  %v19432_v3 = vpop.f32.mrb[74].mxu1  ;;  %v19449_v63 = vpop.xlane.xlu0 %7509  ;;  %v7187_v6 = vmul.f32 0.01, %v6931_v29  ;;  %v23910_v36 = vrot.slane %v19319_v33, %v14776_v2  ;;  %v19462_v7 = vrot.slane %v6012_v4, %v14776_v2  ;;  %v7886_v59 = vrot.slane %v19346_v9, %v19233_v42 }
 0x3af   : > { %v19437_v13 = vpop.f32.mrb[75].mxu1  ;;  %7645 = vadd.xlane.f32.xlu0 %v7444_v18  ;;  %23908 = vst [vmem:[#allocation118_spill] sm:$0xff] %v19449_v63  ;;  %v7446_v18 = vmul.f32 %v19062_v31, %v7311_v61  ;;  %v19455_v35 = vpop.xlane.xlu1 %7511  ;;  %vm7059_vm5 = vcmp.gt.f32.partialorder %v6931_v29, 0.0  ;;  %v19468_v61 = vrot.slane %v5983_v34, %v17093_v26  ;;  %vm8401_vm4 = vcmask 1044484  }
 0x3b0   : > { %23906 = vst [vmem:[#allocation117_spill] sm:$0xff] %v19437_v13  ;;  %23909 = vst [vmem:[#allocation119_spill] sm:$0xff] %v19455_v35  ;;  %v6933_v58 = vadd.f32 %v23910_v36, %v19091_v49  ;;  %v7313_v13 = vsel %vm7057_vm10, %v6929_v43, %v7185_v10  ;;  %v7188_v22 = vmul.f32 0.01, %v6932_v16  ;;  %v6934_v49 = vadd.f32 %v19349_v15, %v19104_v46 }
 0x3b1   : > { %7647 = vadd.xlane.f32.xlu1 %v7445_v1  ;;  %v7447_v1 = vmul.f32 %v19062_v31, %v7312_v37  ;;  %v19474_v33 = vrot.slane %v6014_v50, %v14776_v2  ;;  %v7314_v10 = vsel %vm7058_vm9, %v6930_v8, %v7186_v27  ;;  %v8396_v4 = vsel %vm8395_vm14, %v7890_v23, %v7886_v59  ;;  %v19485_v37 = vld [vmem:[%s17089_s27 + $0x60] sm:$0xff] }
 0x3b2   : > { %v19480_v36 = vpop.xlane.xlu0 %7513  ;;  %vm7060_vm15 = vcmp.gt.f32.partialorder %v6932_v16, 0.0  ;;  %v7448_v46 = vmul.f32 %v19062_v31, %v7313_v13  ;;  %v7189_v50 = vmul.f32 0.01, %v6933_v58  ;;  %v6935_v8 = vadd.f32 %v19361_v11, %v19110_v45 }
 0x3b3   : > { %7649 = vadd.xlane.f32.xlu0 %v7446_v18  ;;  %23911 = vst [vmem:[#allocation120_spill] sm:$0xff] %v19480_v36  ;;  %v19490_v15 = vpop.xlane.xlu1 %7515  ;;  %v6013_v27 = vcombine.high %v19452_v25, %v19452_v25  ;;  %v7315_v59 = vsel %vm7059_vm5, %v6931_v29, %v7187_v6  ;;  %v7894_v34 = vrot.slane %v19376_v55, %v19233_v42  ;;  %vm7061_vm13 = vcmp.gt.f32.partialorder %v6933_v58, 0.0 }
 0x3b4   : > { %v19476_v43 = vpop.f32.mrb[76].mxu1  ;;  %23913 = vst [vmem:[#allocation122_spill] sm:$0xff] %v19490_v15  ;;  %v7190_v45 = vmul.f32 0.01, %v6934_v49  ;;  %v23915_v11 = vrot.slane %v19338_v47, %v14776_v2  ;;  %v6023_v29 = vrot.slane %v19485_v37, %v17093_v26  ;;  %v7316_v6 = vsel %vm7060_vm15, %v6932_v16, %v7188_v22 }
 0x3b5   : > { %v19487_v18 = vpop.f32.mrb[77].mxu1  ;;  %7651 = vadd.xlane.f32.xlu1 %v7447_v1  ;;  %v7898_v12 = vrot.slane %v19416_v51, %v19233_v42  ;;  %vm7062_vm3 = vcmp.gt.f32.partialorder %v6934_v49, 0.0  ;;  %v23918_v47 = vrot.slane %v19371_v28, %v14776_v2  ;;  %v19527_v16 = vrot.slane %v6013_v27, %v14776_v2 }
 0x3b6   : > { %23912 = vst [vmem:[#allocation121_spill] sm:$0xff] %v19487_v18  ;;  %v19496_v23 = vpop.f32.mrb[78].mxu1  ;;  %v7449_v18 = vmul.f32 %v19062_v31, %v7314_v10  ;;  %v6936_v30 = vadd.f32 %v23915_v11, %v19122_v21  ;;  %v19515_v13 = vpop.xlane.xlu0 %7517  ;;  %v6015_v10 = vcombine.high %v19468_v61, %v19468_v61  ;;  %v7191_v21 = vmul.f32 0.01, %v6935_v8 }
 0x3b7   : > { %v19503_v1 = vpop.f32.mrb[79].mxu1  ;;  %7653 = vadd.xlane.f32.xlu0 %v7448_v46  ;;  %23916 = vst [vmem:[#allocation124_spill] sm:$0xff] %v19515_v13  ;;  %v7450_v46 = vmul.f32 %v19062_v31, %v7315_v59  ;;  %v6937_v22 = vadd.f32 %v23918_v47, %v19128_v53  ;;  %v7317_v11 = vsel %vm7061_vm13, %v6933_v58, %v7189_v50  ;;  %vm7063_vm7 = vcmp.gt.f32.partialorder %v6935_v8, 0.0 }
 0x3b8   : > { %23914 = vst [vmem:[#allocation123_spill] sm:$0xff] %v19503_v1  ;;  %v19520_v1 = vpop.xlane.xlu1 %7519  ;;  %v8398_v51 = vsel %vm8397_vm8, %v7894_v34, %v8396_v4  ;;  %v7451_v59 = vmul.f32 %v19062_v31, %v7316_v6  ;;  %v7192_v55 = vmul.f32 0.01, %v6936_v30  ;;  %v6938_v9 = vadd.f32 %v19411_v40, %v19140_v48 }
 0x3b9   : > { %7655 = vadd.xlane.f32.xlu1 %v7449_v18  ;;  %23917 = vst [vmem:[#allocation125_spill] sm:$0xff] %v19520_v1  ;;  %v7902_v18 = vrot.slane %v19426_v0, %v19233_v42  ;;  %v6031_v28 = vcombine.high %v6023_v29, %v6023_v29  ;;  %v7318_v27 = vsel %vm7062_vm3, %v6934_v49, %v7190_v45  ;;  %vm7064_vm0 = vcmp.gt.f32.partialorder %v6936_v30, 0.0 }
 0x3ba   : > { %v8400_v58 = vsel %vm8399_vm6, %v7898_v12, %v8398_v51  ;;  %v19540_v50 = vpop.xlane.xlu0 %7521  ;;  %v19543_v4 = vrot.slane %v6015_v10, %v14776_v2  ;;  %v7452_v6 = vmul.f32 %v19062_v31, %v7317_v11  ;;  %v7193_v48 = vmul.f32 0.01, %v6937_v22 }
 0x3bb   : > { %7657 = vadd.xlane.f32.xlu0 %v7450_v46  ;;  %23919 = vst [vmem:[#allocation126_spill] sm:$0xff] %v19540_v50  ;;  %v6939_v40 = vadd.f32 %v19419_v39, %v19146_v62  ;;  %v6016_v12 = vcombine.high %v19485_v37, %v19485_v37  ;;  %v7319_v49 = vsel %vm7063_vm7, %v6935_v8, %v7191_v21  ;;  %vm7065_vm11 = vcmp.gt.f32.partialorder %v6937_v22, 0.0 }
 0x3bc   : > { %v19536_v53 = vpop.f32.mrb[80].mxu1  ;;  %v19548_v46 = vpop.xlane.xlu1 %7523  ;;  %v19558_v45 = vsel %vm8401_vm4, %v7902_v18, %v8400_v58  ;;  %v19561_v10 = vrot.slane %v6023_v29, %v17093_v26  ;;  %v7453_v11 = vmul.f32 %v19062_v31, %v7318_v27  ;;  %v7194_v62 = vmul.f32 0.01, %v6938_v9 }
 0x3bd   : > { %v19545_v34 = vpop.f32.mrb[81].mxu1  ;;  %7659 = vadd.xlane.f32.xlu1 %v7451_v59  ;;  %23921 = vst [vmem:[#allocation128_spill] sm:$0xff] %v19548_v46  ;;  %v23923_v39 = vrot.slane %v19391_v44, %v14776_v2  ;;  %v19571_v8 = vrot.slane %v6031_v28, %v17093_v26  ;;  %v7320_v21 = vsel %vm7064_vm0, %v6936_v30, %v7192_v55  ;;  %vm7066_vm1 = vcmp.gt.f32.partialorder %v6938_v9, 0.0 }
 0x3be   : > { %23920 = vst [vmem:[#allocation127_spill] sm:$0xff] %v19545_v34  ;;  %v19554_v51 = vpop.f32.mrb[82].mxu1  ;;  %v19576_v18 = vpop.xlane.xlu0 %7525  ;;  %v6061_v59 = vcombine.high %v19561_v10, %v19561_v10  ;;  %v7454_v27 = vmul.f32 %v19062_v31, %v7319_v49  ;;  %v23924_v44 = vrot.slane %v19404_v19, %v14776_v2  ;;  %v6030_v55 = vrot.slane %v6016_v12, %v17093_v26 }
 0x3bf   : > { %v19563_v47 = vpop.f32.mrb[83].mxu1  ;;  %7661 = vadd.xlane.f32.xlu0 %v7452_v6  ;;  %v6940_v37 = vadd.f32 %v23923_v39, %v19158_v41  ;;  %v7195_v41 = vmul.f32 0.01, %v6939_v40  ;;  %v7321_v28 = vsel %vm7065_vm11, %v6937_v22, %v7193_v48  ;;  %vm7067_vm12 = vcmp.gt.f32.partialorder %v6939_v40, 0.0 }
 0x3c0   : > { %23922 = vst [vmem:[#allocation129_spill] sm:$0xff] %v19563_v47  ;;  %v19581_v58 = vpop.xlane.xlu1 %7527  ;;  %v6941_v30 = vadd.f32 %v23924_v44, %v19164_v52  ;;  %v7455_v49 = vmul.f32 %v19062_v31, %v7320_v21  ;;  %v6942_v29 = vadd.f32 %v19462_v7, %v19175_v14  ;;  %v7322_v22 = vsel %vm7066_vm1, %v6938_v9, %v7194_v62  ;;  %v19613_v14 = vld [vmem:[%s22795_s4] ss:$0 sm:$0xff] }
 0x3c1   : > { %7663 = vadd.xlane.f32.xlu1 %v7453_v11  ;;  %v6063_v11 = vcombine.high %v19571_v8, %v19571_v8  ;;  %v7196_v39 = vmul.f32 0.01, %v6940_v37  ;;  %vm7068_vm2 = vcmp.gt.f32.partialorder %v6940_v37, 0.0  ;;  %v7456_v7 = vmul.f32 %v19613_v14, %v7321_v28 }
 0x3c2   : > { %v19603_v12 = vpop.xlane.xlu0 %7529  ;;  %v7197_v62 = vmul.f32 0.01, %v6941_v30  ;;  %v6943_v21 = vadd.f32 %v19474_v33, %v19182_v32  ;;  %v19621_v44 = vrot.slane %v6030_v55, %v17093_v26  ;;  %vm7069_vm10 = vcmp.gt.f32.partialorder %v6941_v30, 0.0 }
 0x3c3   : > { %7665 = vadd.xlane.f32.xlu0 %v7454_v27  ;;  %v19606_v27 = vrot.slane %v6061_v59, %v14776_v2  ;;  %v19627_v48 = vrot.slane %v6063_v11, %v14776_v2  ;;  %v6032_v52 = vcombine.high %v6030_v55, %v6030_v55  ;;  %v7457_v28 = vmul.f32 %v19613_v14, %v7322_v22 }
 0x3c4   : > { %v19598_v19 = vpop.f32.mrb[84].mxu1  ;;  %v19616_v9 = vpop.xlane.xlu1 %7531  ;;  %v7198_v33 = vmul.f32 0.01, %v6942_v29  ;;  %v7918_v55 = vrot.slane %v19490_v15, %v19233_v42  ;;  %v7922_v11 = vrot.slane %v19515_v13, %v19233_v42  ;;  %vm7070_vm9 = vcmp.gt.f32.partialorder %v6942_v29, 0.0 }
 0x3c5   : > { %v19608_v31 = vpop.f32.mrb[85].mxu1  ;;  %7667 = vadd.xlane.f32.xlu1 %v7455_v49  ;;  %23926 = vst [vmem:[#allocation131_spill] sm:$0xff] %v19616_v9  ;;  %v7323_v49 = vsel %vm7067_vm12, %v6939_v40, %v7195_v41  ;;  %v7324_v41 = vsel %vm7068_vm2, %v6940_v37, %v7196_v39  ;;  %v7199_v34 = vmul.f32 0.01, %v6943_v21  ;;  %v19655_v39 = vld [vmem:[%s17089_s27 + $0x68] sm:$0xff]  ;;  %vm7071_vm5 = vcmp.gt.f32.partialorder %v6943_v21, 0.0 }
 0x3c6   : > { %23925 = vst [vmem:[#allocation130_spill] sm:$0xff] %v19608_v31  ;;  %v19623_v59 = vpop.f32.mrb[86].mxu1  ;;  %v23928_v31 = vrot.slane %v19452_v25, %v14776_v2  ;;  %v7458_v22 = vmul.f32 %v19613_v14, %v7323_v49  ;;  %v19661_v49 = vrot.slane %v6032_v52, %v17093_v26  ;;  %v6072_v52 = vrot.slane %v19655_v39, %v17093_v26 }
 0x3c7   : > { %v19629_v6 = vpop.f32.mrb[87].mxu1  ;;  %7669 = vadd.xlane.f32.xlu0 %v7456_v7  ;;  %v19643_v7 = vpop.xlane.xlu0 %7533  ;;  %vm8403_vm11 = vcmask 1045509   ;;  %vm8405_vm2 = vcmask 1046534  }
 0x3c8   : > { %23927 = vst [vmem:[#allocation132_spill] sm:$0xff] %v19629_v6  ;;  %v6944_v40 = vadd.f32 %v23928_v31, %v19199_v24  ;;  %23929 = vst [vmem:[#allocation133_spill] sm:$0xff] %v19643_v7  ;;  %v19646_v32 = vpop.xlane.xlu1 %7535  ;;  %v23931_v24 = vrot.slane %v19468_v61, %v14776_v2  ;;  %v7325_v31 = vsel %vm7069_vm10, %v6941_v30, %v7197_v62 }
 0x3c9   : > { %7671 = vadd.xlane.f32.xlu1 %v7457_v28  ;;  %23930 = vst [vmem:[#allocation134_spill] sm:$0xff] %v19646_v32  ;;  %v7926_v28 = vrot.slane %v19520_v1, %v19233_v42  ;;  %v7459_v6 = vmul.f32 %v19613_v14, %v7324_v41  ;;  %v6062_v61 = vcombine.high %v19621_v44, %v19621_v44 }
 0x3ca   : > { %v6945_v25 = vadd.f32 %v23931_v24, %v19207_v38  ;;  %v7200_v47 = vmul.f32 0.01, %v6944_v40  ;;  %v6946_v38 = vadd.f32 %v19527_v16, %v19265_v5  ;;  %v7326_v30 = vsel %vm7070_vm9, %v6942_v29, %v7198_v33 }
 0x3cb   : > { %7673 = vadd.xlane.f32.xlu0 %v7458_v22  ;;  %v8409_v62 = vsel %vm8395_vm14, %v7922_v11, %v7918_v55  ;;  %v19672_v37 = vpop.xlane.xlu0 %7537  ;;  %vm7072_vm15 = vcmp.gt.f32.partialorder %v6944_v40, 0.0  ;;  %v7460_v5 = vmul.f32 %v19613_v14, %v7325_v31  ;;  %v7930_v16 = vrot.slane %v19540_v50, %v19233_v42 }
 0x3cc   : > { %v19668_v24 = vpop.f32.mrb[88].mxu1  ;;  %23932 = vst [vmem:[#allocation135_spill] sm:$0xff] %v19672_v37  ;;  %v19681_v22 = vpop.xlane.xlu1 %7539  ;;  %v7201_v13 = vmul.f32 0.01, %v6945_v25  ;;  %v6947_v29 = vadd.f32 %v19543_v4, %v19276_v57  ;;  %v7327_v55 = vsel %vm7071_vm5, %v6943_v21, %v7199_v34  ;;  %v8410_v11 = vsel %vm8397_vm8, %v7926_v28, %v8409_v62 }
 0x3cd   : > { %v19676_v41 = vpop.f32.mrb[89].mxu1  ;;  %7675 = vadd.xlane.f32.xlu1 %v7459_v6  ;;  %vm7073_vm13 = vcmp.gt.f32.partialorder %v6945_v25, 0.0  ;;  %v6619_v6 = vrot.slane %v19661_v49, %v14776_v2  ;;  %v7202_v50 = vmul.f32 0.01, %v6946_v38  ;;  %v23935_v57 = vrot.slane %v19561_v10, %v14776_v2 }
 0x3ce   : > { %23933 = vst [vmem:[#allocation136_spill] sm:$0xff] %v19676_v41  ;;  %v19685_v33 = vpop.f32.mrb[90].mxu1  ;;  %v7461_v41 = vmul.f32 %v19613_v14, %v7326_v30  ;;  %v19699_v15 = vrot.slane %v6062_v61, %v14776_v2  ;;  %v7328_v34 = vsel %vm7072_vm15, %v6944_v40, %v7200_v47  ;;  %vm7074_vm3 = vcmp.gt.f32.partialorder %v6946_v38, 0.0 }
 0x3cf   : > { %v19691_v31 = vpop.f32.mrb[91].mxu1  ;;  %7677 = vadd.xlane.f32.xlu0 %v7460_v5  ;;  %v6948_v4 = vadd.f32 %v23935_v57, %v19302_v60  ;;  %v19702_v21 = vpop.xlane.xlu0 %7541  ;;  %v6064_v28 = vcombine.high %v19661_v49, %v19661_v49  ;;  %v6080_v62 = vcombine.high %v6072_v52, %v6072_v52  ;;  %v7462_v30 = vmul.f32 %v19613_v14, %v7327_v55 }
 0x3d0   : > { %23934 = vst [vmem:[#allocation137_spill] sm:$0xff] %v19691_v31  ;;  %v8411_v5 = vsel %vm8399_vm6, %v7930_v16, %v8410_v11  ;;  %v19708_v31 = vpop.xlane.xlu1 %7543  ;;  %v7203_v60 = vmul.f32 0.01, %v6947_v29  ;;  %v23936_v10 = vrot.slane %v19571_v8, %v14776_v2  ;;  %v7329_v40 = vsel %vm7073_vm13, %v6945_v25, %v7201_v13 }
 0x3d1   : > { %7679 = vadd.xlane.f32.xlu1 %v7461_v41  ;;  %v7934_v61 = vrot.slane %v19548_v46, %v19233_v42  ;;  %vm7075_vm7 = vcmp.gt.f32.partialorder %v6947_v29, 0.0  ;;  %v19718_v49 = vrot.slane %v6072_v52, %v17093_v26  ;;  %v7463_v41 = vmul.f32 %v19613_v14, %v7328_v34 }
 0x3d2   : > { %v6949_v47 = vadd.f32 %v23936_v10, %v19315_v17  ;;  %v7204_v16 = vmul.f32 0.01, %v6948_v4  ;;  %v6950_v55 = vadd.f32 %v19606_v27, %v19357_v56  ;;  %v6065_v8 = vcombine.high %v19655_v39, %v19655_v39 }
 0x3d3   : > { %7681 = vadd.xlane.f32.xlu0 %v7462_v30  ;;  %v7330_v13 = vsel %vm7074_vm3, %v6946_v38, %v7202_v50  ;;  %v19728_v25 = vpop.xlane.xlu0 %7545  ;;  %vm7076_vm0 = vcmp.gt.f32.partialorder %v6948_v4, 0.0  ;;  %v6627_v52 = vrot.slane %v6064_v28, %v14776_v2  ;;  %v19732_v11 = vrot.slane %v6080_v62, %v17093_v26 }
 0x3d4   : > { %v19725_v17 = vpop.f32.mrb[92].mxu1  ;;  %v7464_v56 = vmul.f32 %v19613_v14, %v7329_v40  ;;  %v19737_v27 = vpop.xlane.xlu1 %7547  ;;  %v7205_v39 = vmul.f32 0.01, %v6949_v47  ;;  %v6951_v34 = vadd.f32 %v19627_v48, %v19373_v20  ;;  %v7331_v38 = vsel %vm7075_vm7, %v6947_v29, %v7203_v60 }
 0x3d5   : > { %v19734_v57 = vpop.f32.mrb[93].mxu1  ;;  %7683 = vadd.xlane.f32.xlu1 %v7463_v41  ;;  %v19745_v28 = vsel %vm8401_vm4, %v7934_v61, %v8411_v5  ;;  %vm7077_vm1 = vcmp.gt.f32.partialorder %v6949_v47, 0.0  ;;  %v6631_v62 = vrot.slane %v19718_v49, %v14776_v2  ;;  %v7465_v10 = vmul.f32 %v19613_v14, %v7330_v13 }
 0x3d6   : > { %23937 = vst [vmem:[#allocation138_spill] sm:$0xff] %v19734_v57  ;;  %v19741_v50 = vpop.f32.mrb[94].mxu1  ;;  %v7206_v40 = vmul.f32 0.01, %v6950_v55  ;;  %v23939_v20 = vrot.slane %v19621_v44, %v14776_v2  ;;  %v6079_v29 = vrot.slane %v6065_v8, %v17093_v26  ;;  %v7332_v5 = vsel %vm7076_vm0, %v6948_v4, %v7204_v16 }
 0x3d7   : > { %v19749_v30 = vpop.f32.mrb[95].mxu1  ;;  %7685 = vadd.xlane.f32.xlu0 %v7464_v56  ;;  %v19760_v61 = vpop.xlane.xlu0 %7549  ;;  %vm7078_vm12 = vcmp.gt.f32.partialorder %v6950_v55, 0.0  ;;  %v6635_v41 = vrot.slane %v19732_v11, %v14776_v2  ;;  %v7466_v13 = vmul.f32 %v19613_v14, %v7331_v38  ;;  %v7207_v44 = vmul.f32 0.01, %v6951_v34 }
 0x3d8   : > { %23938 = vst [vmem:[#allocation139_spill] sm:$0xff] %v19749_v30  ;;  %v6952_v48 = vadd.f32 %v23939_v20, %v19413_v54  ;;  %23940 = vst [vmem:[#allocation140_spill] sm:$0xff] %v19760_v61  ;;  %v19765_v56 = vpop.xlane.xlu1 %7551  ;;  %v6953_v54 = vadd.f32 %v6619_v6, %v19432_v3  ;;  %v7333_v8 = vsel %vm7077_vm1, %v6949_v47, %v7205_v39  ;;  %vm7079_vm10 = vcmp.gt.f32.partialorder %v6951_v34, 0.0 }
 0x3d9   : > { %7687 = vadd.xlane.f32.xlu1 %v7465_v10  ;;  %v6110_v4 = vcombine.high %v19718_v49, %v19718_v49  ;;  %v7467_v16 = vmul.f32 %v19613_v14, %v7332_v5  ;;  %v23941_v10 = vrot.slane %v19449_v63, %v19233_v42  ;;  %v6954_v3 = vadd.f32 %v19699_v15, %v19476_v43 }
 0x3da   : > { %v7208_v20 = vmul.f32 0.01, %v6952_v48  ;;  %v6081_v6 = vcombine.high %v6079_v29, %v6079_v29  ;;  %v7334_v39 = vsel %vm7078_vm12, %v6950_v55, %v7206_v40  ;;  %vm7080_vm9 = vcmp.gt.f32.partialorder %v6952_v48, 0.0 }
 0x3db   : > { %7689 = vadd.xlane.f32.xlu0 %v7466_v13  ;;  %v8404_v38 = vsel %vm8403_vm11, %v23941_v10, %v19558_v45  ;;  %v19782_v60 = vpop.xlane.xlu0 %7553  ;;  %v6112_v49 = vcombine.high %v19732_v11, %v19732_v11  ;;  %v7468_v45 = vmul.f32 %v19613_v14, %v7333_v8  ;;  %v23944_v43 = vrot.slane %v19455_v35, %v19233_v42 }
 0x3dc   : > { %v19779_v47 = vpop.f32.mrb[96].mxu1  ;;  %23942 = vst [vmem:[#allocation141_spill] sm:$0xff] %v19782_v60  ;;  %v19793_v13 = vpop.xlane.xlu1 %7555  ;;  %v7209_v55 = vmul.f32 0.01, %v6953_v54  ;;  %v6955_v40 = vadd.f32 %v6627_v52, %v19496_v23  ;;  %v7335_v57 = vsel %vm7079_vm10, %v6951_v34, %v7207_v44  ;;  %vm8407_vm5 = vcmask 1047559  }
 0x3dd   : > { %v19786_v5 = vpop.f32.mrb[97].mxu1  ;;  %7691 = vadd.xlane.f32.xlu1 %v7467_v16  ;;  %v8406_v15 = vsel %vm8405_vm2, %v23944_v43, %v8404_v38  ;;  %23945 = vst [vmem:[#allocation143_spill] sm:$0xff] %v19793_v13  ;;  %vm7081_vm15 = vcmp.gt.f32.partialorder %v6953_v54, 0.0  ;;  %v6639_v11 = vrot.slane %v6110_v4, %v14776_v2  ;;  %v6095_v8 = vrot.slane %v6079_v29, %v17093_v26  ;;  %v5410_v16 = vld [vmem:[%s17089_s27 + $0x70] sm:$0xff] }
 0x3de   : > { %23943 = vst [vmem:[#allocation142_spill] sm:$0xff] %v19786_v5  ;;  %v19796_v10 = vpop.f32.mrb[98].mxu1  ;;  %v7469_v38 = vmul.f32 %v19613_v14, %v7334_v39  ;;  %v7210_v43 = vmul.f32 0.01, %v6954_v3  ;;  %v6956_v5 = vadd.f32 %v6631_v62, %v19536_v53  ;;  %v6109_v23 = vrot.slane %v6081_v6, %v17093_v26 }
 0x3df   : > { %v19802_v30 = vpop.f32.mrb[99].mxu1  ;;  %7693 = vadd.xlane.f32.xlu0 %v7468_v45  ;;  %v7336_v52 = vsel %vm7080_vm9, %v6952_v48, %v7208_v20  ;;  %v19810_v44 = vpop.xlane.xlu0 %7557  ;;  %vm7082_vm13 = vcmp.gt.f32.partialorder %v6954_v3, 0.0  ;;  %v6643_v29 = vrot.slane %v6112_v49, %v14776_v2  ;;  %v7470_v4 = vmul.f32 %v19613_v14, %v7335_v57 }
 0x3e0   : > { %23946 = vst [vmem:[#allocation144_spill] sm:$0xff] %v19802_v30  ;;  %v19814_v45 = vpop.xlane.xlu1 %7559  ;;  %v7211_v39 = vmul.f32 0.01, %v6955_v40  ;;  %v6957_v53 = vadd.f32 %v6635_v41, %v19554_v51  ;;  %v6121_v62 = vrot.slane %v5410_v16, %v17093_v26  ;;  %v7337_v48 = vsel %vm7081_vm15, %v6953_v54, %v7209_v55 }
 0x3e1   : > { %7695 = vadd.xlane.f32.xlu1 %v7469_v38  ;;  %vm7083_vm3 = vcmp.gt.f32.partialorder %v6955_v40, 0.0  ;;  %v6647_v20 = vrot.slane %v6095_v8, %v14776_v2  ;;  %v6111_v6 = vcombine.high %v6095_v8, %v6095_v8  ;;  %v7471_v34 = vmul.f32 %v19613_v14, %v7336_v52 }
 0x3e2   : > { %v7212_v49 = vmul.f32 0.01, %v6956_v5  ;;  %v6958_v38 = vadd.f32 %v6639_v11, %v19598_v19  ;;  %v6651_v57 = vrot.slane %v6109_v23, %v14776_v2  ;;  %v7338_v51 = vsel %vm7082_vm13, %v6954_v3, %v7210_v43 }
 0x3e3   : > { %7697 = vadd.xlane.f32.xlu0 %v7470_v4  ;;  %v19826_v41 = vpop.xlane.xlu0 %7561  ;;  %vm7084_vm7 = vcmp.gt.f32.partialorder %v6956_v5, 0.0  ;;  %v6113_v54 = vcombine.high %v6109_v23, %v6109_v23  ;;  %v7472_v8 = vmul.f32 %v19613_v14, %v7337_v48  ;;  %v6114_v4 = vcombine.high %v5410_v16, %v5410_v16 }
 0x3e4   : > { %v19823_v30 = vpop.f32.mrb[100].mxu1  ;;  %v19831_v52 = vpop.xlane.xlu1 %7563  ;;  %v7213_v46 = vmul.f32 0.01, %v6957_v53  ;;  %v6959_v19 = vadd.f32 %v6643_v29, %v19623_v59  ;;  %v6129_v11 = vcombine.high %v6121_v62, %v6121_v62  ;;  %v7339_v3 = vsel %vm7083_vm3, %v6955_v40, %v7211_v39 }
 0x3e5   : > { %v19828_v55 = vpop.f32.mrb[101].mxu1  ;;  %7699 = vadd.xlane.f32.xlu1 %v7471_v34  ;;  %vm7085_vm0 = vcmp.gt.f32.partialorder %v6957_v53, 0.0  ;;  %v6655_v43 = vrot.slane %v6111_v6, %v14776_v2  ;;  %v7473_v34 = vmul.f32 %v19613_v14, %v7338_v51  ;;  %v23949_v16 = vrot.slane %v19480_v36, %v19233_v42  ;;  %v19887_v36 = vld [vmem:[%s17089_s27 + $0x78] sm:$0xff] }
 0x3e6   : > { %23947 = vst [vmem:[#allocation145_spill] sm:$0xff] %v19828_v55  ;;  %v19834_v1 = vpop.f32.mrb[102].mxu1  ;;  %v7214_v59 = vmul.f32 0.01, %v6958_v38  ;;  %v6960_v29 = vadd.f32 %v6647_v20, %v19668_v24  ;;  %v6137_v55 = vrot.slane %v6121_v62, %v17093_v26  ;;  %v7340_v40 = vsel %vm7084_vm7, %v6956_v5, %v7212_v49 }
 0x3e7   : > { %v19838_v23 = vpop.f32.mrb[103].mxu1  ;;  %7701 = vadd.xlane.f32.xlu0 %v7472_v8  ;;  %v19845_v48 = vsel %vm8407_vm5, %v23949_v16, %v8406_v15  ;;  %v19850_v39 = vpop.xlane.xlu0 %7565  ;;  %vm7086_vm1 = vcmp.gt.f32.partialorder %v6958_v38, 0.0  ;;  %v6659_v6 = vrot.slane %v6113_v54, %v14776_v2  ;;  %v6128_v51 = vrot.slane %v6114_v4, %v17093_v26 }
 0x3e8   : > { %23948 = vst [vmem:[#allocation146_spill] sm:$0xff] %v19838_v23  ;;  %23950 = vst [vmem:[#allocation147_spill] sm:$0xff] %v19850_v39  ;;  %v7474_v8 = vmul.f32 %v19613_v14, %v7339_v3  ;;  %v19855_v23 = vpop.xlane.xlu1 %7567  ;;  %v7215_v15 = vmul.f32 0.01, %v6959_v19  ;;  %v6961_v16 = vadd.f32 %v6651_v57, %v19685_v33  ;;  %v6151_v24 = vrot.slane %v6129_v11, %v17093_v26 }
 0x3e9   : > { %7703 = vadd.xlane.f32.xlu1 %v7473_v34  ;;  %v7341_v62 = vsel %vm7085_vm0, %v6957_v53, %v7213_v46  ;;  %vm7087_vm12 = vcmp.gt.f32.partialorder %v6959_v19, 0.0  ;;  %v6159_v20 = vcombine.high %v6137_v55, %v6137_v55  ;;  %v7475_v49 = vmul.f32 %v19613_v14, %v7340_v40 }
 0x3ea   : > { %v7216_v54 = vmul.f32 0.01, %v6960_v29  ;;  %v6962_v4 = vadd.f32 %v6655_v43, %v19725_v17  ;;  %v6663_v3 = vrot.slane %v6137_v55, %v14776_v2  ;;  %v7342_v33 = vsel %vm7086_vm1, %v6958_v38, %v7214_v59 }
 0x3eb   : > { %7705 = vadd.xlane.f32.xlu0 %v7474_v8  ;;  %v19868_v57 = vpop.xlane.xlu0 %7569  ;;  %vm7088_vm10 = vcmp.gt.f32.partialorder %v6960_v29, 0.0  ;;  %v6161_v46 = vcombine.high %v6151_v24, %v6151_v24  ;;  %v6130_v11 = vcombine.high %v6128_v51, %v6128_v51  ;;  %v7476_v40 = vmul.f32 %v19613_v14, %v7341_v62 }
 0x3ec   : > { %v19865_v34 = vpop.f32.mrb[104].mxu1  ;;  %v19873_v8 = vpop.xlane.xlu1 %7571  ;;  %v7217_v17 = vmul.f32 0.01, %v6961_v16  ;;  %v6963_v55 = vadd.f32 %v6659_v6, %v19741_v50  ;;  %v6667_v43 = vrot.slane %v6151_v24, %v14776_v2  ;;  %v7343_v38 = vsel %vm7087_vm12, %v6959_v19, %v7215_v15 }
 0x3ed   : > { %v19870_v53 = vpop.f32.mrb[105].mxu1  ;;  %7707 = vadd.xlane.f32.xlu1 %v7475_v49  ;;  %v7950_v59 = vrot.slane %v19616_v9, %v19233_v42  ;;  %vm7089_vm9 = vcmp.gt.f32.partialorder %v6961_v16, 0.0  ;;  %v7477_v62 = vmul.f32 %v19613_v14, %v7342_v33  ;;  %v7218_v50 = vmul.f32 0.01, %v6962_v4 }
 0x3ee   : > { %23951 = vst [vmem:[#allocation148_spill] sm:$0xff] %v19870_v53  ;;  %v19877_v5 = vpop.f32.mrb[106].mxu1  ;;  %v6671_v53 = vrot.slane %v6159_v20, %v14776_v2  ;;  %v6964_v6 = vadd.f32 %v6663_v3, %v19779_v47  ;;  %v6144_v24 = vrot.slane %v6128_v51, %v17093_v26  ;;  %v7344_v19 = vsel %vm7088_vm10, %v6960_v29, %v7216_v54 }
 0x3ef   : > { %v19883_v49 = vpop.f32.mrb[107].mxu1  ;;  %7709 = vadd.xlane.f32.xlu0 %v7476_v40  ;;  %v19892_v15 = vpop.xlane.xlu0 %7573  ;;  %vm7090_vm15 = vcmp.gt.f32.partialorder %v6962_v4, 0.0  ;;  %v6675_v9 = vrot.slane %v6161_v46, %v14776_v2  ;;  %v6158_v20 = vrot.slane %v6130_v11, %v17093_v26  ;;  %v7478_v40 = vmul.f32 %v19613_v14, %v7343_v38 }
 0x3f0   : > { %23952 = vst [vmem:[#allocation149_spill] sm:$0xff] %v19883_v49  ;;  %v19897_v33 = vpop.xlane.xlu1 %7575  ;;  %v7219_v49 = vmul.f32 0.01, %v6963_v55  ;;  %v6965_v35 = vadd.f32 %v6667_v43, %v19796_v10  ;;  %v7345_v47 = vsel %vm7089_vm9, %v6961_v16, %v7217_v17  ;;  %v6170_v29 = vrot.slane %v19887_v36, %v17093_v26 }
 0x3f1   : > { %7711 = vadd.xlane.f32.xlu1 %v7477_v62  ;;  %v7954_v51 = vrot.slane %v19643_v7, %v19233_v42  ;;  %vm7091_vm13 = vcmp.gt.f32.partialorder %v6963_v55, 0.0  ;;  %v6160_v54 = vcombine.high %v6144_v24, %v6144_v24  ;;  %v7479_v3 = vmul.f32 %v19613_v14, %v7344_v19 }
 0x3f2   : > { %v7220_v46 = vmul.f32 0.01, %v6964_v6  ;;  %v6966_v11 = vadd.f32 %v6671_v53, %v19823_v30  ;;  %v6679_v38 = vrot.slane %v6144_v24, %v14776_v2  ;;  %v7346_v10 = vsel %vm7090_vm15, %v6962_v4, %v7218_v50 }
 0x3f3   : > { %7713 = vadd.xlane.f32.xlu0 %v7478_v40  ;;  %v19909_v16 = vpop.xlane.xlu0 %7577  ;;  %vm7092_vm3 = vcmp.gt.f32.partialorder %v6964_v6, 0.0  ;;  %v6683_v17 = vrot.slane %v6158_v20, %v14776_v2  ;;  %v6162_v7 = vcombine.high %v6158_v20, %v6158_v20  ;;  %v7480_v40 = vmul.f32 %v19613_v14, %v7345_v47 }
 0x3f4   : > { %v5347_v62 = vpop.f32.mrb[108].mxu1  ;;  %v19915_v19 = vpop.xlane.xlu1 %7579  ;;  %v7221_v63 = vmul.f32 0.01, %v6965_v35  ;;  %v6967_v30 = vadd.f32 %v6675_v9, %v19834_v1  ;;  %v6178_v24 = vcombine.high %v6170_v29, %v6170_v29  ;;  %v7347_v4 = vsel %vm7091_vm13, %v6963_v55, %v7219_v49 }
 0x3f5   : > { %v19912_v43 = vpop.f32.mrb[109].mxu1  ;;  %7715 = vadd.xlane.f32.xlu1 %v7479_v3  ;;  %v7958_v50 = vrot.slane %v19646_v32, %v19233_v42  ;;  %vm7093_vm7 = vcmp.gt.f32.partialorder %v6965_v35, 0.0  ;;  %v6687_v0 = vrot.slane %v6160_v54, %v14776_v2  ;;  %v7481_v20 = vmul.f32 %v19613_v14, %v7346_v10 }
 0x3f6   : > { %23953 = vst [vmem:[#allocation150_spill] sm:$0xff] %v19912_v43  ;;  %v5351_v53 = vpop.f32.mrb[110].mxu1  ;;  %v7222_v47 = vmul.f32 0.01, %v6966_v11  ;;  %v6968_v3 = vadd.f32 %v6679_v38, %v19865_v34  ;;  %v6186_v1 = vrot.slane %v6170_v29, %v17093_v26  ;;  %v7348_v9 = vsel %vm7092_vm3, %v6964_v6, %v7220_v46 }
 0x3f7   : > { %v19922_v43 = vpop.f32.mrb[111].mxu1  ;;  %7717 = vadd.xlane.f32.xlu0 %v7480_v40  ;;  %v8416_v55 = vsel %vm8395_vm14, %v7954_v51, %v7950_v59  ;;  %v19929_v49 = vpop.xlane.xlu0 %7581  ;;  %vm7094_vm0 = vcmp.gt.f32.partialorder %v6966_v11, 0.0  ;;  %v6691_v32 = vrot.slane %v6162_v7, %v14776_v2  ;;  %v7482_v54 = vmul.f32 %v19613_v14, %v7347_v4 }
 0x3f8   : > { %23954 = vst [vmem:[#allocation151_spill] sm:$0xff] %v19922_v43  ;;  %v19933_v40 = vpop.xlane.xlu1 %7583  ;;  %v7223_v10 = vmul.f32 0.01, %v6967_v30  ;;  %v6969_v43 = vadd.f32 %v6683_v17, %v19877_v5  ;;  %v6200_v34 = vrot.slane %v6178_v24, %v17093_v26  ;;  %v7349_v29 = vsel %vm7093_vm7, %v6965_v35, %v7221_v63 }
 0x3f9   : > { %7719 = vadd.xlane.f32.xlu1 %v7481_v20  ;;  %v8417_v6 = vsel %vm8397_vm8, %v7958_v50, %v8416_v55  ;;  %vm7095_vm1 = vcmp.gt.f32.partialorder %v6967_v30, 0.0  ;;  %v7483_v59 = vmul.f32 %v19613_v14, %v7348_v9  ;;  %v6163_v7 = vcombine.high %v19887_v36, %v19887_v36 }
 0x3fa   : > { %v7224_v51 = vmul.f32 0.01, %v6968_v3  ;;  %v6970_v46 = vadd.f32 %v6687_v0, %v5347_v62  ;;  %v6695_v4 = vrot.slane %v6186_v1, %v14776_v2  ;;  %v7350_v5 = vsel %vm7094_vm0, %v6966_v11, %v7222_v47 }
 0x3fb   : > { %7721 = vadd.xlane.f32.xlu0 %v7482_v54  ;;  %v7962_v17 = vrot.slane %v19672_v37, %v19233_v42  ;;  %v19946_v63 = vpop.xlane.xlu0 %7585  ;;  %vm7096_vm12 = vcmp.gt.f32.partialorder %v6968_v3, 0.0  ;;  %v7484_v24 = vmul.f32 %v19613_v14, %v7349_v29  ;;  %v6208_v50 = vcombine.high %v6186_v1, %v6186_v1 }
 0x3fc   : > { %v5357_v38 = vpop.f32.mrb[112].mxu1  ;;  %v19951_v36 = vpop.xlane.xlu1 %7587  ;;  %v7225_v0 = vmul.f32 0.01, %v6969_v43  ;;  %v6971_v62 = vadd.f32 %v6691_v32, %v5351_v53  ;;  %v6699_v9 = vrot.slane %v6200_v34, %v14776_v2  ;;  %v7351_v11 = vsel %vm7095_vm1, %v6967_v30, %v7223_v10 }
 0x3fd   : > { %v19948_v35 = vpop.f32.mrb[113].mxu1  ;;  %7723 = vadd.xlane.f32.xlu1 %v7483_v59  ;;  %vm7097_vm10 = vcmp.gt.f32.partialorder %v6969_v43, 0.0  ;;  %v7485_v55 = vmul.f32 %v19613_v14, %v7350_v5  ;;  %v6210_v54 = vcombine.high %v6200_v34, %v6200_v34  ;;  %v6177_v59 = vrot.slane %v6163_v7, %v17093_v26 }
 0x3fe   : > { %23955 = vst [vmem:[#allocation152_spill] sm:$0xff] %v19948_v35  ;;  %v5361_v20 = vpop.f32.mrb[114].mxu1  ;;  %v7966_v1 = vrot.slane %v19681_v22, %v19233_v42  ;;  %v7226_v29 = vmul.f32 0.01, %v6970_v46  ;;  %v6972_v35 = vadd.f32 %v6695_v4, %v5357_v38  ;;  %v7352_v32 = vsel %vm7096_vm12, %v6968_v3, %v7224_v51 }
 0x3ff   : > { %v19955_v47 = vpop.f32.mrb[115].mxu1  ;;  %7725 = vadd.xlane.f32.xlu0 %v7484_v24  ;;  %v8418_v53 = vsel %vm8399_vm6, %v7962_v17, %v8417_v6  ;;  %v19963_v37 = vpop.xlane.xlu0 %7589  ;;  %vm7098_vm9 = vcmp.gt.f32.partialorder %v6970_v46, 0.0  ;;  %v6703_v30 = vrot.slane %v6208_v50, %v14776_v2  ;;  %v7486_v10 = vmul.f32 %v19613_v14, %v7351_v11 }
 0x400   : > { %23956 = vst [vmem:[#allocation153_spill] sm:$0xff] %v19955_v47  ;;  %v19967_v34 = vpop.xlane.xlu1 %7591  ;;  %v7227_v7 = vmul.f32 0.01, %v6971_v62  ;;  %v6973_v5 = vadd.f32 %v6699_v9, %v5361_v20  ;;  %v7353_v24 = vsel %vm7097_vm10, %v6969_v43, %v7225_v0  ;;  %v23957_v3 = vrot.slane %v19576_v18, %v19233_v42 }
 0x401   : > { %7727 = vadd.xlane.f32.xlu1 %v7485_v55  ;;  %vm7099_vm15 = vcmp.gt.f32.partialorder %v6971_v62, 0.0  ;;  %v6707_v51 = vrot.slane %v6210_v54, %v14776_v2  ;;  %v7487_v38 = vmul.f32 %v19613_v14, %v7352_v32  ;;  %v6179_v4 = vcombine.high %v6177_v59, %v6177_v59 }
 0x402   : > { %v8413_v6 = vsel %vm8403_vm11, %v23957_v3, %v19745_v28  ;;  %v19978_v17 = vsel %vm8401_vm4, %v7966_v1, %v8418_v53  ;;  %v7986_v50 = vrot.slane %v19760_v61, %v19233_v42  ;;  %v7228_v43 = vmul.f32 0.01, %v6972_v35 }
 0x403   : > { %7729 = vadd.xlane.f32.xlu0 %v7486_v10  ;;  %v7354_v20 = vsel %vm7098_vm9, %v6970_v46, %v7226_v29  ;;  %v19983_v9 = vpop.xlane.xlu0 %7593  ;;  %vm7100_vm13 = vcmp.gt.f32.partialorder %v6972_v35, 0.0  ;;  %v7488_v55 = vmul.f32 %v19613_v14, %v7353_v24  ;;  %v6193_v54 = vrot.slane %v6177_v59, %v17093_v26 }
 0x404   : > { %v5367_v0 = vpop.f32.mrb[116].mxu1  ;;  %v7982_v1 = vrot.slane %v19737_v27, %v19233_v42  ;;  %v7990_v32 = vrot.slane %v19765_v56, %v19233_v42  ;;  %v19993_v53 = vpop.xlane.xlu1 %7595  ;;  %v7229_v46 = vmul.f32 0.01, %v6973_v5  ;;  %v7355_v10 = vsel %vm7099_vm15, %v6971_v62, %v7227_v7 }
 0x405   : > { %v6974_v28 = vadd.f32 %v6703_v30, %v5367_v0  ;;  %v19985_v11 = vpop.f32.mrb[117].mxu1  ;;  %7731 = vadd.xlane.f32.xlu1 %v7487_v38  ;;  %vm7101_vm3 = vcmp.gt.f32.partialorder %v6973_v5, 0.0  ;;  %v7489_v24 = vmul.f32 %v19613_v14, %v7354_v20  ;;  %v20000_v59 = vrot.slane %v6179_v4, %v17093_v26 }
 0x406   : > { %23958 = vst [vmem:[#allocation154_spill] sm:$0xff] %v19985_v11  ;;  %v5371_v29 = vpop.f32.mrb[118].mxu1  ;;  %v7970_v38 = vrot.slane %v19702_v21, %v19233_v42  ;;  %v8423_v0 = vsel %vm8395_vm14, %v7986_v50, %v7982_v1  ;;  %v7356_v47 = vsel %vm7100_vm13, %v6972_v35, %v7228_v43  ;;  %v7994_v62 = vrot.slane %v19782_v60, %v19233_v42 }
 0x407   : > { %v6975_v30 = vadd.f32 %v6707_v51, %v5371_v29  ;;  %v19996_v3 = vpop.f32.mrb[119].mxu1  ;;  %7733 = vadd.xlane.f32.xlu0 %v7488_v55  ;;  %v7230_v11 = vmul.f32 0.01, %v6974_v28  ;;  %v20008_v7 = vpop.xlane.xlu0 %7597  ;;  %vm7102_vm7 = vcmp.gt.f32.partialorder %v6974_v28, 0.0  ;;  %v6711_v51 = vrot.slane %v6193_v54, %v14776_v2 }
 0x408   : > { %23959 = vst [vmem:[#allocation155_spill] sm:$0xff] %v19996_v3  ;;  %23960 = vst [vmem:[#allocation156_spill] sm:$0xff] %v20008_v7  ;;  %v7490_v26 = vmul.f32 %v19613_v14, %v7355_v10  ;;  %vm8530_vm0 = vcmask 64512   ;;  %v8424_v4 = vsel %vm8397_vm8, %v7990_v32, %v8423_v0  ;;  %v20013_v20 = vpop.xlane.xlu1 %7599  ;;  %v7357_v55 = vsel %vm7101_vm3, %v6973_v5, %v7229_v46 }
 0x409   : > { %7735 = vadd.xlane.f32.xlu1 %v7489_v24  ;;  %23961 = vst [vmem:[#allocation157_spill] sm:$0xff] %v20013_v20  ;;  %v7231_v50 = vmul.f32 0.01, %v6975_v30  ;;  %v23962_v35 = vrot.slane %v19581_v58, %v19233_v42  ;;  %v7974_v1 = vrot.slane %v19708_v31, %v19233_v42  ;;  %vm7103_vm1 = vcmp.gt.f32.partialorder %v6975_v30, 0.0 }
 0x40a   : > { %v6715_v29 = vrot.slane %v20000_v59, %v14776_v2  ;;  %v7491_v32 = vmul.f32 %v19613_v14, %v7356_v47  ;;  %v7978_v10 = vrot.slane %v19728_v25, %v19233_v42  ;;  %v7998_v5 = vrot.slane %v19793_v13, %v19233_v42 }
 0x40b   : > { %v8414_v43 = vsel %vm8405_vm2, %v23962_v35, %v8413_v6  ;;  %7737 = vadd.xlane.f32.xlu0 %v7490_v26  ;;  %v7358_v24 = vsel %vm7102_vm7, %v6974_v28, %v7230_v11  ;;  %v6209_v6 = vcombine.high %v6193_v54, %v6193_v54  ;;  %v8425_v0 = vsel %vm8399_vm6, %v7994_v62, %v8424_v4  ;;  %v20031_v35 = vpop.xlane.xlu0 %7601 }
 0x40c   : > { %v5377_v46 = vpop.f32.mrb[120].mxu1  ;;  %v7492_v47 = vmul.f32 %v19613_v14, %v7357_v55  ;;  %v23964_v26 = vrot.slane %v19603_v12, %v19233_v42  ;;  %v8018_v13 = vrot.slane %v19850_v39, %v19233_v42  ;;  %v8022_v28 = vrot.slane %v19855_v23, %v19233_v42  ;;  %v20044_v11 = vpop.xlane.xlu1 %7603 }
 0x40d   : > { %v6976_v3 = vadd.f32 %v6711_v51, %v5377_v46  ;;  %v20033_v60 = vpop.f32.mrb[121].mxu1  ;;  %7739 = vadd.xlane.f32.xlu1 %v7491_v32  ;;  %v6211_v62 = vcombine.high %v20000_v59, %v20000_v59  ;;  %v7359_v51 = vsel %vm7103_vm1, %v6975_v30, %v7231_v50  ;;  %v8426_v46 = vsel %vm8401_vm4, %v7998_v5, %v8425_v0 }
 0x40e   : > { %23963 = vst [vmem:[#allocation158_spill] sm:$0xff] %v20033_v60  ;;  %v8415_v61 = vsel %vm8407_vm5, %v23964_v26, %v8414_v43  ;;  %v5381_v54 = vpop.f32.mrb[122].mxu1  ;;  %v7493_v43 = vmul.f32 %v19613_v14, %v7358_v24  ;;  %v8014_v26 = vrot.slane %v19831_v52, %v19233_v42  ;;  %v6719_v60 = vrot.slane %v6209_v6, %v14776_v2 }
 0x40f   : > { %vm7104_vm12 = vcmp.gt.f32.partialorder %v6976_v3, 0.0  ;;  %v7232_v4 = vmul.f32 0.01, %v6976_v3  ;;  %v6977_v55 = vadd.f32 %v6715_v29, %v5381_v54  ;;  %v20049_v32 = vpop.f32.mrb[123].mxu1  ;;  %7741 = vadd.xlane.f32.xlu0 %v7492_v47  ;;  %v8420_v59 = vsel %vm8403_vm11, %v7970_v38, %v19978_v17  ;;  %v20058_v39 = vpop.xlane.xlu0 %7605 }
 0x410   : > { %23965 = vst [vmem:[#allocation159_spill] sm:$0xff] %v20049_v32  ;;  %v7494_v50 = vmul.f32 %v19613_v14, %v7359_v51  ;;  %v8002_v24 = vrot.slane %v19810_v44, %v19233_v42  ;;  %v8430_v5 = vsel %vm8395_vm14, %v8018_v13, %v8014_v26  ;;  %v8026_v0 = vrot.slane %v19868_v57, %v19233_v42  ;;  %v20066_v6 = vpop.xlane.xlu1 %7607 }
 0x411   : > { %vm7105_vm10 = vcmp.gt.f32.partialorder %v6977_v55, 0.0  ;;  %v7233_v30 = vmul.f32 0.01, %v6977_v55  ;;  %7743 = vadd.xlane.f32.xlu1 %v7493_v43  ;;  %v7360_v29 = vsel %vm7104_vm12, %v6976_v3, %v7232_v4  ;;  %v8421_v17 = vsel %vm8405_vm2, %v7974_v1, %v8420_v59 }
 0x412   : > { %v8431_v38 = vsel %vm8397_vm8, %v8022_v28, %v8430_v5  ;;  %v6723_v47 = vrot.slane %v6211_v62, %v14776_v2  ;;  %v7495_v54 = vmul.f32 %v19613_v14, %v7360_v29  ;;  %v8030_v51 = vrot.slane %v19873_v8, %v19233_v42 }
 0x413   : > { %7745 = vadd.xlane.f32.xlu0 %v7494_v50  ;;  %v7361_v3 = vsel %vm7105_vm10, %v6977_v55, %v7233_v30  ;;  %v20076_v13 = vsel %vm8530_vm0, %v19845_v48, -inf  ;;  %v20079_v43 = vsel %vm8530_vm0, %v8415_v61, -inf  ;;  %v8006_v1 = vrot.slane %v19814_v45, %v19233_v42  ;;  %v20083_v28 = vpop.xlane.xlu0 %7609 }
 0x414   : > { %v5387_v4 = vpop.f32.mrb[124].mxu1  ;;  %v7496_v55 = vmul.f32 %v19613_v14, %v7361_v3  ;;  %v20089_v59 = vsel %vm8407_vm5, %v7978_v10, %v8421_v17  ;;  %v8432_v61 = vsel %vm8399_vm6, %v8026_v0, %v8431_v38  ;;  %v8050_v30 = vrot.slane %v19929_v49, %v19233_v42  ;;  %v20096_v50 = vpop.xlane.xlu1 %7611 }
 0x415   : > { %v6978_v62 = vadd.f32 %v6719_v60, %v5387_v4  ;;  %v20085_v26 = vpop.f32.mrb[125].mxu1  ;;  %7747 = vadd.xlane.f32.xlu1 %v7495_v54  ;;  %v8427_v60 = vsel %vm8403_vm11, %v8002_v24, %v8426_v46  ;;  %v8054_v5 = vrot.slane %v19933_v40, %v19233_v42  ;;  %v8433_v3 = vsel %vm8401_vm4, %v8030_v51, %v8432_v61 }
 0x416   : > { %23966 = vst [vmem:[#allocation160_spill] sm:$0xff] %v20085_v26  ;;  %v5391_v29 = vpop.f32.mrb[126].mxu1  ;;  %v8034_v0 = vrot.slane %v19892_v15, %v19233_v42  ;;  %v8046_v38 = vrot.slane %v19915_v19, %v19233_v42  ;;  %v8082_v46 = vrot.slane %v20008_v7, %v19233_v42  ;;  %v8086_v24 = vrot.slane %v20013_v20, %v19233_v42 }
 0x417   : > { %vm7106_vm9 = vcmp.gt.f32.partialorder %v6978_v62, 0.0  ;;  %v7234_v54 = vmul.f32 0.01, %v6978_v62  ;;  %v6979_v10 = vadd.f32 %v6723_v47, %v5391_v29  ;;  %v20101_v17 = vpop.f32.mrb[127].mxu1  ;;  %7749 = vadd.xlane.f32.xlu0 %v7496_v55  ;;  %v20112_v4 = vpop.xlane.xlu0 %7613  ;;  %v8058_v51 = vrot.slane %v19946_v63, %v19233_v42 }
 0x418   : > { %23967 = vst [vmem:[#allocation161_spill] sm:$0xff] %v20101_v17  ;;  %23968 = vst [vmem:[#allocation162_spill] sm:$0xff] %v20112_v4  ;;  %v8437_v55 = vsel %vm8395_vm14, %v8050_v30, %v8046_v38  ;;  %v8078_v61 = vrot.slane %v19993_v53, %v19233_v42  ;;  %v20119_v48 = vpop.xlane.xlu1 %7615  ;;  %v8038_v17 = vrot.slane %v19897_v33, %v19233_v42 }
 0x419   : > { %vm7107_vm15 = vcmp.gt.f32.partialorder %v6979_v10, 0.0  ;;  %v7235_v47 = vmul.f32 0.01, %v6979_v10  ;;  %v7362_v29 = vsel %vm7106_vm9, %v6978_v62, %v7234_v54  ;;  %v8438_v32 = vsel %vm8397_vm8, %v8054_v5, %v8437_v55 }
 0x41a   : > { %v7497_v26 = vmul.f32 %v19613_v14, %v7362_v29  ;;  %v8062_v62 = vrot.slane %v19951_v36, %v19233_v42  ;;  %v8444_v30 = vsel %vm8395_vm14, %v8082_v46, %v8078_v61  ;;  %v8090_v38 = vrot.slane %v20031_v35, %v19233_v42 }
 0x41b   : > { %v7363_v54 = vsel %vm7107_vm15, %v6979_v10, %v7235_v47  ;;  %v8114_v7 = vrot.slane %v20112_v4, %v19233_v42  ;;  %v8445_v20 = vsel %vm8397_vm8, %v8086_v24, %v8444_v30  ;;  %v8094_v5 = vrot.slane %v20044_v11, %v19233_v42  ;;  %v20138_v10 = vpop.xlane.xlu0 %7617 }
 0x41c   : > { %7751 = vadd.xlane.f32.xlu1 %v7497_v26  ;;  %v7498_v29 = vmul.f32 %v19613_v14, %v7363_v54  ;;  %v8118_v55 = vrot.slane %v20119_v48, %v19233_v42  ;;  %23969 = vst [vmem:[#allocation163_spill] sm:$0xff] %v20138_v10  ;;  %v8428_v46 = vsel %vm8405_vm2, %v8006_v1, %v8427_v60  ;;  %v20146_v26 = vpop.xlane.xlu1 %7619 }
 0x41d   : > { %v8439_v47 = vsel %vm8399_vm6, %v8058_v51, %v8438_v32  ;;  %v8066_v61 = vrot.slane %v19963_v37, %v19233_v42  ;;  %v8110_v14 = vrot.slane %v20096_v50, %v19233_v42  ;;  %v8434_v24 = vsel %vm8403_vm11, %v8034_v0, %v8433_v3 }
 0x41e   : > { %7753 = vadd.xlane.f32.xlu0 %v7498_v29  ;;  %v8042_v54 = vrot.slane %v19909_v16, %v19233_v42  ;;  %v8440_v30 = vsel %vm8401_vm4, %v8062_v62, %v8439_v47  ;;  %v8070_v1 = vrot.slane %v19967_v34, %v19233_v42  ;;  %v8435_v32 = vsel %vm8405_vm2, %v8038_v17, %v8434_v24 }
 0x41f   : > { %v8446_v60 = vsel %vm8399_vm6, %v8090_v38, %v8445_v20  ;;  %v8098_v51 = vrot.slane %v20058_v39, %v19233_v42  ;;  %v8451_v29 = vsel %vm8395_vm14, %v8114_v7, %v8110_v14  ;;  %v8122_v3 = vrot.slane %v20138_v10, %v19233_v42  ;;  %v20168_v17 = vpop.xlane.xlu0 %7621  ;;  %v24043_v10 = vld [vmem:[#allocation114_spill] sm:$0xff] }
 0x420   : > { %8532 = vmax.xlane.f32.xlu1 %v20076_v13  ;;  %v8447_v0 = vsel %vm8401_vm4, %v8094_v5, %v8446_v60  ;;  %v8102_v62 = vrot.slane %v20066_v6, %v19233_v42  ;;  %v8452_v47 = vsel %vm8397_vm8, %v8118_v55, %v8451_v29  ;;  %v8126_v20 = vrot.slane %v20146_v26, %v19233_v42 }
 0x421   : > { %23970 = vst [vmem:[#allocation164_spill] sm:$0xff] %v20168_v17  ;;  %v8074_v7 = vrot.slane %v19983_v9, %v19233_v42  ;;  %v23971_v13 = vrot.slane %v19826_v41, %v19233_v42  ;;  %v8441_v5 = vsel %vm8403_vm11, %v8066_v61, %v8440_v30  ;;  %v8537_v55 = vsel %vm8530_vm0, %v20089_v59, -inf }
 0x422   : > { %8535 = vmax.xlane.f32.xlu0 %v20079_v43  ;;  %v8436_v14 = vsel %vm8407_vm5, %v8042_v54, %v8435_v32  ;;  %v8442_v24 = vsel %vm8405_vm2, %v8070_v1, %v8441_v5  ;;  %v8106_v60 = vrot.slane %v20083_v28, %v19233_v42  ;;  %v8453_v29 = vsel %vm8399_vm6, %v8122_v3, %v8452_v47 }
 0x423   : > { %v8429_v38 = vsel %vm8407_vm5, %v23971_v13, %v8428_v46  ;;  %v8130_v43 = vrot.slane %v20168_v17, %v19233_v42  ;;  %v8448_v46 = vsel %vm8403_vm11, %v8098_v51, %v8447_v0  ;;  %v8454_v61 = vsel %vm8401_vm4, %v8126_v20, %v8453_v29  ;;  %v24042_v17 = vld [vmem:[#allocation8_spill] sm:$0xff] }
 0x424   : > { %8538 = vmax.xlane.f32.xlu1 %v8537_v55  ;;  %v8540_v30 = vsel %vm8530_vm0, %v8429_v38, -inf  ;;  %v8449_v59 = vsel %vm8405_vm2, %v8102_v62, %v8448_v46  ;;  %v8443_v1 = vsel %vm8407_vm5, %v8074_v7, %v8442_v24  ;;  %v8543_v32 = vsel %vm8530_vm0, %v8436_v14, -inf }
 0x425   : > { %v8450_v51 = vsel %vm8407_vm5, %v8106_v60, %v8449_v59  ;;  %v8455_v0 = vsel %vm8403_vm11, %v8130_v43, %v8454_v61  ;;  %v8546_v20 = vsel %vm8530_vm0, %v8443_v1, -inf }
 0x426   : > { %8541 = vmax.xlane.f32.xlu0 %v8540_v30  ;;  %v20191_v54 = vpop.xlane.xlu1 %7623  ;;  %v8549_v38 = vsel %vm8530_vm0, %v8450_v51, -inf }
 0x427   : > { %23972 = vst [vmem:[#allocation165_spill] sm:$0xff] %v20191_v54  ;;  %v8134_v3 = vrot.slane %v20191_v54, %v19233_v42  ;;  %v24046_v54 = vld [vmem:[#allocation10_spill] sm:$0xff] }
 0x428   : > { %8544 = vmax.xlane.f32.xlu1 %v8543_v32  ;;  %v20197_v47 = vpop.xlane.xlu0 %7625 }
 0x429   : > { %23973 = vst [vmem:[#allocation166_spill] sm:$0xff] %v20197_v47  ;;  %v8138_v62 = vrot.slane %v20197_v47, %v19233_v42  ;;  %v8456_v13 = vsel %vm8405_vm2, %v8134_v3, %v8455_v0 }
 0x42a   : > { %8547 = vmax.xlane.f32.xlu0 %v8546_v20  ;;  %v20205_v7 = vpop.xlane.xlu1 %7627 }
 0x42b   : > { %23974 = vst [vmem:[#allocation167_spill] sm:$0xff] %v20205_v7  ;;  %v8457_v5 = vsel %vm8407_vm5, %v8138_v62, %v8456_v13  ;;  %v8142_v24 = vrot.slane %v20205_v7, %v19233_v42 }
 0x42c   : > { %8550 = vmax.xlane.f32.xlu1 %v8549_v38  ;;  %v20209_v55 = vpop.xlane.xlu0 %7629  ;;  %v8552_v14 = vsel %vm8530_vm0, %v8457_v5, -inf }
 0x42d   : > { %23975 = vst [vmem:[#allocation168_spill] sm:$0xff] %v20209_v55  ;;  %v8146_v60 = vrot.slane %v20209_v55, %v19233_v42 }
 0x42e   : > { %8553 = vmax.xlane.f32.xlu0 %v8552_v14  ;;  %v20216_v29 = vpop.xlane.xlu1 %7631 }
 0x42f   : > { %23976 = vst [vmem:[#allocation169_spill] sm:$0xff] %v20216_v29  ;;  %v8458_v43 = vsel %vm8395_vm14, %v8146_v60, %v8142_v24  ;;  %v8150_v46 = vrot.slane %v20216_v29, %v19233_v42 }
 0x430   : > { %v20221_v61 = vpop.xlane.xlu0 %7633 }
 0x431   : > { %23977 = vst [vmem:[#allocation170_spill] sm:$0xff] %v20221_v61  ;;  %v8459_v30 = vsel %vm8397_vm8, %v8150_v46, %v8458_v43  ;;  %v8154_v59 = vrot.slane %v20221_v61, %v19233_v42 }
 0x432   : > { %v20226_v1 = vpop.xlane.xlu1 %7635 }
 0x433   : > { %23978 = vst [vmem:[#allocation171_spill] sm:$0xff] %v20226_v1  ;;  %v8460_v32 = vsel %vm8399_vm6, %v8154_v59, %v8459_v30  ;;  %v8158_v3 = vrot.slane %v20226_v1, %v19233_v42  ;;  %v24040_v1 = vld [vmem:[#allocation111_spill] sm:$0xff] }
 0x434   : > { %v20231_v51 = vpop.xlane.xlu0 %7637 }
 0x435   : > { %23979 = vst [vmem:[#allocation172_spill] sm:$0xff] %v20231_v51  ;;  %v8461_v0 = vsel %vm8401_vm4, %v8158_v3, %v8460_v32  ;;  %v8162_v20 = vrot.slane %v20231_v51, %v19233_v42 }
 0x436   : > { %v20236_v62 = vpop.xlane.xlu1 %7639 }
 0x437   : > { %23980 = vst [vmem:[#allocation173_spill] sm:$0xff] %v20236_v62  ;;  %v8166_v13 = vrot.slane %v20236_v62, %v19233_v42  ;;  %v8462_v38 = vsel %vm8403_vm11, %v8162_v20, %v8461_v0  ;;  %v24038_v62 = vld [vmem:[#allocation5_spill] sm:$0xff] }
 0x438   : > { %v20241_v5 = vpop.xlane.xlu0 %7641 }
 0x439   : > { %23981 = vst [vmem:[#allocation174_spill] sm:$0xff] %v20241_v5  ;;  %v8170_v14 = vrot.slane %v20241_v5, %v19233_v42  ;;  %v8463_v24 = vsel %vm8405_vm2, %v8166_v13, %v8462_v38 }
 0x43a   : > { %v20246_v60 = vpop.xlane.xlu1 %7643 }
 0x43b   : > { %23982 = vst [vmem:[#allocation175_spill] sm:$0xff] %v20246_v60  ;;  %v8464_v43 = vsel %vm8407_vm5, %v8170_v14, %v8463_v24  ;;  %v8174_v59 = vrot.slane %v20246_v60, %v19233_v42 }
 0x43c   : > { %v20249_v46 = vpop.xlane.xlu0 %7645  ;;  %v8555_v30 = vsel %vm8530_vm0, %v8464_v43, -inf }
 0x43d   : > { %23983 = vst [vmem:[#allocation176_spill] sm:$0xff] %v20249_v46  ;;  %v8178_v32 = vrot.slane %v20249_v46, %v19233_v42  ;;  %8556 = vmax.xlane.f32.xlu1 %v8555_v30 }
 0x43e   : > { %v20256_v3 = vpop.xlane.xlu1 %7647 }
 0x43f   : > { %23984 = vst [vmem:[#allocation177_spill] sm:$0xff] %v20256_v3  ;;  %v8465_v0 = vsel %vm8395_vm14, %v8178_v32, %v8174_v59  ;;  %v8182_v20 = vrot.slane %v20256_v3, %v19233_v42 }
 0x440   : > { %v20261_v13 = vpop.xlane.xlu0 %7649 }
 0x441   : > { %23985 = vst [vmem:[#allocation178_spill] sm:$0xff] %v20261_v13  ;;  %v8466_v38 = vsel %vm8397_vm8, %v8182_v20, %v8465_v0  ;;  %v8186_v14 = vrot.slane %v20261_v13, %v19233_v42 }
 0x442   : > { %v20266_v24 = vpop.xlane.xlu1 %7651 }
 0x443   : > { %23986 = vst [vmem:[#allocation179_spill] sm:$0xff] %v20266_v24  ;;  %v8467_v43 = vsel %vm8399_vm6, %v8186_v14, %v8466_v38  ;;  %v8190_v30 = vrot.slane %v20266_v24, %v19233_v42 }
 0x444   : > { %v20271_v46 = vpop.xlane.xlu0 %7653 }
 0x445   : > { %23987 = vst [vmem:[#allocation180_spill] sm:$0xff] %v20271_v46  ;;  %v8468_v59 = vsel %vm8401_vm4, %v8190_v30, %v8467_v43  ;;  %v8194_v32 = vrot.slane %v20271_v46, %v19233_v42 }
 0x446   : > { %v20276_v5 = vpop.xlane.xlu1 %7655 }
 0x447   : > { %23988 = vst [vmem:[#allocation181_spill] sm:$0xff] %v20276_v5  ;;  %v8198_v0 = vrot.slane %v20276_v5, %v19233_v42  ;;  %v8469_v20 = vsel %vm8403_vm11, %v8194_v32, %v8468_v59 }
 0x448   : > { %v20281_v13 = vpop.xlane.xlu0 %7657 }
 0x449   : > { %23989 = vst [vmem:[#allocation182_spill] sm:$0xff] %v20281_v13  ;;  %v8202_v38 = vrot.slane %v20281_v13, %v19233_v42  ;;  %v8470_v14 = vsel %vm8405_vm2, %v8198_v0, %v8469_v20 }
 0x44a   : > { %v20286_v24 = vpop.xlane.xlu1 %7659 }
 0x44b   : > { %23990 = vst [vmem:[#allocation183_spill] sm:$0xff] %v20286_v24  ;;  %v8471_v43 = vsel %vm8407_vm5, %v8202_v38, %v8470_v14  ;;  %v8206_v5 = vrot.slane %v20286_v24, %v19233_v42 }
 0x44c   : > { %v20289_v30 = vpop.xlane.xlu0 %7661  ;;  %v8558_v46 = vsel %vm8530_vm0, %v8471_v43, -inf }
 0x44d   : > { %23991 = vst [vmem:[#allocation184_spill] sm:$0xff] %v20289_v30  ;;  %v8210_v59 = vrot.slane %v20289_v30, %v19233_v42  ;;  %8559 = vmax.xlane.f32.xlu0 %v8558_v46 }
 0x44e   : > { %v20296_v32 = vpop.xlane.xlu1 %7663 }
 0x44f   : > { %23992 = vst [vmem:[#allocation185_spill] sm:$0xff] %v20296_v32  ;;  %v8472_v13 = vsel %vm8395_vm14, %v8210_v59, %v8206_v5  ;;  %v8214_v0 = vrot.slane %v20296_v32, %v19233_v42 }
 0x450   : > { %v20301_v20 = vpop.xlane.xlu0 %7665 }
 0x451   : > { %23993 = vst [vmem:[#allocation186_spill] sm:$0xff] %v20301_v20  ;;  %v8473_v38 = vsel %vm8397_vm8, %v8214_v0, %v8472_v13  ;;  %v8218_v14 = vrot.slane %v20301_v20, %v19233_v42 }
 0x452   : > { %v20306_v43 = vpop.xlane.xlu1 %7667 }
 0x453   : > { %23994 = vst [vmem:[#allocation187_spill] sm:$0xff] %v20306_v43  ;;  %v8474_v24 = vsel %vm8399_vm6, %v8218_v14, %v8473_v38  ;;  %v8222_v46 = vrot.slane %v20306_v43, %v19233_v42 }
 0x454   : > { %v20311_v30 = vpop.xlane.xlu0 %7669 }
 0x455   : > { %23995 = vst [vmem:[#allocation188_spill] sm:$0xff] %v20311_v30  ;;  %v8475_v5 = vsel %vm8401_vm4, %v8222_v46, %v8474_v24  ;;  %v8226_v59 = vrot.slane %v20311_v30, %v19233_v42 }
 0x456   : > { %v20316_v32 = vpop.xlane.xlu1 %7671 }
 0x457   : > { %23996 = vst [vmem:[#allocation189_spill] sm:$0xff] %v20316_v32  ;;  %v8230_v13 = vrot.slane %v20316_v32, %v19233_v42  ;;  %v8476_v0 = vsel %vm8403_vm11, %v8226_v59, %v8475_v5 }
 0x458   : > { %v20321_v20 = vpop.xlane.xlu0 %7673 }
 0x459   : > { %23997 = vst [vmem:[#allocation190_spill] sm:$0xff] %v20321_v20  ;;  %v8234_v38 = vrot.slane %v20321_v20, %v19233_v42  ;;  %v8477_v14 = vsel %vm8405_vm2, %v8230_v13, %v8476_v0 }
 0x45a   : > { %v20326_v43 = vpop.xlane.xlu1 %7675 }
 0x45b   : > { %23998 = vst [vmem:[#allocation191_spill] sm:$0xff] %v20326_v43  ;;  %v8478_v24 = vsel %vm8407_vm5, %v8234_v38, %v8477_v14  ;;  %v8238_v32 = vrot.slane %v20326_v43, %v19233_v42 }
 0x45c   : > { %v20329_v46 = vpop.xlane.xlu0 %7677  ;;  %v8561_v30 = vsel %vm8530_vm0, %v8478_v24, -inf }
 0x45d   : > { %23999 = vst [vmem:[#allocation192_spill] sm:$0xff] %v20329_v46  ;;  %v8242_v5 = vrot.slane %v20329_v46, %v19233_v42  ;;  %8562 = vmax.xlane.f32.xlu1 %v8561_v30 }
 0x45e   : > { %v20336_v59 = vpop.xlane.xlu1 %7679 }
 0x45f   : > { %24000 = vst [vmem:[#allocation193_spill] sm:$0xff] %v20336_v59  ;;  %v8479_v20 = vsel %vm8395_vm14, %v8242_v5, %v8238_v32  ;;  %v8246_v13 = vrot.slane %v20336_v59, %v19233_v42 }
 0x460   : > { %v20341_v0 = vpop.xlane.xlu0 %7681 }
 0x461   : > { %24001 = vst [vmem:[#allocation194_spill] sm:$0xff] %v20341_v0  ;;  %v8480_v38 = vsel %vm8397_vm8, %v8246_v13, %v8479_v20  ;;  %v8250_v14 = vrot.slane %v20341_v0, %v19233_v42 }
 0x462   : > { %v20346_v24 = vpop.xlane.xlu1 %7683 }
 0x463   : > { %24002 = vst [vmem:[#allocation195_spill] sm:$0xff] %v20346_v24  ;;  %v8481_v43 = vsel %vm8399_vm6, %v8250_v14, %v8480_v38  ;;  %v8254_v30 = vrot.slane %v20346_v24, %v19233_v42 }
 0x464   : > { %v20351_v46 = vpop.xlane.xlu0 %7685 }
 0x465   : > { %24003 = vst [vmem:[#allocation196_spill] sm:$0xff] %v20351_v46  ;;  %v8482_v32 = vsel %vm8401_vm4, %v8254_v30, %v8481_v43  ;;  %v8258_v5 = vrot.slane %v20351_v46, %v19233_v42 }
 0x466   : > { %v20356_v59 = vpop.xlane.xlu1 %7687 }
 0x467   : > { %24004 = vst [vmem:[#allocation197_spill] sm:$0xff] %v20356_v59  ;;  %v8262_v20 = vrot.slane %v20356_v59, %v19233_v42  ;;  %v8483_v13 = vsel %vm8403_vm11, %v8258_v5, %v8482_v32 }
 0x468   : > { %v20361_v0 = vpop.xlane.xlu0 %7689 }
 0x469   : > { %24005 = vst [vmem:[#allocation198_spill] sm:$0xff] %v20361_v0  ;;  %v8266_v38 = vrot.slane %v20361_v0, %v19233_v42  ;;  %v8484_v14 = vsel %vm8405_vm2, %v8262_v20, %v8483_v13 }
 0x46a   : > { %v20366_v24 = vpop.xlane.xlu1 %7691 }
 0x46b   : > { %24006 = vst [vmem:[#allocation199_spill] sm:$0xff] %v20366_v24  ;;  %v8485_v43 = vsel %vm8407_vm5, %v8266_v38, %v8484_v14  ;;  %v8270_v59 = vrot.slane %v20366_v24, %v19233_v42 }
 0x46c   : > { %v20369_v30 = vpop.xlane.xlu0 %7693  ;;  %v8564_v46 = vsel %vm8530_vm0, %v8485_v43, -inf }
 0x46d   : > { %24007 = vst [vmem:[#allocation200_spill] sm:$0xff] %v20369_v30  ;;  %v8274_v32 = vrot.slane %v20369_v30, %v19233_v42  ;;  %8565 = vmax.xlane.f32.xlu0 %v8564_v46 }
 0x46e   : > { %v20376_v5 = vpop.xlane.xlu1 %7695 }
 0x46f   : > { %24008 = vst [vmem:[#allocation201_spill] sm:$0xff] %v20376_v5  ;;  %v8486_v0 = vsel %vm8395_vm14, %v8274_v32, %v8270_v59  ;;  %v8278_v20 = vrot.slane %v20376_v5, %v19233_v42  ;;  %v14733_v59 = vmov 0  }
 0x470   : > { %v20381_v13 = vpop.xlane.xlu0 %7697  ;;  %14366 = vset.pattern.permute.xlu1 %v14733_v59  ;;  %14367 = vset.pattern.permute.xlu0 %v14733_v59 }
 0x471   : > { %24009 = vst [vmem:[#allocation202_spill] sm:$0xff] %v20381_v13  ;;  %v8487_v38 = vsel %vm8397_vm8, %v8278_v20, %v8486_v0  ;;  %v8282_v14 = vrot.slane %v20381_v13, %v19233_v42 }
 0x472   : > { %v20386_v43 = vpop.xlane.xlu1 %7699 }
 0x473   : > { %24010 = vst [vmem:[#allocation203_spill] sm:$0xff] %v20386_v43  ;;  %v8488_v24 = vsel %vm8399_vm6, %v8282_v14, %v8487_v38  ;;  %v8286_v46 = vrot.slane %v20386_v43, %v19233_v42 }
 0x474   : > { %v20391_v30 = vpop.xlane.xlu0 %7701 }
 0x475   : > { %24011 = vst [vmem:[#allocation204_spill] sm:$0xff] %v20391_v30  ;;  %v8489_v32 = vsel %vm8401_vm4, %v8286_v46, %v8488_v24  ;;  %v8290_v0 = vrot.slane %v20391_v30, %v19233_v42 }
 0x476   : > { %v20396_v20 = vpop.xlane.xlu1 %7703 }
 0x477   : > { %24012 = vst [vmem:[#allocation205_spill] sm:$0xff] %v20396_v20  ;;  %v8294_v13 = vrot.slane %v20396_v20, %v19233_v42  ;;  %v8490_v38 = vsel %vm8403_vm11, %v8290_v0, %v8489_v32 }
 0x478   : > { %v20401_v14 = vpop.xlane.xlu0 %7705 }
 0x479   : > { %24013 = vst [vmem:[#allocation206_spill] sm:$0xff] %v20401_v14  ;;  %v8298_v43 = vrot.slane %v20401_v14, %v19233_v42  ;;  %v8491_v5 = vsel %vm8405_vm2, %v8294_v13, %v8490_v38 }
 0x47a   : > { %v20406_v59 = vpop.xlane.xlu1 %7707 }
 0x47b   : > { %24014 = vst [vmem:[#allocation207_spill] sm:$0xff] %v20406_v59  ;;  %v8492_v24 = vsel %vm8407_vm5, %v8298_v43, %v8491_v5  ;;  %v8302_v20 = vrot.slane %v20406_v59, %v19233_v42 }
 0x47c   : > { %v20409_v46 = vpop.xlane.xlu0 %7709  ;;  %v8567_v30 = vsel %vm8530_vm0, %v8492_v24, -inf }
 0x47d   : > { %24015 = vst [vmem:[#allocation208_spill] sm:$0xff] %v20409_v46  ;;  %v8306_v32 = vrot.slane %v20409_v46, %v19233_v42  ;;  %8568 = vmax.xlane.f32.xlu1 %v8567_v30 }
 0x47e   : > { %v20416_v0 = vpop.xlane.xlu1 %7711 }
 0x47f   : > { %24016 = vst [vmem:[#allocation209_spill] sm:$0xff] %v20416_v0  ;;  %v8493_v14 = vsel %vm8395_vm14, %v8306_v32, %v8302_v20  ;;  %v8310_v13 = vrot.slane %v20416_v0, %v19233_v42 }
 0x480   : > { %v20421_v38 = vpop.xlane.xlu0 %7713 }
 0x481   : > { %24017 = vst [vmem:[#allocation210_spill] sm:$0xff] %v20421_v38  ;;  %v8494_v5 = vsel %vm8397_vm8, %v8310_v13, %v8493_v14  ;;  %v8314_v43 = vrot.slane %v20421_v38, %v19233_v42 }
 0x482   : > { %v20426_v24 = vpop.xlane.xlu1 %7715 }
 0x483   : > { %24018 = vst [vmem:[#allocation211_spill] sm:$0xff] %v20426_v24  ;;  %v8495_v59 = vsel %vm8399_vm6, %v8314_v43, %v8494_v5  ;;  %v8318_v30 = vrot.slane %v20426_v24, %v19233_v42 }
 0x484   : > { %v20431_v46 = vpop.xlane.xlu0 %7717 }
 0x485   : > { %24019 = vst [vmem:[#allocation212_spill] sm:$0xff] %v20431_v46  ;;  %v8496_v20 = vsel %vm8401_vm4, %v8318_v30, %v8495_v59  ;;  %v8322_v32 = vrot.slane %v20431_v46, %v19233_v42 }
 0x486   : > { %v20436_v0 = vpop.xlane.xlu1 %7719 }
 0x487   : > { %24020 = vst [vmem:[#allocation213_spill] sm:$0xff] %v20436_v0  ;;  %v8326_v14 = vrot.slane %v20436_v0, %v19233_v42  ;;  %v8497_v13 = vsel %vm8403_vm11, %v8322_v32, %v8496_v20 }
 0x488   : > { %v20441_v38 = vpop.xlane.xlu0 %7721 }
 0x489   : > { %24021 = vst [vmem:[#allocation214_spill] sm:$0xff] %v20441_v38  ;;  %v8330_v5 = vrot.slane %v20441_v38, %v19233_v42  ;;  %v8498_v43 = vsel %vm8405_vm2, %v8326_v14, %v8497_v13 }
 0x48a   : > { %v20446_v24 = vpop.xlane.xlu1 %7723 }
 0x48b   : > { %24022 = vst [vmem:[#allocation215_spill] sm:$0xff] %v20446_v24  ;;  %v8499_v59 = vsel %vm8407_vm5, %v8330_v5, %v8498_v43  ;;  %v8334_v0 = vrot.slane %v20446_v24, %v19233_v42 }
 0x48c   : > { %v20449_v30 = vpop.xlane.xlu0 %7725  ;;  %v8570_v46 = vsel %vm8530_vm0, %v8499_v59, -inf }
 0x48d   : > { %24023 = vst [vmem:[#allocation216_spill] sm:$0xff] %v20449_v30  ;;  %v8338_v20 = vrot.slane %v20449_v30, %v19233_v42  ;;  %8571 = vmax.xlane.f32.xlu0 %v8570_v46 }
 0x48e   : > { %v20456_v32 = vpop.xlane.xlu1 %7727 }
 0x48f   : > { %24024 = vst [vmem:[#allocation217_spill] sm:$0xff] %v20456_v32  ;;  %v8500_v38 = vsel %vm8395_vm14, %v8338_v20, %v8334_v0  ;;  %v8342_v14 = vrot.slane %v20456_v32, %v19233_v42 }
 0x490   : > { %v20461_v13 = vpop.xlane.xlu0 %7729 }
 0x491   : > { %24025 = vst [vmem:[#allocation218_spill] sm:$0xff] %v20461_v13  ;;  %v8501_v5 = vsel %vm8397_vm8, %v8342_v14, %v8500_v38  ;;  %v8346_v43 = vrot.slane %v20461_v13, %v19233_v42 }
 0x492   : > { %v20466_v59 = vpop.xlane.xlu1 %7731 }
 0x493   : > { %24026 = vst [vmem:[#allocation219_spill] sm:$0xff] %v20466_v59  ;;  %v8502_v24 = vsel %vm8399_vm6, %v8346_v43, %v8501_v5  ;;  %v8350_v46 = vrot.slane %v20466_v59, %v19233_v42 }
 0x494   : > { %v20471_v30 = vpop.xlane.xlu0 %7733 }
 0x495   : > { %24027 = vst [vmem:[#allocation220_spill] sm:$0xff] %v20471_v30  ;;  %v8503_v0 = vsel %vm8401_vm4, %v8350_v46, %v8502_v24  ;;  %v8354_v20 = vrot.slane %v20471_v30, %v19233_v42 }
 0x496   : > { %v20476_v32 = vpop.xlane.xlu1 %7735 }
 0x497   : > { %24028 = vst [vmem:[#allocation221_spill] sm:$0xff] %v20476_v32  ;;  %v8358_v38 = vrot.slane %v20476_v32, %v19233_v42  ;;  %v8504_v14 = vsel %vm8403_vm11, %v8354_v20, %v8503_v0 }
 0x498   : > { %v20481_v13 = vpop.xlane.xlu0 %7737 }
 0x499   : > { %24029 = vst [vmem:[#allocation222_spill] sm:$0xff] %v20481_v13  ;;  %v8362_v5 = vrot.slane %v20481_v13, %v19233_v42  ;;  %v8505_v43 = vsel %vm8405_vm2, %v8358_v38, %v8504_v14 }
 0x49a   : > { %v20486_v59 = vpop.xlane.xlu1 %7739 }
 0x49b   : > { %24030 = vst [vmem:[#allocation223_spill] sm:$0xff] %v20486_v59  ;;  %v8506_v24 = vsel %vm8407_vm5, %v8362_v5, %v8505_v43  ;;  %v8366_v20 = vrot.slane %v20486_v59, %v19233_v42  ;;  %v24037_v59 = vld [vmem:[#allocation4_spill] sm:$0xff] }
 0x49c   : > { %v8573_v46 = vsel %vm8530_vm0, %v8506_v24, -inf  ;;  %v20492_v3 = vpop.xlane.xlu0 %7741 }
 0x49d   : > { %8574 = vmax.xlane.f32.xlu1 %v8573_v46  ;;  %24032 = vst [vmem:[#allocation225_spill] sm:$0xff] %v20492_v3  ;;  %v8370_v0 = vrot.slane %v20492_v3, %v19233_v42 }
 0x49e   : > { %v20490_v30 = vpop.xlane.xlu1 %7743 }
 0x49f   : > { %24031 = vst [vmem:[#allocation224_spill] sm:$0xff] %v20490_v30  ;;  %v8374_v14 = vrot.slane %v20490_v30, %v19233_v42  ;;  %v8507_v43 = vsel %vm8395_vm14, %v8370_v0, %v8366_v20  ;;  %v24039_v0 = vld [vmem:[#allocation109_spill] sm:$0xff] }
 0x4a0   : > { %v20500_v38 = vpop.xlane.xlu0 %7745 }
 0x4a1   : > { %24034 = vst [vmem:[#allocation227_spill] sm:$0xff] %v20500_v38  ;;  %v8378_v24 = vrot.slane %v20500_v38, %v19233_v42  ;;  %v8508_v46 = vsel %vm8397_vm8, %v8374_v14, %v8507_v43 }
 0x4a2   : > { %v20494_v32 = vpop.xlane.xlu1 %7747 }
 0x4a3   : > { %24033 = vst [vmem:[#allocation226_spill] sm:$0xff] %v20494_v32  ;;  %v8382_v61 = vrot.slane %v20494_v32, %v19233_v42  ;;  %v8509_v30 = vsel %vm8399_vm6, %v8378_v24, %v8508_v46 }
 0x4a4   : > { %v20510_v51 = vpop.xlane.xlu0 %7749 }
 0x4a5   : > { %24036 = vst [vmem:[#allocation229_spill] sm:$0xff] %v20510_v51  ;;  %v8386_v14 = vrot.slane %v20510_v51, %v19233_v42  ;;  %v8510_v47 = vsel %vm8401_vm4, %v8382_v61, %v8509_v30 }
 0x4a9   : > { %v20504_v5 = vpop.xlane.xlu1 %7751 }
 0x4aa   : > { %24035 = vst [vmem:[#allocation228_spill] sm:$0xff] %v20504_v5  ;;  %v8390_v46 = vrot.slane %v20504_v5, %v19233_v42 }
 0x4ab   : > { %v20523_v29 = vpop.xlane.xlu0 %7753 }
 0x4ac   : > { %24041 = vst [vmem:[#allocation109_spill] sm:$0xff] %v20523_v29 }
 0x4ad   : > { %v8533_v13 = vpop.xlane.xlu1 %8532 }
 0x4ae   : > { %v8598_v3 = vrot.slane %v8533_v13, %v14776_v2  ;;  %v8606_v60 = vrot.slane %v8533_v13, %v24037_v59  ;;  %v8610_v55 = vrot.slane %v8533_v13, %v24038_v62  ;;  %v8614_v7 = vrot.slane %v8533_v13, %v24042_v17 }
 0x4af   : > { %v20542_v4 = vpop.xlane.xlu0 %8535 }
 0x4b0   : > { %v9235_v20 = vsub.f32 %v24039_v0, %v8598_v3  ;;  %v9237_v38 = vsub.f32 %v24040_v1, %v8606_v60  ;;  %v9238_v32 = vsub.f32 %v24043_v10, %v8610_v55  ;;  %v8511_v3 = vsel %vm8403_vm11, %v8386_v14, %v8510_v47  ;;  %v24044_v60 = vld [vmem:[#allocation7_spill] sm:$0xff]  ;;  %v24047_v55 = vld [vmem:[#allocation118_spill] sm:$0xff] }
 0x4b1   : > { %v8394_v1 = vrot.slane %v20523_v29, %v19233_v42  ;;  %v8618_v0 = vrot.slane %v8533_v13, %v24044_v60  ;;  %v8512_v51 = vsel %vm8405_vm2, %v8390_v46, %v8511_v3  ;;  %v8622_v10 = vrot.slane %v8533_v13, %v24046_v54  ;;  %v24048_v47 = vld [vmem:[#allocation6_spill] sm:$0xff] }
 0x4b2   : > { %v9363_v43 = vmul.f32 1.442695, %v9235_v20  ;;  %v9367_v24 = vmul.f32 1.442695, %v9237_v38  ;;  %v24045_v20 = vld [vmem:[#allocation116_spill] sm:$0xff]  ;;  %v8602_v14 = vrot.slane %v8533_v13, %v24048_v47 }
 0x4b3   : > { %v9239_v61 = vsub.f32 %v24045_v20, %v8614_v7  ;;  %v9369_v30 = vmul.f32 1.442695, %v9238_v32  ;;  %v9240_v38 = vsub.f32 %v24047_v55, %v8618_v0  ;;  %v8513_v5 = vsel %vm8407_vm5, %v8394_v1, %v8512_v51  ;;  %v24050_v7 = vld [vmem:[#allocation9_spill] sm:$0xff] }
 0x4b4   : > { %14432 = vpow2.f32 %v9363_v43  ;;  %v8576_v29 = vsel %vm8530_vm0, %v8513_v5, -inf  ;;  %v8626_v32 = vrot.slane %v8533_v13, %v24050_v7  ;;  %v24052_v0 = vld [vmem:[#allocation113_spill] sm:$0xff]  ;;  %v8638_v51 = vrot.slane %v20542_v4, %v24037_v59  ;;  %v24054_v5 = vld [vmem:[#allocation120_spill] sm:$0xff] }
 0x4b5   : > { %14434 = vpow2.f32 %v9367_v24  ;;  %v9371_v43 = vmul.f32 1.442695, %v9239_v61  ;;  %8577 = vmax.xlane.f32.xlu0 %v8576_v29  ;;  %v24051_v24 = vld [vmem:[#allocation119_spill] sm:$0xff]  ;;  %v9373_v3 = vmul.f32 1.442695, %v9240_v38  ;;  %v9236_v20 = vsub.f32 %v24052_v0, %v8602_v14  ;;  %v24055_v55 = vld [vmem:[#allocation125_spill] sm:$0xff] }
 0x4b6   : > { %14436 = vpow2.f32 %v9369_v30  ;;  %v9241_v46 = vsub.f32 %v24051_v24, %v8622_v10  ;;  %v9242_v61 = vsub.f32 %v24054_v5, %v8626_v32  ;;  %v8630_v13 = vrot.slane %v20542_v4, %v14776_v2  ;;  %v24057_v24 = vld [vmem:[#allocation122_spill] sm:$0xff]  ;;  %v24058_v0 = vld [vmem:[#allocation128_spill] sm:$0xff] }
 0x4b7   : > { %14438 = vpow2.f32 %v9371_v43  ;;  %v9365_v30 = vmul.f32 1.442695, %v9236_v20  ;;  %v8646_v10 = vrot.slane %v20542_v4, %v24042_v17  ;;  %v9245_v38 = vsub.f32 %v24055_v55, %v8638_v51  ;;  %v20570_v51 = vpop.xlane.xlu1 %8538 }
 0x4b8   : > { %14440 = vpow2.f32 %v9373_v3  ;;  %v9375_v29 = vmul.f32 1.442695, %v9241_v46  ;;  %v9377_v14 = vmul.f32 1.442695, %v9242_v61  ;;  %v8634_v32 = vrot.slane %v20542_v4, %v24048_v47 }
 0x4b9   : > { %v9243_v46 = vsub.f32 %v24057_v24, %v8630_v13  ;;  %v8654_v3 = vrot.slane %v20542_v4, %v24046_v54  ;;  %v9247_v20 = vsub.f32 %v24058_v0, %v8646_v10  ;;  %v9383_v5 = vmul.f32 1.442695, %v9245_v38  ;;  %v24062_v0 = vld [vmem:[#allocation126_spill] sm:$0xff] }
 0x4ba   : > { %14442 = vpow2.f32 %v9375_v29  ;;  %v8642_v61 = vrot.slane %v20542_v4, %v24038_v62  ;;  %v24060_v29 = vld [vmem:[#allocation124_spill] sm:$0xff]  ;;  %v8662_v10 = vrot.slane %v20570_v51, %v14776_v2 }
 0x4bb   : > { %14444 = vpow2.f32 %v9365_v30  ;;  %v9244_v55 = vsub.f32 %v24060_v29, %v8634_v32  ;;  %v9379_v13 = vmul.f32 1.442695, %v9243_v46  ;;  %v9249_v30 = vsub.f32 %v19581_v58, %v8654_v3  ;;  %v24063_v46 = vld [vmem:[#allocation131_spill] sm:$0xff] }
 0x4bc   : > { %14446 = vpow2.f32 %v9377_v14  ;;  %v9387_v24 = vmul.f32 1.442695, %v9247_v20  ;;  %v8650_v14 = vrot.slane %v20542_v4, %v24044_v60  ;;  %v8670_v58 = vrot.slane %v20570_v51, %v24037_v59 }
 0x4bd   : > { %14448 = vpow2.f32 %v9383_v5  ;;  %v9391_v32 = vmul.f32 1.442695, %v9249_v30  ;;  %v9251_v3 = vsub.f32 %v24063_v46, %v8662_v10  ;;  %v8658_v29 = vrot.slane %v20542_v4, %v24050_v7  ;;  %v24066_v30 = vld [vmem:[#allocation134_spill] sm:$0xff] }
 0x4be   : > { %v20540_v42 = vpop.eup %14432  ;;  %14450 = vpow2.f32 %v9379_v13  ;;  %v8678_v13 = vrot.slane %v20570_v51, %v24042_v17 }
 0x4bf   : > { %24049 = vst [vmem:[#allocation111_spill] sm:$0xff] %v20540_v42  ;;  %9748 = vperm.xlu1 %14366, %v20540_v42   ;;  %v20550_v1 = vpop.eup %14434  ;;  %14452 = vpow2.f32 %v9387_v24  ;;  %v9253_v24 = vsub.f32 %v24066_v30, %v8670_v58  ;;  %v9395_v10 = vmul.f32 1.442695, %v9251_v3  ;;  %v9250_v4 = vsub.f32 %v19603_v12, %v8658_v29  ;;  %v20614_v3 = vpop.xlane.xlu0 %8541 }
 0x4c0   : > { %24053 = vst [vmem:[#allocation114_spill] sm:$0xff] %v20550_v1  ;;  %v20559_v43 = vpop.eup %14436  ;;  %v8674_v29 = vrot.slane %v20570_v51, %v24038_v62 }
 0x4c1   : > { %24056 = vst [vmem:[#allocation116_spill] sm:$0xff] %v20559_v43  ;;  %v9393_v12 = vmul.f32 1.442695, %v9250_v4  ;;  %v8682_v4 = vrot.slane %v20570_v51, %v24044_v60 }
 0x4c3   : > { %9754 = vperm.xlu1 %14366, %v20550_v1   ;;  %v20568_v1 = vpop.eup %14438 }
 0x4c4   : > { %24059 = vst [vmem:[#allocation118_spill] sm:$0xff] %v20568_v1  ;;  %v20579_v38 = vpop.eup %14440 }
 0x4c5   : > { %24061 = vst [vmem:[#allocation119_spill] sm:$0xff] %v20579_v38  ;;  %v20588_v20 = vpop.eup %14442 }
 0x4c6   : > { %24064 = vst [vmem:[#allocation113_spill] sm:$0xff] %v20588_v20  ;;  %v20590_v5 = vpop.eup %14444 }
 0x4c7   : > { %9757 = vperm.xlu1 %14366, %v20559_v43   ;;  %v9381_v43 = vmul.f32 1.442695, %v9244_v55  ;;  %24065 = vst [vmem:[#allocation120_spill] sm:$0xff] %v20590_v5 }
 0x4c9   : > { %14454 = vpow2.f32 %v9381_v43  ;;  %v8686_v43 = vrot.slane %v20570_v51, %v24046_v54 }
 0x4ca   : > { %14456 = vpow2.f32 %v9391_v32  ;;  %v9399_v32 = vmul.f32 1.442695, %v9253_v24  ;;  %v8694_v24 = vrot.slane %v20614_v3, %v14776_v2 }
 0x4cb   : > { %9760 = vperm.xlu1 %14366, %v20568_v1   ;;  %v9246_v1 = vsub.f32 %v24062_v0, %v8642_v61  ;;  %v9248_v61 = vsub.f32 %v19576_v18, %v8650_v14  ;;  %9751 = vperm.xlu0 %14367, %v20590_v5   ;;  %v20600_v0 = vpop.eup %14446  ;;  %v9255_v14 = vsub.f32 %v19681_v22, %v8678_v13 }
 0x4cc   : > { %24067 = vst [vmem:[#allocation125_spill] sm:$0xff] %v20600_v0  ;;  %v20602_v46 = vpop.eup %14448  ;;  %v9257_v22 = vsub.f32 %v19708_v31, %v8686_v43  ;;  %v8702_v43 = vrot.slane %v20614_v3, %v24037_v59 }
 0x4cd   : > { %v9385_v55 = vmul.f32 1.442695, %v9246_v1  ;;  %24068 = vst [vmem:[#allocation122_spill] sm:$0xff] %v20602_v46  ;;  %v9389_v18 = vmul.f32 1.442695, %v9248_v61  ;;  %v8666_v1 = vrot.slane %v20570_v51, %v24048_v47  ;;  %v20612_v58 = vpop.eup %14450  ;;  %v24071_v61 = vld [vmem:[#allocation133_spill] sm:$0xff] }
 0x4ce   : > { %24069 = vst [vmem:[#allocation128_spill] sm:$0xff] %v20612_v58  ;;  %v20616_v30 = vpop.eup %14452  ;;  %v9403_v13 = vmul.f32 1.442695, %v9255_v14  ;;  %v9407_v31 = vmul.f32 1.442695, %v9257_v22  ;;  %v9259_v14 = vsub.f32 %v19737_v27, %v8694_v24  ;;  %v8710_v22 = vrot.slane %v20614_v3, %v24042_v17 }
 0x4cf   : > { %9763 = vperm.xlu1 %14366, %v20579_v38   ;;  %14458 = vpow2.f32 %v9385_v55  ;;  %9778 = vperm.xlu0 %14367, %v20602_v46   ;;  %24070 = vst [vmem:[#allocation124_spill] sm:$0xff] %v20616_v30  ;;  %v9252_v55 = vsub.f32 %v24071_v61, %v8666_v1  ;;  %v9261_v27 = vsub.f32 %v19765_v56, %v8702_v43  ;;  %v24079_v56 = vld [vmem:[#allocation143_spill] sm:$0xff] }
 0x4d0   : > { %14460 = vpow2.f32 %v9395_v10 }
 0x4d1   : > { %14462 = vpow2.f32 %v9389_v18  ;;  %v24074_v18 = vld [vmem:[#allocation135_spill] sm:$0xff]  ;;  %v9397_v61 = vmul.f32 1.442695, %v9252_v55 }
 0x4d2   : > { %14464 = vpow2.f32 %v9399_v32  ;;  %v9254_v1 = vsub.f32 %v24074_v18, %v8674_v29  ;;  %v9256_v29 = vsub.f32 %v19702_v21, %v8682_v4  ;;  %v8698_v4 = vrot.slane %v20614_v3, %v24048_v47 }
 0x4d3   : > { %9766 = vperm.xlu1 %14366, %v20588_v20   ;;  %9784 = vperm.xlu0 %14367, %v20616_v30   ;;  %v20626_v10 = vpop.eup %14454  ;;  %14466 = vpow2.f32 %v9393_v12  ;;  %v8690_v12 = vrot.slane %v20570_v51, %v24050_v7 }
 0x4d4   : > { %24072 = vst [vmem:[#allocation126_spill] sm:$0xff] %v20626_v10  ;;  %v20628_v46 = vpop.eup %14456  ;;  %14468 = vpow2.f32 %v9403_v13  ;;  %v9401_v55 = vmul.f32 1.442695, %v9254_v1  ;;  %v9411_v13 = vmul.f32 1.442695, %v9259_v14  ;;  %v8718_v1 = vrot.slane %v20614_v3, %v24046_v54  ;;  %v20664_v14 = vpop.xlane.xlu1 %8544 }
 0x4d5   : > { %24073 = vst [vmem:[#allocation131_spill] sm:$0xff] %v20628_v46  ;;  %14470 = vpow2.f32 %v9397_v61  ;;  %v9258_v51 = vsub.f32 %v19728_v25, %v8690_v12  ;;  %v9405_v21 = vmul.f32 1.442695, %v9256_v29  ;;  %v9263_v61 = vsub.f32 %v24079_v56, %v8710_v22  ;;  %v24082_v29 = vld [vmem:[#allocation140_spill] sm:$0xff] }
 0x4d6   : > { %14472 = vpow2.f32 %v9407_v31  ;;  %v9415_v31 = vmul.f32 1.442695, %v9261_v27  ;;  %v8706_v12 = vrot.slane %v20614_v3, %v24038_v62  ;;  %v9265_v22 = vsub.f32 %v19814_v45, %v8718_v1 }
 0x4d7   : > { %9769 = vperm.xlu1 %14366, %v20600_v0   ;;  %9790 = vperm.xlu0 %14367, %v20628_v46   ;;  %14474 = vpow2.f32 %v9401_v55  ;;  %v9409_v25 = vmul.f32 1.442695, %v9258_v51  ;;  %v9260_v55 = vsub.f32 %v24082_v29, %v8698_v4  ;;  %v9419_v27 = vmul.f32 1.442695, %v9263_v61 }
 0x4d8   : > { %14476 = vpow2.f32 %v9411_v13  ;;  %v8726_v13 = vrot.slane %v20664_v14, %v14776_v2  ;;  %v8714_v51 = vrot.slane %v20614_v3, %v24044_v60  ;;  %v9423_v45 = vmul.f32 1.442695, %v9265_v22 }
 0x4d9   : > { %v20638_v32 = vpop.eup %14458  ;;  %14478 = vpow2.f32 %v9405_v21  ;;  %v24085_v21 = vld [vmem:[#allocation141_spill] sm:$0xff]  ;;  %v9413_v29 = vmul.f32 1.442695, %v9260_v55  ;;  %v8734_v1 = vrot.slane %v20664_v14, %v24037_v59  ;;  %v8742_v22 = vrot.slane %v20664_v14, %v24042_v17 }
 0x4da   : > { %24075 = vst [vmem:[#allocation134_spill] sm:$0xff] %v20638_v32  ;;  %v20640_v30 = vpop.eup %14460  ;;  %14480 = vpow2.f32 %v9415_v31  ;;  %v9262_v4 = vsub.f32 %v24085_v21, %v8706_v12  ;;  %v9267_v61 = vsub.f32 %v19831_v52, %v8726_v13  ;;  %v9264_v12 = vsub.f32 %v19810_v44, %v8714_v51 }
 0x4db   : > { %9772 = vperm.xlu1 %14366, %v20612_v58   ;;  %24076 = vst [vmem:[#allocation133_spill] sm:$0xff] %v20640_v30  ;;  %9796 = vperm.xlu0 %14367, %v20640_v30   ;;  %v20650_v24 = vpop.eup %14462  ;;  %14482 = vpow2.f32 %v9409_v25  ;;  %v8722_v25 = vrot.slane %v20614_v3, %v24050_v7  ;;  %v9269_v52 = vsub.f32 %v19855_v23, %v8734_v1  ;;  %v20714_v1 = vpop.xlane.xlu0 %8547 }
 0x4dc   : > { %24077 = vst [vmem:[#allocation135_spill] sm:$0xff] %v20650_v24  ;;  %v20652_v18 = vpop.eup %14464  ;;  %14484 = vpow2.f32 %v9419_v27  ;;  %v9417_v55 = vmul.f32 1.442695, %v9262_v4  ;;  %v9427_v27 = vmul.f32 1.442695, %v9267_v61  ;;  %v8730_v51 = vrot.slane %v20664_v14, %v24048_v47 }
 0x4dd   : > { %24078 = vst [vmem:[#allocation230_spill] sm:$0xff] %v20652_v18  ;;  %v20662_v43 = vpop.eup %14466  ;;  %14486 = vpow2.f32 %v9413_v29  ;;  %v9266_v3 = vsub.f32 %v19826_v41, %v8722_v25  ;;  %v9421_v44 = vmul.f32 1.442695, %v9264_v12  ;;  %v8750_v4 = vrot.slane %v20664_v14, %v24046_v54  ;;  %v24092_v12 = vld [vmem:[#allocation147_spill] sm:$0xff] }
 0x4de   : > { %24080 = vst [vmem:[#allocation143_spill] sm:$0xff] %v20662_v43  ;;  %v20666_v30 = vpop.eup %14468  ;;  %14488 = vpow2.f32 %v9423_v45  ;;  %v9271_v23 = vsub.f32 %v19873_v8, %v8742_v22  ;;  %v9431_v29 = vmul.f32 1.442695, %v9269_v52  ;;  %v8738_v25 = vrot.slane %v20664_v14, %v24038_v62 }
 0x4df   : > { %9775 = vperm.xlu1 %14366, %v20626_v10   ;;  %9802 = vperm.xlu0 %14367, %v20652_v18   ;;  %24081 = vst [vmem:[#allocation231_spill] sm:$0xff] %v20666_v30  ;;  %v20676_v56 = vpop.eup %14470  ;;  %14490 = vpow2.f32 %v9417_v55  ;;  %v9425_v41 = vmul.f32 1.442695, %v9266_v3  ;;  %v9268_v55 = vsub.f32 %v24092_v12, %v8730_v51  ;;  %v9273_v8 = vsub.f32 %v19897_v33, %v8750_v4 }
 0x4e0   : > { %24083 = vst [vmem:[#allocation140_spill] sm:$0xff] %v20676_v56  ;;  %v20678_v18 = vpop.eup %14472  ;;  %14492 = vpow2.f32 %v9427_v27  ;;  %v9435_v22 = vmul.f32 1.442695, %v9271_v23  ;;  %v8758_v52 = vrot.slane %v20714_v1, %v14776_v2  ;;  %v8746_v3 = vrot.slane %v20664_v14, %v24044_v60 }
 0x4e1   : > { %24084 = vst [vmem:[#allocation232_spill] sm:$0xff] %v20678_v18  ;;  %v20688_v31 = vpop.eup %14474  ;;  %14494 = vpow2.f32 %v9421_v44  ;;  %v9270_v44 = vsub.f32 %v19868_v57, %v8738_v25  ;;  %v9429_v51 = vmul.f32 1.442695, %v9268_v55  ;;  %v9439_v33 = vmul.f32 1.442695, %v9273_v8 }
 0x4e2   : > { %24086 = vst [vmem:[#allocation141_spill] sm:$0xff] %v20688_v31  ;;  %14496 = vpow2.f32 %v9431_v29  ;;  %v8766_v4 = vrot.slane %v20714_v1, %v24037_v59  ;;  %v9275_v23 = vsub.f32 %v19915_v19, %v8758_v52  ;;  %v9272_v57 = vsub.f32 %v19892_v15, %v8746_v3 }
 0x4e3   : > { %9781 = vperm.xlu1 %14366, %v20638_v32   ;;  %9808 = vperm.xlu0 %14367, %v20666_v30   ;;  %v20690_v30 = vpop.eup %14476  ;;  %14498 = vpow2.f32 %v9425_v41  ;;  %v8754_v41 = vrot.slane %v20664_v14, %v24050_v7  ;;  %v9433_v25 = vmul.f32 1.442695, %v9270_v44  ;;  %v8774_v55 = vrot.slane %v20714_v1, %v24042_v17 }
 0x4e4   : > { %24087 = vst [vmem:[#allocation233_spill] sm:$0xff] %v20690_v30  ;;  %v20700_v13 = vpop.eup %14478  ;;  %14500 = vpow2.f32 %v9435_v22  ;;  %v9277_v19 = vsub.f32 %v19933_v40, %v8766_v4  ;;  %v9443_v8 = vmul.f32 1.442695, %v9275_v23  ;;  %v9437_v15 = vmul.f32 1.442695, %v9272_v57  ;;  %v20764_v4 = vpop.xlane.xlu1 %8550 }
 0x4e5   : > { %24088 = vst [vmem:[#allocation234_spill] sm:$0xff] %v20700_v13  ;;  %v20702_v21 = vpop.eup %14480  ;;  %14502 = vpow2.f32 %v9429_v51  ;;  %v9274_v14 = vsub.f32 %v19909_v16, %v8754_v41  ;;  %v8762_v3 = vrot.slane %v20714_v1, %v24048_v47  ;;  %v8782_v44 = vrot.slane %v20714_v1, %v24046_v54 }
 0x4e6   : > { %24089 = vst [vmem:[#allocation235_spill] sm:$0xff] %v20702_v21  ;;  %v20712_v45 = vpop.eup %14482  ;;  %14504 = vpow2.f32 %v9439_v33  ;;  %v9279_v40 = vsub.f32 %v19951_v36, %v8774_v55  ;;  %v9447_v51 = vmul.f32 1.442695, %v9277_v19  ;;  %v8770_v41 = vrot.slane %v20714_v1, %v24038_v62 }
 0x4e7   : > { %9787 = vperm.xlu1 %14366, %v20650_v24   ;;  %9814 = vperm.xlu0 %14367, %v20678_v18   ;;  %24090 = vst [vmem:[#allocation236_spill] sm:$0xff] %v20712_v45  ;;  %v20716_v61 = vpop.eup %14484  ;;  %14506 = vpow2.f32 %v9433_v25  ;;  %v9441_v16 = vmul.f32 1.442695, %v9274_v14  ;;  %v9276_v57 = vsub.f32 %v19929_v49, %v8762_v3  ;;  %v9281_v36 = vsub.f32 %v19967_v34, %v8782_v44 }
 0x4e8   : > { %24091 = vst [vmem:[#allocation237_spill] sm:$0xff] %v20716_v61  ;;  %v20726_v27 = vpop.eup %14486  ;;  %14508 = vpow2.f32 %v9443_v8  ;;  %v9451_v25 = vmul.f32 1.442695, %v9279_v40  ;;  %v8790_v55 = vrot.slane %v20764_v4, %v14776_v2  ;;  %v8778_v14 = vrot.slane %v20714_v1, %v24044_v60 }
 0x4e9   : > { %24093 = vst [vmem:[#allocation147_spill] sm:$0xff] %v20726_v27  ;;  %14510 = vpow2.f32 %v9437_v15  ;;  %v9278_v49 = vsub.f32 %v19946_v63, %v8770_v41  ;;  %v9445_v15 = vmul.f32 1.442695, %v9276_v57  ;;  %v9455_v34 = vmul.f32 1.442695, %v9281_v36 }
 0x4ea   : > { %14512 = vpow2.f32 %v9447_v51  ;;  %v8798_v3 = vrot.slane %v20764_v4, %v24037_v59  ;;  %v9283_v44 = vsub.f32 %v19993_v53, %v8790_v55  ;;  %v9280_v63 = vsub.f32 %v19963_v37, %v8778_v14  ;;  %v24105_v53 = vld [vmem:[#allocation157_spill] sm:$0xff] }
 0x4eb   : > { %9793 = vperm.xlu1 %14366, %v20662_v43   ;;  %9820 = vperm.xlu0 %14367, %v20690_v30   ;;  %14514 = vpow2.f32 %v9441_v16  ;;  %v8786_v16 = vrot.slane %v20714_v1, %v24050_v7  ;;  %v9449_v41 = vmul.f32 1.442695, %v9278_v49  ;;  %v8806_v57 = vrot.slane %v20764_v4, %v24042_v17 }
 0x4ec   : > { %14516 = vpow2.f32 %v9451_v25  ;;  %v9285_v36 = vsub.f32 %v24105_v53, %v8798_v3  ;;  %v9459_v25 = vmul.f32 1.442695, %v9283_v44  ;;  %v9453_v37 = vmul.f32 1.442695, %v9280_v63  ;;  %v20814_v44 = vpop.xlane.xlu0 %8553  ;;  %v24110_v63 = vld [vmem:[#allocation156_spill] sm:$0xff] }
 0x4ed   : > { %14518 = vpow2.f32 %v9445_v15  ;;  %v9282_v1 = vsub.f32 %v19983_v9, %v8786_v16  ;;  %v8794_v14 = vrot.slane %v20764_v4, %v24048_v47  ;;  %v8814_v49 = vrot.slane %v20764_v4, %v24046_v54 }
 0x4ee   : > { %v9287_v15 = vsub.f32 %v20044_v11, %v8806_v57  ;;  %v8802_v16 = vrot.slane %v20764_v4, %v24038_v62 }
 0x4ef   : > { %9799 = vperm.xlu1 %14366, %v20676_v56   ;;  %9826 = vperm.xlu0 %14367, %v20702_v21   ;;  %v20728_v21 = vpop.eup %14488  ;;  %14520 = vpow2.f32 %v9455_v34  ;;  %v9463_v34 = vmul.f32 1.442695, %v9285_v36  ;;  %v9457_v9 = vmul.f32 1.442695, %v9282_v1  ;;  %v9289_v11 = vsub.f32 %v20066_v6, %v8814_v49 }
 0x4f0   : > { %24094 = vst [vmem:[#allocation238_spill] sm:$0xff] %v20728_v21  ;;  %v20738_v29 = vpop.eup %14490  ;;  %14522 = vpow2.f32 %v9449_v41  ;;  %v9284_v41 = vsub.f32 %v24110_v63, %v8794_v14  ;;  %v9467_v57 = vmul.f32 1.442695, %v9287_v15  ;;  %v8822_v36 = vrot.slane %v20814_v44, %v14776_v2 }
 0x4f1   : > { %24095 = vst [vmem:[#allocation239_spill] sm:$0xff] %v20738_v29  ;;  %v20740_v12 = vpop.eup %14492  ;;  %14524 = vpow2.f32 %v9459_v25  ;;  %v8810_v1 = vrot.slane %v20764_v4, %v24044_v60  ;;  %v9471_v6 = vmul.f32 1.442695, %v9289_v11  ;;  %v8830_v49 = vrot.slane %v20814_v44, %v24037_v59 }
 0x4f2   : > { %24096 = vst [vmem:[#allocation240_spill] sm:$0xff] %v20740_v12  ;;  %v20750_v22 = vpop.eup %14494  ;;  %14526 = vpow2.f32 %v9453_v37  ;;  %v9286_v37 = vsub.f32 %v20031_v35, %v8802_v16  ;;  %v9461_v14 = vmul.f32 1.442695, %v9284_v41  ;;  %v9291_v15 = vsub.f32 %v20096_v50, %v8822_v36 }
 0x4f3   : > { %9805 = vperm.xlu1 %14366, %v20688_v31   ;;  %9832 = vperm.xlu0 %14367, %v20716_v61   ;;  %24097 = vst [vmem:[#allocation241_spill] sm:$0xff] %v20750_v22  ;;  %v20752_v52 = vpop.eup %14496  ;;  %14528 = vpow2.f32 %v9463_v34  ;;  %v9288_v35 = vsub.f32 %v20058_v39, %v8810_v1  ;;  %v8838_v41 = vrot.slane %v20814_v44, %v24042_v17 }
 0x4f4   : > { %24098 = vst [vmem:[#allocation242_spill] sm:$0xff] %v20752_v52  ;;  %v20762_v33 = vpop.eup %14498  ;;  %14530 = vpow2.f32 %v9457_v9  ;;  %v8818_v9 = vrot.slane %v20764_v4, %v24050_v7  ;;  %v9465_v16 = vmul.f32 1.442695, %v9286_v37  ;;  %v9293_v50 = vsub.f32 %v20119_v48, %v8830_v49  ;;  %v20864_v49 = vpop.xlane.xlu1 %8556 }
 0x4f5   : > { %24099 = vst [vmem:[#allocation243_spill] sm:$0xff] %v20762_v33  ;;  %v20766_v23 = vpop.eup %14500  ;;  %14532 = vpow2.f32 %v9467_v57  ;;  %v9475_v11 = vmul.f32 1.442695, %v9291_v15  ;;  %v9469_v39 = vmul.f32 1.442695, %v9288_v35  ;;  %v8826_v1 = vrot.slane %v20814_v44, %v24048_v47  ;;  %v24119_v35 = vld [vmem:[#allocation162_spill] sm:$0xff] }
 0x4f6   : > { %24100 = vst [vmem:[#allocation244_spill] sm:$0xff] %v20766_v23  ;;  %v20776_v19 = vpop.eup %14502  ;;  %14534 = vpow2.f32 %v9461_v14  ;;  %v9290_v4 = vsub.f32 %v20083_v28, %v8818_v9  ;;  %v8846_v37 = vrot.slane %v20814_v44, %v24046_v54  ;;  %v9295_v48 = vsub.f32 %v20146_v26, %v8838_v41  ;;  %v24120_v26 = vld [vmem:[#allocation165_spill] sm:$0xff] }
 0x4f7   : > { %9811 = vperm.xlu1 %14366, %v20700_v13   ;;  %9838 = vperm.xlu0 %14367, %v20728_v21   ;;  %24101 = vst [vmem:[#allocation245_spill] sm:$0xff] %v20776_v19  ;;  %v20778_v8 = vpop.eup %14504  ;;  %14536 = vpow2.f32 %v9471_v6  ;;  %v9479_v14 = vmul.f32 1.442695, %v9293_v50  ;;  %v8834_v9 = vrot.slane %v20814_v44, %v24038_v62 }
 0x4f8   : > { %24102 = vst [vmem:[#allocation246_spill] sm:$0xff] %v20778_v8  ;;  %v20788_v40 = vpop.eup %14506  ;;  %14538 = vpow2.f32 %v9465_v16  ;;  %v9473_v28 = vmul.f32 1.442695, %v9290_v4  ;;  %v9292_v16 = vsub.f32 %v24119_v35, %v8826_v1  ;;  %v9297_v41 = vsub.f32 %v24120_v26, %v8846_v37 }
 0x4f9   : > { %24103 = vst [vmem:[#allocation247_spill] sm:$0xff] %v20788_v40  ;;  %v20790_v51 = vpop.eup %14508  ;;  %14540 = vpow2.f32 %v9475_v11  ;;  %v9483_v50 = vmul.f32 1.442695, %v9295_v48  ;;  %v8854_v11 = vrot.slane %v20864_v49, %v14776_v2  ;;  %v8842_v4 = vrot.slane %v20814_v44, %v24044_v60 }
 0x4fa   : > { %24104 = vst [vmem:[#allocation248_spill] sm:$0xff] %v20790_v51  ;;  %v20800_v55 = vpop.eup %14510  ;;  %14542 = vpow2.f32 %v9469_v39  ;;  %v24123_v39 = vld [vmem:[#allocation163_spill] sm:$0xff]  ;;  %v9477_v35 = vmul.f32 1.442695, %v9292_v16  ;;  %v9487_v37 = vmul.f32 1.442695, %v9297_v41  ;;  %v8862_v48 = vrot.slane %v20864_v49, %v24037_v59 }
 0x4fb   : > { %9817 = vperm.xlu1 %14366, %v20712_v45   ;;  %9844 = vperm.xlu0 %14367, %v20740_v12   ;;  %24106 = vst [vmem:[#allocation157_spill] sm:$0xff] %v20800_v55  ;;  %v9294_v1 = vsub.f32 %v24123_v39, %v8834_v9  ;;  %v8850_v9 = vrot.slane %v20814_v44, %v24050_v7  ;;  %v24127_v16 = vld [vmem:[#allocation164_spill] sm:$0xff]  ;;  %v24131_v44 = vld [vmem:[#allocation166_spill] sm:$0xff] }
 0x4fc   : > { %v9296_v39 = vsub.f32 %v24127_v16, %v8842_v4 }
 0x4fd   : > { %v9481_v41 = vmul.f32 1.442695, %v9294_v1  ;;  %v9298_v4 = vsub.f32 %v24131_v44, %v8850_v9  ;;  %v24135_v44 = vld [vmem:[#allocation168_spill] sm:$0xff] }
 0x4fe   : > { %v9485_v1 = vmul.f32 1.442695, %v9296_v39 }
 0x4ff   : > { %9823 = vperm.xlu1 %14366, %v20726_v27   ;;  %9850 = vperm.xlu0 %14367, %v20752_v52   ;;  %v9489_v39 = vmul.f32 1.442695, %v9298_v4  ;;  %v8874_v4 = vrot.slane %v20864_v49, %v24044_v60 }
 0x503   : > { %9829 = vperm.xlu1 %14366, %v20738_v29   ;;  %9856 = vperm.xlu0 %14367, %v20766_v23  }
 0x507   : > { %9835 = vperm.xlu1 %14366, %v20750_v22   ;;  %9862 = vperm.xlu0 %14367, %v20778_v8   ;;  %v20802_v8 = vpop.eup %14512  ;;  %14544 = vpow2.f32 %v9479_v14  ;;  %v24124_v14 = vld [vmem:[#allocation167_spill] sm:$0xff] }
 0x508   : > { %24107 = vst [vmem:[#allocation249_spill] sm:$0xff] %v20802_v8  ;;  %v20812_v3 = vpop.eup %14514  ;;  %14546 = vpow2.f32 %v9473_v28  ;;  %v9299_v26 = vsub.f32 %v24124_v14, %v8854_v11  ;;  %v24128_v11 = vld [vmem:[#allocation169_spill] sm:$0xff] }
 0x509   : > { %24108 = vst [vmem:[#allocation250_spill] sm:$0xff] %v20812_v3  ;;  %v20816_v53 = vpop.eup %14516  ;;  %14548 = vpow2.f32 %v9483_v50  ;;  %v8870_v50 = vrot.slane %v20864_v49, %v24042_v17  ;;  %v9301_v14 = vsub.f32 %v24128_v11, %v8862_v48  ;;  %v24132_v48 = vld [vmem:[#allocation171_spill] sm:$0xff] }
 0x50a   : > { %24109 = vst [vmem:[#allocation251_spill] sm:$0xff] %v20816_v53  ;;  %v20826_v25 = vpop.eup %14518  ;;  %14550 = vpow2.f32 %v9477_v35  ;;  %v8858_v35 = vrot.slane %v20864_v49, %v24048_v47 }
 0x50b   : > { %9841 = vperm.xlu1 %14366, %v20762_v33   ;;  %9868 = vperm.xlu0 %14367, %v20790_v51   ;;  %24111 = vst [vmem:[#allocation156_spill] sm:$0xff] %v20826_v25  ;;  %v9495_v16 = vmul.f32 1.442695, %v9301_v14 }
 0x50f   : > { %9847 = vperm.xlu1 %14366, %v20776_v19   ;;  %9874 = vperm.xlu0 %14367, %v20802_v8   ;;  %v20828_v8 = vpop.eup %14520  ;;  %14552 = vpow2.f32 %v9487_v37  ;;  %v8878_v37 = vrot.slane %v20864_v49, %v24046_v54 }
 0x510   : > { %24112 = vst [vmem:[#allocation252_spill] sm:$0xff] %v20828_v8  ;;  %v20838_v34 = vpop.eup %14522  ;;  %14554 = vpow2.f32 %v9481_v41  ;;  %v8866_v41 = vrot.slane %v20864_v49, %v24038_v62 }
 0x511   : > { %24113 = vst [vmem:[#allocation253_spill] sm:$0xff] %v20838_v34  ;;  %v20840_v63 = vpop.eup %14524 }
 0x512   : > { %24114 = vst [vmem:[#allocation254_spill] sm:$0xff] %v20840_v63  ;;  %v20850_v57 = vpop.eup %14526 }
 0x513   : > { %9853 = vperm.xlu1 %14366, %v20788_v40   ;;  %9880 = vperm.xlu0 %14367, %v20816_v53   ;;  %24115 = vst [vmem:[#allocation255_spill] sm:$0xff] %v20850_v57  ;;  %v20852_v36 = vpop.eup %14528 }
 0x514   : > { %24116 = vst [vmem:[#allocation256_spill] sm:$0xff] %v20852_v36  ;;  %v20862_v6 = vpop.eup %14530 }
 0x515   : > { %24117 = vst [vmem:[#allocation257_spill] sm:$0xff] %v20862_v6  ;;  %v20866_v15 = vpop.eup %14532 }
 0x516   : > { %24118 = vst [vmem:[#allocation258_spill] sm:$0xff] %v20866_v15 }
 0x517   : > { %9859 = vperm.xlu1 %14366, %v20800_v55   ;;  %9886 = vperm.xlu0 %14367, %v20828_v8   ;;  %v20890_v8 = vpop.xlane.xlu1 %8562 }
 0x51b   : > { %9865 = vperm.xlu1 %14366, %v20812_v3   ;;  %9892 = vperm.xlu0 %14367, %v20840_v63   ;;  %v20904_v51 = vpop.xlane.xlu1 %8568 }
 0x51f   : > { %9871 = vperm.xlu1 %14366, %v20826_v25   ;;  %9898 = vperm.xlu0 %14367, %v20852_v36   ;;  %v20876_v36 = vpop.eup %14534 }
 0x520   : > { %24121 = vst [vmem:[#allocation162_spill] sm:$0xff] %v20876_v36  ;;  %v20878_v63 = vpop.eup %14536 }
 0x521   : > { %24122 = vst [vmem:[#allocation165_spill] sm:$0xff] %v20878_v63 }
 0x523   : > { %9877 = vperm.xlu1 %14366, %v20838_v34   ;;  %9904 = vperm.xlu0 %14367, %v20866_v15   ;;  %v20888_v15 = vpop.eup %14538 }
 0x524   : > { %24125 = vst [vmem:[#allocation163_spill] sm:$0xff] %v20888_v15  ;;  %v20892_v28 = vpop.eup %14540 }
 0x525   : > { %24126 = vst [vmem:[#allocation167_spill] sm:$0xff] %v20892_v28  ;;  %v20902_v53 = vpop.eup %14542 }
 0x526   : > { %24129 = vst [vmem:[#allocation164_spill] sm:$0xff] %v20902_v53  ;;  %v20906_v23 = vpop.eup %14544 }
 0x527   : > { %9883 = vperm.xlu1 %14366, %v20850_v57   ;;  %9910 = vperm.xlu0 %14367, %v20878_v63   ;;  %v9491_v63 = vmul.f32 1.442695, %v9299_v26  ;;  %24130 = vst [vmem:[#allocation169_spill] sm:$0xff] %v20906_v23  ;;  %v9303_v26 = vsub.f32 %v24132_v48, %v8870_v50  ;;  %v20916_v11 = vpop.eup %14546 }
 0x528   : > { %24133 = vst [vmem:[#allocation166_spill] sm:$0xff] %v20916_v11  ;;  %v20922_v9 = vpop.eup %14548 }
 0x529   : > { %14556 = vpow2.f32 %v9491_v63  ;;  %24134 = vst [vmem:[#allocation171_spill] sm:$0xff] %v20922_v9  ;;  %v24136_v63 = vld [vmem:[#allocation173_spill] sm:$0xff]  ;;  %v9499_v14 = vmul.f32 1.442695, %v9303_v26  ;;  %v20932_v12 = vpop.eup %14550 }
 0x52a   : > { %v20920_v52 = vpop.xlane.xlu1 %8574  ;;  %14558 = vpow2.f32 %v9485_v1  ;;  %v9305_v50 = vsub.f32 %v24136_v63, %v8878_v37  ;;  %24137 = vst [vmem:[#allocation168_spill] sm:$0xff] %v20932_v12  ;;  %v20936_v1 = vpop.eup %14552  ;;  %v24140_v63 = vld [vmem:[#allocation175_spill] sm:$0xff] }
 0x52b   : > { %9889 = vperm.xlu1 %14366, %v20862_v6   ;;  %9916 = vperm.xlu0 %14367, %v20892_v28   ;;  %v20918_v28 = vpop.xlane.xlu0 %8559  ;;  %14560 = vpow2.f32 %v9495_v16  ;;  %24138 = vst [vmem:[#allocation173_spill] sm:$0xff] %v20936_v1  ;;  %v20946_v61 = vpop.eup %14554 }
 0x52c   : > { %v8886_v48 = vrot.slane %v20918_v28, %v14776_v2  ;;  %14562 = vpow2.f32 %v9489_v39  ;;  %v9503_v26 = vmul.f32 1.442695, %v9305_v50  ;;  %v8894_v16 = vrot.slane %v20918_v28, %v24037_v59 }
 0x52d   : > { %14564 = vpow2.f32 %v9499_v14  ;;  %v8902_v14 = vrot.slane %v20918_v28, %v24042_v17 }
 0x52f   : > { %9895 = vperm.xlu1 %14366, %v20876_v36   ;;  %9922 = vperm.xlu0 %14367, %v20906_v23   ;;  %v9300_v23 = vsub.f32 %v24135_v44, %v8858_v35  ;;  %v24139_v35 = vld [vmem:[#allocation170_spill] sm:$0xff] }
 0x530   : > { %v9302_v44 = vsub.f32 %v24139_v35, %v8866_v41  ;;  %24141 = vst [vmem:[#allocation170_spill] sm:$0xff] %v20946_v61  ;;  %v24143_v41 = vld [vmem:[#allocation172_spill] sm:$0xff] }
 0x531   : > { %v9493_v37 = vmul.f32 1.442695, %v9300_v23  ;;  %v8882_v23 = vrot.slane %v20864_v49, %v24050_v7  ;;  %v9304_v35 = vsub.f32 %v24143_v41, %v8874_v4  ;;  %v20966_v49 = vpop.xlane.xlu0 %8565  ;;  %v24147_v4 = vld [vmem:[#allocation174_spill] sm:$0xff] }
 0x532   : > { %v9497_v50 = vmul.f32 1.442695, %v9302_v44 }
 0x533   : > { %9901 = vperm.xlu1 %14366, %v20888_v15   ;;  %9928 = vperm.xlu0 %14367, %v20922_v9   ;;  %v9307_v9 = vsub.f32 %v24140_v63, %v8886_v48  ;;  %v20950_v39 = vpop.eup %14556  ;;  %14566 = vpow2.f32 %v9493_v37  ;;  %v24144_v48 = vld [vmem:[#allocation177_spill] sm:$0xff]  ;;  %v9306_v44 = vsub.f32 %v24147_v4, %v8882_v23  ;;  %v9501_v37 = vmul.f32 1.442695, %v9304_v35  ;;  %v24151_v4 = vld [vmem:[#allocation176_spill] sm:$0xff] }
 0x534   : > { %24142 = vst [vmem:[#allocation175_spill] sm:$0xff] %v20950_v39  ;;  %14568 = vpow2.f32 %v9503_v26  ;;  %v9309_v63 = vsub.f32 %v24144_v48, %v8894_v16  ;;  %v20960_v18 = vpop.eup %14558  ;;  %v8890_v26 = vrot.slane %v20918_v28, %v24048_v47  ;;  %v24148_v16 = vld [vmem:[#allocation179_spill] sm:$0xff] }
 0x535   : > { %24145 = vst [vmem:[#allocation172_spill] sm:$0xff] %v20960_v18  ;;  %v20964_v58 = vpop.eup %14560  ;;  %14570 = vpow2.f32 %v9497_v50  ;;  %v9311_v41 = vsub.f32 %v24148_v16, %v8902_v14  ;;  %v20982_v23 = vpop.xlane.xlu0 %8571  ;;  %v9505_v35 = vmul.f32 1.442695, %v9306_v44  ;;  %v8898_v50 = vrot.slane %v20918_v28, %v24038_v62 }
 0x536   : > { %24146 = vst [vmem:[#allocation177_spill] sm:$0xff] %v20964_v58  ;;  %v9511_v48 = vmul.f32 1.442695, %v9309_v63  ;;  %v8918_v16 = vrot.slane %v20890_v8, %v14776_v2 }
 0x537   : > { %9907 = vperm.xlu1 %14366, %v20902_v53   ;;  %9934 = vperm.xlu0 %14367, %v20936_v1   ;;  %v9507_v1 = vmul.f32 1.442695, %v9307_v9  ;;  %v8910_v9 = vrot.slane %v20918_v28, %v24046_v54  ;;  %v9515_v63 = vmul.f32 1.442695, %v9311_v41 }
 0x539   : > { %14572 = vpow2.f32 %v9507_v1  ;;  %v24152_v1 = vld [vmem:[#allocation181_spill] sm:$0xff] }
 0x53a   : > { %14574 = vpow2.f32 %v9501_v37  ;;  %v9313_v14 = vsub.f32 %v24152_v1, %v8910_v9  ;;  %v24156_v9 = vld [vmem:[#allocation178_spill] sm:$0xff]  ;;  %v8926_v1 = vrot.slane %v20890_v8, %v24037_v59 }
 0x53b   : > { %9913 = vperm.xlu1 %14366, %v20916_v11   ;;  %9940 = vperm.xlu0 %14367, %v20950_v39   ;;  %v20976_v39 = vpop.eup %14562  ;;  %14576 = vpow2.f32 %v9511_v48  ;;  %v9310_v48 = vsub.f32 %v24156_v9, %v8898_v50  ;;  %v24160_v50 = vld [vmem:[#allocation180_spill] sm:$0xff] }
 0x53c   : > { %24149 = vst [vmem:[#allocation174_spill] sm:$0xff] %v20976_v39  ;;  %14578 = vpow2.f32 %v9505_v35 }
 0x53d   : > { %14580 = vpow2.f32 %v9515_v63  ;;  %v9513_v63 = vmul.f32 1.442695, %v9310_v48 }
 0x53e   : > { %v20934_v21 = vpop.permute.xlu1 %9748 }
 0x53f   : > { %9919 = vperm.xlu1 %14366, %v20932_v12   ;;  %9946 = vperm.xlu0 %14367, %v20964_v58   ;;  %v9308_v58 = vsub.f32 %v24151_v4, %v8890_v26  ;;  %v8906_v26 = vrot.slane %v20918_v28, %v24044_v60  ;;  %v9519_v4 = vmul.f32 1.442695, %v9313_v14 }
 0x541   : > { %v9509_v41 = vmul.f32 1.442695, %v9308_v58  ;;  %v8914_v58 = vrot.slane %v20918_v28, %v24050_v7  ;;  %v9312_v14 = vsub.f32 %v24160_v50, %v8906_v26  ;;  %v24164_v26 = vld [vmem:[#allocation182_spill] sm:$0xff] }
 0x542   : > { %v20948_v30 = vpop.permute.xlu1 %9754  ;;  %v20998_v44 = vpop.xlane.xlu0 %8577 }
 0x543   : > { %9925 = vperm.xlu1 %14366, %v20946_v61   ;;  %24155 = vst [vmem:[#allocation259_spill] sm:$0xff] %v20998_v44  ;;  %14582 = vpow2.f32 %v9509_v41  ;;  %v9314_v48 = vsub.f32 %v24164_v26, %v8914_v58  ;;  %v9517_v41 = vmul.f32 1.442695, %v9312_v14  ;;  %v24168_v26 = vld [vmem:[#allocation184_spill] sm:$0xff] }
 0x544   : > { %14584 = vpow2.f32 %v9519_v4  ;;  %v8922_v4 = vrot.slane %v20890_v8, %v24048_v47 }
 0x545   : > { %14586 = vpow2.f32 %v9513_v63  ;;  %v9521_v14 = vmul.f32 1.442695, %v9314_v48  ;;  %v8930_v63 = vrot.slane %v20890_v8, %v24038_v62 }
 0x546   : > { %v20962_v46 = vpop.permute.xlu1 %9757 }
 0x547   : > { %9931 = vperm.xlu1 %14366, %v20960_v18   ;;  %v20980_v18 = vpop.eup %14564 }
 0x548   : > { %24150 = vst [vmem:[#allocation179_spill] sm:$0xff] %v20980_v18  ;;  %9952 = vperm.xlu0 %14367, %v20980_v18   ;;  %v20992_v5 = vpop.eup %14566  ;;  %v24157_v18 = vld [vmem:[#allocation183_spill] sm:$0xff] }
 0x549   : > { %24153 = vst [vmem:[#allocation176_spill] sm:$0xff] %v20992_v5  ;;  %v20996_v37 = vpop.eup %14568 }
 0x54a   : > { %v20978_v20 = vpop.permute.xlu1 %9760  ;;  %24154 = vst [vmem:[#allocation181_spill] sm:$0xff] %v20996_v37  ;;  %v21008_v12 = vpop.eup %14570 }
 0x54b   : > { %9937 = vperm.xlu1 %14366, %v20976_v39   ;;  %v9315_v39 = vsub.f32 %v24157_v18, %v8918_v16  ;;  %24158 = vst [vmem:[#allocation178_spill] sm:$0xff] %v21008_v12  ;;  %v21012_v35 = vpop.eup %14572  ;;  %v8934_v18 = vrot.slane %v20890_v8, %v24042_v17  ;;  %v24161_v16 = vld [vmem:[#allocation185_spill] sm:$0xff] }
 0x54c   : > { %9958 = vperm.xlu0 %14367, %v20996_v37   ;;  %24159 = vst [vmem:[#allocation183_spill] sm:$0xff] %v21012_v35  ;;  %v9317_v9 = vsub.f32 %v24161_v16, %v8926_v1  ;;  %v21024_v53 = vpop.eup %14574  ;;  %v24165_v1 = vld [vmem:[#allocation187_spill] sm:$0xff] }
 0x54d   : > { %v9523_v37 = vmul.f32 1.442695, %v9315_v39  ;;  %24162 = vst [vmem:[#allocation180_spill] sm:$0xff] %v21024_v53  ;;  %v8942_v39 = vrot.slane %v20890_v8, %v24046_v54  ;;  %v9319_v50 = vsub.f32 %v24165_v1, %v8934_v18  ;;  %v8950_v1 = vrot.slane %v20966_v49, %v14776_v2 }
 0x54e   : > { %v20994_v61 = vpop.permute.xlu1 %9763  ;;  %v9527_v16 = vmul.f32 1.442695, %v9317_v9 }
 0x54f   : > { %9943 = vperm.xlu1 %14366, %v20992_v5   ;;  %v21014_v5 = vpop.permute.xlu0 %9751  ;;  %14588 = vpow2.f32 %v9523_v37  ;;  %v24169_v37 = vld [vmem:[#allocation189_spill] sm:$0xff]  ;;  %v9531_v9 = vmul.f32 1.442695, %v9319_v50 }
 0x550   : > { %9964 = vperm.xlu0 %14367, %v21012_v35   ;;  %14590 = vpow2.f32 %v9517_v41  ;;  %v9321_v18 = vsub.f32 %v24169_v37, %v8942_v39  ;;  %v24172_v39 = vld [vmem:[#allocation186_spill] sm:$0xff]  ;;  %v8958_v37 = vrot.slane %v20966_v49, %v24037_v59 }
 0x551   : > { %14592 = vpow2.f32 %v9527_v16  ;;  %v9318_v16 = vsub.f32 %v24172_v39, %v8930_v63  ;;  %v24176_v63 = vld [vmem:[#allocation188_spill] sm:$0xff] }
 0x552   : > { %v21010_v11 = vpop.permute.xlu1 %9766  ;;  %14594 = vpow2.f32 %v9521_v14 }
 0x553   : > { %9949 = vperm.xlu1 %14366, %v21008_v12   ;;  %v21028_v12 = vpop.eup %14576  ;;  %v21030_v28 = vpop.permute.xlu0 %9778  ;;  %14596 = vpow2.f32 %v9531_v9  ;;  %v9529_v9 = vmul.f32 1.442695, %v9318_v16 }
 0x554   : > { %24163 = vst [vmem:[#allocation185_spill] sm:$0xff] %v21028_v12  ;;  %9970 = vperm.xlu0 %14367, %v21028_v12   ;;  %v21040_v35 = vpop.eup %14578  ;;  %v9316_v12 = vsub.f32 %v24168_v26, %v8922_v4  ;;  %v8938_v4 = vrot.slane %v20890_v8, %v24044_v60  ;;  %v9535_v26 = vmul.f32 1.442695, %v9321_v18 }
 0x555   : > { %24166 = vst [vmem:[#allocation182_spill] sm:$0xff] %v21040_v35 }
 0x556   : > { %v21026_v15 = vpop.permute.xlu1 %9769  ;;  %v9525_v50 = vmul.f32 1.442695, %v9316_v12  ;;  %v8946_v12 = vrot.slane %v20890_v8, %v24050_v7  ;;  %v9320_v18 = vsub.f32 %v24176_v63, %v8938_v4  ;;  %v24180_v4 = vld [vmem:[#allocation190_spill] sm:$0xff] }
 0x557   : > { %9955 = vperm.xlu1 %14366, %v21024_v53   ;;  %v21044_v53 = vpop.eup %14580  ;;  %v21046_v58 = vpop.permute.xlu0 %9784 }
 0x558   : > { %24167 = vst [vmem:[#allocation187_spill] sm:$0xff] %v21044_v53  ;;  %9976 = vperm.xlu0 %14367, %v21044_v53   ;;  %v21056_v6 = vpop.eup %14582  ;;  %v24173_v53 = vld [vmem:[#allocation191_spill] sm:$0xff]  ;;  %14598 = vpow2.f32 %v9525_v50  ;;  %v9322_v16 = vsub.f32 %v24180_v4, %v8946_v12  ;;  %v9533_v50 = vmul.f32 1.442695, %v9320_v18  ;;  %v24184_v4 = vld [vmem:[#allocation192_spill] sm:$0xff] }
 0x559   : > { %24170 = vst [vmem:[#allocation184_spill] sm:$0xff] %v21056_v6  ;;  %v21060_v41 = vpop.eup %14584  ;;  %14600 = vpow2.f32 %v9535_v26  ;;  %v8954_v26 = vrot.slane %v20966_v49, %v24048_v47 }
 0x55a   : > { %v21042_v36 = vpop.permute.xlu1 %9772  ;;  %24171 = vst [vmem:[#allocation189_spill] sm:$0xff] %v21060_v41  ;;  %v21072_v34 = vpop.eup %14586  ;;  %14602 = vpow2.f32 %v9529_v9  ;;  %v9537_v18 = vmul.f32 1.442695, %v9322_v16  ;;  %v8962_v9 = vrot.slane %v20966_v49, %v24038_v62 }
 0x55b   : > { %9961 = vperm.xlu1 %14366, %v21040_v35   ;;  %v21062_v48 = vpop.permute.xlu0 %9790  ;;  %v9323_v35 = vsub.f32 %v24173_v53, %v8950_v1  ;;  %24174 = vst [vmem:[#allocation186_spill] sm:$0xff] %v21072_v34  ;;  %v21076_v14 = vpop.eup %14588  ;;  %v8966_v53 = vrot.slane %v20966_v49, %v24042_v17  ;;  %v24177_v1 = vld [vmem:[#allocation193_spill] sm:$0xff] }
 0x55c   : > { %9982 = vperm.xlu0 %14367, %v21060_v41   ;;  %24175 = vst [vmem:[#allocation191_spill] sm:$0xff] %v21076_v14  ;;  %v9325_v39 = vsub.f32 %v24177_v1, %v8958_v37  ;;  %v21088_v3 = vpop.eup %14590  ;;  %v24181_v37 = vld [vmem:[#allocation195_spill] sm:$0xff] }
 0x55d   : > { %v9539_v41 = vmul.f32 1.442695, %v9323_v35  ;;  %24178 = vst [vmem:[#allocation188_spill] sm:$0xff] %v21088_v3  ;;  %v8974_v35 = vrot.slane %v20966_v49, %v24046_v54  ;;  %v9327_v63 = vsub.f32 %v24181_v37, %v8966_v53  ;;  %v8982_v37 = vrot.slane %v20904_v51, %v14776_v2 }
 0x55e   : > { %v21058_v57 = vpop.permute.xlu1 %9775  ;;  %v9543_v1 = vmul.f32 1.442695, %v9325_v39 }
 0x55f   : > { %9967 = vperm.xlu1 %14366, %v21056_v6   ;;  %v21078_v6 = vpop.permute.xlu0 %9796  ;;  %14604 = vpow2.f32 %v9539_v41  ;;  %v24185_v41 = vld [vmem:[#allocation197_spill] sm:$0xff]  ;;  %v9547_v39 = vmul.f32 1.442695, %v9327_v63 }
 0x560   : > { %9988 = vperm.xlu0 %14367, %v21076_v14   ;;  %14606 = vpow2.f32 %v9533_v50  ;;  %v9329_v53 = vsub.f32 %v24185_v41, %v8974_v35  ;;  %v24188_v35 = vld [vmem:[#allocation194_spill] sm:$0xff]  ;;  %v8990_v41 = vrot.slane %v20904_v51, %v24037_v59 }
 0x561   : > { %14608 = vpow2.f32 %v9543_v1  ;;  %v9326_v1 = vsub.f32 %v24188_v35, %v8962_v9  ;;  %v24192_v9 = vld [vmem:[#allocation196_spill] sm:$0xff] }
 0x562   : > { %v21074_v25 = vpop.permute.xlu1 %9781  ;;  %14610 = vpow2.f32 %v9537_v18 }
 0x563   : > { %9973 = vperm.xlu1 %14366, %v21072_v34   ;;  %v21092_v34 = vpop.eup %14592  ;;  %v21094_v8 = vpop.permute.xlu0 %9802  ;;  %14612 = vpow2.f32 %v9547_v39  ;;  %v9545_v39 = vmul.f32 1.442695, %v9326_v1 }
 0x564   : > { %24179 = vst [vmem:[#allocation193_spill] sm:$0xff] %v21092_v34  ;;  %9994 = vperm.xlu0 %14367, %v21092_v34   ;;  %v21104_v14 = vpop.eup %14594  ;;  %v9324_v34 = vsub.f32 %v24184_v4, %v8954_v26  ;;  %v8970_v26 = vrot.slane %v20966_v49, %v24044_v60  ;;  %v9551_v4 = vmul.f32 1.442695, %v9329_v53 }
 0x565   : > { %24182 = vst [vmem:[#allocation190_spill] sm:$0xff] %v21104_v14 }
 0x566   : > { %v21090_v55 = vpop.permute.xlu1 %9787  ;;  %v9541_v63 = vmul.f32 1.442695, %v9324_v34  ;;  %v8978_v34 = vrot.slane %v20966_v49, %v24050_v7  ;;  %v9328_v53 = vsub.f32 %v24192_v9, %v8970_v26  ;;  %v24196_v26 = vld [vmem:[#allocation198_spill] sm:$0xff] }
 0x567   : > { %9979 = vperm.xlu1 %14366, %v21088_v3   ;;  %v21108_v3 = vpop.eup %14596  ;;  %v21110_v12 = vpop.permute.xlu0 %9808 }
 0x568   : > { %24183 = vst [vmem:[#allocation195_spill] sm:$0xff] %v21108_v3  ;;  %10000 = vperm.xlu0 %14367, %v21108_v3   ;;  %v21120_v19 = vpop.eup %14598  ;;  %v24189_v3 = vld [vmem:[#allocation199_spill] sm:$0xff]  ;;  %14614 = vpow2.f32 %v9541_v63  ;;  %v9330_v1 = vsub.f32 %v24196_v26, %v8978_v34  ;;  %v9549_v63 = vmul.f32 1.442695, %v9328_v53  ;;  %v24200_v26 = vld [vmem:[#allocation200_spill] sm:$0xff] }
 0x569   : > { %24186 = vst [vmem:[#allocation192_spill] sm:$0xff] %v21120_v19  ;;  %v21124_v50 = vpop.eup %14600  ;;  %14616 = vpow2.f32 %v9551_v4  ;;  %v8986_v4 = vrot.slane %v20904_v51, %v24048_v47 }
 0x56a   : > { %v21106_v40 = vpop.permute.xlu1 %9793  ;;  %24187 = vst [vmem:[#allocation197_spill] sm:$0xff] %v21124_v50  ;;  %v21136_v22 = vpop.eup %14602  ;;  %14618 = vpow2.f32 %v9545_v39  ;;  %v9553_v53 = vmul.f32 1.442695, %v9330_v1  ;;  %v8994_v39 = vrot.slane %v20904_v51, %v24038_v62 }
 0x56b   : > { %9985 = vperm.xlu1 %14366, %v21104_v14   ;;  %v21126_v16 = vpop.permute.xlu0 %9814  ;;  %v9331_v14 = vsub.f32 %v24189_v3, %v8982_v37  ;;  %24190 = vst [vmem:[#allocation194_spill] sm:$0xff] %v21136_v22  ;;  %v21140_v18 = vpop.eup %14604  ;;  %v8998_v3 = vrot.slane %v20904_v51, %v24042_v17  ;;  %v24193_v37 = vld [vmem:[#allocation201_spill] sm:$0xff] }
 0x56c   : > { %10006 = vperm.xlu0 %14367, %v21124_v50   ;;  %24191 = vst [vmem:[#allocation199_spill] sm:$0xff] %v21140_v18  ;;  %v9333_v35 = vsub.f32 %v24193_v37, %v8990_v41  ;;  %v21152_v27 = vpop.eup %14606  ;;  %v24197_v41 = vld [vmem:[#allocation203_spill] sm:$0xff] }
 0x56d   : > { %v9555_v50 = vmul.f32 1.442695, %v9331_v14  ;;  %24194 = vst [vmem:[#allocation196_spill] sm:$0xff] %v21152_v27  ;;  %v9006_v14 = vrot.slane %v20904_v51, %v24046_v54  ;;  %v9335_v9 = vsub.f32 %v24197_v41, %v8998_v3  ;;  %v9014_v41 = vrot.slane %v20982_v23, %v14776_v2 }
 0x56e   : > { %v21122_v33 = vpop.permute.xlu1 %9799  ;;  %v9559_v37 = vmul.f32 1.442695, %v9333_v35 }
 0x56f   : > { %9991 = vperm.xlu1 %14366, %v21120_v19   ;;  %v21142_v19 = vpop.permute.xlu0 %9820  ;;  %14620 = vpow2.f32 %v9555_v50  ;;  %v24201_v50 = vld [vmem:[#allocation205_spill] sm:$0xff]  ;;  %v9563_v35 = vmul.f32 1.442695, %v9335_v9 }
 0x570   : > { %10012 = vperm.xlu0 %14367, %v21140_v18   ;;  %14622 = vpow2.f32 %v9549_v63  ;;  %v9337_v3 = vsub.f32 %v24201_v50, %v9006_v14  ;;  %v24205_v14 = vld [vmem:[#allocation202_spill] sm:$0xff]  ;;  %v9022_v50 = vrot.slane %v20982_v23, %v24037_v59 }
 0x571   : > { %14624 = vpow2.f32 %v9559_v37  ;;  %v9334_v37 = vsub.f32 %v24205_v14, %v8994_v39  ;;  %v24209_v39 = vld [vmem:[#allocation204_spill] sm:$0xff] }
 0x572   : > { %v21138_v29 = vpop.permute.xlu1 %9805  ;;  %14626 = vpow2.f32 %v9553_v53 }
 0x573   : > { %9997 = vperm.xlu1 %14366, %v21136_v22   ;;  %v21156_v22 = vpop.eup %14608  ;;  %v21158_v49 = vpop.permute.xlu0 %9826  ;;  %14628 = vpow2.f32 %v9563_v35  ;;  %v9561_v35 = vmul.f32 1.442695, %v9334_v37 }
 0x574   : > { %24195 = vst [vmem:[#allocation201_spill] sm:$0xff] %v21156_v22  ;;  %10018 = vperm.xlu0 %14367, %v21156_v22   ;;  %v21168_v18 = vpop.eup %14610  ;;  %v9332_v22 = vsub.f32 %v24200_v26, %v8986_v4  ;;  %v9002_v4 = vrot.slane %v20904_v51, %v24044_v60  ;;  %v9567_v26 = vmul.f32 1.442695, %v9337_v3 }
 0x575   : > { %24198 = vst [vmem:[#allocation198_spill] sm:$0xff] %v21168_v18 }
 0x576   : > { %v21154_v45 = vpop.permute.xlu1 %9811  ;;  %v9557_v9 = vmul.f32 1.442695, %v9332_v22  ;;  %v9010_v22 = vrot.slane %v20904_v51, %v24050_v7  ;;  %v9336_v3 = vsub.f32 %v24209_v39, %v9002_v4  ;;  %v24213_v4 = vld [vmem:[#allocation206_spill] sm:$0xff] }
 0x577   : > { %10003 = vperm.xlu1 %14366, %v21152_v27   ;;  %v21172_v27 = vpop.eup %14612  ;;  %v21174_v34 = vpop.permute.xlu0 %9832 }
 0x578   : > { %24199 = vst [vmem:[#allocation203_spill] sm:$0xff] %v21172_v27  ;;  %10024 = vperm.xlu0 %14367, %v21172_v27   ;;  %v21184_v31 = vpop.eup %14614  ;;  %v24206_v27 = vld [vmem:[#allocation207_spill] sm:$0xff]  ;;  %14630 = vpow2.f32 %v9557_v9  ;;  %v9338_v37 = vsub.f32 %v24213_v4, %v9010_v22  ;;  %v9565_v9 = vmul.f32 1.442695, %v9336_v3  ;;  %v24218_v4 = vld [vmem:[#allocation208_spill] sm:$0xff] }
 0x579   : > { %24202 = vst [vmem:[#allocation200_spill] sm:$0xff] %v21184_v31  ;;  %v21188_v63 = vpop.eup %14616  ;;  %14632 = vpow2.f32 %v9567_v26  ;;  %v9018_v26 = vrot.slane %v20982_v23, %v24048_v47 }
 0x57a   : > { %v21170_v13 = vpop.permute.xlu1 %9817  ;;  %24203 = vst [vmem:[#allocation205_spill] sm:$0xff] %v21188_v63  ;;  %v21200_v43 = vpop.eup %14618  ;;  %14634 = vpow2.f32 %v9561_v35  ;;  %v9569_v3 = vmul.f32 1.442695, %v9338_v37  ;;  %v9026_v35 = vrot.slane %v20982_v23, %v24038_v62 }
 0x57b   : > { %10009 = vperm.xlu1 %14366, %v21168_v18   ;;  %v21190_v1 = vpop.permute.xlu0 %9838  ;;  %v9339_v18 = vsub.f32 %v24206_v27, %v9014_v41  ;;  %24207 = vst [vmem:[#allocation202_spill] sm:$0xff] %v21200_v43  ;;  %v21204_v53 = vpop.eup %14620  ;;  %v9030_v27 = vrot.slane %v20982_v23, %v24042_v17  ;;  %v24210_v41 = vld [vmem:[#allocation209_spill] sm:$0xff] }
 0x57c   : > { %24204 = vst [vmem:[#allocation260_spill] sm:$0xff] %v21190_v1  ;;  %10030 = vperm.xlu0 %14367, %v21188_v63   ;;  %24208 = vst [vmem:[#allocation207_spill] sm:$0xff] %v21204_v53  ;;  %v9341_v14 = vsub.f32 %v24210_v41, %v9022_v50  ;;  %v21216_v32 = vpop.eup %14622  ;;  %v24214_v50 = vld [vmem:[#allocation211_spill] sm:$0xff] }
 0x57d   : > { %v9571_v63 = vmul.f32 1.442695, %v9339_v18  ;;  %24211 = vst [vmem:[#allocation204_spill] sm:$0xff] %v21216_v32  ;;  %v9038_v18 = vrot.slane %v20982_v23, %v24046_v54  ;;  %v9343_v39 = vsub.f32 %v24214_v50, %v9030_v27  ;;  %v9046_v50 = vrot.slane %v20920_v52, %v14776_v2 }
 0x57e   : > { %v21186_v56 = vpop.permute.xlu1 %9823  ;;  %v9575_v41 = vmul.f32 1.442695, %v9341_v14 }
 0x57f   : > { %10015 = vperm.xlu1 %14366, %v21184_v31   ;;  %v21206_v31 = vpop.permute.xlu0 %9844  ;;  %14636 = vpow2.f32 %v9571_v63  ;;  %v24219_v63 = vld [vmem:[#allocation213_spill] sm:$0xff]  ;;  %v9579_v14 = vmul.f32 1.442695, %v9343_v39 }
 0x580   : > { %10036 = vperm.xlu0 %14367, %v21204_v53   ;;  %14638 = vpow2.f32 %v9565_v9  ;;  %v9345_v27 = vsub.f32 %v24219_v63, %v9038_v18  ;;  %v24223_v18 = vld [vmem:[#allocation210_spill] sm:$0xff]  ;;  %v9054_v63 = vrot.slane %v20920_v52, %v24037_v59 }
 0x581   : > { %14640 = vpow2.f32 %v9575_v41  ;;  %v9342_v41 = vsub.f32 %v24223_v18, %v9026_v35  ;;  %v24228_v35 = vld [vmem:[#allocation212_spill] sm:$0xff] }
 0x582   : > { %v21202_v24 = vpop.permute.xlu1 %9829  ;;  %14642 = vpow2.f32 %v9569_v3 }
 0x583   : > { %10021 = vperm.xlu1 %14366, %v21200_v43   ;;  %v21220_v43 = vpop.eup %14624  ;;  %v21222_v51 = vpop.permute.xlu0 %9850  ;;  %14644 = vpow2.f32 %v9579_v14  ;;  %v9577_v14 = vmul.f32 1.442695, %v9342_v41 }
 0x584   : > { %24212 = vst [vmem:[#allocation209_spill] sm:$0xff] %v21220_v43  ;;  %10042 = vperm.xlu0 %14367, %v21220_v43   ;;  %v21232_v53 = vpop.eup %14626  ;;  %v9340_v43 = vsub.f32 %v24218_v4, %v9018_v26  ;;  %v9034_v26 = vrot.slane %v20982_v23, %v24044_v60  ;;  %v9583_v4 = vmul.f32 1.442695, %v9345_v27 }
 0x585   : > { %24215 = vst [vmem:[#allocation206_spill] sm:$0xff] %v21232_v53 }
 0x586   : > { %v21218_v10 = vpop.permute.xlu1 %9835  ;;  %v9573_v39 = vmul.f32 1.442695, %v9340_v43  ;;  %v9042_v43 = vrot.slane %v20982_v23, %v24050_v7  ;;  %v9344_v27 = vsub.f32 %v24228_v35, %v9034_v26  ;;  %v24233_v26 = vld [vmem:[#allocation214_spill] sm:$0xff] }
 0x587   : > { %10027 = vperm.xlu1 %14366, %v21216_v32   ;;  %v21236_v32 = vpop.eup %14628  ;;  %v21238_v22 = vpop.permute.xlu0 %9856 }
 0x588   : > { %24217 = vst [vmem:[#allocation261_spill] sm:$0xff] %v21236_v32  ;;  %10048 = vperm.xlu0 %14367, %v21236_v32   ;;  %v21248_v38 = vpop.eup %14630  ;;  %v24224_v32 = vld [vmem:[#allocation215_spill] sm:$0xff]  ;;  %14646 = vpow2.f32 %v9573_v39  ;;  %v9346_v41 = vsub.f32 %v24233_v26, %v9042_v43  ;;  %v9581_v39 = vmul.f32 1.442695, %v9344_v27  ;;  %v24238_v26 = vld [vmem:[#allocation216_spill] sm:$0xff] }
 0x589   : > { %24220 = vst [vmem:[#allocation208_spill] sm:$0xff] %v21248_v38  ;;  %v21252_v9 = vpop.eup %14632  ;;  %14648 = vpow2.f32 %v9583_v4  ;;  %v9050_v4 = vrot.slane %v20920_v52, %v24048_v47 }
 0x58a   : > { %v21234_v0 = vpop.permute.xlu1 %9841  ;;  %24221 = vst [vmem:[#allocation213_spill] sm:$0xff] %v21252_v9  ;;  %14650 = vpow2.f32 %v9577_v14  ;;  %v9585_v27 = vmul.f32 1.442695, %v9346_v41  ;;  %v9058_v14 = vrot.slane %v20920_v52, %v24038_v62 }
 0x58b   : > { %24216 = vst [vmem:[#allocation211_spill] sm:$0xff] %v21234_v0  ;;  %10033 = vperm.xlu1 %14366, %v21232_v53   ;;  %v21254_v37 = vpop.permute.xlu0 %9862  ;;  %v9347_v53 = vsub.f32 %v24224_v32, %v9046_v50  ;;  %v21264_v0 = vpop.eup %14634  ;;  %v9062_v32 = vrot.slane %v20920_v52, %v24042_v17  ;;  %v24229_v50 = vld [vmem:[#allocation217_spill] sm:$0xff] }
 0x58c   : > { %24222 = vst [vmem:[#allocation262_spill] sm:$0xff] %v21254_v37  ;;  %10054 = vperm.xlu0 %14367, %v21252_v9   ;;  %24225 = vst [vmem:[#allocation210_spill] sm:$0xff] %v21264_v0  ;;  %v21268_v3 = vpop.eup %14636  ;;  %v9349_v18 = vsub.f32 %v24229_v50, %v9054_v63  ;;  %v24234_v63 = vld [vmem:[#allocation219_spill] sm:$0xff] }
 0x58d   : > { %24226 = vst [vmem:[#allocation215_spill] sm:$0xff] %v21268_v3  ;;  %v9587_v9 = vmul.f32 1.442695, %v9347_v53  ;;  %v21280_v1 = vpop.eup %14638  ;;  %v9070_v53 = vrot.slane %v20920_v52, %v24046_v54  ;;  %v9351_v35 = vsub.f32 %v24234_v63, %v9062_v32  ;;  %v9078_v63 = vrot.slane %v20998_v44, %v14776_v2 }
 0x58e   : > { %v21250_v42 = vpop.permute.xlu1 %9847  ;;  %24230 = vst [vmem:[#allocation212_spill] sm:$0xff] %v21280_v1  ;;  %v9591_v50 = vmul.f32 1.442695, %v9349_v18 }
 0x58f   : > { %10039 = vperm.xlu1 %14366, %v21248_v38   ;;  %v21270_v38 = vpop.permute.xlu0 %9868  ;;  %14652 = vpow2.f32 %v9587_v9  ;;  %v24239_v9 = vld [vmem:[#allocation221_spill] sm:$0xff]  ;;  %v9595_v18 = vmul.f32 1.442695, %v9351_v35 }
 0x590   : > { %24227 = vst [vmem:[#allocation263_spill] sm:$0xff] %v21270_v38  ;;  %10060 = vperm.xlu0 %14367, %v21268_v3   ;;  %14654 = vpow2.f32 %v9581_v39  ;;  %v9353_v32 = vsub.f32 %v24239_v9, %v9070_v53  ;;  %v24242_v53 = vld [vmem:[#allocation218_spill] sm:$0xff]  ;;  %v9086_v9 = vrot.slane %v20998_v44, %v24037_v59 }
 0x591   : > { %14656 = vpow2.f32 %v9591_v50  ;;  %v9350_v50 = vsub.f32 %v24242_v53, %v9058_v14  ;;  %v24246_v14 = vld [vmem:[#allocation220_spill] sm:$0xff] }
 0x592   : > { %v21266_v37 = vpop.permute.xlu1 %9853  ;;  %14658 = vpow2.f32 %v9585_v27 }
 0x593   : > { %10045 = vperm.xlu1 %14366, %v21264_v0   ;;  %v21284_v0 = vpop.eup %14640  ;;  %v21286_v23 = vpop.permute.xlu0 %9874  ;;  %14660 = vpow2.f32 %v9595_v18  ;;  %v9593_v18 = vmul.f32 1.442695, %v9350_v50 }
 0x594   : > { %24231 = vst [vmem:[#allocation217_spill] sm:$0xff] %v21284_v0  ;;  %24232 = vst [vmem:[#allocation264_spill] sm:$0xff] %v21286_v23  ;;  %10066 = vperm.xlu0 %14367, %v21284_v0   ;;  %v21296_v3 = vpop.eup %14642  ;;  %v9348_v0 = vsub.f32 %v24238_v26, %v9050_v4  ;;  %v9066_v4 = vrot.slane %v20920_v52, %v24044_v60  ;;  %v9599_v26 = vmul.f32 1.442695, %v9353_v32 }
 0x595   : > { %24235 = vst [vmem:[#allocation214_spill] sm:$0xff] %v21296_v3 }
 0x596   : > { %v21282_v38 = vpop.permute.xlu1 %9859  ;;  %v9589_v35 = vmul.f32 1.442695, %v9348_v0  ;;  %v9074_v0 = vrot.slane %v20920_v52, %v24050_v7  ;;  %v9352_v32 = vsub.f32 %v24246_v14, %v9066_v4  ;;  %v24250_v4 = vld [vmem:[#allocation222_spill] sm:$0xff] }
 0x597   : > { %10051 = vperm.xlu1 %14366, %v21280_v1   ;;  %v21300_v1 = vpop.eup %14644  ;;  %v21302_v43 = vpop.permute.xlu0 %9880 }
 0x598   : > { %24236 = vst [vmem:[#allocation219_spill] sm:$0xff] %v21300_v1  ;;  %24237 = vst [vmem:[#allocation265_spill] sm:$0xff] %v21302_v43  ;;  %10072 = vperm.xlu0 %14367, %v21300_v1   ;;  %v21312_v47 = vpop.eup %14646  ;;  %v24243_v1 = vld [vmem:[#allocation223_spill] sm:$0xff]  ;;  %14662 = vpow2.f32 %v9589_v35  ;;  %v9354_v50 = vsub.f32 %v24250_v4, %v9074_v0  ;;  %v9597_v35 = vmul.f32 1.442695, %v9352_v32  ;;  %v24254_v32 = vld [vmem:[#allocation228_spill] sm:$0xff] }
 0x599   : > { %24240 = vst [vmem:[#allocation216_spill] sm:$0xff] %v21312_v47  ;;  %v21316_v39 = vpop.eup %14648  ;;  %14664 = vpow2.f32 %v9599_v26  ;;  %v9102_v26 = vrot.slane %v20998_v44, %v24046_v54 }
 0x59a   : > { %v21298_v23 = vpop.permute.xlu1 %9865  ;;  %24241 = vst [vmem:[#allocation221_spill] sm:$0xff] %v21316_v39  ;;  %v21328_v2 = vpop.eup %14650  ;;  %14666 = vpow2.f32 %v9593_v18  ;;  %v9601_v0 = vmul.f32 1.442695, %v9354_v50 }
 0x59b   : > { %10057 = vperm.xlu1 %14366, %v21296_v3   ;;  %v21318_v41 = vpop.permute.xlu0 %9886  ;;  %v9355_v3 = vsub.f32 %v24243_v1, %v9078_v63  ;;  %24244 = vst [vmem:[#allocation218_spill] sm:$0xff] %v21328_v2  ;;  %v21332_v27 = vpop.eup %14652  ;;  %v9094_v1 = vrot.slane %v20998_v44, %v24042_v17  ;;  %v24247_v63 = vld [vmem:[#allocation224_spill] sm:$0xff]  ;;  %v9361_v18 = vsub.f32 %v24254_v32, %v9102_v26 }
 0x59c   : > { %10078 = vperm.xlu0 %14367, %v21316_v39   ;;  %24245 = vst [vmem:[#allocation223_spill] sm:$0xff] %v21332_v27  ;;  %v9357_v53 = vsub.f32 %v24247_v63, %v9086_v9  ;;  %v21344_v59 = vpop.eup %14654 }
 0x59d   : > { %v9603_v39 = vmul.f32 1.442695, %v9355_v3  ;;  %24248 = vst [vmem:[#allocation220_spill] sm:$0xff] %v21344_v59  ;;  %v24251_v3 = vld [vmem:[#allocation226_spill] sm:$0xff]  ;;  %v9615_v50 = vmul.f32 1.442695, %v9361_v18 }
 0x59e   : > { %v21314_v43 = vpop.permute.xlu1 %9871  ;;  %v9359_v9 = vsub.f32 %v24251_v3, %v9094_v1  ;;  %v9607_v14 = vmul.f32 1.442695, %v9357_v53 }
 0x59f   : > { %10063 = vperm.xlu1 %14366, %v21312_v47   ;;  %v21334_v47 = vpop.permute.xlu0 %9892  ;;  %14668 = vpow2.f32 %v9603_v39 }
 0x5a0   : > { %10084 = vperm.xlu0 %14367, %v21332_v27   ;;  %14670 = vpow2.f32 %v9597_v35  ;;  %v9611_v1 = vmul.f32 1.442695, %v9359_v9 }
 0x5a1   : > { %14672 = vpow2.f32 %v9607_v14 }
 0x5a2   : > { %v21330_v62 = vpop.permute.xlu1 %9877  ;;  %14674 = vpow2.f32 %v9601_v0 }
 0x5a3   : > { %10069 = vperm.xlu1 %14366, %v21328_v2   ;;  %v21348_v2 = vpop.eup %14656  ;;  %v21350_v52 = vpop.permute.xlu0 %9898  ;;  %14676 = vpow2.f32 %v9611_v1 }
 0x5a4   : > { %24249 = vst [vmem:[#allocation224_spill] sm:$0xff] %v21348_v2  ;;  %10090 = vperm.xlu0 %14367, %v21348_v2   ;;  %v21358_v63 = vpop.eup %14658  ;;  %14678 = vpow2.f32 %v9615_v50 }
 0x5a5   : > { %24252 = vst [vmem:[#allocation222_spill] sm:$0xff] %v21358_v63  ;;  %v21362_v17 = vpop.eup %14660 }
 0x5a6   : > { %v21346_v60 = vpop.permute.xlu1 %9883  ;;  %24253 = vst [vmem:[#allocation226_spill] sm:$0xff] %v21362_v17  ;;  %v21369_v39 = vpop.eup %14662 }
 0x5a7   : > { %10075 = vperm.xlu1 %14366, %v21344_v59   ;;  %v21364_v59 = vpop.permute.xlu0 %9904  ;;  %24255 = vst [vmem:[#allocation228_spill] sm:$0xff] %v21369_v39  ;;  %v21373_v4 = vpop.eup %14664 }
 0x5a8   : > { %10096 = vperm.xlu0 %14367, %v21362_v17   ;;  %24256 = vst [vmem:[#allocation266_spill] sm:$0xff] %v21373_v4  ;;  %v21379_v35 = vpop.eup %14666 }
 0x5a9   : > { %24257 = vst [vmem:[#allocation267_spill] sm:$0xff] %v21379_v35  ;;  %v21383_v9 = vpop.eup %14668 }
 0x5aa   : > { %v21360_v27 = vpop.permute.xlu1 %9889  ;;  %24258 = vst [vmem:[#allocation268_spill] sm:$0xff] %v21383_v9  ;;  %v21389_v32 = vpop.eup %14670 }
 0x5ab   : > { %10081 = vperm.xlu1 %14366, %v21358_v63   ;;  %v21375_v3 = vpop.permute.xlu0 %9910  ;;  %24259 = vst [vmem:[#allocation269_spill] sm:$0xff] %v21389_v32 }
 0x5ac   : > { %10102 = vperm.xlu0 %14367, %v21373_v4  }
 0x5ae   : > { %v21371_v53 = vpop.permute.xlu1 %9895 }
 0x5af   : > { %10087 = vperm.xlu1 %14366, %v21369_v39   ;;  %v21385_v14 = vpop.permute.xlu0 %9916  ;;  %v21393_v39 = vpop.eup %14672 }
 0x5b0   : > { %10108 = vperm.xlu0 %14367, %v21383_v9   ;;  %24260 = vst [vmem:[#allocation270_spill] sm:$0xff] %v21393_v39  ;;  %v21399_v1 = vpop.eup %14674  ;;  %v24263_v9 = vld [vmem:[#allocation102_spill] sm:$0xff] }
 0x5b1   : > { %24261 = vst [vmem:[#allocation271_spill] sm:$0xff] %v21399_v1  ;;  %v10138_v50 = vrot.slane %v21014_v5, %v24263_v9  ;;  %v10170_v54 = vrot.slane %v21058_v57, %v24263_v9  ;;  %v10142_v5 = vrot.slane %v20948_v30, %v24263_v9  ;;  %v10178_v30 = vrot.slane %v21074_v25, %v24263_v9 }
 0x5b2   : > { %v21381_v26 = vpop.permute.xlu1 %9901 }
 0x5b3   : > { %10093 = vperm.xlu1 %14366, %v21379_v35   ;;  %v21395_v18 = vpop.permute.xlu0 %9922  ;;  %v21403_v35 = vpop.eup %14676 }
 0x5b4   : > { %10114 = vperm.xlu0 %14367, %v21393_v39   ;;  %24262 = vst [vmem:[#allocation272_spill] sm:$0xff] %v21403_v35  ;;  %v21415_v39 = vpop.eup %14678 }
 0x5b5   : > { %24264 = vst [vmem:[#allocation102_spill] sm:$0xff] %v21415_v39 }
 0x5b6   : > { %v21391_v0 = vpop.permute.xlu1 %9907 }
 0x5b7   : > { %10099 = vperm.xlu1 %14366, %v21389_v32   ;;  %v21407_v17 = vpop.permute.xlu0 %9928  ;;  %v10134_v32 = vrot.slane %v20934_v21, %v24263_v9  ;;  %v10166_v21 = vrot.slane %v21042_v36, %v24263_v9  ;;  %v10154_v36 = vrot.slane %v20994_v61, %v24263_v9  ;;  %v10186_v61 = vrot.slane %v21090_v55, %v24263_v9 }
 0x5b8   : > { %10120 = vperm.xlu0 %14367, %v21403_v35   ;;  %v10146_v35 = vrot.slane %v20962_v46, %v24263_v9  ;;  %v10174_v46 = vrot.slane %v21030_v28, %v24263_v9  ;;  %v10266_v55 = vrot.slane %v21250_v42, %v24263_v9  ;;  %v10262_v42 = vrot.slane %v21206_v31, %v24263_v9 }
 0x5b9   : > { %v10643_v63 = vsel %vm8395_vm14, %v10138_v50, %v10134_v32  ;;  %v10150_v32 = vrot.slane %v20978_v20, %v24263_v9  ;;  %v10650_v57 = vsel %vm8395_vm14, %v10170_v54, %v10166_v21  ;;  %v10198_v54 = vrot.slane %v21078_v6, %v24263_v9 }
 0x5ba   : > { %v21401_v4 = vpop.permute.xlu1 %9913  ;;  %v10671_v31 = vsel %vm8395_vm14, %v10266_v55, %v10262_v42 }
 0x5bb   : > { %10105 = vperm.xlu1 %14366, %v21399_v1   ;;  %v21420_v7 = vpop.permute.xlu0 %9934  ;;  %v10644_v1 = vsel %vm8397_vm8, %v10142_v5, %v10643_v63  ;;  %v10158_v63 = vrot.slane %v21010_v11, %v24263_v9  ;;  %v10651_v5 = vsel %vm8397_vm8, %v10174_v46, %v10650_v57  ;;  %v10210_v11 = vrot.slane %v21138_v29, %v24263_v9 }
 0x5bc   : > { %10126 = vperm.xlu0 %14367, %v21415_v39   ;;  %v10202_v39 = vrot.slane %v21122_v33, %v24263_v9  ;;  %v10645_v20 = vsel %vm8399_vm6, %v10146_v35, %v10644_v1  ;;  %v10162_v33 = vrot.slane %v21026_v15, %v24263_v9  ;;  %v10652_v28 = vsel %vm8399_vm6, %v10178_v30, %v10651_v5 }
 0x5bd   : > { %v10646_v25 = vsel %vm8401_vm4, %v10150_v32, %v10645_v20  ;;  %v10182_v1 = vrot.slane %v21046_v58, %v24263_v9  ;;  %v10206_v32 = vrot.slane %v21094_v8, %v24263_v9  ;;  %v10234_v57 = vrot.slane %v21186_v56, %v24263_v9 }
 0x5be   : > { %v21413_v2 = vpop.permute.xlu1 %9919  ;;  %v10657_v35 = vsel %vm8395_vm14, %v10202_v39, %v10198_v54  ;;  %v10647_v15 = vsel %vm8403_vm11, %v10154_v36, %v10646_v25  ;;  %v10230_v29 = vrot.slane %v21142_v19, %v24263_v9  ;;  %v10218_v20 = vrot.slane %v21154_v45, %v24263_v9 }
 0x5bf   : > { %v21439_v44 = vpop.permute.xlu0 %9940  ;;  %v10648_v39 = vsel %vm8405_vm2, %v10158_v63, %v10647_v15  ;;  %v10653_v30 = vsel %vm8401_vm4, %v10182_v1, %v10652_v28  ;;  %v10658_v58 = vsel %vm8397_vm8, %v10206_v32, %v10657_v35  ;;  %v10190_v19 = vrot.slane %v21062_v48, %v24263_v9 }
 0x5c0   : > { %v10649_v36 = vsel %vm8407_vm5, %v10162_v33, %v10648_v39  ;;  %v10654_v8 = vsel %vm8403_vm11, %v10186_v61, %v10653_v30  ;;  %v10659_v56 = vsel %vm8399_vm6, %v10210_v11, %v10658_v58  ;;  %v10214_v54 = vrot.slane %v21110_v12, %v24263_v9 }
 0x5c1   : > { %v10664_v25 = vsel %vm8395_vm14, %v10234_v57, %v10230_v29  ;;  %v10242_v33 = vrot.slane %v21202_v24, %v24263_v9  ;;  %v10238_v5 = vrot.slane %v21158_v49, %v24263_v9  ;;  %v10274_v45 = vrot.slane %v21266_v37, %v24263_v9 }
 0x5c2   : > { %v21432_v50 = vpop.permute.xlu1 %9925  ;;  %v21502_v28 = vsel %vm8530_vm0, %v10649_v36, 0.0  ;;  %v10194_v48 = vrot.slane %v21106_v40, %v24263_v9  ;;  %v10660_v12 = vsel %vm8401_vm4, %v10214_v54, %v10659_v56  ;;  %v10270_v61 = vrot.slane %v21222_v51, %v24263_v9 }
 0x5c3   : > { %v21462_v6 = vpop.permute.xlu0 %9946  ;;  %v10655_v35 = vsel %vm8405_vm2, %v10190_v19, %v10654_v8  ;;  %v10222_v49 = vrot.slane %v21126_v16, %v24263_v9  ;;  %v10661_v11 = vsel %vm8403_vm11, %v10218_v20, %v10660_v12  ;;  %v10226_v37 = vrot.slane %v21170_v13, %v24263_v9  ;;  %v24269_v12 = vld [vmem:[#allocation211_spill] sm:$0xff] }
 0x5c4   : > { %v10665_v1 = vsel %vm8397_vm8, %v10238_v5, %v10664_v25  ;;  %v10250_v51 = vrot.slane %v21218_v10, %v24263_v9  ;;  %v10672_v32 = vsel %vm8397_vm8, %v10270_v61, %v10671_v31  ;;  %v10298_v57 = vrot.slane %v21314_v43, %v24263_v9  ;;  %v24265_v10 = vld [vmem:[#allocation263_spill] sm:$0xff]  ;;  %v24267_v25 = vld [vmem:[#allocation264_spill] sm:$0xff] }
 0x5c5   : > { %v10666_v40 = vsel %vm8399_vm6, %v10242_v33, %v10665_v1  ;;  %v10246_v16 = vrot.slane %v21174_v34, %v24263_v9  ;;  %v10673_v55 = vsel %vm8399_vm6, %v10274_v45, %v10672_v32  ;;  %v10282_v13 = vrot.slane %v21282_v38, %v24263_v9  ;;  %v24266_v34 = vld [vmem:[#allocation260_spill] sm:$0xff]  ;;  %v24268_v45 = vld [vmem:[#allocation262_spill] sm:$0xff] }
 0x5c6   : > { %v21454_v21 = vpop.permute.xlu1 %9931  ;;  %v10330_v39 = vrot.slane %v21371_v53, %v24263_v9  ;;  %v10278_v29 = vrot.slane %v21238_v22, %v24263_v9  ;;  %v10294_v30 = vrot.slane %v24265_v10, %v24263_v9  ;;  %v10662_v43 = vsel %vm8405_vm2, %v10222_v49, %v10661_v11 }
 0x5c7   : > { %v21487_v63 = vpop.permute.xlu0 %9952  ;;  %v10656_v36 = vsel %vm8407_vm5, %v10194_v48, %v10655_v35  ;;  %v10254_v8 = vrot.slane %v24266_v34, %v24263_v9  ;;  %v10667_v56 = vsel %vm8401_vm4, %v10246_v16, %v10666_v40  ;;  %v10326_v38 = vrot.slane %v21334_v47, %v24263_v9 }
 0x5c8   : > { %v10663_v22 = vsel %vm8407_vm5, %v10226_v37, %v10662_v43  ;;  %v10668_v42 = vsel %vm8403_vm11, %v10250_v51, %v10667_v56  ;;  %v10674_v20 = vsel %vm8401_vm4, %v10278_v29, %v10673_v55  ;;  %v10678_v19 = vsel %vm8395_vm14, %v10298_v57, %v10294_v30 }
 0x5c9   : > { %v10306_v54 = vrot.slane %v21330_v62, %v24263_v9  ;;  %v10302_v33 = vrot.slane %v24267_v25, %v24263_v9  ;;  %v10675_v5 = vsel %vm8403_vm11, %v10282_v13, %v10674_v20  ;;  %v10685_v47 = vsel %vm8395_vm14, %v10330_v39, %v10326_v38 }
 0x5ca   : > { %v21478_v46 = vpop.permute.xlu1 %9937  ;;  %v10338_v31 = vrot.slane %v21381_v26, %v24263_v9  ;;  %v10286_v48 = vrot.slane %v24268_v45, %v24263_v9  ;;  %v10258_v61 = vrot.slane %v24269_v12, %v24263_v9  ;;  %v10334_v35 = vrot.slane %v21350_v52, %v24263_v9 }
 0x5cb   : > { %v21516_v15 = vpop.permute.xlu0 %9958  ;;  %v10290_v62 = vrot.slane %v21298_v23, %v24263_v9  ;;  %v10679_v11 = vsel %vm8397_vm8, %v10302_v33, %v10678_v19  ;;  %v10777_v26 = vsel %vm8530_vm0, %v10663_v22, 0.0  ;;  %v10774_v40 = vsel %vm8530_vm0, %v10656_v36, 0.0  ;;  %v24270_v23 = vld [vmem:[#allocation265_spill] sm:$0xff] }
 0x5cc   : > { %v10680_v51 = vsel %vm8399_vm6, %v10306_v54, %v10679_v11  ;;  %v10686_v32 = vsel %vm8397_vm8, %v10334_v35, %v10685_v47  ;;  %v10669_v52 = vsel %vm8405_vm2, %v10254_v8, %v10668_v42  ;;  %v10676_v57 = vsel %vm8405_vm2, %v10286_v48, %v10675_v5 }
 0x5cd   : > { %v10310_v16 = vrot.slane %v24270_v23, %v24263_v9  ;;  %v10687_v55 = vsel %vm8399_vm6, %v10338_v31, %v10686_v32  ;;  %v10346_v13 = vrot.slane %v21391_v0, %v24263_v9  ;;  %v10342_v39 = vrot.slane %v21364_v59, %v24263_v9 }
 0x5ce   : > { %v9944_v24 = vpop.permute.xlu1 %9943  ;;  %v10362_v29 = vrot.slane %v21413_v2, %v24263_v9  ;;  %v10670_v10 = vsel %vm8407_vm5, %v10258_v61, %v10669_v52  ;;  %v10677_v43 = vsel %vm8407_vm5, %v10290_v62, %v10676_v57  ;;  %v10318_v36 = vrot.slane %v21318_v41, %v24263_v9 }
 0x5cf   : > { %v21542_v53 = vpop.permute.xlu0 %9964  ;;  %v10394_v1 = vrot.slane %v9944_v24, %v24263_v9  ;;  %v10390_v24 = vrot.slane %v21439_v44, %v24263_v9  ;;  %v10681_v44 = vsel %vm8401_vm4, %v10310_v16, %v10680_v51  ;;  %v10358_v2 = vrot.slane %v21385_v14, %v24263_v9 }
 0x5d0   : > { %v10314_v8 = vrot.slane %v21346_v60, %v24263_v9  ;;  %v10688_v56 = vsel %vm8401_vm4, %v10342_v39, %v10687_v55  ;;  %v10398_v38 = vrot.slane %v21462_v6, %v24263_v9  ;;  %v10350_v41 = vrot.slane %v21375_v3, %v24263_v9 }
 0x5d1   : > { %v10699_v0 = vsel %vm8395_vm14, %v10394_v1, %v10390_v24  ;;  %v10366_v22 = vrot.slane %v21395_v18, %v24263_v9  ;;  %v10689_v42 = vsel %vm8403_vm11, %v10346_v13, %v10688_v56  ;;  %v10692_v14 = vsel %vm8395_vm14, %v10362_v29, %v10358_v2 }
 0x5d2   : > { %v9950_v58 = vpop.permute.xlu1 %9949  ;;  %v10370_v60 = vrot.slane %v21432_v50, %v24263_v9  ;;  %v10422_v20 = vrot.slane %v21542_v53, %v24263_v9  ;;  %v10700_v6 = vsel %vm8397_vm8, %v10398_v38, %v10699_v0  ;;  %v10783_v25 = vsel %vm8530_vm0, %v10677_v43, 0.0 }
 0x5d3   : > { %v21565_v37 = vpop.permute.xlu0 %9970  ;;  %v10402_v59 = vrot.slane %v9950_v58, %v24263_v9  ;;  %v10354_v58 = vrot.slane %v21401_v4, %v24263_v9  ;;  %v10682_v50 = vsel %vm8403_vm11, %v10314_v8, %v10681_v44  ;;  %v10322_v53 = vrot.slane %v21360_v27, %v24263_v9 }
 0x5d4   : > { %v10406_v33 = vrot.slane %v21487_v63, %v24263_v9  ;;  %v10374_v5 = vrot.slane %v21407_v17, %v24263_v9  ;;  %v10693_v47 = vsel %vm8397_vm8, %v10366_v22, %v10692_v14  ;;  %v10378_v12 = vrot.slane %v21454_v21, %v24263_v9 }
 0x5d5   : > { %v10701_v18 = vsel %vm8399_vm6, %v10402_v59, %v10700_v6  ;;  %v10694_v48 = vsel %vm8399_vm6, %v10370_v60, %v10693_v47  ;;  %v10430_v27 = vrot.slane %v21565_v37, %v24263_v9  ;;  %v10414_v11 = vrot.slane %v21516_v15, %v24263_v9 }
 0x5d6   : > { %v9956_v49 = vpop.permute.xlu1 %9955  ;;  %v10702_v63 = vsel %vm8401_vm4, %v10406_v33, %v10701_v18  ;;  %v10683_v21 = vsel %vm8405_vm2, %v10318_v36, %v10682_v50  ;;  %v10695_v1 = vsel %vm8401_vm4, %v10374_v5, %v10694_v48  ;;  %v10386_v16 = vrot.slane %v21478_v46, %v24263_v9 }
 0x5d7   : > { %v21592_v34 = vpop.permute.xlu0 %9976  ;;  %v10410_v54 = vrot.slane %v9956_v49, %v24263_v9  ;;  %v10696_v32 = vsel %vm8403_vm11, %v10378_v12, %v10695_v1  ;;  %v10382_v39 = vrot.slane %v21420_v7, %v24263_v9 }
 0x5d8   : > { %v10438_v52 = vrot.slane %v21592_v34, %v24263_v9 }
 0x5d9   : > { %v10703_v17 = vsel %vm8403_vm11, %v10410_v54, %v10702_v63  ;;  %v10697_v46 = vsel %vm8405_vm2, %v10382_v39, %v10696_v32 }
 0x5da   : > { %v21586_v30 = vpop.permute.xlu1 %9961  ;;  %v10704_v23 = vsel %vm8405_vm2, %v10414_v11, %v10703_v17  ;;  %v10698_v0 = vsel %vm8407_vm5, %v10386_v16, %v10697_v46 }
 0x5db   : > { %10772 = vadd.xlane.f32.xlu0 %v21502_v28  ;;  %v9983_v3 = vpop.permute.xlu0 %9982  ;;  %v10690_v28 = vsel %vm8405_vm2, %v10350_v41, %v10689_v42  ;;  %v10418_v62 = vrot.slane %v21586_v30, %v24263_v9  ;;  %v10792_v8 = vsel %vm8530_vm0, %v10698_v0, 0.0 }
 0x5dc   : > { %v10691_v45 = vsel %vm8407_vm5, %v10354_v58, %v10690_v28  ;;  %v10446_v30 = vrot.slane %v9983_v3, %v24263_v9 }
 0x5dd   : > { %v10789_v15 = vsel %vm8530_vm0, %v10691_v45, 0.0  ;;  %v10705_v13 = vsel %vm8407_vm5, %v10418_v62, %v10704_v23 }
 0x5de   : > { %v9968_v19 = vpop.permute.xlu1 %9967  ;;  %v10795_v44 = vsel %vm8530_vm0, %v10705_v13, 0.0 }
 0x5df   : > { %v10426_v4 = vrot.slane %v9968_v19, %v24263_v9  ;;  %10775 = vadd.xlane.f32.xlu1 %v10774_v40  ;;  %10778 = vadd.xlane.f32.xlu0 %v10777_v26  ;;  %v9989_v35 = vpop.permute.xlu0 %9988  ;;  %v10780_v26 = vsel %vm8530_vm0, %v10670_v10, 0.0  ;;  %v10684_v40 = vsel %vm8407_vm5, %v10322_v53, %v10683_v21 }
 0x5e0   : > { %v10786_v43 = vsel %vm8530_vm0, %v10684_v40, 0.0  ;;  %v10454_v38 = vrot.slane %v9989_v35, %v24263_v9 }
 0x5e1   : > { %v10706_v31 = vsel %vm8395_vm14, %v10426_v4, %v10422_v20 }
 0x5e2   : > { %v9974_v61 = vpop.permute.xlu1 %9973  ;;  %v10707_v37 = vsel %vm8397_vm8, %v10430_v27, %v10706_v31 }
 0x5e3   : > { %v10434_v49 = vrot.slane %v9974_v61, %v24263_v9  ;;  %10784 = vadd.xlane.f32.xlu1 %v10783_v25  ;;  %10781 = vadd.xlane.f32.xlu0 %v10780_v26  ;;  %v9995_v55 = vpop.permute.xlu0 %9994 }
 0x5e4   : > { %v10462_v14 = vrot.slane %v9995_v55, %v24263_v9 }
 0x5e5   : > { %v10708_v51 = vsel %vm8399_vm6, %v10434_v49, %v10707_v37 }
 0x5e6   : > { %v9980_v57 = vpop.permute.xlu1 %9979  ;;  %v10709_v29 = vsel %vm8401_vm4, %v10438_v52, %v10708_v51 }
 0x5e7   : > { %v10442_v24 = vrot.slane %v9980_v57, %v24263_v9  ;;  %10790 = vadd.xlane.f32.xlu1 %v10789_v15  ;;  %10787 = vadd.xlane.f32.xlu0 %v10786_v43  ;;  %v10001_v34 = vpop.permute.xlu0 %10000 }
 0x5e8   : > { %v10470_v18 = vrot.slane %v10001_v34, %v24263_v9 }
 0x5e9   : > { %v10710_v10 = vsel %vm8403_vm11, %v10442_v24, %v10709_v29 }
 0x5ea   : > { %v9986_v36 = vpop.permute.xlu1 %9985  ;;  %v10711_v7 = vsel %vm8405_vm2, %v10446_v30, %v10710_v10 }
 0x5eb   : > { %v10450_v59 = vrot.slane %v9986_v36, %v24263_v9  ;;  %10796 = vadd.xlane.f32.xlu1 %v10795_v44  ;;  %10793 = vadd.xlane.f32.xlu0 %v10792_v8  ;;  %v10007_v41 = vpop.permute.xlu0 %10006 }
 0x5ec   : > { %v10478_v33 = vrot.slane %v10007_v41, %v24263_v9 }
 0x5ed   : > { %v10712_v2 = vsel %vm8407_vm5, %v10450_v59, %v10711_v7 }
 0x5ee   : > { %v9992_v56 = vpop.permute.xlu1 %9991  ;;  %v10798_v42 = vsel %vm8530_vm0, %v10712_v2, 0.0 }
 0x5ef   : > { %v10458_v22 = vrot.slane %v9992_v56, %v24263_v9  ;;  %v10013_v20 = vpop.permute.xlu0 %10012  ;;  %10799 = vadd.xlane.f32.xlu0 %v10798_v42 }
 0x5f0   : > { %v10486_v27 = vrot.slane %v10013_v20, %v24263_v9 }
 0x5f1   : > { %v10713_v58 = vsel %vm8395_vm14, %v10458_v22, %v10454_v38 }
 0x5f2   : > { %v9998_v60 = vpop.permute.xlu1 %9997  ;;  %v10714_v19 = vsel %vm8397_vm8, %v10462_v14, %v10713_v58 }
 0x5f3   : > { %v10466_v6 = vrot.slane %v9998_v60, %v24263_v9  ;;  %v10019_v4 = vpop.permute.xlu0 %10018 }
 0x5f4   : > { %v10494_v17 = vrot.slane %v10019_v4, %v24263_v9 }
 0x5f5   : > { %v10715_v3 = vsel %vm8399_vm6, %v10466_v6, %v10714_v19 }
 0x5f6   : > { %v10004_v54 = vpop.permute.xlu1 %10003  ;;  %v10716_v50 = vsel %vm8401_vm4, %v10470_v18, %v10715_v3 }
 0x5f7   : > { %v10474_v25 = vrot.slane %v10004_v54, %v24263_v9  ;;  %v10025_v5 = vpop.permute.xlu0 %10024 }
 0x5f8   : > { %v10502_v1 = vrot.slane %v10025_v5, %v24263_v9 }
 0x5f9   : > { %v10717_v53 = vsel %vm8403_vm11, %v10474_v25, %v10716_v50 }
 0x5fa   : > { %v10010_v28 = vpop.permute.xlu1 %10009  ;;  %v10718_v31 = vsel %vm8405_vm2, %v10478_v33, %v10717_v53 }
 0x5fb   : > { %v10482_v47 = vrot.slane %v10010_v28, %v24263_v9  ;;  %v10031_v63 = vpop.permute.xlu0 %10030 }
 0x5fc   : > { %v10510_v57 = vrot.slane %v10031_v63, %v24263_v9 }
 0x5fd   : > { %v10719_v45 = vsel %vm8407_vm5, %v10482_v47, %v10718_v31 }
 0x5fe   : > { %v10016_v48 = vpop.permute.xlu1 %10015  ;;  %v10801_v12 = vsel %vm8530_vm0, %v10719_v45, 0.0 }
 0x5ff   : > { %v10490_v61 = vrot.slane %v10016_v48, %v24263_v9  ;;  %10802 = vadd.xlane.f32.xlu1 %v10801_v12  ;;  %v10037_v49 = vpop.permute.xlu0 %10036 }
 0x600   : > { %v10518_v29 = vrot.slane %v10037_v49, %v24263_v9 }
 0x601   : > { %v10720_v35 = vsel %vm8395_vm14, %v10490_v61, %v10486_v27 }
 0x602   : > { %v10022_v62 = vpop.permute.xlu1 %10021  ;;  %v10721_v21 = vsel %vm8397_vm8, %v10494_v17, %v10720_v35 }
 0x603   : > { %v10498_v11 = vrot.slane %v10022_v62, %v24263_v9  ;;  %v10043_v40 = vpop.permute.xlu0 %10042 }
 0x604   : > { %v10526_v46 = vrot.slane %v10043_v40, %v24263_v9 }
 0x605   : > { %v10722_v37 = vsel %vm8399_vm6, %v10498_v11, %v10721_v21 }
 0x606   : > { %v10028_v26 = vpop.permute.xlu1 %10027  ;;  %v10723_v32 = vsel %vm8401_vm4, %v10502_v1, %v10722_v37 }
 0x607   : > { %v10506_v51 = vrot.slane %v10028_v26, %v24263_v9  ;;  %v10049_v23 = vpop.permute.xlu0 %10048 }
 0x608   : > { %v10534_v7 = vrot.slane %v10049_v23, %v24263_v9 }
 0x609   : > { %v10724_v52 = vsel %vm8403_vm11, %v10506_v51, %v10723_v32 }
 0x60a   : > { %v10034_v15 = vpop.permute.xlu1 %10033  ;;  %v10725_v55 = vsel %vm8405_vm2, %v10510_v57, %v10724_v52 }
 0x60b   : > { %v10514_v16 = vrot.slane %v10034_v15, %v24263_v9  ;;  %v10055_v10 = vpop.permute.xlu0 %10054 }
 0x60c   : > { %v10542_v22 = vrot.slane %v10055_v10, %v24263_v9 }
 0x60d   : > { %v10726_v24 = vsel %vm8407_vm5, %v10514_v16, %v10725_v55 }
 0x60e   : > { %v10040_v13 = vpop.permute.xlu1 %10039  ;;  %v10804_v39 = vsel %vm8530_vm0, %v10726_v24, 0.0 }
 0x60f   : > { %v10522_v30 = vrot.slane %v10040_v13, %v24263_v9  ;;  %10805 = vadd.xlane.f32.xlu0 %v10804_v39  ;;  %v10061_v44 = vpop.permute.xlu0 %10060  ;;  %v24271_v13 = vld [vmem:[#allocation6_spill] sm:$0xff]  ;;  %v24272_v39 = vld [vmem:[#allocation259_spill] sm:$0xff] }
 0x610   : > { %v10550_v3 = vrot.slane %v10061_v44, %v24263_v9  ;;  %v24273_v44 = vld [vmem:[#allocation5_spill] sm:$0xff] }
 0x611   : > { %v10727_v43 = vsel %vm8395_vm14, %v10522_v30, %v10518_v29  ;;  %v9082_v29 = vrot.slane %v24272_v39, %v24271_v13 }
 0x612   : > { %v10046_v36 = vpop.permute.xlu1 %10045  ;;  %v10728_v0 = vsel %vm8397_vm8, %v10526_v46, %v10727_v43 }
 0x613   : > { %v10530_v34 = vrot.slane %v10046_v36, %v24263_v9  ;;  %v10067_v8 = vpop.permute.xlu0 %10066 }
 0x614   : > { %v10558_v25 = vrot.slane %v10067_v8, %v24263_v9  ;;  %v24275_v8 = vld [vmem:[#allocation7_spill] sm:$0xff] }
 0x615   : > { %v10729_v59 = vsel %vm8399_vm6, %v10530_v34, %v10728_v0  ;;  %v9090_v34 = vrot.slane %v24272_v39, %v24273_v44  ;;  %v24274_v0 = vld [vmem:[#allocation225_spill] sm:$0xff] }
 0x616   : > { %v10052_v2 = vpop.permute.xlu1 %10051  ;;  %v10730_v38 = vsel %vm8401_vm4, %v10534_v7, %v10729_v59  ;;  %v9356_v59 = vsub.f32 %v24274_v0, %v9082_v29 }
 0x617   : > { %v10538_v56 = vrot.slane %v10052_v2, %v24263_v9  ;;  %v10073_v58 = vpop.permute.xlu0 %10072 }
 0x618   : > { %v10566_v47 = vrot.slane %v10073_v58, %v24263_v9 }
 0x619   : > { %v10731_v41 = vsel %vm8403_vm11, %v10538_v56, %v10730_v38  ;;  %v9098_v56 = vrot.slane %v24272_v39, %v24275_v8  ;;  %v24276_v38 = vld [vmem:[#allocation227_spill] sm:$0xff] }
 0x61a   : > { %v10058_v42 = vpop.permute.xlu1 %10057  ;;  %v10732_v60 = vsel %vm8405_vm2, %v10542_v22, %v10731_v41  ;;  %v9358_v41 = vsub.f32 %v24276_v38, %v9090_v34  ;;  %v9605_v22 = vmul.f32 1.442695, %v9356_v59  ;;  %v24292_v34 = vld [vmem:[#allocation143_spill] sm:$0xff]  ;;  %v24294_v38 = vld [vmem:[#allocation141_spill] sm:$0xff] }
 0x61b   : > { %v10546_v14 = vrot.slane %v10058_v42, %v24263_v9  ;;  %v10079_v18 = vpop.permute.xlu0 %10078  ;;  %v24277_v42 = vld [vmem:[#allocation9_spill] sm:$0xff] }
 0x61c   : > { %v10574_v27 = vrot.slane %v10079_v18, %v24263_v9  ;;  %v9106_v58 = vrot.slane %v24272_v39, %v24277_v42  ;;  %14680 = vpow2.f32 %v9605_v22 }
 0x61d   : > { %v10733_v20 = vsel %vm8407_vm5, %v10546_v14, %v10732_v60  ;;  %v24278_v14 = vld [vmem:[#allocation229_spill] sm:$0xff] }
 0x61e   : > { %v10064_v6 = vpop.permute.xlu1 %10063  ;;  %v10807_v19 = vsel %vm8530_vm0, %v10733_v20, 0.0  ;;  %v9360_v60 = vsub.f32 %v24278_v14, %v9098_v56  ;;  %v9609_v20 = vmul.f32 1.442695, %v9358_v41 }
 0x61f   : > { %v10554_v54 = vrot.slane %v10064_v6, %v24263_v9  ;;  %10808 = vadd.xlane.f32.xlu1 %v10807_v19  ;;  %v10085_v28 = vpop.permute.xlu0 %10084  ;;  %v24279_v6 = vld [vmem:[#allocation109_spill] sm:$0xff] }
 0x620   : > { %v10582_v21 = vrot.slane %v10085_v28, %v24263_v9  ;;  %v9362_v19 = vsub.f32 %v24279_v6, %v9106_v58  ;;  %14682 = vpow2.f32 %v9609_v20  ;;  %v24295_v58 = vld [vmem:[#allocation234_spill] sm:$0xff] }
 0x621   : > { %v10734_v4 = vsel %vm8395_vm14, %v10554_v54, %v10550_v3  ;;  %v9613_v3 = vmul.f32 1.442695, %v9360_v60 }
 0x622   : > { %v10070_v50 = vpop.permute.xlu1 %10069  ;;  %v10735_v33 = vsel %vm8397_vm8, %v10558_v25, %v10734_v4  ;;  %v9617_v18 = vmul.f32 1.442695, %v9362_v19  ;;  %v24296_v19 = vld [vmem:[#allocation236_spill] sm:$0xff] }
 0x623   : > { %v10562_v53 = vrot.slane %v10070_v50, %v24263_v9  ;;  %v10091_v61 = vpop.permute.xlu0 %10090  ;;  %14684 = vpow2.f32 %v9613_v3 }
 0x624   : > { %v10590_v40 = vrot.slane %v10091_v61, %v24263_v9  ;;  %14686 = vpow2.f32 %v9617_v18  ;;  %v24284_v61 = vld [vmem:[#allocation4_spill] sm:$0xff] }
 0x625   : > { %v10736_v5 = vsel %vm8399_vm6, %v10562_v53, %v10735_v33 }
 0x626   : > { %v10076_v31 = vpop.permute.xlu1 %10075  ;;  %v10737_v48 = vsel %vm8401_vm4, %v10566_v47, %v10736_v5  ;;  %v21765_v54 = vpop.eup %14680 }
 0x627   : > { %v10570_v45 = vrot.slane %v10076_v31, %v24263_v9  ;;  %v10097_v1 = vpop.permute.xlu0 %10096  ;;  %24280 = vst [vmem:[#allocation263_spill] sm:$0xff] %v21765_v54 }
 0x628   : > { %v10598_v15 = vrot.slane %v10097_v1, %v24263_v9  ;;  %v24287_v1 = vld [vmem:[#allocation119_spill] sm:$0xff] }
 0x629   : > { %v10738_v12 = vsel %vm8403_vm11, %v10570_v45, %v10737_v48  ;;  %v24282_v45 = vld [vmem:[#allocation3_spill] sm:$0xff] }
 0x62a   : > { %v10082_v63 = vpop.permute.xlu1 %10081  ;;  %v10739_v17 = vsel %vm8405_vm2, %v10574_v27, %v10738_v12  ;;  %v21768_v4 = vpop.eup %14682  ;;  %v24283_v27 = vld [vmem:[#allocation111_spill] sm:$0xff] }
 0x62b   : > { %v10578_v35 = vrot.slane %v10082_v63, %v24263_v9  ;;  %v10103_v16 = vpop.permute.xlu0 %10102 }
 0x62c   : > { %v10606_v30 = vrot.slane %v10103_v16, %v24263_v9 }
 0x62d   : > { %v10740_v62 = vsel %vm8407_vm5, %v10578_v35, %v10739_v17  ;;  %v21773_v50 = vpop.eup %14684  ;;  %v24285_v17 = vld [vmem:[#allocation114_spill] sm:$0xff] }
 0x62e   : > { %v10088_v49 = vpop.permute.xlu1 %10087  ;;  %v10810_v11 = vsel %vm8530_vm0, %v10740_v62, 0.0  ;;  %v21776_v53 = vpop.eup %14686 }
 0x62f   : > { %v10586_v37 = vrot.slane %v10088_v49, %v24263_v9  ;;  %10811 = vadd.xlane.f32.xlu0 %v10810_v11  ;;  %v21771_v25 = vpop.permute.xlu0 %10108  ;;  %24281 = vst [vmem:[#allocation260_spill] sm:$0xff] %v21776_v53  ;;  %v24286_v11 = vld [vmem:[#allocation116_spill] sm:$0xff] }
 0x631   : > { %v10741_v26 = vsel %vm8395_vm14, %v10586_v37, %v10582_v21 }
 0x632   : > { %v10094_v51 = vpop.permute.xlu1 %10093  ;;  %v10742_v52 = vsel %vm8397_vm8, %v10590_v40, %v10741_v26 }
 0x633   : > { %v10594_v32 = vrot.slane %v10094_v51, %v24263_v9  ;;  %v21778_v33 = vpop.permute.xlu0 %10114 }
 0x635   : > { %v10743_v57 = vsel %vm8399_vm6, %v10594_v32, %v10742_v52  ;;  %v24288_v52 = vld [vmem:[#allocation125_spill] sm:$0xff] }
 0x636   : > { %v10100_v23 = vpop.permute.xlu1 %10099  ;;  %v10744_v24 = vsel %vm8401_vm4, %v10598_v15, %v10743_v57 }
 0x637   : > { %v10602_v55 = vrot.slane %v10100_v23, %v24263_v9  ;;  %v21781_v28 = vpop.permute.xlu0 %10120  ;;  %v24289_v23 = vld [vmem:[#allocation126_spill] sm:$0xff] }
 0x639   : > { %v10745_v10 = vsel %vm8403_vm11, %v10602_v55, %v10744_v24  ;;  %v24290_v24 = vld [vmem:[#allocation134_spill] sm:$0xff] }
 0x63a   : > { %v10106_v43 = vpop.permute.xlu1 %10105  ;;  %v10746_v36 = vsel %vm8405_vm2, %v10606_v30, %v10745_v10  ;;  %v24291_v10 = vld [vmem:[#allocation135_spill] sm:$0xff] }
 0x63b   : > { %v10610_v46 = vrot.slane %v10106_v43, %v24263_v9  ;;  %v21783_v5 = vpop.permute.xlu0 %10126 }
 0x63d   : > { %v10747_v7 = vsel %vm8407_vm5, %v10610_v46, %v10746_v36 }
 0x63e   : > { %v10813_v2 = vsel %vm8530_vm0, %v10747_v7, 0.0  ;;  %v24293_v7 = vld [vmem:[#allocation140_spill] sm:$0xff] }
 0x63f   : > { %10814 = vadd.xlane.f32.xlu1 %v10813_v2 }
 0x650   : > { %10111 = vperm.xlu1 %14366, %v21765_v54  }
 0x654   : > { %10117 = vperm.xlu1 %14366, %v21768_v4  }
 0x658   : > { %10123 = vperm.xlu1 %14366, %v21773_v50  }
 0x65c   : > { %10129 = vperm.xlu1 %14366, %v21776_v53   ;;  %v24396_v53 = vld [vmem:[#allocation197_spill] sm:$0xff] }
 0x668   : > { %v10773_v47 = vpop.xlane.xlu0 %10772 }
 0x669   : > { %14688 = vrcp.f32 %v10773_v47  ;;  %v24297_v47 = vld [vmem:[#allocation147_spill] sm:$0xff] }
 0x66c   : > { %v10776_v12 = vpop.xlane.xlu1 %10775  ;;  %v10779_v32 = vpop.xlane.xlu0 %10778 }
 0x66d   : > { %14690 = vrcp.f32 %v10776_v12 }
 0x66e   : > { %14692 = vrcp.f32 %v10779_v32  ;;  %v24301_v32 = vld [vmem:[#allocation245_spill] sm:$0xff] }
 0x670   : > { %v10782_v36 = vpop.xlane.xlu0 %10781  ;;  %v10785_v6 = vpop.xlane.xlu1 %10784 }
 0x671   : > { %14694 = vrcp.f32 %v10782_v36  ;;  %v24304_v36 = vld [vmem:[#allocation250_spill] sm:$0xff] }
 0x672   : > { %14696 = vrcp.f32 %v10785_v6 }
 0x673   : > { %v21785_v31 = vpop.eup %14688 }
 0x674   : > { %v10854_v48 = vrot.slane %v21785_v31, %v24282_v45  ;;  %v10862_v35 = vrot.slane %v21785_v31, %v24284_v61  ;;  %v10866_v49 = vrot.slane %v21785_v31, %v24273_v44  ;;  %v10874_v37 = vrot.slane %v21785_v31, %v24275_v8 }
 0x675   : > { %v10882_v40 = vrot.slane %v21785_v31, %v24277_v42 }
 0x676   : > { %v11491_v63 = vmul.f32 %v24283_v27, %v10854_v48  ;;  %v11493_v62 = vmul.f32 %v24285_v17, %v10862_v35  ;;  %v11494_v21 = vmul.f32 %v24286_v11, %v10866_v49  ;;  %v11496_v26 = vmul.f32 %v24287_v1, %v10874_v37  ;;  %v24298_v27 = vld [vmem:[#allocation239_spill] sm:$0xff]  ;;  %v24299_v17 = vld [vmem:[#allocation241_spill] sm:$0xff]  ;;  %v10791_v37 = vpop.xlane.xlu1 %10790 }
 0x677   : > { %v21801_v51 = vpop.eup %14690  ;;  %v11498_v57 = vmul.f32 %v24288_v52, %v10882_v40  ;;  %v24300_v1 = vld [vmem:[#allocation243_spill] sm:$0xff] }
 0x678   : > { %11621 = vperm.xlu1 %14366, %v11491_v63   ;;  %v10890_v15 = vrot.slane %v21801_v51, %v24271_v13  ;;  %v10898_v55 = vrot.slane %v21801_v51, %v24273_v44  ;;  %v10906_v29 = vrot.slane %v21801_v51, %v24275_v8  ;;  %v10914_v43 = vrot.slane %v21801_v51, %v24277_v42  ;;  %v21815_v46 = vpop.eup %14692 }
 0x679   : > { %v10922_v59 = vrot.slane %v21815_v46, %v24271_v13  ;;  %v10930_v56 = vrot.slane %v21815_v46, %v24273_v44  ;;  %v10938_v22 = vrot.slane %v21815_v46, %v24275_v8  ;;  %v10946_v60 = vrot.slane %v21815_v46, %v24277_v42 }
 0x67a   : > { %v11500_v16 = vmul.f32 %v24289_v23, %v10890_v15  ;;  %v11502_v39 = vmul.f32 %v24290_v24, %v10898_v55  ;;  %v11504_v30 = vmul.f32 %v24291_v10, %v10906_v29  ;;  %v11506_v0 = vmul.f32 %v24292_v34, %v10914_v43  ;;  %v21851_v15 = vpop.xlane.xlu1 %10796  ;;  %v24302_v23 = vld [vmem:[#allocation247_spill] sm:$0xff] }
 0x67b   : > { %v11508_v2 = vmul.f32 %v24293_v7, %v10922_v59  ;;  %v11510_v41 = vmul.f32 %v24294_v38, %v10930_v56  ;;  %v11512_v14 = vmul.f32 %v24295_v58, %v10938_v22  ;;  %v21829_v20 = vpop.eup %14694  ;;  %v11514_v3 = vmul.f32 %v24296_v19, %v10946_v60  ;;  %v24305_v7 = vld [vmem:[#allocation156_spill] sm:$0xff]  ;;  %v24306_v58 = vld [vmem:[#allocation253_spill] sm:$0xff] }
 0x67c   : > { %11631 = vperm.xlu1 %14366, %v11493_v62   ;;  %v10954_v18 = vrot.slane %v21829_v20, %v24271_v13  ;;  %v10962_v12 = vrot.slane %v21829_v20, %v24273_v44  ;;  %v10970_v35 = vrot.slane %v21829_v20, %v24275_v8  ;;  %v10978_v49 = vrot.slane %v21829_v20, %v24277_v42  ;;  %v21843_v11 = vpop.eup %14696 }
 0x67d   : > { %v10986_v40 = vrot.slane %v21843_v11, %v24271_v13  ;;  %v11002_v55 = vrot.slane %v21843_v11, %v24275_v8  ;;  %v11010_v10 = vrot.slane %v21843_v11, %v24277_v42  ;;  %v10622_v19 = vrot.slane %v21778_v33, %v24263_v9 }
 0x67e   : > { %v11516_v48 = vmul.f32 %v24297_v47, %v10954_v18  ;;  %v11518_v63 = vmul.f32 %v24298_v27, %v10962_v12  ;;  %v11520_v62 = vmul.f32 %v24299_v17, %v10970_v35  ;;  %v24307_v47 = vld [vmem:[#allocation255_spill] sm:$0xff]  ;;  %v10630_v35 = vrot.slane %v21781_v28, %v24263_v9 }
 0x67f   : > { %v11524_v52 = vmul.f32 %v24301_v32, %v10986_v40  ;;  %v11530_v34 = vmul.f32 %v24304_v36, %v11010_v10  ;;  %v10638_v40 = vrot.slane %v21783_v5, %v24263_v9 }
 0x680   : > { %11636 = vperm.xlu1 %14366, %v11494_v21   ;;  %v10788_v21 = vpop.xlane.xlu0 %10787 }
 0x681   : > { %14698 = vrcp.f32 %v10788_v21 }
 0x682   : > { %14700 = vrcp.f32 %v10791_v37 }
 0x684   : > { %11646 = vperm.xlu1 %14366, %v11496_v26   ;;  %v11522_v26 = vmul.f32 %v24300_v1, %v10978_v49  ;;  %v24308_v49 = vld [vmem:[#allocation257_spill] sm:$0xff] }
 0x688   : > { %11656 = vperm.xlu1 %14366, %v11498_v57   ;;  %v10994_v57 = vrot.slane %v21843_v11, %v24273_v44 }
 0x68c   : > { %11666 = vperm.xlu1 %14366, %v11500_v16   ;;  %v11526_v16 = vmul.f32 %v24302_v23, %v10994_v57  ;;  %v21856_v24 = vpop.xlane.xlu1 %10802 }
 0x690   : > { %11676 = vperm.xlu1 %14366, %v11502_v39   ;;  %v24303_v39 = vld [vmem:[#allocation157_spill] sm:$0xff] }
 0x691   : > { %v11528_v29 = vmul.f32 %v24303_v39, %v11002_v55 }
 0x694   : > { %11686 = vperm.xlu1 %14366, %v11504_v30   ;;  %v21861_v30 = vpop.eup %14698 }
 0x695   : > { %v11026_v56 = vrot.slane %v21861_v30, %v24273_v44  ;;  %v11034_v60 = vrot.slane %v21861_v30, %v24275_v8  ;;  %v21887_v27 = vpop.eup %14700 }
 0x696   : > { %v11050_v37 = vrot.slane %v21887_v27, %v24271_v13  ;;  %v11058_v23 = vrot.slane %v21887_v27, %v24273_v44  ;;  %v11066_v10 = vrot.slane %v21887_v27, %v24275_v8 }
 0x698   : > { %11696 = vperm.xlu1 %14366, %v11506_v0   ;;  %v11018_v0 = vrot.slane %v21861_v30, %v24271_v13 }
 0x69c   : > { %11706 = vperm.xlu1 %14366, %v11508_v2   ;;  %v11532_v2 = vmul.f32 %v24305_v7, %v11018_v0  ;;  %v24312_v7 = vld [vmem:[#allocation166_spill] sm:$0xff] }
 0x6a0   : > { %11716 = vperm.xlu1 %14366, %v11510_v41   ;;  %v10614_v41 = vrot.slane %v21771_v25, %v24263_v9  ;;  %v11042_v25 = vrot.slane %v21861_v30, %v24277_v42 }
 0x6a2   : > { %v11538_v21 = vmul.f32 %v24308_v49, %v11042_v25  ;;  %v24320_v49 = vld [vmem:[#allocation174_spill] sm:$0xff] }
 0x6a4   : > { %11726 = vperm.xlu1 %14366, %v11512_v14   ;;  %v11534_v14 = vmul.f32 %v24306_v58, %v11026_v56  ;;  %v10858_v58 = vrot.slane %v21785_v31, %v24271_v13 }
 0x6a8   : > { %11736 = vperm.xlu1 %14366, %v11514_v3  }
 0x6ac   : > { %11746 = vperm.xlu1 %14366, %v11516_v48   ;;  %v21863_v43 = vpop.xlane.xlu1 %10808  ;;  %v11536_v48 = vmul.f32 %v24307_v47, %v11034_v60  ;;  %v24317_v47 = vld [vmem:[#allocation172_spill] sm:$0xff] }
 0x6b0   : > { %11756 = vperm.xlu1 %14366, %v11518_v63  }
 0x6b4   : > { %11766 = vperm.xlu1 %14366, %v11520_v62   ;;  %v10794_v62 = vpop.xlane.xlu0 %10793 }
 0x6b5   : > { %14702 = vrcp.f32 %v10794_v62 }
 0x6b6   : > { %14704 = vrcp.f32 %v21851_v15 }
 0x6b8   : > { %11776 = vperm.xlu1 %14366, %v11522_v26   ;;  %v10800_v62 = vpop.xlane.xlu0 %10799 }
 0x6b9   : > { %14706 = vrcp.f32 %v10800_v62 }
 0x6ba   : > { %14708 = vrcp.f32 %v21856_v24  ;;  %v24332_v24 = vld [vmem:[#allocation186_spill] sm:$0xff] }
 0x6bc   : > { %11786 = vperm.xlu1 %14366, %v11524_v52   ;;  %v24309_v52 = vld [vmem:[#allocation162_spill] sm:$0xff] }
 0x6bd   : > { %v11540_v57 = vmul.f32 %v24309_v52, %v11050_v37 }
 0x6bf   : > { %v21913_v0 = vpop.eup %14702 }
 0x6c0   : > { %11796 = vperm.xlu1 %14366, %v11526_v16   ;;  %v11082_v56 = vrot.slane %v21913_v0, %v24271_v13  ;;  %v11106_v25 = vrot.slane %v21913_v0, %v24277_v42 }
 0x6c4   : > { %11806 = vperm.xlu1 %14366, %v11528_v29   ;;  %v24310_v29 = vld [vmem:[#allocation163_spill] sm:$0xff] }
 0x6c5   : > { %v11542_v5 = vmul.f32 %v24310_v29, %v11058_v23  ;;  %v24323_v23 = vld [vmem:[#allocation128_spill] sm:$0xff] }
 0x6c8   : > { %11816 = vperm.xlu1 %14366, %v11530_v34   ;;  %v11074_v34 = vrot.slane %v21887_v27, %v24277_v42 }
 0x6cc   : > { %v21868_v59 = vpop.xlane.xlu1 %10814  ;;  %11826 = vperm.xlu1 %14366, %v11532_v2   ;;  %v11546_v2 = vmul.f32 %v24312_v7, %v11074_v34  ;;  %v24326_v7 = vld [vmem:[#allocation180_spill] sm:$0xff] }
 0x6d0   : > { %v10112_v38 = vpop.permute.xlu1 %10111  ;;  %11836 = vperm.xlu1 %14366, %v11534_v14   ;;  %v24314_v14 = vld [vmem:[#allocation170_spill] sm:$0xff] }
 0x6d1   : > { %v10618_v22 = vrot.slane %v10112_v38, %v24263_v9  ;;  %v24313_v38 = vld [vmem:[#allocation168_spill] sm:$0xff] }
 0x6d3   : > { %v10748_v6 = vsel %vm8395_vm14, %v10618_v22, %v10614_v41  ;;  %v11548_v41 = vmul.f32 %v24313_v38, %v11082_v56  ;;  %v11090_v22 = vrot.slane %v21913_v0, %v24273_v44 }
 0x6d4   : > { %v10118_v3 = vpop.permute.xlu1 %10117  ;;  %v10749_v12 = vsel %vm8397_vm8, %v10622_v19, %v10748_v6  ;;  %11846 = vperm.xlu1 %14366, %v11536_v48   ;;  %v11098_v6 = vrot.slane %v21913_v0, %v24275_v8  ;;  %v24315_v19 = vld [vmem:[#allocation120_spill] sm:$0xff] }
 0x6d5   : > { %v10626_v18 = vrot.slane %v10118_v3, %v24263_v9  ;;  %v11550_v60 = vmul.f32 %v24314_v14, %v11090_v22  ;;  %v11492_v3 = vmul.f32 %v24315_v19, %v10858_v58  ;;  %v24327_v22 = vld [vmem:[#allocation124_spill] sm:$0xff] }
 0x6d6   : > { %v11552_v48 = vmul.f32 %v24317_v47, %v11098_v6 }
 0x6d7   : > { %v10750_v63 = vsel %vm8399_vm6, %v10626_v18, %v10749_v12  ;;  %v24316_v18 = vld [vmem:[#allocation8_spill] sm:$0xff]  ;;  %v21933_v12 = vpop.eup %14704 }
 0x6d8   : > { %v10124_v33 = vpop.permute.xlu1 %10123  ;;  %v10751_v1 = vsel %vm8401_vm4, %v10630_v35, %v10750_v63  ;;  %11856 = vperm.xlu1 %14366, %v11538_v21   ;;  %v10870_v15 = vrot.slane %v21785_v31, %v24316_v18  ;;  %v24318_v63 = vld [vmem:[#allocation118_spill] sm:$0xff]  ;;  %v11554_v21 = vmul.f32 %v24320_v49, %v11106_v25  ;;  %v11114_v37 = vrot.slane %v21933_v12, %v24271_v13  ;;  %v21965_v38 = vpop.eup %14706  ;;  %v24330_v25 = vld [vmem:[#allocation184_spill] sm:$0xff] }
 0x6d9   : > { %v10634_v17 = vrot.slane %v10124_v33, %v24263_v9  ;;  %v24319_v33 = vld [vmem:[#allocation10_spill] sm:$0xff]  ;;  %v10902_v34 = vrot.slane %v21801_v51, %v24316_v18  ;;  %v11138_v56 = vrot.slane %v21933_v12, %v24277_v42  ;;  %v11146_v19 = vrot.slane %v21965_v38, %v24271_v13 }
 0x6da   : > { %v11495_v35 = vmul.f32 %v24318_v63, %v10870_v15  ;;  %v10910_v14 = vrot.slane %v21801_v51, %v24319_v33  ;;  %v24329_v15 = vld [vmem:[#allocation131_spill] sm:$0xff]  ;;  %v10926_v49 = vrot.slane %v21815_v46, %v24284_v61 }
 0x6db   : > { %v10752_v26 = vsel %vm8403_vm11, %v10634_v17, %v10751_v1  ;;  %v10878_v17 = vrot.slane %v21785_v31, %v24319_v33  ;;  %v11122_v31 = vrot.slane %v21933_v12, %v24273_v44  ;;  %v11503_v58 = vmul.f32 %v24327_v22, %v10902_v34 }
 0x6dc   : > { %v10130_v32 = vpop.permute.xlu1 %10129  ;;  %v10753_v16 = vsel %vm8405_vm2, %v10638_v40, %v10752_v26  ;;  %11866 = vperm.xlu1 %14366, %v11540_v57   ;;  %v24321_v26 = vld [vmem:[#allocation113_spill] sm:$0xff]  ;;  %v11505_v47 = vmul.f32 %v24329_v15, %v10910_v14  ;;  %v11564_v63 = vmul.f32 %v24330_v25, %v11146_v19  ;;  %v24338_v14 = vld [vmem:[#allocation192_spill] sm:$0xff] }
 0x6dd   : > { %v10642_v28 = vrot.slane %v10130_v32, %v24263_v9  ;;  %v24311_v9 = vld [vmem:[#allocation164_spill] sm:$0xff]  ;;  %v11497_v40 = vmul.f32 %v24321_v26, %v10878_v17  ;;  %v10886_v32 = vrot.slane %v21801_v51, %v24282_v45  ;;  %v24331_v17 = vld [vmem:[#allocation133_spill] sm:$0xff] }
 0x6de   : > { %v11544_v36 = vmul.f32 %v24311_v9, %v11066_v10  ;;  %v24325_v9 = vld [vmem:[#allocation122_spill] sm:$0xff]  ;;  %v24339_v19 = vld [vmem:[#allocation233_spill] sm:$0xff] }
 0x6df   : > { %v10754_v55 = vsel %vm8407_vm5, %v10642_v28, %v10753_v16  ;;  %v24322_v28 = vld [vmem:[#allocation176_spill] sm:$0xff]  ;;  %v11499_v16 = vmul.f32 %v24323_v23, %v10886_v32  ;;  %v11170_v23 = vrot.slane %v21965_v38, %v24277_v42 }
 0x6e0   : > { %v10816_v39 = vsel %vm8530_vm0, %v10754_v55, 0.0  ;;  %11876 = vperm.xlu1 %14366, %v11542_v5   ;;  %v11556_v52 = vmul.f32 %v24322_v28, %v11114_v37  ;;  %v10894_v55 = vrot.slane %v21801_v51, %v24284_v61  ;;  %v11130_v5 = vrot.slane %v21933_v12, %v24275_v8 }
 0x6e1   : > { %10817 = vadd.xlane.f32.xlu0 %v10816_v39  ;;  %v24324_v39 = vld [vmem:[#allocation178_spill] sm:$0xff]  ;;  %v11154_v51 = vrot.slane %v21965_v38, %v24273_v44  ;;  %v11162_v37 = vrot.slane %v21965_v38, %v24275_v8  ;;  %v10934_v28 = vrot.slane %v21815_v46, %v24316_v18 }
 0x6e2   : > { %v11558_v29 = vmul.f32 %v24324_v39, %v11122_v31  ;;  %v24335_v39 = vld [vmem:[#allocation231_spill] sm:$0xff] }
 0x6e4   : > { %11886 = vperm.xlu1 %14366, %v11544_v36   ;;  %v11501_v36 = vmul.f32 %v24325_v9, %v10894_v55  ;;  %v10806_v9 = vpop.xlane.xlu0 %10805 }
 0x6e5   : > { %14710 = vrcp.f32 %v10806_v9  ;;  %v24345_v9 = vld [vmem:[#allocation238_spill] sm:$0xff] }
 0x6e6   : > { %14712 = vrcp.f32 %v21863_v43  ;;  %v24348_v43 = vld [vmem:[#allocation202_spill] sm:$0xff] }
 0x6e8   : > { %11896 = vperm.xlu1 %14366, %v11546_v2   ;;  %v11560_v2 = vmul.f32 %v24326_v7, %v11130_v5  ;;  %v10942_v5 = vrot.slane %v21815_v46, %v24319_v33 }
 0x6ec   : > { %11906 = vperm.xlu1 %14366, %v11548_v41  }
 0x6f0   : > { %11916 = vperm.xlu1 %14366, %v11550_v60   ;;  %v24328_v60 = vld [vmem:[#allocation182_spill] sm:$0xff] }
 0x6f1   : > { %v11562_v6 = vmul.f32 %v24328_v60, %v11138_v56  ;;  %v24337_v56 = vld [vmem:[#allocation232_spill] sm:$0xff] }
 0x6f2   : > { %v11513_v22 = vmul.f32 %v24337_v56, %v10942_v5 }
 0x6f4   : > { %11926 = vperm.xlu1 %14366, %v11552_v48   ;;  %v10918_v48 = vrot.slane %v21815_v46, %v24282_v45 }
 0x6f6   : > { %v11507_v62 = vmul.f32 %v24331_v17, %v10918_v48  ;;  %v24340_v48 = vld [vmem:[#allocation194_spill] sm:$0xff]  ;;  %v24341_v17 = vld [vmem:[#allocation235_spill] sm:$0xff] }
 0x6f7   : > { %11626 = vperm.xlu0 %14367, %v11492_v3   ;;  %v21941_v1 = vpop.permute.xlu1 %11621 }
 0x6f8   : > { %11936 = vperm.xlu1 %14366, %v11554_v21   ;;  %v11566_v21 = vmul.f32 %v24332_v24, %v11154_v51  ;;  %v24342_v24 = vld [vmem:[#allocation196_spill] sm:$0xff] }
 0x6fb   : > { %11641 = vperm.xlu0 %14367, %v11495_v35   ;;  %v21949_v57 = vpop.permute.xlu1 %11631 }
 0x6fc   : > { %11946 = vperm.xlu1 %14366, %v11556_v52   ;;  %v24334_v52 = vld [vmem:[#allocation188_spill] sm:$0xff] }
 0x6fd   : > { %v11568_v31 = vmul.f32 %v24334_v52, %v11162_v37 }
 0x6ff   : > { %11651 = vperm.xlu0 %14367, %v11497_v40   ;;  %v21957_v10 = vpop.permute.xlu1 %11636  ;;  %v24333_v40 = vld [vmem:[#allocation230_spill] sm:$0xff] }
 0x700   : > { %11956 = vperm.xlu1 %14366, %v11558_v29   ;;  %v11509_v32 = vmul.f32 %v24333_v40, %v10926_v49  ;;  %v11511_v29 = vmul.f32 %v24335_v39, %v10934_v28  ;;  %v10966_v49 = vrot.slane %v21829_v20, %v24316_v18  ;;  %v24343_v28 = vld [vmem:[#allocation237_spill] sm:$0xff] }
 0x702   : > { %v11519_v52 = vmul.f32 %v24343_v28, %v10966_v49  ;;  %v10812_v28 = vpop.xlane.xlu0 %10811 }
 0x703   : > { %11661 = vperm.xlu0 %14367, %v11499_v16   ;;  %v21967_v41 = vpop.permute.xlu1 %11646  ;;  %v22000_v16 = vpop.eup %14708  ;;  %14714 = vrcp.f32 %v10812_v28  ;;  %v24362_v28 = vld [vmem:[#allocation214_spill] sm:$0xff] }
 0x704   : > { %11966 = vperm.xlu1 %14366, %v11560_v2   ;;  %v11178_v7 = vrot.slane %v22000_v16, %v24271_v13  ;;  %v11186_v46 = vrot.slane %v22000_v16, %v24273_v44  ;;  %v11202_v37 = vrot.slane %v22000_v16, %v24277_v42  ;;  %v22034_v40 = vpop.eup %14710  ;;  %14716 = vrcp.f32 %v21868_v59  ;;  %v24360_v59 = vld [vmem:[#allocation212_spill] sm:$0xff] }
 0x705   : > { %v22069_v49 = vpop.eup %14712  ;;  %v11214_v54 = vrot.slane %v22034_v40, %v24284_v61 }
 0x706   : > { %v11572_v60 = vmul.f32 %v24338_v14, %v11178_v7  ;;  %v11574_v25 = vmul.f32 %v24340_v48, %v11186_v46  ;;  %v24346_v7 = vld [vmem:[#allocation200_spill] sm:$0xff] }
 0x707   : > { %11671 = vperm.xlu0 %14367, %v11501_v36   ;;  %v21975_v3 = vpop.permute.xlu1 %11656  ;;  %v24336_v36 = vld [vmem:[#allocation190_spill] sm:$0xff] }
 0x708   : > { %11976 = vperm.xlu1 %14366, %v11562_v6   ;;  %v11570_v34 = vmul.f32 %v24336_v36, %v11170_v23  ;;  %v24344_v23 = vld [vmem:[#allocation198_spill] sm:$0xff] }
 0x709   : > { %v11578_v39 = vmul.f32 %v24344_v23, %v11202_v37  ;;  %v11006_v37 = vrot.slane %v21843_v11, %v24319_v33 }
 0x70b   : > { %11681 = vperm.xlu0 %14367, %v11503_v58   ;;  %v21984_v35 = vpop.permute.xlu1 %11666  ;;  %v10950_v58 = vrot.slane %v21829_v20, %v24282_v45 }
 0x70c   : > { %11986 = vperm.xlu1 %14366, %v11564_v63   ;;  %v11194_v63 = vrot.slane %v22000_v16, %v24275_v8 }
 0x70d   : > { %v11515_v15 = vmul.f32 %v24339_v19, %v10950_v58  ;;  %v24347_v58 = vld [vmem:[#allocation240_spill] sm:$0xff]  ;;  %v11226_v19 = vrot.slane %v22034_v40, %v24275_v8 }
 0x70f   : > { %11691 = vperm.xlu0 %14367, %v11505_v47   ;;  %v21992_v26 = vpop.permute.xlu1 %11676  ;;  %v10958_v47 = vrot.slane %v21829_v20, %v24284_v61 }
 0x710   : > { %11996 = vperm.xlu1 %14366, %v11566_v21   ;;  %v11576_v21 = vmul.f32 %v24342_v24, %v11194_v63  ;;  %v24350_v63 = vld [vmem:[#allocation204_spill] sm:$0xff] }
 0x711   : > { %v24351_v24 = vld [vmem:[#allocation244_spill] sm:$0xff] }
 0x713   : > { %11701 = vperm.xlu0 %14367, %v11507_v62   ;;  %v22002_v55 = vpop.permute.xlu1 %11686  ;;  %v11517_v62 = vmul.f32 %v24341_v17, %v10958_v47  ;;  %v24349_v47 = vld [vmem:[#allocation242_spill] sm:$0xff]  ;;  %v11584_v17 = vmul.f32 %v24350_v63, %v11226_v19  ;;  %v24358_v19 = vld [vmem:[#allocation249_spill] sm:$0xff] }
 0x714   : > { %12006 = vperm.xlu1 %14366, %v11568_v31   ;;  %v10974_v31 = vrot.slane %v21829_v20, %v24319_v33  ;;  %v11218_v20 = vrot.slane %v22034_v40, %v24273_v44 }
 0x716   : > { %v11521_v36 = vmul.f32 %v24345_v9, %v10974_v31  ;;  %v11582_v46 = vmul.f32 %v24348_v43, %v11218_v20  ;;  %v24352_v31 = vld [vmem:[#allocation206_spill] sm:$0xff]  ;;  %v24356_v20 = vld [vmem:[#allocation248_spill] sm:$0xff] }
 0x717   : > { %11711 = vperm.xlu0 %14367, %v11509_v32   ;;  %v22010_v2 = vpop.permute.xlu1 %11696 }
 0x718   : > { %12016 = vperm.xlu1 %14366, %v11570_v34   ;;  %v10982_v34 = vrot.slane %v21843_v11, %v24282_v45 }
 0x71a   : > { %v11523_v14 = vmul.f32 %v24347_v58, %v10982_v34  ;;  %v24354_v34 = vld [vmem:[#allocation208_spill] sm:$0xff] }
 0x71b   : > { %11721 = vperm.xlu0 %14367, %v11511_v29   ;;  %v22018_v6 = vpop.permute.xlu1 %11706  ;;  %v11210_v29 = vrot.slane %v22034_v40, %v24271_v13 }
 0x71c   : > { %12026 = vperm.xlu1 %14366, %v11572_v60   ;;  %v10990_v60 = vrot.slane %v21843_v11, %v24284_v61 }
 0x71d   : > { %v11580_v56 = vmul.f32 %v24346_v7, %v11210_v29  ;;  %v24353_v29 = vld [vmem:[#allocation246_spill] sm:$0xff] }
 0x71e   : > { %v11525_v48 = vmul.f32 %v24349_v47, %v10990_v60  ;;  %v11529_v9 = vmul.f32 %v24353_v29, %v11006_v37  ;;  %v24357_v60 = vld [vmem:[#allocation210_spill] sm:$0xff]  ;;  %v11038_v37 = vrot.slane %v21861_v30, %v24319_v33 }
 0x71f   : > { %11731 = vperm.xlu0 %14367, %v11513_v22   ;;  %v22026_v51 = vpop.permute.xlu1 %11716 }
 0x720   : > { %12036 = vperm.xlu1 %14366, %v11574_v25   ;;  %v10998_v25 = vrot.slane %v21843_v11, %v24316_v18  ;;  %v11250_v11 = vrot.slane %v22069_v49, %v24273_v44 }
 0x722   : > { %v11590_v43 = vmul.f32 %v24357_v60, %v11250_v11 }
 0x723   : > { %11741 = vperm.xlu0 %14367, %v11515_v15   ;;  %v22036_v32 = vpop.permute.xlu1 %11726 }
 0x724   : > { %12046 = vperm.xlu1 %14366, %v11576_v21   ;;  %v11527_v21 = vmul.f32 %v24351_v24, %v10998_v25  ;;  %v24361_v24 = vld [vmem:[#allocation251_spill] sm:$0xff] }
 0x727   : > { %11751 = vperm.xlu0 %14367, %v11517_v62   ;;  %v22044_v5 = vpop.permute.xlu1 %11736  ;;  %v11234_v62 = vrot.slane %v22034_v40, %v24277_v42 }
 0x728   : > { %12056 = vperm.xlu1 %14366, %v11578_v39   ;;  %v11242_v39 = vrot.slane %v22069_v49, %v24271_v13 }
 0x729   : > { %v11586_v23 = vmul.f32 %v24352_v31, %v11234_v62  ;;  %v22102_v62 = vpop.eup %14714 }
 0x72a   : > { %v11588_v7 = vmul.f32 %v24354_v34, %v11242_v39  ;;  %v22110_v39 = vpop.eup %14716  ;;  %v11046_v34 = vrot.slane %v21887_v27, %v24282_v45 }
 0x72b   : > { %11761 = vperm.xlu0 %14367, %v11519_v52   ;;  %v22053_v22 = vpop.permute.xlu1 %11746 }
 0x72c   : > { %12066 = vperm.xlu1 %14366, %v11580_v56  }
 0x72f   : > { %11771 = vperm.xlu0 %14367, %v11521_v36   ;;  %v22061_v15 = vpop.permute.xlu1 %11756  ;;  %v11014_v36 = vrot.slane %v21861_v30, %v24282_v45 }
 0x730   : > { %12076 = vperm.xlu1 %14366, %v11582_v46   ;;  %v11258_v46 = vrot.slane %v22069_v49, %v24275_v8 }
 0x731   : > { %v11531_v58 = vmul.f32 %v24356_v20, %v11014_v36  ;;  %v24366_v20 = vld [vmem:[#allocation254_spill] sm:$0xff] }
 0x732   : > { %v11592_v63 = vmul.f32 %v24360_v59, %v11258_v46 }
 0x733   : > { %11781 = vperm.xlu0 %14367, %v11523_v14   ;;  %v22074_v52 = vpop.permute.xlu1 %11766  ;;  %v11022_v14 = vrot.slane %v21861_v30, %v24284_v61 }
 0x734   : > { %12086 = vperm.xlu1 %14366, %v11584_v17   ;;  %v11266_v17 = vrot.slane %v22069_v49, %v24277_v42 }
 0x735   : > { %v11533_v47 = vmul.f32 %v24358_v19, %v11022_v14  ;;  %v11054_v14 = vrot.slane %v21887_v27, %v24284_v61  ;;  %v24369_v19 = vld [vmem:[#allocation256_spill] sm:$0xff] }
 0x736   : > { %v11594_v31 = vmul.f32 %v24362_v28, %v11266_v17  ;;  %v11078_v28 = vrot.slane %v21913_v0, %v24282_v45 }
 0x737   : > { %11791 = vperm.xlu0 %14367, %v11525_v48   ;;  %v22085_v56 = vpop.permute.xlu1 %11776  ;;  %v11030_v48 = vrot.slane %v21861_v30, %v24316_v18  ;;  %v11302_v30 = vrot.slane %v22110_v39, %v24282_v45 }
 0x738   : > { %12096 = vperm.xlu1 %14366, %v11586_v23   ;;  %24355 = vst [vmem:[#allocation264_spill] sm:$0xff] %v22085_v56  ;;  %v11274_v23 = vrot.slane %v22102_v62, %v24271_v13 }
 0x73b   : > { %11801 = vperm.xlu0 %14367, %v11527_v21   ;;  %v22097_v25 = vpop.permute.xlu1 %11786  ;;  %v11535_v21 = vmul.f32 %v24361_v24, %v11030_v48  ;;  %v11062_v48 = vrot.slane %v21887_v27, %v24316_v18  ;;  %v11070_v24 = vrot.slane %v21887_v27, %v24319_v33  ;;  %v11110_v27 = vrot.slane %v21933_v12, %v24282_v45 }
 0x73c   : > { %12106 = vperm.xlu1 %14366, %v11588_v7   ;;  %24359 = vst [vmem:[#allocation262_spill] sm:$0xff] %v22097_v25  ;;  %v24365_v7 = vld [vmem:[#allocation216_spill] sm:$0xff]  ;;  %v11254_v25 = vrot.slane %v22069_v49, %v24316_v18 }
 0x73d   : > { %v11596_v11 = vmul.f32 %v24365_v7, %v11274_v23  ;;  %v11086_v23 = vrot.slane %v21913_v0, %v24284_v61  ;;  %v11126_v7 = vrot.slane %v21933_v12, %v24316_v18 }
 0x73f   : > { %11811 = vperm.xlu0 %14367, %v11529_v9   ;;  %v22112_v29 = vpop.permute.xlu1 %11796  ;;  %v24364_v9 = vld [vmem:[#allocation252_spill] sm:$0xff] }
 0x740   : > { %12116 = vperm.xlu1 %14366, %v11590_v43   ;;  %24363 = vst [vmem:[#allocation211_spill] sm:$0xff] %v22112_v29  ;;  %v11537_v36 = vmul.f32 %v24364_v9, %v11038_v37  ;;  %v24368_v43 = vld [vmem:[#allocation223_spill] sm:$0xff]  ;;  %v11094_v9 = vrot.slane %v21913_v0, %v24316_v18 }
 0x741   : > { %v11603_v46 = vmul.f32 %v24368_v43, %v11302_v30  ;;  %v24374_v30 = vld [vmem:[#allocation167_spill] sm:$0xff] }
 0x743   : > { %11821 = vperm.xlu0 %14367, %v11531_v58   ;;  %v11539_v58 = vmul.f32 %v24366_v20, %v11046_v34  ;;  %v22123_v60 = vpop.permute.xlu1 %11806  ;;  %v11118_v34 = vrot.slane %v21933_v12, %v24284_v61  ;;  %v11547_v20 = vmul.f32 %v24374_v30, %v11078_v28 }
 0x744   : > { %12126 = vperm.xlu1 %14366, %v11592_v63   ;;  %24367 = vst [vmem:[#allocation265_spill] sm:$0xff] %v22123_v60  ;;  %v24371_v63 = vld [vmem:[#allocation258_spill] sm:$0xff] }
 0x745   : > { %v11543_v17 = vmul.f32 %v24371_v63, %v11062_v48  ;;  %v24377_v48 = vld [vmem:[#allocation173_spill] sm:$0xff] }
 0x747   : > { %11831 = vperm.xlu0 %14367, %v11533_v47   ;;  %v11541_v47 = vmul.f32 %v24369_v19, %v11054_v14  ;;  %v22129_v59 = vpop.permute.xlu1 %11816  ;;  %v24375_v14 = vld [vmem:[#allocation169_spill] sm:$0xff]  ;;  %v24376_v19 = vld [vmem:[#allocation171_spill] sm:$0xff] }
 0x748   : > { %12136 = vperm.xlu1 %14366, %v11594_v31   ;;  %24370 = vst [vmem:[#allocation259_spill] sm:$0xff] %v22129_v59  ;;  %v11549_v43 = vmul.f32 %v24375_v14, %v11086_v23  ;;  %v24381_v23 = vld [vmem:[#allocation179_spill] sm:$0xff]  ;;  %v24382_v14 = vld [vmem:[#allocation181_spill] sm:$0xff] }
 0x749   : > { %v22174_v30 = vmul.f32 %v24381_v23, %v11126_v7  ;;  %v24385_v7 = vld [vmem:[#allocation11_spill] sm:$0xff] }
 0x74a   : > { %v24387_v23 = vld [vmem:[#allocation187_spill] sm:$0xff] }
 0x74b   : > { %11841 = vperm.xlu0 %14367, %v11535_v21   ;;  %v24372_v21 = vld [vmem:[#allocation165_spill] sm:$0xff]  ;;  %v22137_v31 = vpop.permute.xlu1 %11826 }
 0x74c   : > { %12146 = vperm.xlu1 %14366, %v11596_v11   ;;  %v11545_v37 = vmul.f32 %v24372_v21, %v11070_v24  ;;  %24373 = vst [vmem:[#allocation5_spill] sm:$0xff] %v22137_v31  ;;  %v11134_v11 = vrot.slane %v21933_v12, %v24319_v33  ;;  %v11166_v24 = vrot.slane %v21965_v38, %v24319_v33  ;;  %v24393_v31 = vld [vmem:[#allocation195_spill] sm:$0xff] }
 0x74f   : > { %11851 = vperm.xlu0 %14367, %v11537_v36   ;;  %v11102_v36 = vrot.slane %v21913_v0, %v24319_v33  ;;  %v11150_v0 = vrot.slane %v21965_v38, %v24284_v61  ;;  %v22168_v21 = vpop.permute.xlu1 %11836 }
 0x750   : > { %12181 = vperm.xlu1 %14366, %v11603_v46   ;;  %v11158_v46 = vrot.slane %v21965_v38, %v24316_v18  ;;  %24379 = vst [vmem:[#allocation225_spill] sm:$0xff] %v22168_v21 }
 0x751   : > { %v11553_v63 = vmul.f32 %v24377_v48, %v11102_v36  ;;  %v24383_v36 = vld [vmem:[#allocation183_spill] sm:$0xff] }
 0x753   : > { %11861 = vperm.xlu0 %14367, %v11539_v58   ;;  %v11142_v58 = vrot.slane %v21965_v38, %v24282_v45  ;;  %v11182_v38 = vrot.slane %v22000_v16, %v24284_v61  ;;  %v22230_v60 = vpop.permute.xlu1 %11846 }
 0x754   : > { %24395 = vst [vmem:[#allocation7_spill] sm:$0xff] %v22230_v60  ;;  %v24404_v60 = vld [vmem:[#allocation207_spill] sm:$0xff] }
 0x757   : > { %11871 = vperm.xlu0 %14367, %v11541_v47   ;;  %v11551_v47 = vmul.f32 %v24376_v19, %v11094_v9  ;;  %v11174_v9 = vrot.slane %v22000_v16, %v24282_v45  ;;  %v24384_v19 = vld [vmem:[#allocation185_spill] sm:$0xff] }
 0x758   : > { %v22185_v48 = vmul.f32 %v24384_v19, %v11150_v0  ;;  %v24388_v0 = vld [vmem:[#allocation189_spill] sm:$0xff]  ;;  %v11206_v19 = vrot.slane %v22034_v40, %v24282_v45 }
 0x75b   : > { %11881 = vperm.xlu0 %14367, %v11543_v17   ;;  %v24378_v17 = vld [vmem:[#allocation175_spill] sm:$0xff] }
 0x75c   : > { %v22164_v12 = vmul.f32 %v24378_v17, %v11110_v27  ;;  %v22182_v27 = vmul.f32 %v24383_v36, %v11142_v58  ;;  %v12259_v17 = vmul.f32 %v21941_v1, %v24385_v7  ;;  %v11198_v58 = vrot.slane %v22000_v16, %v24319_v33  ;;  %v24390_v7 = vld [vmem:[#allocation191_spill] sm:$0xff] }
 0x75d   : > { %v22201_v36 = vmul.f32 %v24388_v0, %v11166_v24  ;;  %v11222_v1 = vrot.slane %v22034_v40, %v24316_v18  ;;  %v24391_v24 = vld [vmem:[#allocation14_spill] sm:$0xff]  ;;  %v24392_v0 = vld [vmem:[#allocation193_spill] sm:$0xff] }
 0x75e   : > { %v22221_v21 = vmul.f32 %v24392_v0, %v11182_v38  ;;  %v22233_v29 = vmul.f32 %v24396_v53, %v11198_v58 }
 0x75f   : > { %11891 = vperm.xlu0 %14367, %v11545_v37   ;;  %v24380_v37 = vld [vmem:[#allocation177_spill] sm:$0xff] }
 0x760   : > { %v22171_v28 = vmul.f32 %v24380_v37, %v11118_v34  ;;  %v11190_v34 = vrot.slane %v22000_v16, %v24316_v18  ;;  %v11230_v16 = vrot.slane %v22034_v40, %v24319_v33 }
 0x762   : > { %v22224_v59 = vmul.f32 %v24393_v31, %v11190_v34  ;;  %v24400_v34 = vld [vmem:[#allocation203_spill] sm:$0xff] }
 0x763   : > { %11901 = vperm.xlu0 %14367, %v11547_v20   ;;  %v22177_v20 = vmul.f32 %v24382_v14, %v11134_v11  ;;  %v24386_v11 = vld [vmem:[#allocation38_spill] sm:$0xff]  ;;  %v22196_v14 = vmul.f32 %v24387_v23, %v11158_v46  ;;  %v12264_v23 = vmul.f32 %v21967_v41, %v24391_v24  ;;  %v24397_v41 = vld [vmem:[#allocation199_spill] sm:$0xff]  ;;  %v24398_v24 = vld [vmem:[#allocation201_spill] sm:$0xff]  ;;  %v22242_v0 = vmul.f32 %v24400_v34, %v11222_v1 }
 0x764   : > { %v12261_v37 = vmul.f32 %v21949_v57, %v24386_v11  ;;  %v24389_v57 = vld [vmem:[#allocation37_spill] sm:$0xff]  ;;  %v22212_v11 = vmul.f32 %v24390_v7, %v11174_v9  ;;  %v12387_v9 = vrot.slane %v12259_v17, 4  ;;  %v24394_v7 = vld [vmem:[#allocation39_spill] sm:$0xff]  ;;  %v22236_v38 = vmul.f32 %v24397_v41, %v11206_v19 }
 0x765   : > { %v12262_v46 = vmul.f32 %v21957_v10, %v24389_v57  ;;  %v11246_v10 = vrot.slane %v22069_v49, %v24284_v61  ;;  %v12266_v40 = vmul.f32 %v21975_v3, %v24394_v7  ;;  %v22239_v31 = vmul.f32 %v24398_v24, %v11214_v54  ;;  %24401 = vst [vmem:[#allocation9_spill] sm:$0xff] %v22242_v0  ;;  %v24402_v3 = vld [vmem:[#allocation205_spill] sm:$0xff] }
 0x766   : > { %v12399_v57 = vrot.slane %v12261_v37, 4  ;;  %v22247_v7 = vmul.f32 %v24402_v3, %v11230_v16  ;;  %v12417_v58 = vrot.slane %v12264_v23, 4  ;;  %v11282_v54 = vrot.slane %v22102_v62, %v24273_v44  ;;  %v24406_v1 = vld [vmem:[#allocation209_spill] sm:$0xff] }
 0x767   : > { %11911 = vperm.xlu0 %14367, %v11549_v43   ;;  %v11238_v43 = vrot.slane %v22069_v49, %v24282_v45  ;;  %24399 = vst [vmem:[#allocation227_spill] sm:$0xff] %v22239_v31  ;;  %v12405_v56 = vrot.slane %v12262_v46, 4  ;;  %v11290_v19 = vrot.slane %v22102_v62, %v24275_v8  ;;  %v22259_v41 = vmul.f32 %v24406_v1, %v11246_v10  ;;  %v24410_v1 = vld [vmem:[#allocation41_spill] sm:$0xff] }
 0x768   : > { %24403 = vst [vmem:[#allocation229_spill] sm:$0xff] %v22247_v7  ;;  %v12388_v24 = vadd.f32 %v12387_v9, %v12259_v17  ;;  %v12400_v34 = vadd.f32 %v12399_v57, %v12261_v37  ;;  %v12429_v16 = vrot.slane %v12266_v40, 4  ;;  %v11278_v7 = vrot.slane %v22102_v62, %v24284_v61  ;;  %v22272_v37 = vpop.permute.xlu1 %11856  ;;  %v24412_v9 = vld [vmem:[#allocation213_spill] sm:$0xff] }
 0x769   : > { %v22250_v53 = vmul.f32 %v24404_v60, %v11238_v43  ;;  %24407 = vst [vmem:[#allocation3_spill] sm:$0xff] %v22259_v41  ;;  %v11298_v60 = vrot.slane %v22102_v62, %v24277_v42  ;;  %v12406_v10 = vadd.f32 %v12405_v56, %v12262_v46  ;;  %v12268_v17 = vmul.f32 %v21984_v35, %v24410_v1 }
 0x76a   : > { %24411 = vst [vmem:[#allocation114_spill] sm:$0xff] %v22272_v37  ;;  %v11294_v56 = vrot.slane %v22102_v62, %v24319_v33  ;;  %v12389_v46 = vrot.slane %v12388_v24, 2  ;;  %v12401_v35 = vrot.slane %v12400_v34, 2  ;;  %v12430_v1 = vadd.f32 %v12429_v16, %v12266_v40  ;;  %v24416_v37 = vld [vmem:[#allocation222_spill] sm:$0xff]  ;;  %v24421_v40 = vld [vmem:[#allocation15_spill] sm:$0xff] }
 0x76b   : > { %11921 = vperm.xlu0 %14367, %v11551_v47   ;;  %24405 = vst [vmem:[#allocation109_spill] sm:$0xff] %v22250_v53  ;;  %v11262_v47 = vrot.slane %v22069_v49, %v24319_v33  ;;  %v24408_v49 = vld [vmem:[#allocation261_spill] sm:$0xff]  ;;  %v11270_v53 = vrot.slane %v22102_v62, %v24282_v45  ;;  %v22288_v0 = vmul.f32 %v24416_v37, %v11298_v60  ;;  %v24422_v60 = vld [vmem:[#allocation219_spill] sm:$0xff] }
 0x76c   : > { %v22264_v43 = vmul.f32 %v24408_v49, %v11254_v25  ;;  %v12418_v25 = vadd.f32 %v12417_v58, %v12264_v23  ;;  %v11310_v23 = vrot.slane %v22110_v39, %v24284_v61  ;;  %v24417_v58 = vld [vmem:[#allocation215_spill] sm:$0xff]  ;;  %v12270_v16 = vmul.f32 %v21992_v26, %v24421_v40 }
 0x76d   : > { %v22275_v57 = vmul.f32 %v24412_v9, %v11262_v47  ;;  %v11318_v47 = vrot.slane %v22110_v39, %v24316_v18  ;;  %v12441_v9 = vrot.slane %v12268_v17, 4  ;;  %v12431_v61 = vrot.slane %v12430_v1, 2 }
 0x76e   : > { %v10818_v3 = vpop.xlane.xlu0 %10817  ;;  %24409 = vst [vmem:[#allocation111_spill] sm:$0xff] %v22264_v43  ;;  %v24415_v43 = vld [vmem:[#allocation220_spill] sm:$0xff]  ;;  %v11314_v26 = vrot.slane %v22110_v39, %v24273_v44 }
 0x76f   : > { %14718 = vrcp.f32 %v10818_v3  ;;  %11931 = vperm.xlu0 %14367, %v11553_v63   ;;  %24413 = vst [vmem:[#allocation116_spill] sm:$0xff] %v22275_v57  ;;  %v11286_v63 = vrot.slane %v22102_v62, %v24316_v18  ;;  %v24414_v3 = vld [vmem:[#allocation218_spill] sm:$0xff]  ;;  %v22283_v41 = vmul.f32 %v24415_v43, %v11290_v19  ;;  %v24419_v19 = vld [vmem:[#allocation217_spill] sm:$0xff]  ;;  %v12407_v62 = vrot.slane %v12406_v10, 2 }
 0x770   : > { %v22280_v49 = vmul.f32 %v24414_v3, %v11282_v54  ;;  %v22296_v54 = vmul.f32 %v24417_v58, %v11270_v53  ;;  %v22299_v43 = vmul.f32 %v24419_v19, %v11278_v7  ;;  %v11326_v3 = vrot.slane %v22110_v39, %v24319_v33  ;;  %v24424_v53 = vld [vmem:[#allocation221_spill] sm:$0xff] }
 0x771   : > { %v22304_v37 = vmul.f32 %v24422_v60, %v11286_v63  ;;  %v11306_v18 = vrot.slane %v22110_v39, %v24271_v13  ;;  %v22311_v58 = vmul.f32 %v24424_v53, %v11294_v56  ;;  %v12390_v7 = vadd.f32 %v12389_v46, %v12388_v24  ;;  %v24427_v63 = vld [vmem:[#allocation12_spill] sm:$0xff] }
 0x772   : > { %24418 = vst [vmem:[#allocation119_spill] sm:$0xff] %v22296_v54  ;;  %24420 = vst [vmem:[#allocation125_spill] sm:$0xff] %v22299_v43  ;;  %v12402_v19 = vadd.f32 %v12401_v35, %v12400_v34  ;;  %v22313_v43 = vpop.permute.xlu1 %11866  ;;  %v24428_v60 = vld [vmem:[#allocation224_spill] sm:$0xff]  ;;  %v11322_v24 = vrot.slane %v22110_v39, %v24275_v8  ;;  %v12408_v34 = vadd.f32 %v12407_v62, %v12406_v10  ;;  %v12453_v46 = vrot.slane %v12270_v16, 4  ;;  %v24433_v62 = vld [vmem:[#allocation13_spill] sm:$0xff] }
 0x773   : > { %11941 = vperm.xlu0 %14367, %v22164_v12   ;;  %24423 = vst [vmem:[#allocation126_spill] sm:$0xff] %v22304_v37  ;;  %v12419_v12 = vrot.slane %v12418_v25, 2  ;;  %24425 = vst [vmem:[#allocation134_spill] sm:$0xff] %v22311_v58  ;;  %v11605_v33 = vmul.f32 %v24428_v60, %v11310_v23  ;;  %v24429_v37 = vld [vmem:[#allocation226_spill] sm:$0xff]  ;;  %v12442_v56 = vadd.f32 %v12441_v9, %v12268_v17  ;;  %v24431_v23 = vld [vmem:[#allocation228_spill] sm:$0xff] }
 0x774   : > { %24426 = vst [vmem:[#allocation135_spill] sm:$0xff] %v22313_v43  ;;  %v22321_v13 = vmul.f32 %v24429_v37, %v11318_v47  ;;  %v11330_v35 = vrot.slane %v22110_v39, %v24277_v42  ;;  %v22333_v60 = vmul.f32 %v24431_v23, %v11306_v18  ;;  %v12391_v47 = vrot.slane %v12390_v7, 1 }
 0x775   : > { %v12420_v58 = vadd.f32 %v12419_v12, %v12418_v25  ;;  %v12403_v37 = vrot.slane %v12402_v19, 1  ;;  %v12432_v57 = vadd.f32 %v12431_v61, %v12430_v1  ;;  %v24434_v25 = vld [vmem:[#allocation267_spill] sm:$0xff]  ;;  %v24436_v12 = vld [vmem:[#allocation269_spill] sm:$0xff]  ;;  %v12409_v18 = vrot.slane %v12408_v34, 1 }
 0x776   : > { %v11627_v54 = vpop.permute.xlu0 %11626  ;;  %24432 = vst [vmem:[#allocation143_spill] sm:$0xff] %v22333_v60  ;;  %v22340_v9 = vmul.f32 %v24434_v25, %v11314_v26  ;;  %v12454_v23 = vadd.f32 %v12453_v46, %v12270_v16  ;;  %v22345_v60 = vpop.permute.xlu1 %11876  ;;  %v24439_v61 = vld [vmem:[#allocation271_spill] sm:$0xff]  ;;  %v24443_v16 = vld [vmem:[#allocation40_spill] sm:$0xff] }
 0x777   : > { %v12260_v40 = vmul.f32 %v11627_v54, %v24427_v63  ;;  %11951 = vperm.xlu0 %14367, %v22171_v28   ;;  %v24430_v63 = vld [vmem:[#allocation266_spill] sm:$0xff]  ;;  %24438 = vst [vmem:[#allocation234_spill] sm:$0xff] %v22345_v60  ;;  %v22348_v1 = vmul.f32 %v24439_v61, %v11330_v35  ;;  %v12404_v31 = vadd.f32 %v12403_v37, %v12402_v19  ;;  %v12433_v26 = vrot.slane %v12432_v57, 1  ;;  %v24442_v25 = vld [vmem:[#allocation43_spill] sm:$0xff]  ;;  %v24444_v60 = vld [vmem:[#allocation45_spill] sm:$0xff] }
 0x778   : > { %v22330_v28 = vmul.f32 %v24430_v63, %v11326_v3  ;;  %24435 = vst [vmem:[#allocation140_spill] sm:$0xff] %v22340_v9  ;;  %v22343_v3 = vmul.f32 %v24436_v12, %v11322_v24  ;;  %v12443_v63 = vrot.slane %v12442_v56, 2  ;;  %v12272_v24 = vmul.f32 %v22002_v55, %v24442_v25 }
 0x779   : > { %v22327_v53 = vpop.eup %14718  ;;  %v12393_v54 = vrot.slane %v12260_v40, 4  ;;  %24440 = vst [vmem:[#allocation236_spill] sm:$0xff] %v22348_v1  ;;  %v12410_v35 = vadd.f32 %v12409_v18, %v12408_v34  ;;  %v12455_v1 = vrot.slane %v12454_v23, 2 }
 0x77a   : > { %v11642_v43 = vpop.permute.xlu0 %11641  ;;  %v11334_v10 = vrot.slane %v22327_v53, %v24282_v45  ;;  %24437 = vst [vmem:[#allocation141_spill] sm:$0xff] %v22343_v3  ;;  %v12421_v45 = vrot.slane %v12420_v58, 1  ;;  %v12444_v61 = vadd.f32 %v12443_v63, %v12442_v56  ;;  %v12465_v55 = vrot.slane %v12272_v24, 4 }
 0x77b   : > { %v12394_v17 = vadd.f32 %v12393_v54, %v12260_v40  ;;  %v12263_v39 = vmul.f32 %v11642_v43, %v24433_v62  ;;  %11961 = vperm.xlu0 %14367, %v22174_v30   ;;  %v24441_v43 = vld [vmem:[#allocation268_spill] sm:$0xff]  ;;  %v12392_v30 = vadd.f32 %v12391_v47, %v12390_v7 }
 0x77c   : > { %v11611_v62 = vmul.f32 %v24441_v43, %v11334_v10  ;;  %v12274_v10 = vmul.f32 %v22010_v2, %v24444_v60  ;;  %v12422_v7 = vadd.f32 %v12421_v45, %v12420_v58  ;;  %v22357_v43 = vadd.f32 %v12433_v26, %v12432_v57  ;;  %v24447_v2 = vld [vmem:[#allocation42_spill] sm:$0xff] }
 0x77d   : > { %v12395_v40 = vrot.slane %v12394_v17, 2  ;;  %v12411_v54 = vrot.slane %v12263_v39, 4  ;;  %v12445_v60 = vrot.slane %v12444_v61, 1  ;;  %v12456_v45 = vadd.f32 %v12455_v1, %v12454_v23 }
 0x77e   : > { %v11652_v12 = vpop.permute.xlu0 %11651  ;;  %12221 = vperm.xlu1 %14366, %v11611_v62   ;;  %v12477_v57 = vrot.slane %v12274_v10, 4 }
 0x77f   : > { %v12396_v3 = vadd.f32 %v12395_v40, %v12394_v17  ;;  %v12412_v9 = vadd.f32 %v12411_v54, %v12263_v39  ;;  %v12265_v46 = vmul.f32 %v11652_v12, %v24443_v16  ;;  %11971 = vperm.xlu0 %14367, %v22177_v20   ;;  %v24445_v17 = vld [vmem:[#allocation17_spill] sm:$0xff]  ;;  %v24446_v40 = vld [vmem:[#allocation47_spill] sm:$0xff]  ;;  %v22363_v20 = vpop.permute.xlu1 %11886  ;;  %v12466_v12 = vadd.f32 %v12465_v55, %v12272_v24 }
 0x780   : > { %v12276_v39 = vmul.f32 %v22018_v6, %v24445_v17  ;;  %v12278_v54 = vmul.f32 %v22026_v51, %v24446_v40  ;;  %v11346_v6 = vrot.slane %v22327_v53, %v24273_v44  ;;  %v12457_v44 = vrot.slane %v12456_v45, 1  ;;  %v24448_v17 = vld [vmem:[#allocation16_spill] sm:$0xff] }
 0x781   : > { %v12397_v19 = vrot.slane %v12396_v3, 1  ;;  %v12413_v47 = vrot.slane %v12412_v9, 2  ;;  %v12423_v37 = vrot.slane %v12265_v46, 4  ;;  %v12467_v40 = vrot.slane %v12466_v12, 2 }
 0x782   : > { %v11662_v34 = vpop.permute.xlu0 %11661  ;;  %12191 = vperm.xlu1 %14366, %v11605_v33   ;;  %v11614_v24 = vmul.f32 %v21768_v4, %v11346_v6  ;;  %v22381_v4 = vadd.f32 %v12457_v44, %v12456_v45  ;;  %v24451_v6 = vld [vmem:[#allocation49_spill] sm:$0xff] }
 0x783   : > { %v12398_v56 = vadd.f32 %v12397_v19, %v12396_v3  ;;  %v12414_v18 = vadd.f32 %v12413_v47, %v12412_v9  ;;  %v12424_v63 = vadd.f32 %v12423_v37, %v12265_v46  ;;  %v12267_v58 = vmul.f32 %v11662_v34, %v24447_v2  ;;  %11981 = vperm.xlu0 %14367, %v22182_v27  }
 0x784   : > { %v12489_v3 = vrot.slane %v12276_v39, 4  ;;  %v12501_v9 = vrot.slane %v12278_v54, 4  ;;  %v12446_v27 = vadd.f32 %v12445_v60, %v12444_v61  ;;  %v12478_v47 = vadd.f32 %v12477_v57, %v12274_v10  ;;  %v24450_v60 = vld [vmem:[#allocation19_spill] sm:$0xff] }
 0x785   : > { %v13283_v62 = vsel %vm8395_vm14, %v12398_v56, %v12392_v30  ;;  %v12415_v51 = vrot.slane %v12414_v18, 1  ;;  %v12425_v26 = vrot.slane %v12424_v63, 2  ;;  %v12435_v25 = vrot.slane %v12267_v58, 4  ;;  %v22373_v30 = vpop.permute.xlu1 %11896 }
 0x786   : > { %v13284_v33 = vsel %vm8397_vm8, %v12404_v31, %v13283_v62  ;;  %v11672_v16 = vpop.permute.xlu0 %11671  ;;  %12156 = vperm.xlu1 %14366, %v22280_v49   ;;  %v12490_v34 = vadd.f32 %v12489_v3, %v12276_v39  ;;  %v12502_v56 = vadd.f32 %v12501_v9, %v12278_v54  ;;  %v12280_v57 = vmul.f32 %v22036_v32, %v24450_v60 }
 0x787   : > { %v13285_v46 = vsel %vm8399_vm6, %v12410_v35, %v13284_v33  ;;  %v12416_v23 = vadd.f32 %v12415_v51, %v12414_v18  ;;  %v12426_v1 = vadd.f32 %v12425_v26, %v12424_v63  ;;  %v12436_v19 = vadd.f32 %v12435_v25, %v12267_v58  ;;  %11991 = vperm.xlu0 %14367, %v22185_v48   ;;  %v24449_v48 = vld [vmem:[#allocation44_spill] sm:$0xff] }
 0x788   : > { %v12269_v35 = vmul.f32 %v11672_v16, %v24448_v17  ;;  %v12479_v58 = vrot.slane %v12478_v47, 2  ;;  %v12282_v62 = vmul.f32 %v22044_v5, %v24451_v6  ;;  %v12468_v51 = vadd.f32 %v12467_v40, %v12466_v12 }
 0x789   : > { %v13286_v37 = vsel %vm8401_vm4, %v12416_v23, %v13285_v46  ;;  %v12427_v31 = vrot.slane %v12426_v1, 1  ;;  %v12437_v55 = vrot.slane %v12436_v19, 2  ;;  %v12491_v26 = vrot.slane %v12490_v34, 2  ;;  %v22395_v32 = vpop.permute.xlu1 %11906 }
 0x78a   : > { %v13287_v49 = vsel %vm8403_vm11, %v12422_v7, %v13286_v37  ;;  %v11682_v61 = vpop.permute.xlu0 %11681  ;;  %v12447_v63 = vrot.slane %v12269_v35, 4  ;;  %12236 = vperm.xlu1 %14366, %v11614_v24   ;;  %v12503_v25 = vrot.slane %v12502_v56, 2  ;;  %v12480_v23 = vadd.f32 %v12479_v58, %v12478_v47 }
 0x78b   : > { %v12428_v10 = vadd.f32 %v12427_v31, %v12426_v1  ;;  %v12438_v18 = vadd.f32 %v12437_v55, %v12436_v19  ;;  %v12271_v2 = vmul.f32 %v11682_v61, %v24449_v48  ;;  %12001 = vperm.xlu0 %14367, %v22196_v14   ;;  %v24452_v14 = vld [vmem:[#allocation46_spill] sm:$0xff]  ;;  %v12513_v1 = vrot.slane %v12280_v57, 4 }
 0x78c   : > { %v12448_v54 = vadd.f32 %v12447_v63, %v12269_v35  ;;  %v12525_v19 = vrot.slane %v12282_v62, 4  ;;  %v11354_v12 = vrot.slane %v22327_v53, %v24275_v8  ;;  %v12469_v31 = vrot.slane %v12468_v51, 1  ;;  %v24453_v35 = vld [vmem:[#allocation21_spill] sm:$0xff] }
 0x78d   : > { %v13288_v7 = vsel %vm8405_vm2, %v12428_v10, %v13287_v49  ;;  %v12439_v39 = vrot.slane %v12438_v18, 1  ;;  %v12459_v45 = vrot.slane %v12271_v2, 4  ;;  %v12492_v55 = vadd.f32 %v12491_v26, %v12490_v34  ;;  %v22410_v63 = vpop.permute.xlu1 %11916 }
 0x78e   : > { %v13289_v5 = vsel %vm8407_vm5, %v22357_v43, %v13288_v7  ;;  %v11692_v3 = vpop.permute.xlu0 %11691  ;;  %v12449_v33 = vrot.slane %v12448_v54, 2  ;;  %12201 = vperm.xlu1 %14366, %v22321_v13   ;;  %v12504_v17 = vadd.f32 %v12503_v25, %v12502_v56  ;;  %v12284_v13 = vmul.f32 %v22053_v22, %v24453_v35  ;;  %v24455_v25 = vld [vmem:[#allocation51_spill] sm:$0xff]  ;;  %v24457_v35 = vld [vmem:[#allocation20_spill] sm:$0xff] }
 0x78f   : > { %13411 = vst [vmem:[%s22391_s12] sm:$0xff] %v13289_v5  ;;  %v12440_v9 = vadd.f32 %v12439_v39, %v12438_v18  ;;  %v12460_v16 = vadd.f32 %v12459_v45, %v12271_v2  ;;  %v12273_v46 = vmul.f32 %v11692_v3, %v24452_v14  ;;  %12011 = vperm.xlu0 %14367, %v22201_v36   ;;  %v24454_v36 = vld [vmem:[#allocation18_spill] sm:$0xff]  ;;  %v12481_v8 = vrot.slane %v12480_v23, 1 }
 0x790   : > { %v12450_v43 = vadd.f32 %v12449_v33, %v12448_v54  ;;  %v12514_v18 = vadd.f32 %v12513_v1, %v12280_v57  ;;  %v11616_v34 = vmul.f32 %v21773_v50, %v11354_v12  ;;  %v12470_v58 = vadd.f32 %v12469_v31, %v12468_v51 }
 0x791   : > { %v13290_v44 = vsel %vm8395_vm14, %v12446_v27, %v12440_v9  ;;  %v12461_v24 = vrot.slane %v12460_v16, 2  ;;  %v12471_v37 = vrot.slane %v12273_v46, 4  ;;  %v12526_v27 = vadd.f32 %v12525_v19, %v12282_v62  ;;  %v24456_v9 = vld [vmem:[#allocation48_spill] sm:$0xff]  ;;  %v22423_v1 = vpop.permute.xlu1 %11926 }
 0x792   : > { %v11702_v40 = vpop.permute.xlu0 %11701  ;;  %v12451_v47 = vrot.slane %v12450_v43, 1  ;;  %12166 = vperm.xlu1 %14366, %v22283_v41   ;;  %v12493_v60 = vrot.slane %v12492_v55, 1  ;;  %v12505_v6 = vrot.slane %v12504_v17, 1  ;;  %v12537_v7 = vrot.slane %v12284_v13, 4 }
 0x793   : > { %v12462_v49 = vadd.f32 %v12461_v24, %v12460_v16  ;;  %v12472_v61 = vadd.f32 %v12471_v37, %v12273_v46  ;;  %v12275_v10 = vmul.f32 %v11702_v40, %v24454_v36  ;;  %12021 = vperm.xlu0 %14367, %v22212_v11   ;;  %v12482_v45 = vadd.f32 %v12481_v8, %v12480_v23 }
 0x794   : > { %v12452_v56 = vadd.f32 %v12451_v47, %v12450_v43  ;;  %v12515_v26 = vrot.slane %v12514_v18, 2  ;;  %v12527_v11 = vrot.slane %v12526_v27, 2  ;;  %v12286_v50 = vmul.f32 %v22061_v15, %v24455_v25  ;;  %v24458_v47 = vld [vmem:[#allocation24_spill] sm:$0xff] }
 0x795   : > { %v12463_v48 = vrot.slane %v12462_v49, 1  ;;  %v12473_v22 = vrot.slane %v12472_v61, 2  ;;  %v12483_v2 = vrot.slane %v12275_v10, 4  ;;  %v12494_v16 = vadd.f32 %v12493_v60, %v12492_v55 }
 0x796   : > { %v11712_v41 = vpop.permute.xlu0 %11711  ;;  %v13291_v39 = vsel %vm8397_vm8, %v12452_v56, %v13290_v44  ;;  %12246 = vperm.xlu1 %14366, %v11616_v34   ;;  %v22421_v14 = vadd.f32 %v12505_v6, %v12504_v17  ;;  %v12538_v46 = vadd.f32 %v12537_v7, %v12284_v13  ;;  %v12528_v43 = vadd.f32 %v12527_v11, %v12526_v27  ;;  %v24461_v27 = vld [vmem:[#allocation50_spill] sm:$0xff]  ;;  %v22445_v6 = vpop.permute.xlu1 %11936  ;;  %v24466_v7 = vld [vmem:[#allocation260_spill] sm:$0xff] }
 0x797   : > { %v12464_v54 = vadd.f32 %v12463_v48, %v12462_v49  ;;  %v12474_v57 = vadd.f32 %v12473_v22, %v12472_v61  ;;  %v12484_v62 = vadd.f32 %v12483_v2, %v12275_v10  ;;  %12031 = vperm.xlu0 %14367, %v22221_v21   ;;  %v13292_v51 = vsel %vm8399_vm6, %v22381_v4, %v13291_v39  ;;  %v24459_v61 = vld [vmem:[#allocation54_spill] sm:$0xff]  ;;  %v24462_v48 = vld [vmem:[#allocation25_spill] sm:$0xff] }
 0x798   : > { %v12277_v33 = vmul.f32 %v11712_v41, %v24456_v9  ;;  %v12516_v4 = vadd.f32 %v12515_v26, %v12514_v18  ;;  %v12549_v24 = vrot.slane %v12286_v50, 4  ;;  %v11362_v37 = vrot.slane %v22327_v53, %v24277_v42  ;;  %v24463_v22 = vld [vmem:[#allocation262_spill] sm:$0xff] }
 0x799   : > { %v12475_v5 = vrot.slane %v12474_v57, 1  ;;  %v12485_v3 = vrot.slane %v12484_v62, 2  ;;  %v13293_v23 = vsel %vm8401_vm4, %v12464_v54, %v13292_v51  ;;  %v12539_v40 = vrot.slane %v12538_v46, 2 }
 0x79a   : > { %v11722_v19 = vpop.permute.xlu0 %11721  ;;  %v13294_v15 = vsel %vm8403_vm11, %v12470_v58, %v13293_v23  ;;  %v12495_v44 = vrot.slane %v12277_v33, 4  ;;  %12211 = vperm.xlu1 %14366, %v22330_v28   ;;  %v12288_v49 = vmul.f32 %v22074_v52, %v24458_v47  ;;  %v24460_v28 = vld [vmem:[#allocation264_spill] sm:$0xff]  ;;  %v12550_v56 = vadd.f32 %v12549_v24, %v12286_v50  ;;  %v24465_v52 = vld [vmem:[#allocation211_spill] sm:$0xff] }
 0x79b   : > { %v12476_v12 = vadd.f32 %v12475_v5, %v12474_v57  ;;  %v12486_v21 = vadd.f32 %v12485_v3, %v12484_v62  ;;  %12041 = vperm.xlu0 %14367, %v22224_v59   ;;  %v12279_v13 = vmul.f32 %v11722_v19, %v24457_v35  ;;  %v12290_v36 = vmul.f32 %v24460_v28, %v24459_v61  ;;  %v24464_v58 = vld [vmem:[#allocation28_spill] sm:$0xff]  ;;  %v24467_v3 = vld [vmem:[#allocation22_spill] sm:$0xff] }
 0x79c   : > { %v12496_v17 = vadd.f32 %v12495_v44, %v12277_v33  ;;  %v12292_v2 = vmul.f32 %v24463_v22, %v24462_v48  ;;  %v12294_v60 = vmul.f32 %v24465_v52, %v24464_v58  ;;  %v11618_v41 = vmul.f32 %v24466_v7, %v11362_v37 }
 0x79d   : > { %v13295_v31 = vsel %vm8405_vm2, %v12476_v12, %v13294_v15  ;;  %v12487_v55 = vrot.slane %v12486_v21, 1  ;;  %v12507_v42 = vrot.slane %v12279_v13, 4  ;;  %v12517_v62 = vrot.slane %v12516_v4, 1 }
 0x79e   : > { %v13296_v10 = vsel %vm8407_vm5, %v12482_v45, %v13295_v31  ;;  %v11732_v8 = vpop.permute.xlu0 %11731  ;;  %v12497_v18 = vrot.slane %v12496_v17, 2  ;;  %12176 = vperm.xlu1 %14366, %v22288_v0   ;;  %v12540_v45 = vadd.f32 %v12539_v40, %v12538_v46  ;;  %v12561_v26 = vrot.slane %v12288_v49, 4  ;;  %v22452_v31 = vpop.permute.xlu1 %11946 }
 0x79f   : > { %13412 = vst [vmem:[%s22391_s12 + $0x8] sm:$0xff] %v13296_v10  ;;  %v12488_v59 = vadd.f32 %v12487_v55, %v12486_v21  ;;  %v12281_v34 = vmul.f32 %v11732_v8, %v24461_v27  ;;  %12051 = vperm.xlu0 %14367, %v22233_v29   ;;  %v12508_v57 = vadd.f32 %v12507_v42, %v12279_v13  ;;  %v12573_v11 = vrot.slane %v12290_v36, 4  ;;  %v24468_v10 = vld [vmem:[#allocation227_spill] sm:$0xff]  ;;  %v24469_v27 = vld [vmem:[#allocation52_spill] sm:$0xff] }
 0x7a0   : > { %v12498_v54 = vadd.f32 %v12497_v18, %v12496_v17  ;;  %v12529_v33 = vrot.slane %v12528_v43, 1  ;;  %v12551_v29 = vrot.slane %v12550_v56, 2  ;;  %v12585_v23 = vrot.slane %v12292_v2, 4 }
 0x7a1   : > { %v13297_v39 = vsel %vm8395_vm14, %v12494_v16, %v12488_v59  ;;  %v12519_v0 = vrot.slane %v12281_v34, 4  ;;  %v12509_v51 = vrot.slane %v12508_v57, 2  ;;  %v12597_v19 = vrot.slane %v12294_v60, 4 }
 0x7a2   : > { %v11742_v25 = vpop.permute.xlu0 %11741  ;;  %v12499_v50 = vrot.slane %v12498_v54, 1  ;;  %12256 = vperm.xlu1 %14366, %v11618_v41   ;;  %v12518_v46 = vadd.f32 %v12517_v62, %v12516_v4  ;;  %v12541_v44 = vrot.slane %v12540_v45, 1  ;;  %v12562_v24 = vadd.f32 %v12561_v26, %v12288_v49  ;;  %v24471_v41 = vld [vmem:[#allocation29_spill] sm:$0xff] }
 0x7a3   : > { %v12520_v5 = vadd.f32 %v12519_v0, %v12281_v34  ;;  %v12283_v9 = vmul.f32 %v11742_v25, %v24467_v3  ;;  %12061 = vperm.xlu0 %14367, %v22236_v38   ;;  %v12510_v15 = vadd.f32 %v12509_v51, %v12508_v57  ;;  %v12574_v37 = vadd.f32 %v12573_v11, %v12290_v36  ;;  %v24473_v57 = vld [vmem:[#allocation9_spill] sm:$0xff]  ;;  %v24475_v51 = vld [vmem:[#allocation259_spill] sm:$0xff] }
 0x7a4   : > { %v12500_v16 = vadd.f32 %v12499_v50, %v12498_v54  ;;  %v12530_v47 = vadd.f32 %v12529_v33, %v12528_v43  ;;  %v12552_v61 = vadd.f32 %v12551_v29, %v12550_v56  ;;  %v12586_v28 = vadd.f32 %v12585_v23, %v12292_v2  ;;  %v24470_v2 = vld [vmem:[#allocation2_spill] sm:$0xff]  ;;  %v22463_v54 = vpop.permute.xlu1 %11956  ;;  %v24474_v50 = vld [vmem:[#allocation32_spill] sm:$0xff] }
 0x7a5   : > { %v12521_v12 = vrot.slane %v12520_v5, 2  ;;  %v12531_v21 = vrot.slane %v12283_v9, 4  ;;  %v12511_v35 = vrot.slane %v12510_v15, 1  ;;  %v12598_v38 = vadd.f32 %v12597_v19, %v12294_v60 }
 0x7a6   : > { %v11752_v55 = vpop.permute.xlu0 %11751  ;;  %v13298_v17 = vsel %vm8397_vm8, %v12500_v16, %v13297_v39  ;;  %v12542_v59 = vadd.f32 %v12541_v44, %v12540_v45  ;;  %v12563_v18 = vrot.slane %v12562_v24, 2  ;;  %v12575_v42 = vrot.slane %v12574_v37, 2 }
 0x7a7   : > { %v12522_v13 = vadd.f32 %v12521_v12, %v12520_v5  ;;  %v12532_v40 = vadd.f32 %v12531_v21, %v12283_v9  ;;  %12071 = vperm.xlu0 %14367, %v24468_v10   ;;  %v13299_v4 = vsel %vm8399_vm6, %v22421_v14, %v13298_v17  ;;  %v12512_v8 = vadd.f32 %v12511_v35, %v12510_v15  ;;  %v24472_v14 = vld [vmem:[#allocation265_spill] sm:$0xff]  ;;  %v24479_v35 = vld [vmem:[#allocation23_spill] sm:$0xff] }
 0x7a8   : > { %v12285_v34 = vmul.f32 %v11752_v55, %v24469_v27  ;;  %v12553_v52 = vrot.slane %v12552_v61, 1  ;;  %v12587_v60 = vrot.slane %v12586_v28, 2  ;;  %v12599_v7 = vrot.slane %v12598_v38, 2  ;;  %v24476_v21 = vld [vmem:[#allocation33_spill] sm:$0xff] }
 0x7a9   : > { %v12523_v49 = vrot.slane %v12522_v13, 1  ;;  %v12533_v36 = vrot.slane %v12532_v40, 2  ;;  %v13300_v22 = vsel %vm8401_vm4, %v12512_v8, %v13299_v4  ;;  %v12296_v39 = vmul.f32 %v24472_v14, %v24471_v41  ;;  %v22477_v8 = vpop.permute.xlu1 %11966  ;;  %v24483_v41 = vld [vmem:[#allocation225_spill] sm:$0xff] }
 0x7aa   : > { %v11762_v48 = vpop.permute.xlu0 %11761  ;;  %v13301_v0 = vsel %vm8403_vm11, %v12518_v46, %v13300_v22  ;;  %v12543_v45 = vrot.slane %v12285_v34, 4  ;;  %v12564_v11 = vadd.f32 %v12563_v18, %v12562_v24  ;;  %v12576_v25 = vadd.f32 %v12575_v42, %v12574_v37  ;;  %v24477_v46 = vld [vmem:[#allocation5_spill] sm:$0xff] }
 0x7ab   : > { %v12524_v43 = vadd.f32 %v12523_v49, %v12522_v13  ;;  %v12534_v56 = vadd.f32 %v12533_v36, %v12532_v40  ;;  %v12287_v58 = vmul.f32 %v11762_v48, %v24470_v2  ;;  %12081 = vperm.xlu0 %14367, %v24473_v57   ;;  %v12298_v5 = vmul.f32 %v24475_v51, %v24474_v50  ;;  %v24478_v24 = vld [vmem:[#allocation229_spill] sm:$0xff] }
 0x7ac   : > { %v12544_v23 = vadd.f32 %v12543_v45, %v12285_v34  ;;  %v12588_v16 = vadd.f32 %v12587_v60, %v12586_v28  ;;  %v12600_v15 = vadd.f32 %v12599_v7, %v12598_v38  ;;  %v12609_v12 = vrot.slane %v12296_v39, 4  ;;  %v24480_v18 = vld [vmem:[#allocation53_spill] sm:$0xff]  ;;  %v24482_v7 = vld [vmem:[#allocation36_spill] sm:$0xff] }
 0x7ad   : > { %v12535_v62 = vrot.slane %v12534_v56, 1  ;;  %v12555_v26 = vrot.slane %v12287_v58, 4  ;;  %v13302_v3 = vsel %vm8405_vm2, %v12524_v43, %v13301_v0  ;;  %v12300_v44 = vmul.f32 %v24477_v46, %v24476_v21  ;;  %v24481_v22 = vld [vmem:[#allocation109_spill] sm:$0xff]  ;;  %v24486_v21 = vld [vmem:[#allocation68_spill] sm:$0xff]  ;;  %v24487_v46 = vld [vmem:[#allocation7_spill] sm:$0xff] }
 0x7ae   : > { %v11772_v9 = vpop.permute.xlu0 %11771  ;;  %v13303_v33 = vsel %vm8407_vm5, %v12530_v47, %v13302_v3  ;;  %v12545_v55 = vrot.slane %v12544_v23, 2  ;;  %v12554_v40 = vadd.f32 %v12553_v52, %v12552_v61  ;;  %v12565_v47 = vrot.slane %v12564_v11, 1 }
 0x7af   : > { %v12536_v29 = vadd.f32 %v12535_v62, %v12534_v56  ;;  %v12556_v19 = vadd.f32 %v12555_v26, %v12287_v58  ;;  %13413 = vst [vmem:[%s22391_s12 + $0x10] sm:$0xff] %v13303_v33  ;;  %12091 = vperm.xlu0 %14367, %v24478_v24   ;;  %v12289_v13 = vmul.f32 %v11772_v9, %v24479_v35  ;;  %v12577_v10 = vrot.slane %v12576_v25, 1  ;;  %v22485_v9 = vpop.permute.xlu1 %11976  ;;  %v24484_v33 = vld [vmem:[#allocation3_spill] sm:$0xff] }
 0x7b0   : > { %v12621_v4 = vrot.slane %v12298_v5, 4  ;;  %v12546_v38 = vadd.f32 %v12545_v55, %v12544_v23  ;;  %v12589_v27 = vrot.slane %v12588_v16, 1  ;;  %v12601_v34 = vrot.slane %v12600_v15, 1 }
 0x7b1   : > { %v13304_v37 = vsel %vm8395_vm14, %v12542_v59, %v12536_v29  ;;  %v12557_v17 = vrot.slane %v12556_v19, 2  ;;  %v12567_v36 = vrot.slane %v12289_v13, 4  ;;  %v12610_v48 = vadd.f32 %v12609_v12, %v12296_v39  ;;  %v24485_v29 = vld [vmem:[#allocation55_spill] sm:$0xff] }
 0x7b2   : > { %v11782_v28 = vpop.permute.xlu0 %11781  ;;  %v12633_v59 = vrot.slane %v12300_v44, 4  ;;  %v12547_v43 = vrot.slane %v12546_v38, 1  ;;  %v12566_v58 = vadd.f32 %v12565_v47, %v12564_v11  ;;  %v12578_v52 = vadd.f32 %v12577_v10, %v12576_v25  ;;  %v24489_v10 = vld [vmem:[#allocation114_spill] sm:$0xff] }
 0x7b3   : > { %v12558_v49 = vadd.f32 %v12557_v17, %v12556_v19  ;;  %v12291_v42 = vmul.f32 %v11782_v28, %v24480_v18  ;;  %12101 = vperm.xlu0 %14367, %v24481_v22   ;;  %v12568_v61 = vadd.f32 %v12567_v36, %v12289_v13  ;;  %v12622_v60 = vadd.f32 %v12621_v4, %v12298_v5  ;;  %v24490_v28 = vld [vmem:[#allocation75_spill] sm:$0xff] }
 0x7b4   : > { %v12302_v14 = vmul.f32 %v24483_v41, %v24482_v7  ;;  %v12548_v0 = vadd.f32 %v12547_v43, %v12546_v38  ;;  %v12590_v50 = vadd.f32 %v12589_v27, %v12588_v16  ;;  %v22483_v39 = vadd.f32 %v12601_v34, %v12600_v15  ;;  %v24491_v38 = vld [vmem:[#allocation135_spill] sm:$0xff]  ;;  %v22500_v43 = vpop.permute.xlu1 %11986 }
 0x7b5   : > { %v12559_v56 = vrot.slane %v12558_v49, 1  ;;  %v12579_v2 = vrot.slane %v12291_v42, 4  ;;  %v12569_v45 = vrot.slane %v12568_v61, 2  ;;  %v12611_v51 = vrot.slane %v12610_v48, 2  ;;  %v24492_v36 = vld [vmem:[#allocation111_spill] sm:$0xff] }
 0x7b6   : > { %v11792_v57 = vpop.permute.xlu0 %11791  ;;  %v12634_v3 = vadd.f32 %v12633_v59, %v12300_v44  ;;  %v13305_v11 = vsel %vm8397_vm8, %v12548_v0, %v13304_v37  ;;  %v12623_v19 = vrot.slane %v12622_v60, 2  ;;  %v12645_v12 = vrot.slane %v12302_v14, 4  ;;  %v24488_v37 = vld [vmem:[#allocation72_spill] sm:$0xff] }
 0x7b7   : > { %v12560_v62 = vadd.f32 %v12559_v56, %v12558_v49  ;;  %v12580_v26 = vadd.f32 %v12579_v2, %v12291_v42  ;;  %12111 = vperm.xlu0 %14367, %v24484_v33   ;;  %v12570_v25 = vadd.f32 %v12569_v45, %v12568_v61  ;;  %v12293_v23 = vmul.f32 %v11792_v57, %v24485_v29  ;;  %v24494_v57 = vld [vmem:[#allocation59_spill] sm:$0xff] }
 0x7b8   : > { %v12304_v24 = vmul.f32 %v24487_v46, %v24486_v21  ;;  %v13306_v16 = vsel %vm8399_vm6, %v12554_v40, %v13305_v11  ;;  %v12612_v13 = vadd.f32 %v12611_v51, %v12610_v48  ;;  %v12635_v47 = vrot.slane %v12634_v3, 2  ;;  %v24493_v48 = vld [vmem:[#allocation57_spill] sm:$0xff]  ;;  %v24496_v29 = vld [vmem:[#allocation79_spill] sm:$0xff] }
 0x7b9   : > { %v12581_v5 = vrot.slane %v12580_v26, 2  ;;  %v13307_v44 = vsel %vm8401_vm4, %v12560_v62, %v13306_v16  ;;  %v12571_v55 = vrot.slane %v12570_v25, 1  ;;  %v12591_v35 = vrot.slane %v12293_v23, 4 }
 0x7ba   : > { %v11802_v15 = vpop.permute.xlu0 %11801  ;;  %v12306_v4 = vmul.f32 %v24489_v10, %v24488_v37  ;;  %v12308_v49 = vmul.f32 %v24491_v38, %v24490_v28  ;;  %v13308_v18 = vsel %vm8403_vm11, %v12566_v58, %v13307_v44  ;;  %v12624_v34 = vadd.f32 %v12623_v19, %v12622_v60  ;;  %v24495_v60 = vld [vmem:[#allocation116_spill] sm:$0xff] }
 0x7bb   : > { %v12582_v17 = vadd.f32 %v12581_v5, %v12580_v26  ;;  %12121 = vperm.xlu0 %14367, %v24492_v36   ;;  %v12572_v42 = vadd.f32 %v12571_v55, %v12570_v25  ;;  %v12592_v27 = vadd.f32 %v12591_v35, %v12293_v23  ;;  %v12646_v59 = vadd.f32 %v12645_v12, %v12302_v14  ;;  %v24497_v23 = vld [vmem:[#allocation234_spill] sm:$0xff]  ;;  %v22512_v35 = vpop.permute.xlu1 %11996 }
 0x7bc   : > { %v12657_v22 = vrot.slane %v12304_v24, 4  ;;  %v12295_v56 = vmul.f32 %v11802_v15, %v24493_v48  ;;  %v12613_v62 = vrot.slane %v12612_v13, 1  ;;  %v12636_v58 = vadd.f32 %v12635_v47, %v12634_v3  ;;  %v24498_v15 = vld [vmem:[#allocation62_spill] sm:$0xff]  ;;  %v24499_v47 = vld [vmem:[#allocation119_spill] sm:$0xff] }
 0x7bd   : > { %v12583_v40 = vrot.slane %v12582_v17, 1  ;;  %v13309_v2 = vsel %vm8405_vm2, %v12572_v42, %v13308_v18  ;;  %v12593_v41 = vrot.slane %v12592_v27, 2  ;;  %v12669_v45 = vrot.slane %v12306_v4, 4 }
 0x7be   : > { %v11812_v61 = vpop.permute.xlu0 %11811  ;;  %v13310_v26 = vsel %vm8407_vm5, %v12578_v52, %v13309_v2  ;;  %v12681_v14 = vrot.slane %v12308_v49, 4  ;;  %v12603_v11 = vrot.slane %v12295_v56, 4  ;;  %v12625_v25 = vrot.slane %v12624_v34, 1 }
 0x7bf   : > { %v12584_v7 = vadd.f32 %v12583_v40, %v12582_v17  ;;  %v12297_v0 = vmul.f32 %v11812_v61, %v24494_v57  ;;  %12131 = vperm.xlu0 %14367, %v24495_v60   ;;  %13414 = vst [vmem:[%s22391_s12 + $0x18] sm:$0xff] %v13310_v26  ;;  %v12594_v33 = vadd.f32 %v12593_v41, %v12592_v27  ;;  %v12647_v5 = vrot.slane %v12646_v59, 2  ;;  %v24500_v61 = vld [vmem:[#allocation84_spill] sm:$0xff] }
 0x7c0   : > { %v12310_v19 = vmul.f32 %v24497_v23, %v24496_v29  ;;  %v12658_v46 = vadd.f32 %v12657_v22, %v12304_v24  ;;  %v12604_v16 = vadd.f32 %v12603_v11, %v12295_v56  ;;  %v12614_v44 = vadd.f32 %v12613_v62, %v12612_v13  ;;  %v24502_v26 = vld [vmem:[#allocation64_spill] sm:$0xff] }
 0x7c1   : > { %v13311_v51 = vsel %vm8395_vm14, %v12590_v50, %v12584_v7  ;;  %v12615_v12 = vrot.slane %v12297_v0, 4  ;;  %v12595_v3 = vrot.slane %v12594_v33, 1  ;;  %v12637_v55 = vrot.slane %v12636_v58, 1  ;;  %v24501_v7 = vld [vmem:[#allocation125_spill] sm:$0xff]  ;;  %v24504_v29 = vld [vmem:[#allocation88_spill] sm:$0xff] }
 0x7c2   : > { %v11822_v21 = vpop.permute.xlu0 %11821  ;;  %v12670_v17 = vadd.f32 %v12669_v45, %v12306_v4  ;;  %v12682_v37 = vadd.f32 %v12681_v14, %v12308_v49  ;;  %v12605_v28 = vrot.slane %v12604_v16, 2  ;;  %v12626_v36 = vadd.f32 %v12625_v25, %v12624_v34  ;;  %v22524_v45 = vpop.permute.xlu1 %12006  ;;  %v24503_v14 = vld [vmem:[#allocation6_spill] sm:$0xff] }
 0x7c3   : > { %v12299_v52 = vmul.f32 %v11822_v21, %v24498_v15  ;;  %v12616_v50 = vadd.f32 %v12615_v12, %v12297_v0  ;;  %12141 = vperm.xlu0 %14367, %v24499_v47   ;;  %v12596_v10 = vadd.f32 %v12595_v3, %v12594_v33  ;;  %v22515_v18 = vadd.f32 %v12647_v5, %v12646_v59  ;;  %v24505_v21 = vld [vmem:[#allocation143_spill] sm:$0xff] }
 0x7c4   : > { %v12693_v24 = vrot.slane %v12310_v19, 4  ;;  %v12659_v27 = vrot.slane %v12658_v46, 2  ;;  %v12606_v22 = vadd.f32 %v12605_v28, %v12604_v16  ;;  %v12638_v48 = vadd.f32 %v12637_v55, %v12636_v58 }
 0x7c5   : > { %v12627_v38 = vrot.slane %v12299_v52, 4  ;;  %v12617_v42 = vrot.slane %v12616_v50, 2  ;;  %v13312_v13 = vsel %vm8397_vm8, %v12596_v10, %v13311_v51  ;;  %v12671_v56 = vrot.slane %v12670_v17, 2 }
 0x7c6   : > { %v11832_v40 = vpop.permute.xlu0 %11831  ;;  %v12312_v2 = vmul.f32 %v22363_v20, %v24500_v61  ;;  %v13313_v49 = vsel %vm8399_vm6, %v22483_v39, %v13312_v13  ;;  %v12683_v34 = vrot.slane %v12682_v37, 2  ;;  %v12607_v59 = vrot.slane %v12606_v22, 1  ;;  %v22539_v13 = vpop.permute.xlu1 %12016 }
 0x7c7   : > { %v12628_v4 = vadd.f32 %v12627_v38, %v12299_v52  ;;  %12151 = vperm.xlu0 %14367, %v24501_v7   ;;  %v12618_v41 = vadd.f32 %v12617_v42, %v12616_v50  ;;  %v12649_v0 = vrot.slane %v22515_v18, 1  ;;  %v12694_v62 = vadd.f32 %v12693_v24, %v12310_v19  ;;  %v24506_v50 = vld [vmem:[#allocation263_spill] sm:$0xff]  ;;  %v24508_v24 = vld [vmem:[#allocation65_spill] sm:$0xff] }
 0x7c8   : > { %v12301_v58 = vmul.f32 %v11832_v40, %v24502_v26  ;;  %v11338_v20 = vrot.slane %v22327_v53, %v24503_v14  ;;  %v12660_v51 = vadd.f32 %v12659_v27, %v12658_v46  ;;  %v12608_v33 = vadd.f32 %v12607_v59, %v12606_v22  ;;  %v24511_v26 = vld [vmem:[#allocation92_spill] sm:$0xff]  ;;  %v24512_v14 = vld [vmem:[#allocation74_spill] sm:$0xff] }
 0x7c9   : > { %v12629_v57 = vrot.slane %v12628_v4, 2  ;;  %v12619_v39 = vrot.slane %v12618_v41, 1  ;;  %v12672_v25 = vadd.f32 %v12671_v56, %v12670_v17  ;;  %v12705_v5 = vrot.slane %v12312_v2, 4  ;;  %v24507_v17 = vld [vmem:[#allocation4_spill] sm:$0xff] }
 0x7ca   : > { %v11842_v60 = vpop.permute.xlu0 %11841  ;;  %v12314_v23 = vmul.f32 %v22373_v30, %v24504_v29  ;;  %v12639_v12 = vrot.slane %v12301_v58, 4  ;;  %v12684_v19 = vadd.f32 %v12683_v34, %v12682_v37  ;;  %v13314_v3 = vsel %vm8401_vm4, %v12608_v33, %v13313_v49  ;;  %v24509_v34 = vld [vmem:[#allocation70_spill] sm:$0xff] }
 0x7cb   : > { %v12630_v11 = vadd.f32 %v12629_v57, %v12628_v4  ;;  %12186 = vperm.xlu0 %14367, %v24505_v21   ;;  %v12620_v16 = vadd.f32 %v12619_v39, %v12618_v41  ;;  %v12695_v52 = vrot.slane %v12694_v62, 2  ;;  %v13315_v46 = vsel %vm8403_vm11, %v12614_v44, %v13314_v3  ;;  %v24510_v57 = vld [vmem:[#allocation270_spill] sm:$0xff] }
 0x7cc   : > { %v11612_v47 = vmul.f32 %v24506_v50, %v11338_v20  ;;  %v11342_v10 = vrot.slane %v22327_v53, %v24507_v17  ;;  %v12640_v38 = vadd.f32 %v12639_v12, %v12301_v58  ;;  %v12303_v37 = vmul.f32 %v11842_v60, %v24508_v24  ;;  %v24513_v17 = vld [vmem:[#allocation78_spill] sm:$0xff] }
 0x7cd   : > { %v12631_v15 = vrot.slane %v12630_v11, 1  ;;  %v13316_v30 = vsel %vm8405_vm2, %v12620_v16, %v13315_v46  ;;  %v12661_v42 = vrot.slane %v12660_v51, 1  ;;  %v12706_v40 = vadd.f32 %v12705_v5, %v12312_v2 }
 0x7ce   : > { %v11852_v55 = vpop.permute.xlu0 %11851  ;;  %v12717_v27 = vrot.slane %v12314_v23, 4  ;;  %v13317_v22 = vsel %vm8407_vm5, %v12626_v36, %v13316_v30  ;;  %v12673_v44 = vrot.slane %v12672_v25, 1  ;;  %v12641_v56 = vrot.slane %v12640_v38, 2  ;;  %v24515_v30 = vld [vmem:[#allocation96_spill] sm:$0xff] }
 0x7cf   : > { %v12632_v28 = vadd.f32 %v12631_v15, %v12630_v11  ;;  %12226 = vperm.xlu0 %14367, %v11612_v47   ;;  %13415 = vst [vmem:[%s22391_s12 + $0x20] sm:$0xff] %v13317_v22  ;;  %v12651_v61 = vrot.slane %v12303_v37, 4  ;;  %v12685_v49 = vrot.slane %v12684_v19, 1  ;;  %v22544_v7 = vadd.f32 %v12695_v52, %v12694_v62  ;;  %v22553_v15 = vpop.permute.xlu1 %12026  ;;  %v24516_v22 = vld [vmem:[#allocation8_spill] sm:$0xff] }
 0x7d0   : > { %v12305_v59 = vmul.f32 %v11852_v55, %v24509_v34  ;;  %v11613_v2 = vmul.f32 %v24510_v57, %v11342_v10  ;;  %v12316_v58 = vmul.f32 %v22395_v32, %v24511_v26  ;;  %v12642_v60 = vadd.f32 %v12641_v56, %v12640_v38  ;;  %v24514_v10 = vld [vmem:[#allocation140_spill] sm:$0xff] }
 0x7d1   : > { %v13318_v4 = vsel %vm8395_vm14, %v12638_v48, %v12632_v28  ;;  %v12652_v36 = vadd.f32 %v12651_v61, %v12303_v37  ;;  %v12650_v33 = vadd.f32 %v12649_v0, %v22515_v18  ;;  %v12707_v48 = vrot.slane %v12706_v40, 2 }
 0x7d2   : > { %v11862_v41 = vpop.permute.xlu0 %11861  ;;  %v12718_v39 = vadd.f32 %v12717_v27, %v12314_v23  ;;  %v12663_v11 = vrot.slane %v12305_v59, 4  ;;  %v12662_v62 = vadd.f32 %v12661_v42, %v12660_v51  ;;  %v12643_v5 = vrot.slane %v12642_v60, 1 }
 0x7d3   : > { %v12307_v20 = vmul.f32 %v11862_v41, %v24512_v14  ;;  %12231 = vperm.xlu0 %14367, %v11613_v2   ;;  %v12653_v29 = vrot.slane %v12652_v36, 2  ;;  %v12674_v21 = vadd.f32 %v12673_v44, %v12672_v25  ;;  %v12686_v3 = vadd.f32 %v12685_v49, %v12684_v19  ;;  %v24517_v49 = vld [vmem:[#allocation82_spill] sm:$0xff] }
 0x7d4   : > { %v12697_v16 = vrot.slane %v22544_v7, 1  ;;  %v12664_v32 = vadd.f32 %v12663_v11, %v12305_v59  ;;  %v12729_v46 = vrot.slane %v12316_v58, 4  ;;  %v12644_v55 = vadd.f32 %v12643_v5, %v12642_v60  ;;  %v24518_v2 = vld [vmem:[#allocation126_spill] sm:$0xff]  ;;  %v24519_v11 = vld [vmem:[#allocation272_spill] sm:$0xff] }
 0x7d5   : > { %v12675_v12 = vrot.slane %v12307_v20, 4  ;;  %v12654_v50 = vadd.f32 %v12653_v29, %v12652_v36  ;;  %v12708_v0 = vadd.f32 %v12707_v48, %v12706_v40  ;;  %v12719_v23 = vrot.slane %v12718_v39, 2 }
 0x7d6   : > { %v11872_v52 = vpop.permute.xlu0 %11871  ;;  %v12665_v47 = vrot.slane %v12664_v32, 2  ;;  %v12318_v25 = vmul.f32 %v22410_v63, %v24515_v30  ;;  %v13319_v19 = vsel %vm8397_vm8, %v12644_v55, %v13318_v4  ;;  %v11350_v40 = vrot.slane %v22327_v53, %v24516_v22  ;;  %v22564_v63 = vpop.permute.xlu1 %12036 }
 0x7d7   : > { %v12676_v18 = vadd.f32 %v12675_v12, %v12307_v20  ;;  %v12309_v51 = vmul.f32 %v11872_v52, %v24513_v17  ;;  %12196 = vperm.xlu0 %14367, %v24514_v10   ;;  %v12655_v28 = vrot.slane %v12654_v50, 1  ;;  %v13320_v24 = vsel %vm8399_vm6, %v12650_v33, %v13319_v19 }
 0x7d8   : > { %v12666_v37 = vadd.f32 %v12665_v47, %v12664_v32  ;;  %v12730_v44 = vadd.f32 %v12729_v46, %v12316_v58  ;;  %v12709_v59 = vrot.slane %v12708_v0, 1  ;;  %v12720_v41 = vadd.f32 %v12719_v23, %v12718_v39  ;;  %v24520_v32 = vld [vmem:[#allocation85_spill] sm:$0xff]  ;;  %v24521_v46 = vld [vmem:[#allocation99_spill] sm:$0xff] }
 0x7d9   : > { %v12677_v38 = vrot.slane %v12676_v18, 2  ;;  %v12687_v42 = vrot.slane %v12309_v51, 4  ;;  %v12656_v56 = vadd.f32 %v12655_v28, %v12654_v50  ;;  %v12741_v26 = vrot.slane %v12318_v25, 4  ;;  %v24522_v50 = vld [vmem:[#allocation104_spill] sm:$0xff] }
 0x7da   : > { %v11882_v27 = vpop.permute.xlu0 %11881  ;;  %v12667_v4 = vrot.slane %v12666_v37, 1  ;;  %v11615_v5 = vmul.f32 %v24519_v11, %v11350_v40  ;;  %v12731_v29 = vrot.slane %v12730_v44, 2  ;;  %v12320_v55 = vmul.f32 %v22423_v1, %v24521_v46 }
 0x7db   : > { %v12678_v61 = vadd.f32 %v12677_v38, %v12676_v18  ;;  %v12311_v34 = vmul.f32 %v11882_v27, %v24517_v49  ;;  %v12688_v57 = vadd.f32 %v12687_v42, %v12309_v51  ;;  %12161 = vperm.xlu0 %14367, %v24518_v2   ;;  %v13321_v60 = vsel %vm8401_vm4, %v12656_v56, %v13320_v24  ;;  %v22579_v38 = vpop.permute.xlu1 %12046  ;;  %v24523_v27 = vld [vmem:[#allocation89_spill] sm:$0xff]  ;;  %v24525_v49 = vld [vmem:[#allocation56_spill] sm:$0xff]  ;;  %v24526_v2 = vld [vmem:[#allocation10_spill] sm:$0xff] }
 0x7dc   : > { %v13322_v20 = vsel %vm8403_vm11, %v12662_v62, %v13321_v60  ;;  %v12668_v58 = vadd.f32 %v12667_v4, %v12666_v37  ;;  %v12322_v18 = vmul.f32 %v22445_v6, %v24522_v50  ;;  %v12698_v30 = vadd.f32 %v12697_v16, %v22544_v7 }
 0x7dd   : > { %v12679_v36 = vrot.slane %v12678_v61, 1  ;;  %v12699_v14 = vrot.slane %v12311_v34, 4  ;;  %v12689_v33 = vrot.slane %v12688_v57, 2  ;;  %v12721_v19 = vrot.slane %v12720_v41, 1 }
 0x7de   : > { %v11892_v48 = vpop.permute.xlu0 %11891  ;;  %v13323_v23 = vsel %vm8405_vm2, %v12668_v58, %v13322_v20  ;;  %v12742_v28 = vadd.f32 %v12741_v26, %v12318_v25  ;;  %v12710_v6 = vadd.f32 %v12709_v59, %v12708_v0  ;;  %v12732_v40 = vadd.f32 %v12731_v29, %v12730_v44 }
 0x7df   : > { %v12680_v39 = vadd.f32 %v12679_v36, %v12678_v61  ;;  %v12700_v12 = vadd.f32 %v12699_v14, %v12311_v34  ;;  %v12313_v52 = vmul.f32 %v11892_v48, %v24520_v32  ;;  %v12690_v62 = vadd.f32 %v12689_v33, %v12688_v57  ;;  %12241 = vperm.xlu0 %14367, %v11615_v5   ;;  %v24524_v61 = vld [vmem:[#allocation141_spill] sm:$0xff] }
 0x7e0   : > { %v13324_v47 = vsel %vm8407_vm5, %v12674_v21, %v13323_v23  ;;  %v12753_v21 = vrot.slane %v12320_v55, 4  ;;  %v12765_v56 = vrot.slane %v12322_v18, 4  ;;  %v12324_v7 = vmul.f32 %v22452_v31, %v24525_v49  ;;  %v22590_v31 = vpop.permute.xlu1 %12056  ;;  %v24527_v48 = vld [vmem:[#allocation93_spill] sm:$0xff] }
 0x7e1   : > { %v13325_v17 = vsel %vm8395_vm14, %v12686_v3, %v12680_v39  ;;  %v12701_v51 = vrot.slane %v12700_v12, 2  ;;  %v12711_v10 = vrot.slane %v12313_v52, 4  ;;  %13416 = vst [vmem:[%s22391_s12 + $0x28] sm:$0xff] %v13324_v47  ;;  %v12691_v1 = vrot.slane %v12690_v62, 1 }
 0x7e2   : > { %v11902_v24 = vpop.permute.xlu0 %11901  ;;  %v12722_v4 = vadd.f32 %v12721_v19, %v12720_v41  ;;  %v12743_v57 = vrot.slane %v12742_v28, 2  ;;  %v11358_v26 = vrot.slane %v22327_v53, %v24526_v2  ;;  %v12733_v20 = vrot.slane %v12732_v40, 1  ;;  %v24528_v41 = vld [vmem:[#allocation134_spill] sm:$0xff] }
 0x7e3   : > { %v12702_v37 = vadd.f32 %v12701_v51, %v12700_v12  ;;  %v12712_v42 = vadd.f32 %v12711_v10, %v12313_v52  ;;  %v12315_v22 = vmul.f32 %v11902_v24, %v24523_v27  ;;  %v12692_v3 = vadd.f32 %v12691_v1, %v12690_v62  ;;  %12206 = vperm.xlu0 %14367, %v24524_v61   ;;  %v24529_v53 = vld [vmem:[#allocation58_spill] sm:$0xff]  ;;  %v24532_v27 = vld [vmem:[#allocation60_spill] sm:$0xff] }
 0x7e4   : > { %v12754_v58 = vadd.f32 %v12753_v21, %v12320_v55  ;;  %v12766_v33 = vadd.f32 %v12765_v56, %v12322_v18  ;;  %v12777_v5 = vrot.slane %v12324_v7, 4  ;;  %v12326_v32 = vmul.f32 %v22463_v54, %v24529_v53  ;;  %v24530_v55 = vld [vmem:[#allocation102_spill] sm:$0xff] }
 0x7e5   : > { %v12703_v16 = vrot.slane %v12702_v37, 1  ;;  %v12713_v25 = vrot.slane %v12712_v42, 2  ;;  %v12723_v34 = vrot.slane %v12315_v22, 4  ;;  %v13326_v0 = vsel %vm8397_vm8, %v12692_v3, %v13325_v17  ;;  %v24531_v17 = vld [vmem:[#allocation97_spill] sm:$0xff] }
 0x7e6   : > { %v11912_v59 = vpop.permute.xlu0 %11911  ;;  %v13327_v44 = vsel %vm8399_vm6, %v12698_v30, %v13326_v0  ;;  %v11617_v18 = vmul.f32 %v24530_v55, %v11358_v26  ;;  %v12744_v23 = vadd.f32 %v12743_v57, %v12742_v28  ;;  %v12734_v10 = vadd.f32 %v12733_v20, %v12732_v40  ;;  %v22603_v28 = vpop.permute.xlu1 %12066  ;;  %v24534_v0 = vld [vmem:[#allocation236_spill] sm:$0xff] }
 0x7e7   : > { %v12704_v60 = vadd.f32 %v12703_v16, %v12702_v37  ;;  %v12714_v36 = vadd.f32 %v12713_v25, %v12712_v42  ;;  %v12724_v14 = vadd.f32 %v12723_v34, %v12315_v22  ;;  %v12317_v11 = vmul.f32 %v11912_v59, %v24527_v48  ;;  %12171 = vperm.xlu0 %14367, %v24528_v41   ;;  %v24533_v16 = vld [vmem:[#allocation103_spill] sm:$0xff] }
 0x7e8   : > { %v12755_v30 = vrot.slane %v12754_v58, 2  ;;  %v12767_v19 = vrot.slane %v12766_v33, 2  ;;  %v12778_v24 = vadd.f32 %v12777_v5, %v12324_v7  ;;  %v12789_v42 = vrot.slane %v12326_v32, 4 }
 0x7e9   : > { %v13328_v29 = vsel %vm8401_vm4, %v12704_v60, %v13327_v44  ;;  %v12715_v39 = vrot.slane %v12714_v36, 1  ;;  %v12725_v12 = vrot.slane %v12724_v14, 2  ;;  %v12735_v46 = vrot.slane %v12317_v11, 4  ;;  %v24535_v60 = vld [vmem:[#allocation61_spill] sm:$0xff] }
 0x7ea   : > { %v13329_v52 = vsel %vm8403_vm11, %v12710_v6, %v13328_v29  ;;  %v11922_v50 = vpop.permute.xlu0 %11921  ;;  %v12328_v22 = vmul.f32 %v22477_v8, %v24532_v27  ;;  %v12745_v3 = vrot.slane %v12744_v23, 1  ;;  %v12756_v25 = vadd.f32 %v12755_v30, %v12754_v58  ;;  %v24536_v58 = vld [vmem:[#allocation26_spill] sm:$0xff]  ;;  %v22615_v53 = vpop.permute.xlu1 %12076 }
 0x7eb   : > { %v12716_v62 = vadd.f32 %v12715_v39, %v12714_v36  ;;  %v12726_v47 = vadd.f32 %v12725_v12, %v12724_v14  ;;  %v12319_v51 = vmul.f32 %v11922_v50, %v24531_v17  ;;  %v12736_v1 = vadd.f32 %v12735_v46, %v12317_v11  ;;  %12251 = vperm.xlu0 %14367, %v11617_v18   ;;  %v24537_v39 = vld [vmem:[#allocation63_spill] sm:$0xff] }
 0x7ec   : > { %v12768_v34 = vadd.f32 %v12767_v19, %v12766_v33  ;;  %v12779_v59 = vrot.slane %v12778_v24, 2  ;;  %v12790_v44 = vadd.f32 %v12789_v42, %v12326_v32  ;;  %v12330_v36 = vmul.f32 %v22485_v9, %v24535_v60 }
 0x7ed   : > { %v13330_v54 = vsel %vm8405_vm2, %v12716_v62, %v13329_v52  ;;  %v12727_v37 = vrot.slane %v12726_v47, 1  ;;  %v12747_v6 = vrot.slane %v12319_v51, 4  ;;  %v12737_v56 = vrot.slane %v12736_v1, 2 }
 0x7ee   : > { %v13331_v21 = vsel %vm8407_vm5, %v12722_v4, %v13330_v54  ;;  %v11932_v40 = vpop.permute.xlu0 %11931  ;;  %v12801_v4 = vrot.slane %v12328_v22, 4  ;;  %v12746_v48 = vadd.f32 %v12745_v3, %v12744_v23  ;;  %v12757_v5 = vrot.slane %v12756_v25, 1  ;;  %v24538_v54 = vld [vmem:[#allocation27_spill] sm:$0xff] }
 0x7ef   : > { %13417 = vst [vmem:[%s22391_s12 + $0x30] sm:$0xff] %v13331_v21  ;;  %v12728_v61 = vadd.f32 %v12727_v37, %v12726_v47  ;;  %v12748_v49 = vadd.f32 %v12747_v6, %v12319_v51  ;;  %v12321_v7 = vmul.f32 %v11932_v40, %v24533_v16  ;;  %v12738_v57 = vadd.f32 %v12737_v56, %v12736_v1  ;;  %v22621_v56 = vpop.permute.xlu1 %12086 }
 0x7f0   : > { %12216 = vperm.xlu0 %14367, %v24534_v0   ;;  %v12769_v29 = vrot.slane %v12768_v34, 1  ;;  %v12332_v12 = vmul.f32 %v22500_v43, %v24537_v39  ;;  %v12780_v32 = vadd.f32 %v12779_v59, %v12778_v24  ;;  %v12791_v9 = vrot.slane %v12790_v44, 2  ;;  %v24540_v0 = vld [vmem:[#allocation66_spill] sm:$0xff] }
 0x7f1   : > { %v13332_v8 = vsel %vm8395_vm14, %v12734_v10, %v12728_v61  ;;  %v12749_v2 = vrot.slane %v12748_v49, 2  ;;  %v12759_v26 = vrot.slane %v12321_v7, 4  ;;  %v12739_v14 = vrot.slane %v12738_v57, 1 }
 0x7f2   : > { %v11942_v20 = vpop.permute.xlu0 %11941  ;;  %v12802_v18 = vadd.f32 %v12801_v4, %v12328_v22  ;;  %v12813_v62 = vrot.slane %v12330_v36, 4  ;;  %v12758_v19 = vadd.f32 %v12757_v5, %v12756_v25  ;;  %v12770_v43 = vadd.f32 %v12769_v29, %v12768_v34  ;;  %v24539_v25 = vld [vmem:[#allocation30_spill] sm:$0xff] }
 0x7f3   : > { %v12750_v11 = vadd.f32 %v12749_v2, %v12748_v49  ;;  %v12760_v41 = vadd.f32 %v12759_v26, %v12321_v7  ;;  %v12323_v33 = vmul.f32 %v11942_v20, %v24536_v58  ;;  %v12740_v52 = vadd.f32 %v12739_v14, %v12738_v57 }
 0x7f4   : > { %v12825_v1 = vrot.slane %v12332_v12, 4  ;;  %v12781_v24 = vrot.slane %v12780_v32, 1  ;;  %v12792_v22 = vadd.f32 %v12791_v9, %v12790_v44  ;;  %v12803_v21 = vrot.slane %v12802_v18, 2 }
 0x7f5   : > { %v12751_v46 = vrot.slane %v12750_v11, 1  ;;  %v12761_v50 = vrot.slane %v12760_v41, 2  ;;  %v12771_v55 = vrot.slane %v12323_v33, 4  ;;  %v13333_v23 = vsel %vm8397_vm8, %v12740_v52, %v13332_v8  ;;  %v24541_v8 = vld [vmem:[#allocation69_spill] sm:$0xff]  ;;  %v22633_v52 = vpop.permute.xlu1 %12096 }
 0x7f6   : > { %v11952_v47 = vpop.permute.xlu0 %11951  ;;  %v13334_v17 = vsel %vm8399_vm6, %v12746_v48, %v13333_v23  ;;  %v12814_v49 = vadd.f32 %v12813_v62, %v12330_v36  ;;  %v12826_v57 = vadd.f32 %v12825_v1, %v12332_v12  ;;  %v12334_v59 = vmul.f32 %v22512_v35, %v24540_v0  ;;  %v24542_v35 = vld [vmem:[#allocation31_spill] sm:$0xff] }
 0x7f7   : > { %v12752_v51 = vadd.f32 %v12751_v46, %v12750_v11  ;;  %v12762_v10 = vadd.f32 %v12761_v50, %v12760_v41  ;;  %v12772_v30 = vadd.f32 %v12771_v55, %v12323_v33  ;;  %v12325_v37 = vmul.f32 %v11952_v47, %v24538_v54  ;;  %v24543_v46 = vld [vmem:[#allocation73_spill] sm:$0xff]  ;;  %v24544_v54 = vld [vmem:[#allocation34_spill] sm:$0xff] }
 0x7f8   : > { %v12336_v2 = vmul.f32 %v22524_v45, %v24541_v8  ;;  %v12782_v44 = vadd.f32 %v12781_v24, %v12780_v32  ;;  %v12793_v20 = vrot.slane %v12792_v22, 1  ;;  %v12804_v36 = vadd.f32 %v12803_v21, %v12802_v18  ;;  %v24545_v21 = vld [vmem:[#allocation77_spill] sm:$0xff]  ;;  %v24546_v8 = vld [vmem:[#allocation35_spill] sm:$0xff] }
 0x7f9   : > { %v13335_v6 = vsel %vm8401_vm4, %v12752_v51, %v13334_v17  ;;  %v12763_v42 = vrot.slane %v12762_v10, 1  ;;  %v12773_v27 = vrot.slane %v12772_v30, 2  ;;  %v12783_v3 = vrot.slane %v12325_v37, 4 }
 0x7fa   : > { %v13336_v40 = vsel %vm8403_vm11, %v12758_v19, %v13335_v6  ;;  %v11962_v61 = vpop.permute.xlu0 %11961  ;;  %v12815_v58 = vrot.slane %v12814_v49, 2  ;;  %v12827_v39 = vrot.slane %v12826_v57, 2  ;;  %v12837_v45 = vrot.slane %v12334_v59, 4 }
 0x7fb   : > { %v12764_v16 = vadd.f32 %v12763_v42, %v12762_v10  ;;  %v12774_v7 = vadd.f32 %v12773_v27, %v12772_v30  ;;  %v12327_v34 = vmul.f32 %v11962_v61, %v24539_v25  ;;  %v12784_v26 = vadd.f32 %v12783_v3, %v12325_v37  ;;  %v22641_v3 = vpop.permute.xlu1 %12106 }
 0x7fc   : > { %v12849_v12 = vrot.slane %v12336_v2, 4  ;;  %v12338_v50 = vmul.f32 %v22539_v13, %v24543_v46  ;;  %v12805_v62 = vrot.slane %v12804_v36, 1  ;;  %v12794_v47 = vadd.f32 %v12793_v20, %v12792_v22 }
 0x7fd   : > { %v13337_v4 = vsel %vm8405_vm2, %v12764_v16, %v13336_v40  ;;  %v12775_v60 = vrot.slane %v12774_v7, 1  ;;  %v12795_v14 = vrot.slane %v12327_v34, 4  ;;  %v12785_v11 = vrot.slane %v12784_v26, 2 }
 0x7fe   : > { %v13338_v48 = vsel %vm8407_vm5, %v12770_v43, %v13337_v4  ;;  %v11972_v41 = vpop.permute.xlu0 %11971  ;;  %v12816_v17 = vadd.f32 %v12815_v58, %v12814_v49  ;;  %v12828_v19 = vadd.f32 %v12827_v39, %v12826_v57  ;;  %v12838_v43 = vadd.f32 %v12837_v45, %v12334_v59  ;;  %v24548_v45 = vld [vmem:[#allocation67_spill] sm:$0xff] }
 0x7ff   : > { %13418 = vst [vmem:[%s22391_s12 + $0x38] sm:$0xff] %v13338_v48  ;;  %v12776_v33 = vadd.f32 %v12775_v60, %v12774_v7  ;;  %v12796_v5 = vadd.f32 %v12795_v14, %v12327_v34  ;;  %v12329_v29 = vmul.f32 %v11972_v41, %v24542_v35  ;;  %v12786_v32 = vadd.f32 %v12785_v11, %v12784_v26  ;;  %v24547_v14 = vld [vmem:[#allocation81_spill] sm:$0xff] }
 0x800   : > { %v12850_v24 = vadd.f32 %v12849_v12, %v12336_v2  ;;  %v12861_v6 = vrot.slane %v12338_v50, 4  ;;  %v12806_v27 = vadd.f32 %v12805_v62, %v12804_v36  ;;  %v12340_v40 = vmul.f32 %v22553_v15, %v24545_v21 }
 0x801   : > { %v13339_v55 = vsel %vm8395_vm14, %v12782_v44, %v12776_v33  ;;  %v12797_v9 = vrot.slane %v12796_v5, 2  ;;  %v12807_v18 = vrot.slane %v12329_v29, 4  ;;  %v12787_v23 = vrot.slane %v12786_v32, 1 }
 0x802   : > { %v11982_v30 = vpop.permute.xlu0 %11981  ;;  %v12817_v49 = vrot.slane %v12816_v17, 1  ;;  %v12829_v57 = vrot.slane %v12828_v19, 1  ;;  %v12839_v0 = vrot.slane %v12838_v43, 2  ;;  %v12851_v26 = vrot.slane %v12850_v24, 2 }
 0x803   : > { %v12798_v51 = vadd.f32 %v12797_v9, %v12796_v5  ;;  %v12808_v10 = vadd.f32 %v12807_v18, %v12329_v29  ;;  %v12788_v1 = vadd.f32 %v12787_v23, %v12786_v32  ;;  %v12331_v37 = vmul.f32 %v11982_v30, %v24544_v54  ;;  %v22650_v29 = vpop.permute.xlu1 %12116  ;;  %v24549_v23 = vld [vmem:[#allocation86_spill] sm:$0xff] }
 0x804   : > { %v12862_v44 = vadd.f32 %v12861_v6, %v12338_v50  ;;  %v12873_v60 = vrot.slane %v12340_v40, 4  ;;  %v12342_v20 = vmul.f32 %v22564_v63, %v24547_v14  ;;  %v12818_v11 = vadd.f32 %v12817_v49, %v12816_v17  ;;  %v24550_v17 = vld [vmem:[#allocation90_spill] sm:$0xff] }
 0x805   : > { %v12799_v42 = vrot.slane %v12798_v51, 1  ;;  %v12809_v13 = vrot.slane %v12808_v10, 2  ;;  %v13340_v22 = vsel %vm8397_vm8, %v12788_v1, %v13339_v55  ;;  %v12819_v61 = vrot.slane %v12331_v37, 4  ;;  %v24551_v1 = vld [vmem:[#allocation94_spill] sm:$0xff] }
 0x806   : > { %v13341_v16 = vsel %vm8399_vm6, %v12794_v47, %v13340_v22  ;;  %v11992_v34 = vpop.permute.xlu0 %11991  ;;  %v12830_v5 = vadd.f32 %v12829_v57, %v12828_v19  ;;  %v12840_v35 = vadd.f32 %v12839_v0, %v12838_v43  ;;  %v12852_v32 = vadd.f32 %v12851_v26, %v12850_v24  ;;  %v24552_v24 = vld [vmem:[#allocation71_spill] sm:$0xff] }
 0x807   : > { %v12800_v7 = vadd.f32 %v12799_v42, %v12798_v51  ;;  %v12810_v25 = vadd.f32 %v12809_v13, %v12808_v10  ;;  %v12820_v59 = vadd.f32 %v12819_v61, %v12331_v37  ;;  %v12333_v2 = vmul.f32 %v11992_v34, %v24546_v8  ;;  %v22663_v22 = vpop.permute.xlu1 %12126 }
 0x808   : > { %v12863_v46 = vrot.slane %v12862_v44, 2  ;;  %v12874_v55 = vadd.f32 %v12873_v60, %v12340_v40  ;;  %v12885_v9 = vrot.slane %v12342_v20, 4  ;;  %v12344_v47 = vmul.f32 %v22579_v38, %v24549_v23 }
 0x809   : > { %v13342_v15 = vsel %vm8401_vm4, %v12800_v7, %v13341_v16  ;;  %v12811_v4 = vrot.slane %v12810_v25, 1  ;;  %v12821_v48 = vrot.slane %v12820_v59, 2  ;;  %v12831_v58 = vrot.slane %v12333_v2, 4 }
 0x80a   : > { %v13343_v36 = vsel %vm8403_vm11, %v12806_v27, %v13342_v15  ;;  %v12002_v33 = vpop.permute.xlu0 %12001  ;;  %v12346_v51 = vmul.f32 %v22590_v31, %v24550_v17  ;;  %v12841_v43 = vrot.slane %v12840_v35, 1  ;;  %v12348_v54 = vmul.f32 %v22603_v28, %v24551_v1 }
 0x80b   : > { %v12812_v41 = vadd.f32 %v12811_v4, %v12810_v25  ;;  %v12822_v39 = vadd.f32 %v12821_v48, %v12820_v59  ;;  %v12335_v12 = vmul.f32 %v12002_v33, %v24548_v45  ;;  %v12832_v63 = vadd.f32 %v12831_v58, %v12333_v2  ;;  %v24553_v59 = vld [vmem:[#allocation76_spill] sm:$0xff] }
 0x80c   : > { %v12853_v42 = vrot.slane %v12852_v32, 1  ;;  %v12864_v13 = vadd.f32 %v12863_v46, %v12862_v44  ;;  %v12875_v40 = vrot.slane %v12874_v55, 2  ;;  %v12886_v38 = vadd.f32 %v12885_v9, %v12342_v20 }
 0x80d   : > { %v13344_v50 = vsel %vm8405_vm2, %v12812_v41, %v13343_v36  ;;  %v12823_v62 = vrot.slane %v12822_v39, 1  ;;  %v12833_v10 = vrot.slane %v12832_v63, 2  ;;  %v12843_v30 = vrot.slane %v12335_v12, 4 }
 0x80e   : > { %v13345_v18 = vsel %vm8407_vm5, %v12818_v11, %v13344_v50  ;;  %v12012_v19 = vpop.permute.xlu0 %12011  ;;  %v12897_v49 = vrot.slane %v12344_v47, 4  ;;  %v12909_v16 = vrot.slane %v12346_v51, 4  ;;  %v12842_v28 = vadd.f32 %v12841_v43, %v12840_v35 }
 0x80f   : > { %13419 = vst [vmem:[%s22391_s12 + $0x40] sm:$0xff] %v13345_v18  ;;  %v12824_v37 = vadd.f32 %v12823_v62, %v12822_v39  ;;  %v12337_v6 = vmul.f32 %v12012_v19, %v24552_v24  ;;  %v12834_v27 = vadd.f32 %v12833_v10, %v12832_v63  ;;  %v12844_v21 = vadd.f32 %v12843_v30, %v12335_v12  ;;  %v24555_v63 = vld [vmem:[#allocation80_spill] sm:$0xff] }
 0x810   : > { %v12921_v57 = vrot.slane %v12348_v54, 4  ;;  %v12854_v2 = vadd.f32 %v12853_v42, %v12852_v32  ;;  %v12865_v26 = vrot.slane %v12864_v13, 1  ;;  %v12876_v4 = vadd.f32 %v12875_v40, %v12874_v55  ;;  %v24554_v32 = vld [vmem:[#allocation98_spill] sm:$0xff]  ;;  %v24557_v42 = vld [vmem:[#allocation83_spill] sm:$0xff] }
 0x811   : > { %v13346_v31 = vsel %vm8395_vm14, %v12830_v5, %v12824_v37  ;;  %v12855_v61 = vrot.slane %v12337_v6, 4  ;;  %v12835_v7 = vrot.slane %v12834_v27, 1  ;;  %v12845_v25 = vrot.slane %v12844_v21, 2  ;;  %v22668_v5 = vpop.permute.xlu1 %12136 }
 0x812   : > { %v12022_v34 = vpop.permute.xlu0 %12021  ;;  %v12887_v60 = vrot.slane %v12886_v38, 2  ;;  %v12898_v36 = vadd.f32 %v12897_v49, %v12344_v47  ;;  %v12910_v48 = vadd.f32 %v12909_v16, %v12346_v51  ;;  %v12922_v33 = vadd.f32 %v12921_v57, %v12348_v54 }
 0x813   : > { %v12856_v0 = vadd.f32 %v12855_v61, %v12337_v6  ;;  %v12339_v8 = vmul.f32 %v12022_v34, %v24553_v59  ;;  %v12836_v44 = vadd.f32 %v12835_v7, %v12834_v27  ;;  %v12846_v15 = vadd.f32 %v12845_v25, %v12844_v21  ;;  %v24558_v21 = vld [vmem:[#allocation106_spill] sm:$0xff] }
 0x814   : > { %v12866_v12 = vadd.f32 %v12865_v26, %v12864_v13  ;;  %v12350_v46 = vmul.f32 %v22615_v53, %v24554_v32  ;;  %v12877_v9 = vrot.slane %v12876_v4, 1  ;;  %v12888_v18 = vadd.f32 %v12887_v60, %v12886_v38  ;;  %v24556_v53 = vld [vmem:[#allocation101_spill] sm:$0xff] }
 0x815   : > { %v12857_v14 = vrot.slane %v12856_v0, 2  ;;  %v12867_v20 = vrot.slane %v12339_v8, 4  ;;  %v13347_v11 = vsel %vm8397_vm8, %v12836_v44, %v13346_v31  ;;  %v12847_v41 = vrot.slane %v12846_v15, 1  ;;  %v22681_v38 = vpop.permute.xlu1 %12146 }
 0x816   : > { %v12032_v58 = vpop.permute.xlu0 %12031  ;;  %v13348_v35 = vsel %vm8399_vm6, %v12842_v28, %v13347_v11  ;;  %v12899_v47 = vrot.slane %v12898_v36, 2  ;;  %v12911_v17 = vrot.slane %v12910_v48, 2  ;;  %v12923_v19 = vrot.slane %v12922_v33, 2 }
 0x817   : > { %v12858_v39 = vadd.f32 %v12857_v14, %v12856_v0  ;;  %v12868_v45 = vadd.f32 %v12867_v20, %v12339_v8  ;;  %v12848_v50 = vadd.f32 %v12847_v41, %v12846_v15  ;;  %v12341_v55 = vmul.f32 %v12032_v58, %v24555_v63  ;;  %v24560_v15 = vld [vmem:[#allocation108_spill] sm:$0xff] }
 0x818   : > { %v12933_v37 = vrot.slane %v12350_v46, 4  ;;  %v12352_v24 = vmul.f32 %v22621_v56, %v24556_v53  ;;  %v12878_v27 = vadd.f32 %v12877_v9, %v12876_v4  ;;  %v12354_v40 = vmul.f32 %v22633_v52, %v24558_v21  ;;  %v24559_v52 = vld [vmem:[#allocation87_spill] sm:$0xff] }
 0x819   : > { %v12859_v62 = vrot.slane %v12858_v39, 1  ;;  %v12869_v23 = vrot.slane %v12868_v45, 2  ;;  %v13349_v51 = vsel %vm8401_vm4, %v12848_v50, %v13348_v35  ;;  %v12879_v10 = vrot.slane %v12341_v55, 4  ;;  %v22690_v35 = vpop.permute.xlu1 %12181 }
 0x81a   : > { %v12042_v30 = vpop.permute.xlu0 %12041  ;;  %v13350_v43 = vsel %vm8403_vm11, %v12854_v2, %v13349_v51  ;;  %v12900_v49 = vadd.f32 %v12899_v47, %v12898_v36  ;;  %v12912_v16 = vadd.f32 %v12911_v17, %v12910_v48  ;;  %v12889_v28 = vrot.slane %v12888_v18, 1 }
 0x81b   : > { %v12860_v1 = vadd.f32 %v12859_v62, %v12858_v39  ;;  %v12870_v54 = vadd.f32 %v12869_v23, %v12868_v45  ;;  %v12880_v6 = vadd.f32 %v12879_v10, %v12341_v55  ;;  %v12343_v13 = vmul.f32 %v12042_v30, %v24557_v42  ;;  %v24561_v45 = vld [vmem:[#allocation91_spill] sm:$0xff]  ;;  %v24562_v30 = vld [vmem:[#allocation112_spill] sm:$0xff] }
 0x81c   : > { %v12924_v56 = vadd.f32 %v12923_v19, %v12922_v33  ;;  %v12934_v59 = vadd.f32 %v12933_v37, %v12350_v46  ;;  %v12945_v8 = vrot.slane %v12352_v24, 4  ;;  %v12957_v44 = vrot.slane %v12354_v40, 4 }
 0x81d   : > { %v13351_v31 = vsel %vm8405_vm2, %v12860_v1, %v13350_v43  ;;  %v12871_v61 = vrot.slane %v12870_v54, 1  ;;  %v12881_v25 = vrot.slane %v12880_v6, 2  ;;  %v12891_v0 = vrot.slane %v12343_v13, 4  ;;  %v22696_v43 = vpop.permute.xlu1 %12221 }
 0x81e   : > { %v13352_v7 = vsel %vm8407_vm5, %v12866_v12, %v13351_v31  ;;  %v12052_v34 = vpop.permute.xlu0 %12051  ;;  %v12356_v4 = vmul.f32 %v22641_v3, %v24560_v15  ;;  %v12901_v20 = vrot.slane %v12900_v49, 1  ;;  %v12913_v36 = vrot.slane %v12912_v16, 1  ;;  %v24564_v31 = vld [vmem:[#allocation117_spill] sm:$0xff] }
 0x81f   : > { %13420 = vst [vmem:[%s22391_s12 + $0x48] sm:$0xff] %v13352_v7  ;;  %v12872_v57 = vadd.f32 %v12871_v61, %v12870_v54  ;;  %v12882_v2 = vadd.f32 %v12881_v25, %v12880_v6  ;;  %v12345_v26 = vmul.f32 %v12052_v34, %v24559_v52  ;;  %v12892_v14 = vadd.f32 %v12891_v0, %v12343_v13  ;;  %v24563_v6 = vld [vmem:[#allocation95_spill] sm:$0xff] }
 0x820   : > { %v12890_v58 = vadd.f32 %v12889_v28, %v12888_v18  ;;  %v12925_v33 = vrot.slane %v12924_v56, 1  ;;  %v12935_v32 = vrot.slane %v12934_v59, 2  ;;  %v12946_v46 = vadd.f32 %v12945_v8, %v12352_v24  ;;  %v24565_v34 = vld [vmem:[#allocation123_spill] sm:$0xff] }
 0x821   : > { %v13353_v60 = vsel %vm8395_vm14, %v12878_v27, %v12872_v57  ;;  %v12883_v48 = vrot.slane %v12882_v2, 1  ;;  %v12903_v11 = vrot.slane %v12345_v26, 4  ;;  %v12893_v39 = vrot.slane %v12892_v14, 2  ;;  %v24566_v57 = vld [vmem:[#allocation100_spill] sm:$0xff]  ;;  %v22707_v15 = vpop.permute.xlu1 %12191 }
 0x822   : > { %v12062_v41 = vpop.permute.xlu0 %12061  ;;  %v12958_v3 = vadd.f32 %v12957_v44, %v12354_v40  ;;  %v12969_v55 = vrot.slane %v12356_v4, 4  ;;  %v12902_v23 = vadd.f32 %v12901_v20, %v12900_v49  ;;  %v12914_v47 = vadd.f32 %v12913_v36, %v12912_v16 }
 0x823   : > { %v12347_v12 = vmul.f32 %v12062_v41, %v24561_v45  ;;  %v12884_v50 = vadd.f32 %v12883_v48, %v12882_v2  ;;  %v12904_v63 = vadd.f32 %v12903_v11, %v12345_v26  ;;  %v12894_v9 = vadd.f32 %v12893_v39, %v12892_v14 }
 0x824   : > { %v12926_v10 = vadd.f32 %v12925_v33, %v12924_v56  ;;  %v12358_v19 = vmul.f32 %v22650_v29, %v24562_v30  ;;  %v12936_v37 = vadd.f32 %v12935_v32, %v12934_v59  ;;  %v12947_v13 = vrot.slane %v12946_v46, 2 }
 0x825   : > { %v12915_v62 = vrot.slane %v12347_v12, 4  ;;  %v13354_v17 = vsel %vm8397_vm8, %v12884_v50, %v13353_v60  ;;  %v12905_v51 = vrot.slane %v12904_v63, 2  ;;  %v12895_v54 = vrot.slane %v12894_v9, 1 }
 0x826   : > { %v12072_v18 = vpop.permute.xlu0 %12071  ;;  %v13355_v1 = vsel %vm8399_vm6, %v12890_v58, %v13354_v17  ;;  %v12959_v27 = vrot.slane %v12958_v3, 2  ;;  %v12970_v21 = vadd.f32 %v12969_v55, %v12356_v4  ;;  %v12360_v61 = vmul.f32 %v22663_v22, %v24564_v31  ;;  %v24567_v58 = vld [vmem:[#allocation105_spill] sm:$0xff] }
 0x827   : > { %v12906_v53 = vadd.f32 %v12905_v51, %v12904_v63  ;;  %v12916_v24 = vadd.f32 %v12915_v62, %v12347_v12  ;;  %v12349_v42 = vmul.f32 %v12072_v18, %v24563_v6  ;;  %v12896_v40 = vadd.f32 %v12895_v54, %v12894_v9  ;;  %v24568_v62 = vld [vmem:[#allocation129_spill] sm:$0xff]  ;;  %v12157_v18 = vpop.permute.xlu1 %12156 }
 0x828   : > { %v12981_v25 = vrot.slane %v12358_v19, 4  ;;  %v12362_v28 = vmul.f32 %v22668_v5, %v24565_v34  ;;  %v12937_v26 = vrot.slane %v12936_v37, 1  ;;  %v12948_v22 = vadd.f32 %v12947_v13, %v12946_v46 }
 0x829   : > { %v12907_v49 = vrot.slane %v12906_v53, 1  ;;  %v12917_v16 = vrot.slane %v12916_v24, 2  ;;  %v12927_v29 = vrot.slane %v12349_v42, 4  ;;  %v13356_v56 = vsel %vm8401_vm4, %v12896_v40, %v13355_v1  ;;  %v24569_v1 = vld [vmem:[#allocation107_spill] sm:$0xff] }
 0x82a   : > { %v12082_v7 = vpop.permute.xlu0 %12081  ;;  %v13357_v59 = vsel %vm8403_vm11, %v12902_v23, %v13356_v56  ;;  %v12971_v44 = vrot.slane %v12970_v21, 2  ;;  %v12993_v60 = vrot.slane %v12360_v61, 4  ;;  %v12960_v48 = vadd.f32 %v12959_v27, %v12958_v3 }
 0x82b   : > { %v12351_v0 = vmul.f32 %v12082_v7, %v24566_v57  ;;  %v12908_v8 = vadd.f32 %v12907_v49, %v12906_v53  ;;  %v12918_v2 = vadd.f32 %v12917_v16, %v12916_v24  ;;  %v12928_v52 = vadd.f32 %v12927_v29, %v12349_v42 }
 0x82c   : > { %v12982_v39 = vadd.f32 %v12981_v25, %v12358_v19  ;;  %v13005_v45 = vrot.slane %v12362_v28, 4  ;;  %v12949_v46 = vrot.slane %v12948_v22, 1  ;;  %v12972_v50 = vadd.f32 %v12971_v44, %v12970_v21 }
 0x82d   : > { %v12939_v4 = vrot.slane %v12351_v0, 4  ;;  %v13358_v14 = vsel %vm8405_vm2, %v12908_v8, %v13357_v59  ;;  %v12919_v5 = vrot.slane %v12918_v2, 1  ;;  %v12929_v20 = vrot.slane %v12928_v52, 2  ;;  %v12237_v59 = vpop.permute.xlu1 %12236 }
 0x82e   : > { %v12092_v36 = vpop.permute.xlu0 %12091  ;;  %v13359_v11 = vsel %vm8407_vm5, %v12914_v47, %v13358_v14  ;;  %v12994_v9 = vadd.f32 %v12993_v60, %v12360_v61  ;;  %v12364_v23 = vmul.f32 %v22681_v38, %v24568_v62  ;;  %v12938_v51 = vadd.f32 %v12937_v26, %v12936_v37 }
 0x82f   : > { %v12940_v41 = vadd.f32 %v12939_v4, %v12351_v0  ;;  %v12353_v33 = vmul.f32 %v12092_v36, %v24567_v58  ;;  %13421 = vst [vmem:[%s22391_s12 + $0x50] sm:$0xff] %v13359_v11  ;;  %v12920_v12 = vadd.f32 %v12919_v5, %v12918_v2  ;;  %v12930_v32 = vadd.f32 %v12929_v20, %v12928_v52 }
 0x830   : > { %v12961_v53 = vrot.slane %v12960_v48, 1  ;;  %v12983_v24 = vrot.slane %v12982_v39, 2  ;;  %v13006_v6 = vadd.f32 %v13005_v45, %v12362_v28  ;;  %v12973_v13 = vrot.slane %v12972_v50, 1  ;;  %v24570_v28 = vld [vmem:[#allocation110_spill] sm:$0xff] }
 0x831   : > { %v12941_v63 = vrot.slane %v12940_v41, 2  ;;  %v12951_v55 = vrot.slane %v12353_v33, 4  ;;  %v13360_v3 = vsel %vm8395_vm14, %v12926_v10, %v12920_v12  ;;  %v12931_v17 = vrot.slane %v12930_v32, 1  ;;  %v24574_v12 = vld [vmem:[#allocation132_spill] sm:$0xff] }
 0x832   : > { %v12102_v47 = vpop.permute.xlu0 %12101  ;;  %v12950_v31 = vadd.f32 %v12949_v46, %v12948_v22  ;;  %v12995_v38 = vrot.slane %v12994_v9, 2  ;;  %v13017_v61 = vrot.slane %v12364_v23, 4  ;;  %v12962_v25 = vadd.f32 %v12961_v53, %v12960_v48  ;;  %v24571_v22 = vld [vmem:[#allocation142_spill] sm:$0xff]  ;;  %v24572_v48 = vld [vmem:[#allocation115_spill] sm:$0xff] }
 0x833   : > { %v12942_v30 = vadd.f32 %v12941_v63, %v12940_v41  ;;  %v12952_v19 = vadd.f32 %v12951_v55, %v12353_v33  ;;  %v12355_v54 = vmul.f32 %v12102_v47, %v24569_v1  ;;  %v12932_v42 = vadd.f32 %v12931_v17, %v12930_v32  ;;  %v24573_v33 = vld [vmem:[#allocation152_spill] sm:$0xff]  ;;  %v12202_v17 = vpop.permute.xlu1 %12201 }
 0x834   : > { %v12984_v34 = vadd.f32 %v12983_v24, %v12982_v39  ;;  %v13007_v56 = vrot.slane %v13006_v6, 2  ;;  %v12974_v0 = vadd.f32 %v12973_v13, %v12972_v50  ;;  %v13018_v26 = vadd.f32 %v13017_v61, %v12364_v23 }
 0x835   : > { %v12943_v27 = vrot.slane %v12942_v30, 1  ;;  %v12953_v21 = vrot.slane %v12952_v19, 2  ;;  %v12963_v40 = vrot.slane %v12355_v54, 4  ;;  %v13361_v10 = vsel %vm8397_vm8, %v12932_v42, %v13360_v3 }
 0x836   : > { %v12112_v49 = vpop.permute.xlu0 %12111  ;;  %v13362_v37 = vsel %vm8399_vm6, %v12938_v51, %v13361_v10  ;;  %v12371_v44 = vmul.f32 %v22690_v35, %v24571_v22  ;;  %v12996_v5 = vadd.f32 %v12995_v38, %v12994_v9  ;;  %v12985_v41 = vrot.slane %v12984_v34, 1 }
 0x837   : > { %v12944_v16 = vadd.f32 %v12943_v27, %v12942_v30  ;;  %v12954_v29 = vadd.f32 %v12953_v21, %v12952_v19  ;;  %v12964_v7 = vadd.f32 %v12963_v40, %v12355_v54  ;;  %v12357_v57 = vmul.f32 %v12112_v49, %v24570_v28  ;;  %v24575_v30 = vld [vmem:[#allocation121_spill] sm:$0xff]  ;;  %v12167_v28 = vpop.permute.xlu1 %12166 }
 0x838   : > { %v13008_v58 = vadd.f32 %v13007_v56, %v13006_v6  ;;  %v12379_v39 = vmul.f32 %v22696_v43, %v24573_v33  ;;  %v12366_v32 = vmul.f32 %v12157_v18, %v24574_v12  ;;  %v13019_v63 = vrot.slane %v13018_v26, 2  ;;  %v24576_v18 = vld [vmem:[#allocation145_spill] sm:$0xff]  ;;  %v24580_v12 = vld [vmem:[#allocation148_spill] sm:$0xff] }
 0x839   : > { %v13363_v8 = vsel %vm8401_vm4, %v12944_v16, %v13362_v37  ;;  %v12955_v2 = vrot.slane %v12954_v29, 1  ;;  %v12965_v52 = vrot.slane %v12964_v7, 2  ;;  %v12975_v60 = vrot.slane %v12357_v57, 4  ;;  %v24577_v37 = vld [vmem:[#allocation127_spill] sm:$0xff] }
 0x83a   : > { %v13364_v4 = vsel %vm8403_vm11, %v12950_v31, %v13363_v8  ;;  %v12122_v14 = vpop.permute.xlu0 %12121  ;;  %v13059_v55 = vrot.slane %v12371_v44, 4  ;;  %v12997_v3 = vrot.slane %v12996_v5, 1  ;;  %v12986_v19 = vadd.f32 %v12985_v41, %v12984_v34 }
 0x83b   : > { %v12956_v20 = vadd.f32 %v12955_v2, %v12954_v29  ;;  %v12966_v36 = vadd.f32 %v12965_v52, %v12964_v7  ;;  %v12359_v11 = vmul.f32 %v12122_v14, %v24572_v48  ;;  %v12976_v45 = vadd.f32 %v12975_v60, %v12357_v57  ;;  %v24579_v48 = vld [vmem:[#allocation130_spill] sm:$0xff] }
 0x83c   : > { %v13107_v1 = vrot.slane %v12379_v39, 4  ;;  %v12373_v54 = vmul.f32 %v22707_v15, %v24576_v18  ;;  %v13029_v24 = vrot.slane %v12366_v32, 4  ;;  %v13009_v27 = vrot.slane %v13008_v58, 1 }
 0x83d   : > { %v13365_v35 = vsel %vm8405_vm2, %v12956_v20, %v13364_v4  ;;  %v12967_v46 = vrot.slane %v12966_v36, 1  ;;  %v12987_v50 = vrot.slane %v12359_v11, 4  ;;  %v12977_v62 = vrot.slane %v12976_v45, 2 }
 0x83e   : > { %v13366_v9 = vsel %vm8407_vm5, %v12962_v25, %v13365_v35  ;;  %v12132_v23 = vpop.permute.xlu0 %12131  ;;  %v13020_v21 = vadd.f32 %v13019_v63, %v13018_v26  ;;  %v13060_v40 = vadd.f32 %v13059_v55, %v12371_v44  ;;  %v12998_v61 = vadd.f32 %v12997_v3, %v12996_v5  ;;  %v24578_v25 = vld [vmem:[#allocation155_spill] sm:$0xff]  ;;  %v12247_v55 = vpop.permute.xlu1 %12246 }
 0x83f   : > { %13422 = vst [vmem:[%s22391_s12 + $0x58] sm:$0xff] %v13366_v9  ;;  %v12968_v47 = vadd.f32 %v12967_v46, %v12966_v36  ;;  %v12988_v51 = vadd.f32 %v12987_v50, %v12359_v11  ;;  %v12361_v43 = vmul.f32 %v12132_v23, %v24575_v30  ;;  %v12978_v53 = vadd.f32 %v12977_v62, %v12976_v45  ;;  %v24581_v23 = vld [vmem:[#allocation144_spill] sm:$0xff] }
 0x840   : > { %v13108_v29 = vadd.f32 %v13107_v1, %v12379_v39  ;;  %v13071_v7 = vrot.slane %v12373_v54, 4  ;;  %v12382_v15 = vmul.f32 %v12237_v59, %v24578_v25  ;;  %v13030_v56 = vadd.f32 %v13029_v24, %v12366_v32 }
 0x841   : > { %v13367_v6 = vsel %vm8395_vm14, %v12974_v0, %v12968_v47  ;;  %v12989_v42 = vrot.slane %v12988_v51, 2  ;;  %v12999_v13 = vrot.slane %v12361_v43, 4  ;;  %v12979_v31 = vrot.slane %v12978_v53, 1 }
 0x842   : > { %v12142_v38 = vpop.permute.xlu0 %12141  ;;  %v13010_v2 = vadd.f32 %v13009_v27, %v13008_v58  ;;  %v13021_v52 = vrot.slane %v13020_v21, 1  ;;  %v13061_v26 = vrot.slane %v13060_v40, 2  ;;  %v13109_v20 = vrot.slane %v13108_v29, 2 }
 0x843   : > { %v12990_v10 = vadd.f32 %v12989_v42, %v12988_v51  ;;  %v13000_v49 = vadd.f32 %v12999_v13, %v12361_v43  ;;  %v12363_v16 = vmul.f32 %v12142_v38, %v24577_v37  ;;  %v12980_v34 = vadd.f32 %v12979_v31, %v12978_v53  ;;  %v24582_v53 = vld [vmem:[#allocation137_spill] sm:$0xff] }
 0x844   : > { %v13072_v36 = vadd.f32 %v13071_v7, %v12373_v54  ;;  %v13125_v59 = vrot.slane %v12382_v15, 4  ;;  %v13031_v41 = vrot.slane %v13030_v56, 2  ;;  %v13062_v45 = vadd.f32 %v13061_v26, %v13060_v40  ;;  %v24583_v31 = vld [vmem:[#allocation153_spill] sm:$0xff] }
 0x845   : > { %v12991_v57 = vrot.slane %v12990_v10, 1  ;;  %v13001_v0 = vrot.slane %v13000_v49, 2  ;;  %v13011_v8 = vrot.slane %v12363_v16, 4  ;;  %v13368_v22 = vsel %vm8397_vm8, %v12980_v34, %v13367_v6 }
 0x846   : > { %v12152_v44 = vpop.permute.xlu0 %12151  ;;  %v13369_v4 = vsel %vm8399_vm6, %v12986_v19, %v13368_v22  ;;  %v12375_v32 = vmul.f32 %v12202_v17, %v24580_v12  ;;  %v13022_v63 = vadd.f32 %v13021_v52, %v13020_v21  ;;  %v13110_v47 = vadd.f32 %v13109_v20, %v13108_v29  ;;  %v24584_v52 = vld [vmem:[#allocation154_spill] sm:$0xff] }
 0x847   : > { %v12992_v60 = vadd.f32 %v12991_v57, %v12990_v10  ;;  %v13002_v14 = vadd.f32 %v13001_v0, %v13000_v49  ;;  %v13012_v5 = vadd.f32 %v13011_v8, %v12363_v16  ;;  %v12365_v11 = vmul.f32 %v12152_v44, %v24579_v48  ;;  %v12212_v16 = vpop.permute.xlu1 %12211 }
 0x848   : > { %v13073_v51 = vrot.slane %v13072_v36, 2  ;;  %v13126_v30 = vadd.f32 %v13125_v59, %v12382_v15  ;;  %v13032_v19 = vadd.f32 %v13031_v41, %v13030_v56  ;;  %v13083_v54 = vrot.slane %v12375_v32, 4 }
 0x849   : > { %v13370_v33 = vsel %vm8401_vm4, %v12992_v60, %v13369_v4  ;;  %v13003_v39 = vrot.slane %v13002_v14, 1  ;;  %v13013_v58 = vrot.slane %v13012_v5, 2  ;;  %v13023_v46 = vrot.slane %v12365_v11, 4  ;;  %v24585_v4 = vld [vmem:[#allocation159_spill] sm:$0xff] }
 0x84a   : > { %v13371_v35 = vsel %vm8403_vm11, %v12998_v61, %v13370_v33  ;;  %v12187_v50 = vpop.permute.xlu0 %12186  ;;  %v12368_v24 = vmul.f32 %v12167_v28, %v24582_v53  ;;  %v13063_v27 = vrot.slane %v13062_v45, 1  ;;  %v13111_v61 = vrot.slane %v13110_v47, 1 }
 0x84b   : > { %v13004_v9 = vadd.f32 %v13003_v39, %v13002_v14  ;;  %v13014_v62 = vadd.f32 %v13013_v58, %v13012_v5  ;;  %v12372_v3 = vmul.f32 %v12187_v50, %v24581_v23  ;;  %v13024_v43 = vadd.f32 %v13023_v46, %v12365_v11  ;;  %v12177_v58 = vpop.permute.xlu1 %12176 }
 0x84c   : > { %v13074_v10 = vadd.f32 %v13073_v51, %v13072_v36  ;;  %v13127_v37 = vrot.slane %v13126_v30, 2  ;;  %v13033_v15 = vrot.slane %v13032_v19, 1  ;;  %v13084_v34 = vadd.f32 %v13083_v54, %v12375_v32 }
 0x84d   : > { %v13372_v1 = vsel %vm8405_vm2, %v13004_v9, %v13371_v35  ;;  %v13015_v18 = vrot.slane %v13014_v62, 1  ;;  %v13065_v17 = vrot.slane %v12372_v3, 4  ;;  %v13025_v42 = vrot.slane %v13024_v43, 2  ;;  %v24586_v35 = vld [vmem:[#allocation146_spill] sm:$0xff] }
 0x84e   : > { %v13373_v6 = vsel %vm8407_vm5, %v13010_v2, %v13372_v1  ;;  %v12227_v13 = vpop.permute.xlu0 %12226  ;;  %v13041_v56 = vrot.slane %v12368_v24, 4  ;;  %v13064_v0 = vadd.f32 %v13063_v27, %v13062_v45  ;;  %v13112_v22 = vadd.f32 %v13111_v61, %v13110_v47  ;;  %v24589_v27 = vld [vmem:[#allocation139_spill] sm:$0xff] }
 0x84f   : > { %13423 = vst [vmem:[%s22391_s12 + $0x60] sm:$0xff] %v13373_v6  ;;  %v13016_v21 = vadd.f32 %v13015_v18, %v13014_v62  ;;  %v13066_v40 = vadd.f32 %v13065_v17, %v12372_v3  ;;  %v12380_v38 = vmul.f32 %v12227_v13, %v24583_v31  ;;  %v13026_v49 = vadd.f32 %v13025_v42, %v13024_v43 }
 0x850   : > { %v13075_v44 = vrot.slane %v13074_v10, 1  ;;  %v12384_v60 = vmul.f32 %v12247_v55, %v24585_v4  ;;  %v13128_v5 = vadd.f32 %v13127_v37, %v13126_v30  ;;  %v13034_v48 = vadd.f32 %v13033_v15, %v13032_v19  ;;  %v24587_v55 = vld [vmem:[#allocation150_spill] sm:$0xff] }
 0x851   : > { %v13374_v29 = vsel %vm8395_vm14, %v13022_v63, %v13016_v21  ;;  %v13067_v7 = vrot.slane %v13066_v40, 2  ;;  %v13113_v25 = vrot.slane %v12380_v38, 4  ;;  %v13027_v28 = vrot.slane %v13026_v49, 1 }
 0x852   : > { %v12232_v57 = vpop.permute.xlu0 %12231  ;;  %v13085_v11 = vrot.slane %v13084_v34, 2  ;;  %v13042_v41 = vadd.f32 %v13041_v56, %v12368_v24  ;;  %v13076_v50 = vadd.f32 %v13075_v44, %v13074_v10  ;;  %v13137_v63 = vrot.slane %v12384_v60, 4  ;;  %v24588_v24 = vld [vmem:[#allocation136_spill] sm:$0xff] }
 0x853   : > { %v13068_v8 = vadd.f32 %v13067_v7, %v13066_v40  ;;  %v13114_v2 = vadd.f32 %v13113_v25, %v12380_v38  ;;  %v12381_v26 = vmul.f32 %v12232_v57, %v24584_v52  ;;  %v13028_v14 = vadd.f32 %v13027_v28, %v13026_v49  ;;  %v12257_v40 = vpop.permute.xlu1 %12256 }
 0x854   : > { %v12377_v9 = vmul.f32 %v12212_v16, %v24587_v55  ;;  %v13129_v30 = vrot.slane %v13128_v5, 1  ;;  %v13086_v43 = vadd.f32 %v13085_v11, %v13084_v34  ;;  %v13043_v19 = vrot.slane %v13042_v41, 2  ;;  %v24590_v34 = vld [vmem:[#allocation158_spill] sm:$0xff] }
 0x855   : > { %v13069_v20 = vrot.slane %v13068_v8, 1  ;;  %v13115_v36 = vrot.slane %v13114_v2, 2  ;;  %v13119_v59 = vrot.slane %v12381_v26, 4  ;;  %v13375_v33 = vsel %vm8397_vm8, %v13028_v14, %v13374_v29 }
 0x856   : > { %v12197_v39 = vpop.permute.xlu0 %12196  ;;  %v22756_v62 = vsel %vm8399_vm6, %v13034_v48, %v13375_v33  ;;  %v13138_v42 = vadd.f32 %v13137_v63, %v12384_v60  ;;  %v13095_v13 = vrot.slane %v12377_v9, 4  ;;  %v12370_v21 = vmul.f32 %v12177_v58, %v24589_v27  ;;  %v24592_v48 = vld [vmem:[#allocation149_spill] sm:$0xff]  ;;  %v24594_v27 = vld [vmem:[#allocation160_spill] sm:$0xff] }
 0x857   : > { %v13070_v45 = vadd.f32 %v13069_v20, %v13068_v8  ;;  %v13116_v12 = vadd.f32 %v13115_v36, %v13114_v2  ;;  %v13120_v32 = vadd.f32 %v13119_v59, %v12381_v26  ;;  %v12374_v46 = vmul.f32 %v12197_v39, %v24586_v35  ;;  %v24591_v8 = vld [vmem:[#allocation161_spill] sm:$0xff] }
 0x858   : > { %v13130_v49 = vadd.f32 %v13129_v30, %v13128_v5  ;;  %v13087_v37 = vrot.slane %v13086_v43, 1  ;;  %v13044_v16 = vadd.f32 %v13043_v19, %v13042_v41  ;;  %v13139_v28 = vrot.slane %v13138_v42, 2 }
 0x859   : > { %v13381_v23 = vsel %vm8395_vm14, %v13070_v45, %v13064_v0  ;;  %v13117_v3 = vrot.slane %v13116_v12, 1  ;;  %v13121_v47 = vrot.slane %v13120_v32, 2  ;;  %v13077_v51 = vrot.slane %v12374_v46, 4 }
 0x85a   : > { %v13382_v1 = vsel %vm8397_vm8, %v13076_v50, %v13381_v23  ;;  %v12162_v18 = vpop.permute.xlu0 %12161  ;;  %v13096_v57 = vadd.f32 %v13095_v13, %v12377_v9  ;;  %v13053_v0 = vrot.slane %v12370_v21, 4  ;;  %v12386_v2 = vmul.f32 %v12257_v40, %v24591_v8 }
 0x85b   : > { %v13118_v17 = vadd.f32 %v13117_v3, %v13116_v12  ;;  %v13122_v54 = vadd.f32 %v13121_v47, %v13120_v32  ;;  %v13078_v53 = vadd.f32 %v13077_v51, %v12374_v46  ;;  %v12367_v6 = vmul.f32 %v12162_v18, %v24588_v24  ;;  %v24593_v3 = vld [vmem:[#allocation138_spill] sm:$0xff] }
 0x85c   : > { %v13088_v4 = vadd.f32 %v13087_v37, %v13086_v43  ;;  %v13045_v60 = vrot.slane %v13044_v16, 1  ;;  %v13140_v41 = vadd.f32 %v13139_v28, %v13138_v42  ;;  %v13097_v33 = vrot.slane %v13096_v57, 2 }
 0x85d   : > { %v13388_v31 = vsel %vm8395_vm14, %v13118_v17, %v13112_v22  ;;  %v13123_v38 = vrot.slane %v13122_v54, 1  ;;  %v13079_v61 = vrot.slane %v13078_v53, 2  ;;  %v13035_v10 = vrot.slane %v12367_v6, 4 }
 0x85e   : > { %v12242_v29 = vpop.permute.xlu0 %12241  ;;  %v13054_v39 = vadd.f32 %v13053_v0, %v12370_v21  ;;  %v13149_v58 = vrot.slane %v12386_v2, 4  ;;  %v13046_v46 = vadd.f32 %v13045_v60, %v13044_v16  ;;  %v13141_v51 = vrot.slane %v13140_v41, 1 }
 0x85f   : > { %v13124_v7 = vadd.f32 %v13123_v38, %v13122_v54  ;;  %v13080_v25 = vadd.f32 %v13079_v61, %v13078_v53  ;;  %v13036_v15 = vadd.f32 %v13035_v10, %v12367_v6  ;;  %v12383_v56 = vmul.f32 %v12242_v29, %v24590_v34  ;;  %v24595_v34 = vld [vmem:[#allocation151_spill] sm:$0xff] }
 0x860   : > { %v13098_v30 = vadd.f32 %v13097_v33, %v13096_v57  ;;  %v13055_v43 = vrot.slane %v13054_v39, 2  ;;  %v13150_v19 = vadd.f32 %v13149_v58, %v12386_v2  ;;  %v13142_v40 = vadd.f32 %v13141_v51, %v13140_v41 }
 0x861   : > { %v13389_v52 = vsel %vm8397_vm8, %v13124_v7, %v13388_v31  ;;  %v13081_v26 = vrot.slane %v13080_v25, 1  ;;  %v13037_v22 = vrot.slane %v13036_v15, 2  ;;  %v13131_v44 = vrot.slane %v12383_v56, 4 }
 0x862   : > { %v13390_v14 = vsel %vm8399_vm6, %v13130_v49, %v13389_v52  ;;  %v12207_v5 = vpop.permute.xlu0 %12206  ;;  %v13099_v31 = vrot.slane %v13098_v30, 1  ;;  %v13056_v38 = vadd.f32 %v13055_v43, %v13054_v39  ;;  %v13151_v61 = vrot.slane %v13150_v19, 2 }
 0x863   : > { %v13082_v20 = vadd.f32 %v13081_v26, %v13080_v25  ;;  %v13038_v36 = vadd.f32 %v13037_v22, %v13036_v15  ;;  %v13132_v59 = vadd.f32 %v13131_v44, %v12383_v56  ;;  %v12376_v11 = vmul.f32 %v12207_v5, %v24592_v48 }
 0x864   : > { %v13100_v28 = vadd.f32 %v13099_v31, %v13098_v30  ;;  %v13057_v57 = vrot.slane %v13056_v38, 1  ;;  %v13152_v0 = vadd.f32 %v13151_v61, %v13150_v19 }
 0x865   : > { %v13383_v45 = vsel %vm8399_vm6, %v13082_v20, %v13382_v1  ;;  %v13039_v12 = vrot.slane %v13038_v36, 1  ;;  %v13133_v32 = vrot.slane %v13132_v59, 2  ;;  %v13089_v35 = vrot.slane %v12376_v11, 4 }
 0x866   : > { %v13384_v50 = vsel %vm8401_vm4, %v13088_v4, %v13383_v45  ;;  %v12172_v63 = vpop.permute.xlu0 %12171  ;;  %v13153_v5 = vrot.slane %v13152_v0, 1 }
 0x867   : > { %v13040_v55 = vadd.f32 %v13039_v12, %v13038_v36  ;;  %v13134_v9 = vadd.f32 %v13133_v32, %v13132_v59  ;;  %v13090_v23 = vadd.f32 %v13089_v35, %v12376_v11  ;;  %v12369_v47 = vmul.f32 %v12172_v63, %v24593_v3 }
 0x868   : > { %v13154_v33 = vadd.f32 %v13153_v5, %v13152_v0 }
 0x869   : > { %v13377_v18 = vsel %vm8401_vm4, %v13040_v55, %v22756_v62  ;;  %v13135_v1 = vrot.slane %v13134_v9, 1  ;;  %v13091_v17 = vrot.slane %v13090_v23, 2  ;;  %v13047_v54 = vrot.slane %v12369_v47, 4 }
 0x86a   : > { %v13378_v53 = vsel %vm8403_vm11, %v13046_v46, %v13377_v18  ;;  %v12252_v24 = vpop.permute.xlu0 %12251 }
 0x86b   : > { %v13136_v6 = vadd.f32 %v13135_v1, %v13134_v9  ;;  %v13092_v42 = vadd.f32 %v13091_v17, %v13090_v23  ;;  %v13048_v13 = vadd.f32 %v13047_v54, %v12369_v47  ;;  %v12385_v21 = vmul.f32 %v12252_v24, %v24594_v27 }
 0x86d   : > { %v13391_v10 = vsel %vm8401_vm4, %v13136_v6, %v13390_v14  ;;  %v13093_v49 = vrot.slane %v13092_v42, 1  ;;  %v13049_v37 = vrot.slane %v13048_v13, 2  ;;  %v13143_v62 = vrot.slane %v12385_v21, 4 }
 0x86e   : > { %v13392_v16 = vsel %vm8403_vm11, %v13142_v40, %v13391_v10  ;;  %v13058_v14 = vadd.f32 %v13057_v57, %v13056_v38 }
 0x86f   : > { %v12217_v29 = vpop.permute.xlu0 %12216  ;;  %v13094_v7 = vadd.f32 %v13093_v49, %v13092_v42  ;;  %v13050_v25 = vadd.f32 %v13049_v37, %v13048_v13  ;;  %v13144_v15 = vadd.f32 %v13143_v62, %v12385_v21 }
 0x870   : > { %v12378_v56 = vmul.f32 %v12217_v29, %v24595_v34 }
 0x871   : > { %v13385_v8 = vsel %vm8403_vm11, %v13094_v7, %v13384_v50  ;;  %v13051_v2 = vrot.slane %v13050_v25, 1  ;;  %v13145_v52 = vrot.slane %v13144_v15, 2 }
 0x872   : > { %v13101_v26 = vrot.slane %v12378_v56, 4  ;;  %v13386_v22 = vsel %vm8405_vm2, %v13100_v28, %v13385_v8 }
 0x873   : > { %v13052_v44 = vadd.f32 %v13051_v2, %v13050_v25  ;;  %v13146_v4 = vadd.f32 %v13145_v52, %v13144_v15 }
 0x874   : > { %v13102_v60 = vadd.f32 %v13101_v26, %v12378_v56 }
 0x875   : > { %v13379_v20 = vsel %vm8405_vm2, %v13052_v44, %v13378_v53  ;;  %v13147_v36 = vrot.slane %v13146_v4, 1 }
 0x876   : > { %v13103_v59 = vrot.slane %v13102_v60, 2  ;;  %v13380_v48 = vsel %vm8407_vm5, %v13058_v14, %v13379_v20 }
 0x877   : > { %13424 = vst [vmem:[%s22391_s12 + $0x68] sm:$0xff] %v13380_v48  ;;  %v13148_v11 = vadd.f32 %v13147_v36, %v13146_v4 }
 0x878   : > { %v13104_v41 = vadd.f32 %v13103_v59, %v13102_v60 }
 0x879   : > { %v13393_v39 = vsel %vm8405_vm2, %v13148_v11, %v13392_v16 }
 0x87a   : > { %v13105_v58 = vrot.slane %v13104_v41, 1  ;;  %v13394_v45 = vsel %vm8407_vm5, %v13154_v33, %v13393_v39 }
 0x87b   : > { %13426 = vst [vmem:[%s22391_s12 + $0x78] sm:$0xff] %v13394_v45 }
 0x87c   : > { %v13106_v12 = vadd.f32 %v13105_v58, %v13104_v41 }
 0x87e   : > { %v13387_v32 = vsel %vm8407_vm5, %v13106_v12, %v13386_v22 }
 0x87f   : > { %13425 = vst [vmem:[%s22391_s12 + $0x70] sm:$0xff] %v13387_v32 }
 0x880 PF: > { %s15_s18 = sadd.s32 1, %s14729_s18  }
 0x881   : > { %p12_p4 = scmp.ge.s32.totalorder %s15_s18, 4  }
 0x883   :  { %14 = sbr.rel (!%p12_p4) target bundleno = 1 (0x1), region = 76 }

</bundles_post_ra>
